<compile_context>
chip_gen: v7x
topology: tpu7x:2x2x1
jax: 0.10.0
libtpu: 0.0.40
codegen_flags: <defaults>
</compile_context>

<pallas_src>
import functools
import math

import jax
import jax.numpy as jnp
from jax import lax
from jax.experimental import pallas as pl
from jax.experimental.pallas import tpu as pltpu


# ----------------------------------------------------------------------------
# Pallas kernels
# ----------------------------------------------------------------------------
def _proj_kernel(x_ref, w_ref, b_ref, o_ref):
    """Row-tile of the whole-sequence LSTM-1 input projection: x @ W + b."""
    o_ref[...] = (jnp.dot(x_ref[...], w_ref[...], preferred_element_type=jnp.float32)
                  + b_ref[...])


def _fused_recurrent_kernel(
    gx1_ref,                                 # [S, B, 4*HP]  hoisted LSTM-1 projection
    whh1_ref,                                # [HP, 4*HP]    LSTM-1 recurrent
    w2_ref, b2_ref,                          # [2*HP, 4*HP], [1, 4*HP]  LSTM-2 stacked
    g1_wa_ref, g1_whn_ref, g1_ba_ref, g1_bhn_ref,   # GRU-1 stacked
    g2_wa_ref, g2_whn_ref, g2_ba_ref, g2_bhn_ref,   # GRU-2 stacked
    fcw_ref, fcb_ref,                        # [HP, OUT_P], [1, OUT_P]  final FC
    out_ref,                                 # [B, OUT_P]
):
    """Single-invocation fused 2xLSTM -> 2xGRU -> FC; time loop unrolled in-kernel."""
    S = gx1_ref.shape[0]
    B = gx1_ref.shape[1]
    HP = whh1_ref.shape[0]

    def lstm_from_gates(gates, c_prev):
        # PyTorch gate order i, f, g, o; each gate on a 128-lane block.
        i = jax.nn.sigmoid(gates[:, 0 * HP:1 * HP])
        f = jax.nn.sigmoid(gates[:, 1 * HP:2 * HP])
        g = jnp.tanh(gates[:, 2 * HP:3 * HP])
        o = jax.nn.sigmoid(gates[:, 3 * HP:4 * HP])
        c_new = f * c_prev + i * g
        h_new = o * jnp.tanh(c_new)
        return h_new, c_new

    def gru_cell(x, h_prev, wa_ref, whn_ref, ba_ref, bhn_ref):
        # Stacked matmul gives r, z and the x-side of n in one MXU issue:
        #   ga = [x|h] @ [[Wih_r,Wih_z,Wih_n];[Whh_r,Whh_z,0]] + [br, bz, bih_n]
        xh = jnp.concatenate([x, h_prev], axis=-1)
        ga = (jnp.dot(xh, wa_ref[...], preferred_element_type=jnp.float32)
              + ba_ref[...])
        gh_n = (jnp.dot(h_prev, whn_ref[...], preferred_element_type=jnp.float32)
                + bhn_ref[...])
        r = jax.nn.sigmoid(ga[:, 0 * HP:1 * HP])
        z = jax.nn.sigmoid(ga[:, 1 * HP:2 * HP])
        n = jnp.tanh(ga[:, 2 * HP:3 * HP] + r * gh_n)
        return (1.0 - z) * n + z * h_prev

    def step(t, carry):
        h1, c1, h2, c2, g1, g2 = carry

        # --- LSTM layer 1 (input projection + bias pre-folded into gx1) ---
        gates1 = gx1_ref[t] + jnp.dot(h1, whh1_ref[...],
                                      preferred_element_type=jnp.float32)
        h1, c1 = lstm_from_gates(gates1, c1)

        # --- LSTM layer 2 (input + recurrent matmuls fused via [h1|h2]) ---
        gates2 = (jnp.dot(jnp.concatenate([h1, h2], axis=-1), w2_ref[...],
                          preferred_element_type=jnp.float32) + b2_ref[...])
        h2, c2 = lstm_from_gates(gates2, c2)

        # --- GRU layers ---
        g1 = gru_cell(h2, g1, g1_wa_ref, g1_whn_ref, g1_ba_ref, g1_bhn_ref)
        g2 = gru_cell(g1, g2, g2_wa_ref, g2_whn_ref, g2_ba_ref, g2_bhn_ref)
        return (h1, c1, h2, c2, g1, g2)

    zeros = jnp.zeros((B, HP), jnp.float32)
    init = (zeros, zeros, zeros, zeros, zeros, zeros)
    _, _, _, _, _, g2 = lax.fori_loop(0, S, step, init, unroll=True)

    # --- final FC on the last-timestep GRU output (dropout = identity) ---
    out_ref[...] = (jnp.dot(g2, fcw_ref[...], preferred_element_type=jnp.float32)
                    + fcb_ref[...])


# ----------------------------------------------------------------------------
# Wrappers (pallas_call plumbing)
# ----------------------------------------------------------------------------
def input_projection(x2d, w, b, *, tm=256):
    """x2d: [M, E] @ w: [E, 4*HP] + b: [1, 4*HP] -> [M, 4*HP]; row-tiled MXU matmul."""
    M, E = x2d.shape
    N = w.shape[1]
    tm = M if M <= tm else tm
    grid = (pl.cdiv(M, tm),)
    # TODO(synk): at BERT scale also tile K/N and single-buffer w/b (Buffered(1)).
    return pl.pallas_call(
        _proj_kernel,
        out_shape=jax.ShapeDtypeStruct((M, N), jnp.float32),
        grid_spec=pltpu.PrefetchScalarGridSpec(
            num_scalar_prefetch=0,
            grid=grid,
            in_specs=[pl.BlockSpec((tm, E), lambda i: (i, 0)),
                      pl.BlockSpec((E, N), lambda i: (0, 0)),
                      pl.BlockSpec((1, N), lambda i: (0, 0))],
            out_specs=pl.BlockSpec((tm, N), lambda i: (i, 0)),
        ),
        compiler_params=pltpu.CompilerParams(dimension_semantics=("parallel",)),
    )(x2d, w, b)


def fused_recurrent_fc(gx1, p):
    """gx1: [S, B, 4*HP] hoisted LSTM-1 projection -> FC output [B, OUT_P].

    Single pallas_call, no grid: all weights land in VMEM once, the time loop
    is unrolled inside the kernel and recurrent state is carried in vregs.
    """
    S, B, G4 = gx1.shape
    OUT_P = p["fc_w"].shape[1]
    return pl.pallas_call(
        _fused_recurrent_kernel,
        out_shape=jax.ShapeDtypeStruct((B, OUT_P), jnp.float32),
    )(gx1,
      p["lstm1_whh"],
      p["lstm2_w"], p["lstm2_b"],
      p["gru1_wa"], p["gru1_whn"], p["gru1_ba"], p["gru1_bhn"],
      p["gru2_wa"], p["gru2_whn"], p["gru2_ba"], p["gru2_bhn"],
      p["fc_w"], p["fc_b"])


# ----------------------------------------------------------------------------
# Parameter construction (deterministic, PyTorch-style uniform init, lane-padded)
# ----------------------------------------------------------------------------
def _uniform(key, shape, bound):
    return jax.random.uniform(key, shape, jnp.float32, -bound, bound)


def _pad_cols(w, h_real, h_pad, n_gates):
    """[R, n_gates*h_real] -> [R, n_gates*h_pad]; gate k's real cols land on
    lanes [k*h_pad : k*h_pad + h_real], padding lanes are zero."""
    r = w.shape[0]
    out = jnp.zeros((r, n_gates * h_pad), w.dtype)
    for k in range(n_gates):
        out = out.at[:, k * h_pad:k * h_pad + h_real].set(
            w[:, k * h_real:(k + 1) * h_real])
    return out


def _pad_rows(w, row_real, row_pad):
    out = jnp.zeros((row_pad, w.shape[1]), w.dtype)
    return out.at[:row_real, :].set(w)


def init_params(key, *, vocab, max_pos, embed_dim, hidden, hidden_pad,
                out_size, out_pad):
    ks = iter(jax.random.split(key, 64))
    H, HP = hidden, hidden_pad
    p = {}

    # Synthetic "BERT" embedding tables (stand-in for the pretrained encoder).
    p["tok_emb"] = jax.random.normal(next(ks), (vocab, embed_dim), jnp.float32) * 0.02
    p["pos_emb"] = jax.random.normal(next(ks), (max_pos, embed_dim), jnp.float32) * 0.02
    p["ln_gamma"] = jnp.ones((embed_dim,), jnp.float32)
    p["ln_beta"] = jnp.zeros((embed_dim,), jnp.float32)

    kb = 1.0 / math.sqrt(H)

    # ---- LSTM layer 1 (input = embed_dim); biases merged into the projection ----
    wih = _uniform(next(ks), (embed_dim, 4 * H), kb)
    whh = _uniform(next(ks), (H, 4 * H), kb)
    bih = _uniform(next(ks), (1, 4 * H), kb)
    bhh = _uniform(next(ks), (1, 4 * H), kb)
    p["lstm1_wih"] = _pad_cols(wih, H, HP, 4)                       # [E, 4*HP]
    p["lstm1_whh"] = _pad_rows(_pad_cols(whh, H, HP, 4), H, HP)     # [HP, 4*HP]
    p["lstm1_b"] = _pad_cols(bih + bhh, H, HP, 4)                   # [1, 4*HP]

    # ---- LSTM layer 2: input + recurrent weights stacked -> one matmul/step ----
    wih = _uniform(next(ks), (H, 4 * H), kb)
    whh = _uniform(next(ks), (H, 4 * H), kb)
    bih = _uniform(next(ks), (1, 4 * H), kb)
    bhh = _uniform(next(ks), (1, 4 * H), kb)
    wih_p = _pad_rows(_pad_cols(wih, H, HP, 4), H, HP)
    whh_p = _pad_rows(_pad_cols(whh, H, HP, 4), H, HP)
    p["lstm2_w"] = jnp.concatenate([wih_p, whh_p], axis=0)          # [2*HP, 4*HP]
    p["lstm2_b"] = _pad_cols(bih + bhh, H, HP, 4)                   # [1, 4*HP]

    # ---- GRU layers: r/z/n_x stacked; only h-side of the n gate kept apart ----
    for name in ("gru1", "gru2"):
        wih = _uniform(next(ks), (H, 3 * H), kb)
        whh = _uniform(next(ks), (H, 3 * H), kb)
        bih = _uniform(next(ks), (1, 3 * H), kb)
        bhh = _uniform(next(ks), (1, 3 * H), kb)
        wih_p = _pad_rows(_pad_cols(wih, H, HP, 3), H, HP)          # [HP, 3*HP]
        whh_p = _pad_rows(_pad_cols(whh, H, HP, 3), H, HP)          # [HP, 3*HP]
        whh_rz = whh_p.at[:, 2 * HP:3 * HP].set(0.0)                # zero n-block
        p[f"{name}_wa"] = jnp.concatenate([wih_p, whh_rz], axis=0)  # [2*HP, 3*HP]
        ba_real = jnp.concatenate(
            [bih[:, :2 * H] + bhh[:, :2 * H], bih[:, 2 * H:]], axis=-1)  # [1, 3*H]
        p[f"{name}_ba"] = _pad_cols(ba_real, H, HP, 3)              # [1, 3*HP]
        p[f"{name}_whn"] = _pad_rows(_pad_cols(whh[:, 2 * H:], H, HP, 1), H, HP)  # [HP, HP]
        p[f"{name}_bhn"] = _pad_cols(bhh[:, 2 * H:], H, HP, 1)      # [1, HP]

    # ---- final FC ----
    fw = _uniform(next(ks), (H, out_size), kb)
    fb = _uniform(next(ks), (1, out_size), kb)
    p["fc_w"] = _pad_rows(_pad_cols(fw, out_size, out_pad, 1), H, HP)  # [HP, OUT_P]
    p["fc_b"] = _pad_cols(fb, out_size, out_pad, 1)                    # [1, OUT_P]
    return p


# ----------------------------------------------------------------------------
# Full forward pass
# ----------------------------------------------------------------------------
@functools.partial(jax.jit, static_argnames=("out_size",))
def bert_lstm_gru_forward(params, input_ids, attention_mask, *, out_size):
    del attention_mask  # only consumed inside the (replaced) BERT encoder
    B, S = input_ids.shape

    # --- synthetic BERT last_hidden_state: [B, S, E] (plain JAX glue) ---
    pos = jnp.arange(S)
    emb = params["tok_emb"][input_ids] + params["pos_emb"][pos][None, :, :]
    mu = jnp.mean(emb, axis=-1, keepdims=True)
    var = jnp.mean((emb - mu) ** 2, axis=-1, keepdims=True)
    hidden_states = (emb - mu) * jax.lax.rsqrt(var + 1e-12)
    hidden_states = hidden_states * params["ln_gamma"] + params["ln_beta"]

    # time-major for the recurrent kernel: [S, B, E]
    x = jnp.transpose(hidden_states, (1, 0, 2)).astype(jnp.float32)
    E = x.shape[-1]

    # --- hoisted LSTM-1 input projection: one full-sequence MXU matmul ---
    gx1 = input_projection(x.reshape(S * B, E), params["lstm1_wih"], params["lstm1_b"])
    gx1 = gx1.reshape(S, B, gx1.shape[-1])          # [S, B, 4*HP]

    # --- fused 2xLSTM -> 2xGRU -> FC, single kernel, in-kernel time loop ---
    out_p = fused_recurrent_fc(gx1, params)         # [B, OUT_P]

    # strip lane padding; dropout = identity (eval mode)
    return out_p[:, :out_size]                      # [B, out_size]


# ----------------------------------------------------------------------------
if __name__ == "__main__":
    # Small shapes consistent with the module:
    #   batch=2, seq=8, (scaled-down) embed_dim=64, hidden_size=32, output_size=64
    B, S = 2, 8
    VOCAB, MAX_POS = 100, 64
    EMBED_DIM, HIDDEN, OUT_SIZE = 64, 32, 64
    HIDDEN_PAD, OUT_PAD = 128, 128     # lane-dense padding (128 lanes)

    key = jax.random.PRNGKey(0)
    pkey, dkey = jax.random.split(key)
    params = init_params(pkey, vocab=VOCAB, max_pos=MAX_POS, embed_dim=EMBED_DIM,
                         hidden=HIDDEN, hidden_pad=HIDDEN_PAD,
                         out_size=OUT_SIZE, out_pad=OUT_PAD)

    input_ids = jax.random.randint(dkey, (B, S), 0, VOCAB, dtype=jnp.int32)
    attention_mask = jnp.ones((B, S), dtype=jnp.int32)

    out = bert_lstm_gru_forward(params, input_ids, attention_mask, out_size=OUT_SIZE)
    out = jax.block_until_ready(out)
    assert out.shape == (B, OUT_SIZE) and out.dtype == jnp.float32
    assert bool(jnp.all(jnp.isfinite(out)))
    print("KERNEL_OK")
</pallas_src>

<mosaic_0001>
module attributes {stable_mosaic.version = 11 : i64} {
  func.func @_proj_kernel(%arg0: i32, %arg1: memref<16x64xf32, #tpu.memory_space<vmem>>, %arg2: memref<64x512xf32, #tpu.memory_space<vmem>>, %arg3: memref<1x512xf32, #tpu.memory_space<vmem>>, %arg4: memref<16x512xf32, #tpu.memory_space<vmem>>) attributes {dimension_semantics = [#tpu.dimension_semantics<parallel>], iteration_bounds = array<i64: 1>, scalar_prefetch = 0 : i64, scratch_operands = 0 : i64, tpu.core_type = #tpu.core_type<tc>, window_params = [{transform_indices = @transform_0, window_bounds = array<i64: 16, 64>}, {pipeline_mode = #tpu.pipeline_mode<synchronous>, transform_indices = @transform_1, window_bounds = array<i64: 64, 512>}, {pipeline_mode = #tpu.pipeline_mode<synchronous>, transform_indices = @transform_2, window_bounds = array<i64: 1, 512>}, {transform_indices = @transform_3, window_bounds = array<i64: 16, 512>}]} {
    %c0 = arith.constant 0 : index
    %c0_0 = arith.constant 0 : index
    %0 = vector.load %arg1[%c0, %c0_0] : memref<16x64xf32, #tpu.memory_space<vmem>>, vector<16x64xf32>
    %c0_1 = arith.constant 0 : index
    %c0_2 = arith.constant 0 : index
    %1 = vector.load %arg2[%c0_1, %c0_2] : memref<64x512xf32, #tpu.memory_space<vmem>>, vector<64x512xf32>
    %cst = arith.constant dense<0.000000e+00> : vector<16x512xf32>
    %2 = tpu.matmul %0, %1, %cst {dimension_numbers = #tpu.dot_dimension_numbers<[1], [0], [0], [1], [0, 0, 1, 1], [], []>} : vector<16x64xf32>, vector<64x512xf32>, vector<16x512xf32> -> vector<16x512xf32>
    %c0_3 = arith.constant 0 : index
    %c0_4 = arith.constant 0 : index
    %3 = vector.load %arg3[%c0_3, %c0_4] : memref<1x512xf32, #tpu.memory_space<vmem>>, vector<1x512xf32>
    %4 = vector.broadcast %3 : vector<1x512xf32> to vector<16x512xf32>
    %5 = arith.addf %2, %4 : vector<16x512xf32>
    %c0_5 = arith.constant 0 : index
    %c0_6 = arith.constant 0 : index
    %6 = vector.load %arg4[%c0_5, %c0_6] : memref<16x512xf32, #tpu.memory_space<vmem>>, vector<16x512xf32>
    tpu.vector_store %arg4[%c0_5, %c0_6], %5 {strides = array<i32>} : memref<16x512xf32, #tpu.memory_space<vmem>>, vector<16x512xf32>,
    return
  }
  func.func @transform_0(%arg0: i32) -> (i32, i32) {
    %c0_i32 = arith.constant 0 : i32
    %c0_i32_0 = arith.constant 0 : i32
    return %arg0, %c0_i32 : i32, i32
  }
  func.func @transform_1(%arg0: i32) -> (i32, i32) {
    %c0_i32 = arith.constant 0 : i32
    %c0_i32_0 = arith.constant 0 : i32
    %c0_i32_1 = arith.constant 0 : i32
    return %c0_i32, %c0_i32_0 : i32, i32
  }
  func.func @transform_2(%arg0: i32) -> (i32, i32) {
    %c0_i32 = arith.constant 0 : i32
    %c0_i32_0 = arith.constant 0 : i32
    %c0_i32_1 = arith.constant 0 : i32
    return %c0_i32, %c0_i32_0 : i32, i32
  }
  func.func @transform_3(%arg0: i32) -> (i32, i32) {
    %c0_i32 = arith.constant 0 : i32
    %c0_i32_0 = arith.constant 0 : i32
    return %arg0, %c0_i32 : i32, i32
  }
}

module attributes {stable_mosaic.version = 11 : i64} {
  func.func @_fused_recurrent_kernel(%arg0: memref<8x2x512xf32, #tpu.memory_space<vmem>>, %arg1: memref<128x512xf32, #tpu.memory_space<vmem>>, %arg2: memref<256x512xf32, #tpu.memory_space<vmem>>, %arg3: memref<1x512xf32, #tpu.memory_space<vmem>>, %arg4: memref<256x384xf32, #tpu.memory_space<vmem>>, %arg5: memref<128x128xf32, #tpu.memory_space<vmem>>, %arg6: memref<1x384xf32, #tpu.memory_space<vmem>>, %arg7: memref<1x128xf32, #tpu.memory_space<vmem>>, %arg8: memref<256x384xf32, #tpu.memory_space<vmem>>, %arg9: memref<128x128xf32, #tpu.memory_space<vmem>>, %arg10: memref<1x384xf32, #tpu.memory_space<vmem>>, %arg11: memref<1x128xf32, #tpu.memory_space<vmem>>, %arg12: memref<128x128xf32, #tpu.memory_space<vmem>>, %arg13: memref<1x128xf32, #tpu.memory_space<vmem>>, %arg14: memref<2x128xf32, #tpu.memory_space<vmem>>) attributes {dimension_semantics = [], scalar_prefetch = 0 : i64, scratch_operands = 0 : i64, tpu.core_type = #tpu.core_type<tc>} {
    %cst = arith.constant 0.000000e+00 : f32
    %0 = vector.broadcast %cst : f32 to vector<2x128xf32>
    %c0_i32 = arith.constant 0 : i32
    %1 = arith.index_cast %c0_i32 : i32 to index
    %c0 = arith.constant 0 : index
    %c0_0 = arith.constant 0 : index
    %2 = vector.load %arg0[%1, %c0, %c0_0] : memref<8x2x512xf32, #tpu.memory_space<vmem>>, vector<1x2x512xf32>
    %3 = vector.shape_cast %2 : vector<1x2x512xf32> to vector<2x512xf32>
    %c0_1 = arith.constant 0 : index
    %c0_2 = arith.constant 0 : index
    %4 = vector.load %arg1[%c0_1, %c0_2] : memref<128x512xf32, #tpu.memory_space<vmem>>, vector<128x512xf32>
    %cst_3 = arith.constant dense<0.000000e+00> : vector<2x512xf32>
    %5 = tpu.matmul %0, %4, %cst_3 {dimension_numbers = #tpu.dot_dimension_numbers<[1], [0], [0], [1], [0, 0, 1, 1], [], []>} : vector<2x128xf32>, vector<128x512xf32>, vector<2x512xf32> -> vector<2x512xf32>
    %6 = arith.addf %3, %5 : vector<2x512xf32>
    %7 = vector.extract_strided_slice %6 {offsets = [0, 0], sizes = [2, 128], strides = [1, 1]} : vector<2x512xf32> to vector<2x128xf32>
    %8 = arith.negf %7 : vector<2x128xf32>
    %9 = math.exp %8 : vector<2x128xf32>
    %cst_4 = arith.constant 1.000000e+00 : f32
    %10 = vector.broadcast %cst_4 : f32 to vector<2x128xf32>
    %11 = arith.addf %10, %9 : vector<2x128xf32>
    %12 = arith.divf %10, %11 : vector<2x128xf32>
    %13 = vector.extract_strided_slice %6 {offsets = [0, 128], sizes = [2, 128], strides = [1, 1]} : vector<2x512xf32> to vector<2x128xf32>
    %14 = arith.negf %13 : vector<2x128xf32>
    %15 = math.exp %14 : vector<2x128xf32>
    %cst_5 = arith.constant 1.000000e+00 : f32
    %16 = vector.broadcast %cst_5 : f32 to vector<2x128xf32>
    %17 = arith.addf %16, %15 : vector<2x128xf32>
    %18 = arith.divf %16, %17 : vector<2x128xf32>
    %19 = vector.extract_strided_slice %6 {offsets = [0, 256], sizes = [2, 128], strides = [1, 1]} : vector<2x512xf32> to vector<2x128xf32>
    %20 = math.tanh %19 : vector<2x128xf32>
    %21 = vector.extract_strided_slice %6 {offsets = [0, 384], sizes = [2, 128], strides = [1, 1]} : vector<2x512xf32> to vector<2x128xf32>
    %22 = arith.negf %21 : vector<2x128xf32>
    %23 = math.exp %22 : vector<2x128xf32>
    %cst_6 = arith.constant 1.000000e+00 : f32
    %24 = vector.broadcast %cst_6 : f32 to vector<2x128xf32>
    %25 = arith.addf %24, %23 : vector<2x128xf32>
    %26 = arith.divf %24, %25 : vector<2x128xf32>
    %27 = arith.mulf %18, %0 : vector<2x128xf32>
    %28 = arith.mulf %12, %20 : vector<2x128xf32>
    %29 = arith.addf %27, %28 : vector<2x128xf32>
    %30 = math.tanh %29 : vector<2x128xf32>
    %31 = arith.mulf %26, %30 : vector<2x128xf32>
    %32 = tpu.concatenate %31, %0 in 1 : vector<2x128xf32>, vector<2x128xf32> -> vector<2x256xf32>
    %c0_7 = arith.constant 0 : index
    %c0_8 = arith.constant 0 : index
    %33 = vector.load %arg2[%c0_7, %c0_8] : memref<256x512xf32, #tpu.memory_space<vmem>>, vector<256x512xf32>
    %cst_9 = arith.constant dense<0.000000e+00> : vector<2x512xf32>
    %34 = tpu.matmul %32, %33, %cst_9 {dimension_numbers = #tpu.dot_dimension_numbers<[1], [0], [0], [1], [0, 0, 1, 1], [], []>} : vector<2x256xf32>, vector<256x512xf32>, vector<2x512xf32> -> vector<2x512xf32>
    %c0_10 = arith.constant 0 : index
    %c0_11 = arith.constant 0 : index
    %35 = vector.load %arg3[%c0_10, %c0_11] : memref<1x512xf32, #tpu.memory_space<vmem>>, vector<1x512xf32>
    %36 = vector.broadcast %35 : vector<1x512xf32> to vector<2x512xf32>
    %37 = arith.addf %34, %36 : vector<2x512xf32>
    %38 = vector.extract_strided_slice %37 {offsets = [0, 0], sizes = [2, 128], strides = [1, 1]} : vector<2x512xf32> to vector<2x128xf32>
    %39 = arith.negf %38 : vector<2x128xf32>
    %40 = math.exp %39 : vector<2x128xf32>
    %cst_12 = arith.constant 1.000000e+00 : f32
    %41 = vector.broadcast %cst_12 : f32 to vector<2x128xf32>
    %42 = arith.addf %41, %40 : vector<2x128xf32>
    %43 = arith.divf %41, %42 : vector<2x128xf32>
    %44 = vector.extract_strided_slice %37 {offsets = [0, 128], sizes = [2, 128], strides = [1, 1]} : vector<2x512xf32> to vector<2x128xf32>
    %45 = arith.negf %44 : vector<2x128xf32>
    %46 = math.exp %45 : vector<2x128xf32>
    %cst_13 = arith.constant 1.000000e+00 : f32
    %47 = vector.broadcast %cst_13 : f32 to vector<2x128xf32>
    %48 = arith.addf %47, %46 : vector<2x128xf32>
    %49 = arith.divf %47, %48 : vector<2x128xf32>
    %50 = vector.extract_strided_slice %37 {offsets = [0, 256], sizes = [2, 128], strides = [1, 1]} : vector<2x512xf32> to vector<2x128xf32>
    %51 = math.tanh %50 : vector<2x128xf32>
    %52 = vector.extract_strided_slice %37 {offsets = [0, 384], sizes = [2, 128], strides = [1, 1]} : vector<2x512xf32> to vector<2x128xf32>
    %53 = arith.negf %52 : vector<2x128xf32>
    %54 = math.exp %53 : vector<2x128xf32>
    %cst_14 = arith.constant 1.000000e+00 : f32
    %55 = vector.broadcast %cst_14 : f32 to vector<2x128xf32>
    %56 = arith.addf %55, %54 : vector<2x128xf32>
    %57 = arith.divf %55, %56 : vector<2x128xf32>
    %58 = arith.mulf %49, %0 : vector<2x128xf32>
    %59 = arith.mulf %43, %51 : vector<2x128xf32>
    %60 = arith.addf %58, %59 : vector<2x128xf32>
    %61 = math.tanh %60 : vector<2x128xf32>
    %62 = arith.mulf %57, %61 : vector<2x128xf32>
    %63 = tpu.concatenate %62, %0 in 1 : vector<2x128xf32>, vector<2x128xf32> -> vector<2x256xf32>
    %c0_15 = arith.constant 0 : index
    %c0_16 = arith.constant 0 : index
    %64 = vector.load %arg4[%c0_15, %c0_16] : memref<256x384xf32, #tpu.memory_space<vmem>>, vector<256x384xf32>
    %cst_17 = arith.constant dense<0.000000e+00> : vector<2x384xf32>
    %65 = tpu.matmul %63, %64, %cst_17 {dimension_numbers = #tpu.dot_dimension_numbers<[1], [0], [0], [1], [0, 0, 1, 1], [], []>} : vector<2x256xf32>, vector<256x384xf32>, vector<2x384xf32> -> vector<2x384xf32>
    %c0_18 = arith.constant 0 : index
    %c0_19 = arith.constant 0 : index
    %66 = vector.load %arg6[%c0_18, %c0_19] : memref<1x384xf32, #tpu.memory_space<vmem>>, vector<1x384xf32>
    %67 = vector.broadcast %66 : vector<1x384xf32> to vector<2x384xf32>
    %68 = arith.addf %65, %67 : vector<2x384xf32>
    %c0_20 = arith.constant 0 : index
    %c0_21 = arith.constant 0 : index
    %69 = vector.load %arg5[%c0_20, %c0_21] : memref<128x128xf32, #tpu.memory_space<vmem>>, vector<128x128xf32>
    %cst_22 = arith.constant dense<0.000000e+00> : vector<2x128xf32>
    %70 = tpu.matmul %0, %69, %cst_22 {dimension_numbers = #tpu.dot_dimension_numbers<[1], [0], [0], [1], [0, 0, 1, 1], [], []>} : vector<2x128xf32>, vector<128x128xf32>, vector<2x128xf32> -> vector<2x128xf32>
    %c0_23 = arith.constant 0 : index
    %c0_24 = arith.constant 0 : index
    %71 = vector.load %arg7[%c0_23, %c0_24] : memref<1x128xf32, #tpu.memory_space<vmem>>, vector<1x128xf32>
    %72 = vector.broadcast %71 : vector<1x128xf32> to vector<2x128xf32>
    %73 = arith.addf %70, %72 : vector<2x128xf32>
    %74 = vector.extract_strided_slice %68 {offsets = [0, 0], sizes = [2, 128], strides = [1, 1]} : vector<2x384xf32> to vector<2x128xf32>
    %75 = arith.negf %74 : vector<2x128xf32>
    %76 = math.exp %75 : vector<2x128xf32>
    %cst_25 = arith.constant 1.000000e+00 : f32
    %77 = vector.broadcast %cst_25 : f32 to vector<2x128xf32>
    %78 = arith.addf %77, %76 : vector<2x128xf32>
    %79 = arith.divf %77, %78 : vector<2x128xf32>
    %80 = vector.extract_strided_slice %68 {offsets = [0, 128], sizes = [2, 128], strides = [1, 1]} : vector<2x384xf32> to vector<2x128xf32>
    %81 = arith.negf %80 : vector<2x128xf32>
    %82 = math.exp %81 : vector<2x128xf32>
    %cst_26 = arith.constant 1.000000e+00 : f32
    %83 = vector.broadcast %cst_26 : f32 to vector<2x128xf32>
    %84 = arith.addf %83, %82 : vector<2x128xf32>
    %85 = arith.divf %83, %84 : vector<2x128xf32>
    %86 = vector.extract_strided_slice %68 {offsets = [0, 256], sizes = [2, 128], strides = [1, 1]} : vector<2x384xf32> to vector<2x128xf32>
    %87 = arith.mulf %79, %73 : vector<2x128xf32>
    %88 = arith.addf %86, %87 : vector<2x128xf32>
    %89 = math.tanh %88 : vector<2x128xf32>
    %cst_27 = arith.constant 1.000000e+00 : f32
    %90 = vector.broadcast %cst_27 : f32 to vector<2x128xf32>
    %91 = arith.subf %90, %85 : vector<2x128xf32>
    %92 = arith.mulf %91, %89 : vector<2x128xf32>
    %93 = arith.mulf %85, %0 : vector<2x128xf32>
    %94 = arith.addf %92, %93 : vector<2x128xf32>
    %95 = tpu.concatenate %94, %0 in 1 : vector<2x128xf32>, vector<2x128xf32> -> vector<2x256xf32>
    %c0_28 = arith.constant 0 : index
    %c0_29 = arith.constant 0 : index
    %96 = vector.load %arg8[%c0_28, %c0_29] : memref<256x384xf32, #tpu.memory_space<vmem>>, vector<256x384xf32>
    %cst_30 = arith.constant dense<0.000000e+00> : vector<2x384xf32>
    %97 = tpu.matmul %95, %96, %cst_30 {dimension_numbers = #tpu.dot_dimension_numbers<[1], [0], [0], [1], [0, 0, 1, 1], [], []>} : vector<2x256xf32>, vector<256x384xf32>, vector<2x384xf32> -> vector<2x384xf32>
    %c0_31 = arith.constant 0 : index
    %c0_32 = arith.constant 0 : index
    %98 = vector.load %arg10[%c0_31, %c0_32] : memref<1x384xf32, #tpu.memory_space<vmem>>, vector<1x384xf32>
    %99 = vector.broadcast %98 : vector<1x384xf32> to vector<2x384xf32>
    %100 = arith.addf %97, %99 : vector<2x384xf32>
    %c0_33 = arith.constant 0 : index
    %c0_34 = arith.constant 0 : index
    %101 = vector.load %arg9[%c0_33, %c0_34] : memref<128x128xf32, #tpu.memory_space<vmem>>, vector<128x128xf32>
    %cst_35 = arith.constant dense<0.000000e+00> : vector<2x128xf32>
    %102 = tpu.matmul %0, %101, %cst_35 {dimension_numbers = #tpu.dot_dimension_numbers<[1], [0], [0], [1], [0, 0, 1, 1], [], []>} : vector<2x128xf32>, vector<128x128xf32>, vector<2x128xf32> -> vector<2x128xf32>
    %c0_36 = arith.constant 0 : index
    %c0_37 = arith.constant 0 : index
    %103 = vector.load %arg11[%c0_36, %c0_37] : memref<1x128xf32, #tpu.memory_space<vmem>>, vector<1x128xf32>
    %104 = vector.broadcast %103 : vector<1x128xf32> to vector<2x128xf32>
    %105 = arith.addf %102, %104 : vector<2x128xf32>
    %106 = vector.extract_strided_slice %100 {offsets = [0, 0], sizes = [2, 128], strides = [1, 1]} : vector<2x384xf32> to vector<2x128xf32>
    %107 = arith.negf %106 : vector<2x128xf32>
    %108 = math.exp %107 : vector<2x128xf32>
    %cst_38 = arith.constant 1.000000e+00 : f32
    %109 = vector.broadcast %cst_38 : f32 to vector<2x128xf32>
    %110 = arith.addf %109, %108 : vector<2x128xf32>
    %111 = arith.divf %109, %110 : vector<2x128xf32>
    %112 = vector.extract_strided_slice %100 {offsets = [0, 128], sizes = [2, 128], strides = [1, 1]} : vector<2x384xf32> to vector<2x128xf32>
    %113 = arith.negf %112 : vector<2x128xf32>
    %114 = math.exp %113 : vector<2x128xf32>
    %cst_39 = arith.constant 1.000000e+00 : f32
    %115 = vector.broadcast %cst_39 : f32 to vector<2x128xf32>
    %116 = arith.addf %115, %114 : vector<2x128xf32>
    %117 = arith.divf %115, %116 : vector<2x128xf32>
    %118 = vector.extract_strided_slice %100 {offsets = [0, 256], sizes = [2, 128], strides = [1, 1]} : vector<2x384xf32> to vector<2x128xf32>
    %119 = arith.mulf %111, %105 : vector<2x128xf32>
    %120 = arith.addf %118, %119 : vector<2x128xf32>
    %121 = math.tanh %120 : vector<2x128xf32>
    %cst_40 = arith.constant 1.000000e+00 : f32
    %122 = vector.broadcast %cst_40 : f32 to vector<2x128xf32>
    %123 = arith.subf %122, %117 : vector<2x128xf32>
    %124 = arith.mulf %123, %121 : vector<2x128xf32>
    %125 = arith.mulf %117, %0 : vector<2x128xf32>
    %126 = arith.addf %124, %125 : vector<2x128xf32>
    %c1_i32 = arith.constant 1 : i32
    %127 = arith.index_cast %c1_i32 : i32 to index
    %c0_41 = arith.constant 0 : index
    %c0_42 = arith.constant 0 : index
    %128 = vector.load %arg0[%127, %c0_41, %c0_42] : memref<8x2x512xf32, #tpu.memory_space<vmem>>, vector<1x2x512xf32>
    %129 = vector.shape_cast %128 : vector<1x2x512xf32> to vector<2x512xf32>
    %c0_43 = arith.constant 0 : index
    %c0_44 = arith.constant 0 : index
    %130 = vector.load %arg1[%c0_43, %c0_44] : memref<128x512xf32, #tpu.memory_space<vmem>>, vector<128x512xf32>
    %cst_45 = arith.constant dense<0.000000e+00> : vector<2x512xf32>
    %131 = tpu.matmul %31, %130, %cst_45 {dimension_numbers = #tpu.dot_dimension_numbers<[1], [0], [0], [1], [0, 0, 1, 1], [], []>} : vector<2x128xf32>, vector<128x512xf32>, vector<2x512xf32> -> vector<2x512xf32>
    %132 = arith.addf %129, %131 : vector<2x512xf32>
    %133 = vector.extract_strided_slice %132 {offsets = [0, 0], sizes = [2, 128], strides = [1, 1]} : vector<2x512xf32> to vector<2x128xf32>
    %134 = arith.negf %133 : vector<2x128xf32>
    %135 = math.exp %134 : vector<2x128xf32>
    %cst_46 = arith.constant 1.000000e+00 : f32
    %136 = vector.broadcast %cst_46 : f32 to vector<2x128xf32>
    %137 = arith.addf %136, %135 : vector<2x128xf32>
    %138 = arith.divf %136, %137 : vector<2x128xf32>
    %139 = vector.extract_strided_slice %132 {offsets = [0, 128], sizes = [2, 128], strides = [1, 1]} : vector<2x512xf32> to vector<2x128xf32>
    %140 = arith.negf %139 : vector<2x128xf32>
    %141 = math.exp %140 : vector<2x128xf32>
    %cst_47 = arith.constant 1.000000e+00 : f32
    %142 = vector.broadcast %cst_47 : f32 to vector<2x128xf32>
    %143 = arith.addf %142, %141 : vector<2x128xf32>
    %144 = arith.divf %142, %143 : vector<2x128xf32>
    %145 = vector.extract_strided_slice %132 {offsets = [0, 256], sizes = [2, 128], strides = [1, 1]} : vector<2x512xf32> to vector<2x128xf32>
    %146 = math.tanh %145 : vector<2x128xf32>
    %147 = vector.extract_strided_slice %132 {offsets = [0, 384], sizes = [2, 128], strides = [1, 1]} : vector<2x512xf32> to vector<2x128xf32>
    %148 = arith.negf %147 : vector<2x128xf32>
    %149 = math.exp %148 : vector<2x128xf32>
    %cst_48 = arith.constant 1.000000e+00 : f32
    %150 = vector.broadcast %cst_48 : f32 to vector<2x128xf32>
    %151 = arith.addf %150, %149 : vector<2x128xf32>
    %152 = arith.divf %150, %151 : vector<2x128xf32>
    %153 = arith.mulf %144, %29 : vector<2x128xf32>
    %154 = arith.mulf %138, %146 : vector<2x128xf32>
    %155 = arith.addf %153, %154 : vector<2x128xf32>
    %156 = math.tanh %155 : vector<2x128xf32>
    %157 = arith.mulf %152, %156 : vector<2x128xf32>
    %158 = tpu.concatenate %157, %62 in 1 : vector<2x128xf32>, vector<2x128xf32> -> vector<2x256xf32>
    %c0_49 = arith.constant 0 : index
    %c0_50 = arith.constant 0 : index
    %159 = vector.load %arg2[%c0_49, %c0_50] : memref<256x512xf32, #tpu.memory_space<vmem>>, vector<256x512xf32>
    %cst_51 = arith.constant dense<0.000000e+00> : vector<2x512xf32>
    %160 = tpu.matmul %158, %159, %cst_51 {dimension_numbers = #tpu.dot_dimension_numbers<[1], [0], [0], [1], [0, 0, 1, 1], [], []>} : vector<2x256xf32>, vector<256x512xf32>, vector<2x512xf32> -> vector<2x512xf32>
    %c0_52 = arith.constant 0 : index
    %c0_53 = arith.constant 0 : index
    %161 = vector.load %arg3[%c0_52, %c0_53] : memref<1x512xf32, #tpu.memory_space<vmem>>, vector<1x512xf32>
    %162 = vector.broadcast %161 : vector<1x512xf32> to vector<2x512xf32>
    %163 = arith.addf %160, %162 : vector<2x512xf32>
    %164 = vector.extract_strided_slice %163 {offsets = [0, 0], sizes = [2, 128], strides = [1, 1]} : vector<2x512xf32> to vector<2x128xf32>
    %165 = arith.negf %164 : vector<2x128xf32>
    %166 = math.exp %165 : vector<2x128xf32>
    %cst_54 = arith.constant 1.000000e+00 : f32
    %167 = vector.broadcast %cst_54 : f32 to vector<2x128xf32>
    %168 = arith.addf %167, %166 : vector<2x128xf32>
    %169 = arith.divf %167, %168 : vector<2x128xf32>
    %170 = vector.extract_strided_slice %163 {offsets = [0, 128], sizes = [2, 128], strides = [1, 1]} : vector<2x512xf32> to vector<2x128xf32>
    %171 = arith.negf %170 : vector<2x128xf32>
    %172 = math.exp %171 : vector<2x128xf32>
    %cst_55 = arith.constant 1.000000e+00 : f32
    %173 = vector.broadcast %cst_55 : f32 to vector<2x128xf32>
    %174 = arith.addf %173, %172 : vector<2x128xf32>
    %175 = arith.divf %173, %174 : vector<2x128xf32>
    %176 = vector.extract_strided_slice %163 {offsets = [0, 256], sizes = [2, 128], strides = [1, 1]} : vector<2x512xf32> to vector<2x128xf32>
    %177 = math.tanh %176 : vector<2x128xf32>
    %178 = vector.extract_strided_slice %163 {offsets = [0, 384], sizes = [2, 128], strides = [1, 1]} : vector<2x512xf32> to vector<2x128xf32>
    %179 = arith.negf %178 : vector<2x128xf32>
    %180 = math.exp %179 : vector<2x128xf32>
    %cst_56 = arith.constant 1.000000e+00 : f32
    %181 = vector.broadcast %cst_56 : f32 to vector<2x128xf32>
    %182 = arith.addf %181, %180 : vector<2x128xf32>
    %183 = arith.divf %181, %182 : vector<2x128xf32>
    %184 = arith.mulf %175, %60 : vector<2x128xf32>
    %185 = arith.mulf %169, %177 : vector<2x128xf32>
    %186 = arith.addf %184, %185 : vector<2x128xf32>
    %187 = math.tanh %186 : vector<2x128xf32>
    %188 = arith.mulf %183, %187 : vector<2x128xf32>
    %189 = tpu.concatenate %188, %94 in 1 : vector<2x128xf32>, vector<2x128xf32> -> vector<2x256xf32>
    %c0_57 = arith.constant 0 : index
    %c0_58 = arith.constant 0 : index
    %190 = vector.load %arg4[%c0_57, %c0_58] : memref<256x384xf32, #tpu.memory_space<vmem>>, vector<256x384xf32>
    %cst_59 = arith.constant dense<0.000000e+00> : vector<2x384xf32>
    %191 = tpu.matmul %189, %190, %cst_59 {dimension_numbers = #tpu.dot_dimension_numbers<[1], [0], [0], [1], [0, 0, 1, 1], [], []>} : vector<2x256xf32>, vector<256x384xf32>, vector<2x384xf32> -> vector<2x384xf32>
    %c0_60 = arith.constant 0 : index
    %c0_61 = arith.constant 0 : index
    %192 = vector.load %arg6[%c0_60, %c0_61] : memref<1x384xf32, #tpu.memory_space<vmem>>, vector<1x384xf32>
    %193 = vector.broadcast %192 : vector<1x384xf32> to vector<2x384xf32>
    %194 = arith.addf %191, %193 : vector<2x384xf32>
    %c0_62 = arith.constant 0 : index
    %c0_63 = arith.constant 0 : index
    %195 = vector.load %arg5[%c0_62, %c0_63] : memref<128x128xf32, #tpu.memory_space<vmem>>, vector<128x128xf32>
    %cst_64 = arith.constant dense<0.000000e+00> : vector<2x128xf32>
    %196 = tpu.matmul %94, %195, %cst_64 {dimension_numbers = #tpu.dot_dimension_numbers<[1], [0], [0], [1], [0, 0, 1, 1], [], []>} : vector<2x128xf32>, vector<128x128xf32>, vector<2x128xf32> -> vector<2x128xf32>
    %c0_65 = arith.constant 0 : index
    %c0_66 = arith.constant 0 : index
    %197 = vector.load %arg7[%c0_65, %c0_66] : memref<1x128xf32, #tpu.memory_space<vmem>>, vector<1x128xf32>
    %198 = vector.broadcast %197 : vector<1x128xf32> to vector<2x128xf32>
    %199 = arith.addf %196, %198 : vector<2x128xf32>
    %200 = vector.extract_strided_slice %194 {offsets = [0, 0], sizes = [2, 128], strides = [1, 1]} : vector<2x384xf32> to vector<2x128xf32>
    %201 = arith.negf %200 : vector<2x128xf32>
    %202 = math.exp %201 : vector<2x128xf32>
    %cst_67 = arith.constant 1.000000e+00 : f32
    %203 = vector.broadcast %cst_67 : f32 to vector<2x128xf32>
    %204 = arith.addf %203, %202 : vector<2x128xf32>
    %205 = arith.divf %203, %204 : vector<2x128xf32>
    %206 = vector.extract_strided_slice %194 {offsets = [0, 128], sizes = [2, 128], strides = [1, 1]} : vector<2x384xf32> to vector<2x128xf32>
    %207 = arith.negf %206 : vector<2x128xf32>
    %208 = math.exp %207 : vector<2x128xf32>
    %cst_68 = arith.constant 1.000000e+00 : f32
    %209 = vector.broadcast %cst_68 : f32 to vector<2x128xf32>
    %210 = arith.addf %209, %208 : vector<2x128xf32>
    %211 = arith.divf %209, %210 : vector<2x128xf32>
    %212 = vector.extract_strided_slice %194 {offsets = [0, 256], sizes = [2, 128], strides = [1, 1]} : vector<2x384xf32> to vector<2x128xf32>
    %213 = arith.mulf %205, %199 : vector<2x128xf32>
    %214 = arith.addf %212, %213 : vector<2x128xf32>
    %215 = math.tanh %214 : vector<2x128xf32>
    %cst_69 = arith.constant 1.000000e+00 : f32
    %216 = vector.broadcast %cst_69 : f32 to vector<2x128xf32>
    %217 = arith.subf %216, %211 : vector<2x128xf32>
    %218 = arith.mulf %217, %215 : vector<2x128xf32>
    %219 = arith.mulf %211, %94 : vector<2x128xf32>
    %220 = arith.addf %218, %219 : vector<2x128xf32>
    %221 = tpu.concatenate %220, %126 in 1 : vector<2x128xf32>, vector<2x128xf32> -> vector<2x256xf32>
    %c0_70 = arith.constant 0 : index
    %c0_71 = arith.constant 0 : index
    %222 = vector.load %arg8[%c0_70, %c0_71] : memref<256x384xf32, #tpu.memory_space<vmem>>, vector<256x384xf32>
    %cst_72 = arith.constant dense<0.000000e+00> : vector<2x384xf32>
    %223 = tpu.matmul %221, %222, %cst_72 {dimension_numbers = #tpu.dot_dimension_numbers<[1], [0], [0], [1], [0, 0, 1, 1], [], []>} : vector<2x256xf32>, vector<256x384xf32>, vector<2x384xf32> -> vector<2x384xf32>
    %c0_73 = arith.constant 0 : index
    %c0_74 = arith.constant 0 : index
    %224 = vector.load %arg10[%c0_73, %c0_74] : memref<1x384xf32, #tpu.memory_space<vmem>>, vector<1x384xf32>
    %225 = vector.broadcast %224 : vector<1x384xf32> to vector<2x384xf32>
    %226 = arith.addf %223, %225 : vector<2x384xf32>
    %c0_75 = arith.constant 0 : index
    %c0_76 = arith.constant 0 : index
    %227 = vector.load %arg9[%c0_75, %c0_76] : memref<128x128xf32, #tpu.memory_space<vmem>>, vector<128x128xf32>
    %cst_77 = arith.constant dense<0.000000e+00> : vector<2x128xf32>
    %228 = tpu.matmul %126, %227, %cst_77 {dimension_numbers = #tpu.dot_dimension_numbers<[1], [0], [0], [1], [0, 0, 1, 1], [], []>} : vector<2x128xf32>, vector<128x128xf32>, vector<2x128xf32> -> vector<2x128xf32>
    %c0_78 = arith.constant 0 : index
    %c0_79 = arith.constant 0 : index
    %229 = vector.load %arg11[%c0_78, %c0_79] : memref<1x128xf32, #tpu.memory_space<vmem>>, vector<1x128xf32>
    %230 = vector.broadcast %229 : vector<1x128xf32> to vector<2x128xf32>
    %231 = arith.addf %228, %230 : vector<2x128xf32>
    %232 = vector.extract_strided_slice %226 {offsets = [0, 0], sizes = [2, 128], strides = [1, 1]} : vector<2x384xf32> to vector<2x128xf32>
    %233 = arith.negf %232 : vector<2x128xf32>
    %234 = math.exp %233 : vector<2x128xf32>
    %cst_80 = arith.constant 1.000000e+00 : f32
    %235 = vector.broadcast %cst_80 : f32 to vector<2x128xf32>
    %236 = arith.addf %235, %234 : vector<2x128xf32>
    %237 = arith.divf %235, %236 : vector<2x128xf32>
    %238 = vector.extract_strided_slice %226 {offsets = [0, 128], sizes = [2, 128], strides = [1, 1]} : vector<2x384xf32> to vector<2x128xf32>
    %239 = arith.negf %238 : vector<2x128xf32>
    %240 = math.exp %239 : vector<2x128xf32>
    %cst_81 = arith.constant 1.000000e+00 : f32
    %241 = vector.broadcast %cst_81 : f32 to vector<2x128xf32>
    %242 = arith.addf %241, %240 : vector<2x128xf32>
    %243 = arith.divf %241, %242 : vector<2x128xf32>
    %244 = vector.extract_strided_slice %226 {offsets = [0, 256], sizes = [2, 128], strides = [1, 1]} : vector<2x384xf32> to vector<2x128xf32>
    %245 = arith.mulf %237, %231 : vector<2x128xf32>
    %246 = arith.addf %244, %245 : vector<2x128xf32>
    %247 = math.tanh %246 : vector<2x128xf32>
    %cst_82 = arith.constant 1.000000e+00 : f32
    %248 = vector.broadcast %cst_82 : f32 to vector<2x128xf32>
    %249 = arith.subf %248, %243 : vector<2x128xf32>
    %250 = arith.mulf %249, %247 : vector<2x128xf32>
    %251 = arith.mulf %243, %126 : vector<2x128xf32>
    %252 = arith.addf %250, %251 : vector<2x128xf32>
    %c2_i32 = arith.constant 2 : i32
    %253 = arith.index_cast %c2_i32 : i32 to index
    %c0_83 = arith.constant 0 : index
    %c0_84 = arith.constant 0 : index
    %254 = vector.load %arg0[%253, %c0_83, %c0_84] : memref<8x2x512xf32, #tpu.memory_space<vmem>>, vector<1x2x512xf32>
    %255 = vector.shape_cast %254 : vector<1x2x512xf32> to vector<2x512xf32>
    %c0_85 = arith.constant 0 : index
    %c0_86 = arith.constant 0 : index
    %256 = vector.load %arg1[%c0_85, %c0_86] : memref<128x512xf32, #tpu.memory_space<vmem>>, vector<128x512xf32>
    %cst_87 = arith.constant dense<0.000000e+00> : vector<2x512xf32>
    %257 = tpu.matmul %157, %256, %cst_87 {dimension_numbers = #tpu.dot_dimension_numbers<[1], [0], [0], [1], [0, 0, 1, 1], [], []>} : vector<2x128xf32>, vector<128x512xf32>, vector<2x512xf32> -> vector<2x512xf32>
    %258 = arith.addf %255, %257 : vector<2x512xf32>
    %259 = vector.extract_strided_slice %258 {offsets = [0, 0], sizes = [2, 128], strides = [1, 1]} : vector<2x512xf32> to vector<2x128xf32>
    %260 = arith.negf %259 : vector<2x128xf32>
    %261 = math.exp %260 : vector<2x128xf32>
    %cst_88 = arith.constant 1.000000e+00 : f32
    %262 = vector.broadcast %cst_88 : f32 to vector<2x128xf32>
    %263 = arith.addf %262, %261 : vector<2x128xf32>
    %264 = arith.divf %262, %263 : vector<2x128xf32>
    %265 = vector.extract_strided_slice %258 {offsets = [0, 128], sizes = [2, 128], strides = [1, 1]} : vector<2x512xf32> to vector<2x128xf32>
    %266 = arith.negf %265 : vector<2x128xf32>
    %267 = math.exp %266 : vector<2x128xf32>
    %cst_89 = arith.constant 1.000000e+00 : f32
    %268 = vector.broadcast %cst_89 : f32 to vector<2x128xf32>
    %269 = arith.addf %268, %267 : vector<2x128xf32>
    %270 = arith.divf %268, %269 : vector<2x128xf32>
    %271 = vector.extract_strided_slice %258 {offsets = [0, 256], sizes = [2, 128], strides = [1, 1]} : vector<2x512xf32> to vector<2x128xf32>
    %272 = math.tanh %271 : vector<2x128xf32>
    %273 = vector.extract_strided_slice %258 {offsets = [0, 384], sizes = [2, 128], strides = [1, 1]} : vector<2x512xf32> to vector<2x128xf32>
    %274 = arith.negf %273 : vector<2x128xf32>
    %275 = math.exp %274 : vector<2x128xf32>
    %cst_90 = arith.constant 1.000000e+00 : f32
    %276 = vector.broadcast %cst_90 : f32 to vector<2x128xf32>
    %277 = arith.addf %276, %275 : vector<2x128xf32>
    %278 = arith.divf %276, %277 : vector<2x128xf32>
    %279 = arith.mulf %270, %155 : vector<2x128xf32>
    %280 = arith.mulf %264, %272 : vector<2x128xf32>
    %281 = arith.addf %279, %280 : vector<2x128xf32>
    %282 = math.tanh %281 : vector<2x128xf32>
    %283 = arith.mulf %278, %282 : vector<2x128xf32>
    %284 = tpu.concatenate %283, %188 in 1 : vector<2x128xf32>, vector<2x128xf32> -> vector<2x256xf32>
    %c0_91 = arith.constant 0 : index
    %c0_92 = arith.constant 0 : index
    %285 = vector.load %arg2[%c0_91, %c0_92] : memref<256x512xf32, #tpu.memory_space<vmem>>, vector<256x512xf32>
    %cst_93 = arith.constant dense<0.000000e+00> : vector<2x512xf32>
    %286 = tpu.matmul %284, %285, %cst_93 {dimension_numbers = #tpu.dot_dimension_numbers<[1], [0], [0], [1], [0, 0, 1, 1], [], []>} : vector<2x256xf32>, vector<256x512xf32>, vector<2x512xf32> -> vector<2x512xf32>
    %c0_94 = arith.constant 0 : index
    %c0_95 = arith.constant 0 : index
    %287 = vector.load %arg3[%c0_94, %c0_95] : memref<1x512xf32, #tpu.memory_space<vmem>>, vector<1x512xf32>
    %288 = vector.broadcast %287 : vector<1x512xf32> to vector<2x512xf32>
    %289 = arith.addf %286, %288 : vector<2x512xf32>
    %290 = vector.extract_strided_slice %289 {offsets = [0, 0], sizes = [2, 128], strides = [1, 1]} : vector<2x512xf32> to vector<2x128xf32>
    %291 = arith.negf %290 : vector<2x128xf32>
    %292 = math.exp %291 : vector<2x128xf32>
    %cst_96 = arith.constant 1.000000e+00 : f32
    %293 = vector.broadcast %cst_96 : f32 to vector<2x128xf32>
    %294 = arith.addf %293, %292 : vector<2x128xf32>
    %295 = arith.divf %293, %294 : vector<2x128xf32>
    %296 = vector.extract_strided_slice %289 {offsets = [0, 128], sizes = [2, 128], strides = [1, 1]} : vector<2x512xf32> to vector<2x128xf32>
    %297 = arith.negf %296 : vector<2x128xf32>
    %298 = math.exp %297 : vector<2x128xf32>
    %cst_97 = arith.constant 1.000000e+00 : f32
    %299 = vector.broadcast %cst_97 : f32 to vector<2x128xf32>
    %300 = arith.addf %299, %298 : vector<2x128xf32>
    %301 = arith.divf %299, %300 : vector<2x128xf32>
    %302 = vector.extract_strided_slice %289 {offsets = [0, 256], sizes = [2, 128], strides = [1, 1]} : vector<2x512xf32> to vector<2x128xf32>
    %303 = math.tanh %302 : vector<2x128xf32>
    %304 = vector.extract_strided_slice %289 {offsets = [0, 384], sizes = [2, 128], strides = [1, 1]} : vector<2x512xf32> to vector<2x128xf32>
    %305 = arith.negf %304 : vector<2x128xf32>
    %306 = math.exp %305 : vector<2x128xf32>
    %cst_98 = arith.constant 1.000000e+00 : f32
    %307 = vector.broadcast %cst_98 : f32 to vector<2x128xf32>
    %308 = arith.addf %307, %306 : vector<2x128xf32>
    %309 = arith.divf %307, %308 : vector<2x128xf32>
    %310 = arith.mulf %301, %186 : vector<2x128xf32>
    %311 = arith.mulf %295, %303 : vector<2x128xf32>
    %312 = arith.addf %310, %311 : vector<2x128xf32>
    %313 = math.tanh %312 : vector<2x128xf32>
    %314 = arith.mulf %309, %313 : vector<2x128xf32>
    %315 = tpu.concatenate %314, %220 in 1 : vector<2x128xf32>, vector<2x128xf32> -> vector<2x256xf32>
    %c0_99 = arith.constant 0 : index
    %c0_100 = arith.constant 0 : index
    %316 = vector.load %arg4[%c0_99, %c0_100] : memref<256x384xf32, #tpu.memory_space<vmem>>, vector<256x384xf32>
    %cst_101 = arith.constant dense<0.000000e+00> : vector<2x384xf32>
    %317 = tpu.matmul %315, %316, %cst_101 {dimension_numbers = #tpu.dot_dimension_numbers<[1], [0], [0], [1], [0, 0, 1, 1], [], []>} : vector<2x256xf32>, vector<256x384xf32>, vector<2x384xf32> -> vector<2x384xf32>
    %c0_102 = arith.constant 0 : index
    %c0_103 = arith.constant 0 : index
    %318 = vector.load %arg6[%c0_102, %c0_103] : memref<1x384xf32, #tpu.memory_space<vmem>>, vector<1x384xf32>
    %319 = vector.broadcast %318 : vector<1x384xf32> to vector<2x384xf32>
    %320 = arith.addf %317, %319 : vector<2x384xf32>
    %c0_104 = arith.constant 0 : index
    %c0_105 = arith.constant 0 : index
    %321 = vector.load %arg5[%c0_104, %c0_105] : memref<128x128xf32, #tpu.memory_space<vmem>>, vector<128x128xf32>
    %cst_106 = arith.constant dense<0.000000e+00> : vector<2x128xf32>
    %322 = tpu.matmul %220, %321, %cst_106 {dimension_numbers = #tpu.dot_dimension_numbers<[1], [0], [0], [1], [0, 0, 1, 1], [], []>} : vector<2x128xf32>, vector<128x128xf32>, vector<2x128xf32> -> vector<2x128xf32>
    %c0_107 = arith.constant 0 : index
    %c0_108 = arith.constant 0 : index
    %323 = vector.load %arg7[%c0_107, %c0_108] : memref<1x128xf32, #tpu.memory_space<vmem>>, vector<1x128xf32>
    %324 = vector.broadcast %323 : vector<1x128xf32> to vector<2x128xf32>
    %325 = arith.addf %322, %324 : vector<2x128xf32>
    %326 = vector.extract_strided_slice %320 {offsets = [0, 0], sizes = [2, 128], strides = [1, 1]} : vector<2x384xf32> to vector<2x128xf32>
    %327 = arith.negf %326 : vector<2x128xf32>
    %328 = math.exp %327 : vector<2x128xf32>
    %cst_109 = arith.constant 1.000000e+00 : f32
    %329 = vector.broadcast %cst_109 : f32 to vector<2x128xf32>
    %330 = arith.addf %329, %328 : vector<2x128xf32>
    %331 = arith.divf %329, %330 : vector<2x128xf32>
    %332 = vector.extract_strided_slice %320 {offsets = [0, 128], sizes = [2, 128], strides = [1, 1]} : vector<2x384xf32> to vector<2x128xf32>
    %333 = arith.negf %332 : vector<2x128xf32>
    %334 = math.exp %333 : vector<2x128xf32>
    %cst_110 = arith.constant 1.000000e+00 : f32
    %335 = vector.broadcast %cst_110 : f32 to vector<2x128xf32>
    %336 = arith.addf %335, %334 : vector<2x128xf32>
    %337 = arith.divf %335, %336 : vector<2x128xf32>
    %338 = vector.extract_strided_slice %320 {offsets = [0, 256], sizes = [2, 128], strides = [1, 1]} : vector<2x384xf32> to vector<2x128xf32>
    %339 = arith.mulf %331, %325 : vector<2x128xf32>
    %340 = arith.addf %338, %339 : vector<2x128xf32>
    %341 = math.tanh %340 : vector<2x128xf32>
    %cst_111 = arith.constant 1.000000e+00 : f32
    %342 = vector.broadcast %cst_111 : f32 to vector<2x128xf32>
    %343 = arith.subf %342, %337 : vector<2x128xf32>
    %344 = arith.mulf %343, %341 : vector<2x128xf32>
    %345 = arith.mulf %337, %220 : vector<2x128xf32>
    %346 = arith.addf %344, %345 : vector<2x128xf32>
    %347 = tpu.concatenate %346, %252 in 1 : vector<2x128xf32>, vector<2x128xf32> -> vector<2x256xf32>
    %c0_112 = arith.constant 0 : index
    %c0_113 = arith.constant 0 : index
    %348 = vector.load %arg8[%c0_112, %c0_113] : memref<256x384xf32, #tpu.memory_space<vmem>>, vector<256x384xf32>
    %cst_114 = arith.constant dense<0.000000e+00> : vector<2x384xf32>
    %349 = tpu.matmul %347, %348, %cst_114 {dimension_numbers = #tpu.dot_dimension_numbers<[1], [0], [0], [1], [0, 0, 1, 1], [], []>} : vector<2x256xf32>, vector<256x384xf32>, vector<2x384xf32> -> vector<2x384xf32>
    %c0_115 = arith.constant 0 : index
    %c0_116 = arith.constant 0 : index
    %350 = vector.load %arg10[%c0_115, %c0_116] : memref<1x384xf32, #tpu.memory_space<vmem>>, vector<1x384xf32>
    %351 = vector.broadcast %350 : vector<1x384xf32> to vector<2x384xf32>
    %352 = arith.addf %349, %351 : vector<2x384xf32>
    %c0_117 = arith.constant 0 : index
    %c0_118 = arith.constant 0 : index
    %353 = vector.load %arg9[%c0_117, %c0_118] : memref<128x128xf32, #tpu.memory_space<vmem>>, vector<128x128xf32>
    %cst_119 = arith.constant dense<0.000000e+00> : vector<2x128xf32>
    %354 = tpu.matmul %252, %353, %cst_119 {dimension_numbers = #tpu.dot_dimension_numbers<[1], [0], [0], [1], [0, 0, 1, 1], [], []>} : vector<2x128xf32>, vector<128x128xf32>, vector<2x128xf32> -> vector<2x128xf32>
    %c0_120 = arith.constant 0 : index
    %c0_121 = arith.constant 0 : index
    %355 = vector.load %arg11[%c0_120, %c0_121] : memref<1x128xf32, #tpu.memory_space<vmem>>, vector<1x128xf32>
    %356 = vector.broadcast %355 : vector<1x128xf32> to vector<2x128xf32>
    %357 = arith.addf %354, %356 : vector<2x128xf32>
    %358 = vector.extract_strided_slice %352 {offsets = [0, 0], sizes = [2, 128], strides = [1, 1]} : vector<2x384xf32> to vector<2x128xf32>
    %359 = arith.negf %358 : vector<2x128xf32>
    %360 = math.exp %359 : vector<2x128xf32>
    %cst_122 = arith.constant 1.000000e+00 : f32
    %361 = vector.broadcast %cst_122 : f32 to vector<2x128xf32>
    %362 = arith.addf %361, %360 : vector<2x128xf32>
    %363 = arith.divf %361, %362 : vector<2x128xf32>
    %364 = vector.extract_strided_slice %352 {offsets = [0, 128], sizes = [2, 128], strides = [1, 1]} : vector<2x384xf32> to vector<2x128xf32>
    %365 = arith.negf %364 : vector<2x128xf32>
    %366 = math.exp %365 : vector<2x128xf32>
    %cst_123 = arith.constant 1.000000e+00 : f32
    %367 = vector.broadcast %cst_123 : f32 to vector<2x128xf32>
    %368 = arith.addf %367, %366 : vector<2x128xf32>
    %369 = arith.divf %367, %368 : vector<2x128xf32>
    %370 = vector.extract_strided_slice %352 {offsets = [0, 256], sizes = [2, 128], strides = [1, 1]} : vector<2x384xf32> to vector<2x128xf32>
    %371 = arith.mulf %363, %357 : vector<2x128xf32>
    %372 = arith.addf %370, %371 : vector<2x128xf32>
    %373 = math.tanh %372 : vector<2x128xf32>
    %cst_124 = arith.constant 1.000000e+00 : f32
    %374 = vector.broadcast %cst_124 : f32 to vector<2x128xf32>
    %375 = arith.subf %374, %369 : vector<2x128xf32>
    %376 = arith.mulf %375, %373 : vector<2x128xf32>
    %377 = arith.mulf %369, %252 : vector<2x128xf32>
    %378 = arith.addf %376, %377 : vector<2x128xf32>
    %c3_i32 = arith.constant 3 : i32
    %379 = arith.index_cast %c3_i32 : i32 to index
    %c0_125 = arith.constant 0 : index
    %c0_126 = arith.constant 0 : index
    %380 = vector.load %arg0[%379, %c0_125, %c0_126] : memref<8x2x512xf32, #tpu.memory_space<vmem>>, vector<1x2x512xf32>
    %381 = vector.shape_cast %380 : vector<1x2x512xf32> to vector<2x512xf32>
    %c0_127 = arith.constant 0 : index
    %c0_128 = arith.constant 0 : index
    %382 = vector.load %arg1[%c0_127, %c0_128] : memref<128x512xf32, #tpu.memory_space<vmem>>, vector<128x512xf32>
    %cst_129 = arith.constant dense<0.000000e+00> : vector<2x512xf32>
    %383 = tpu.matmul %283, %382, %cst_129 {dimension_numbers = #tpu.dot_dimension_numbers<[1], [0], [0], [1], [0, 0, 1, 1], [], []>} : vector<2x128xf32>, vector<128x512xf32>, vector<2x512xf32> -> vector<2x512xf32>
    %384 = arith.addf %381, %383 : vector<2x512xf32>
    %385 = vector.extract_strided_slice %384 {offsets = [0, 0], sizes = [2, 128], strides = [1, 1]} : vector<2x512xf32> to vector<2x128xf32>
    %386 = arith.negf %385 : vector<2x128xf32>
    %387 = math.exp %386 : vector<2x128xf32>
    %cst_130 = arith.constant 1.000000e+00 : f32
    %388 = vector.broadcast %cst_130 : f32 to vector<2x128xf32>
    %389 = arith.addf %388, %387 : vector<2x128xf32>
    %390 = arith.divf %388, %389 : vector<2x128xf32>
    %391 = vector.extract_strided_slice %384 {offsets = [0, 128], sizes = [2, 128], strides = [1, 1]} : vector<2x512xf32> to vector<2x128xf32>
    %392 = arith.negf %391 : vector<2x128xf32>
    %393 = math.exp %392 : vector<2x128xf32>
    %cst_131 = arith.constant 1.000000e+00 : f32
    %394 = vector.broadcast %cst_131 : f32 to vector<2x128xf32>
    %395 = arith.addf %394, %393 : vector<2x128xf32>
    %396 = arith.divf %394, %395 : vector<2x128xf32>
    %397 = vector.extract_strided_slice %384 {offsets = [0, 256], sizes = [2, 128], strides = [1, 1]} : vector<2x512xf32> to vector<2x128xf32>
    %398 = math.tanh %397 : vector<2x128xf32>
    %399 = vector.extract_strided_slice %384 {offsets = [0, 384], sizes = [2, 128], strides = [1, 1]} : vector<2x512xf32> to vector<2x128xf32>
    %400 = arith.negf %399 : vector<2x128xf32>
    %401 = math.exp %400 : vector<2x128xf32>
    %cst_132 = arith.constant 1.000000e+00 : f32
    %402 = vector.broadcast %cst_132 : f32 to vector<2x128xf32>
    %403 = arith.addf %402, %401 : vector<2x128xf32>
    %404 = arith.divf %402, %403 : vector<2x128xf32>
    %405 = arith.mulf %396, %281 : vector<2x128xf32>
    %406 = arith.mulf %390, %398 : vector<2x128xf32>
    %407 = arith.addf %405, %406 : vector<2x128xf32>
    %408 = math.tanh %407 : vector<2x128xf32>
    %409 = arith.mulf %404, %408 : vector<2x128xf32>
    %410 = tpu.concatenate %409, %314 in 1 : vector<2x128xf32>, vector<2x128xf32> -> vector<2x256xf32>
    %c0_133 = arith.constant 0 : index
    %c0_134 = arith.constant 0 : index
    %411 = vector.load %arg2[%c0_133, %c0_134] : memref<256x512xf32, #tpu.memory_space<vmem>>, vector<256x512xf32>
    %cst_135 = arith.constant dense<0.000000e+00> : vector<2x512xf32>
    %412 = tpu.matmul %410, %411, %cst_135 {dimension_numbers = #tpu.dot_dimension_numbers<[1], [0], [0], [1], [0, 0, 1, 1], [], []>} : vector<2x256xf32>, vector<256x512xf32>, vector<2x512xf32> -> vector<2x512xf32>
    %c0_136 = arith.constant 0 : index
    %c0_137 = arith.constant 0 : index
    %413 = vector.load %arg3[%c0_136, %c0_137] : memref<1x512xf32, #tpu.memory_space<vmem>>, vector<1x512xf32>
    %414 = vector.broadcast %413 : vector<1x512xf32> to vector<2x512xf32>
    %415 = arith.addf %412, %414 : vector<2x512xf32>
    %416 = vector.extract_strided_slice %415 {offsets = [0, 0], sizes = [2, 128], strides = [1, 1]} : vector<2x512xf32> to vector<2x128xf32>
    %417 = arith.negf %416 : vector<2x128xf32>
    %418 = math.exp %417 : vector<2x128xf32>
    %cst_138 = arith.constant 1.000000e+00 : f32
    %419 = vector.broadcast %cst_138 : f32 to vector<2x128xf32>
    %420 = arith.addf %419, %418 : vector<2x128xf32>
    %421 = arith.divf %419, %420 : vector<2x128xf32>
    %422 = vector.extract_strided_slice %415 {offsets = [0, 128], sizes = [2, 128], strides = [1, 1]} : vector<2x512xf32> to vector<2x128xf32>
    %423 = arith.negf %422 : vector<2x128xf32>
    %424 = math.exp %423 : vector<2x128xf32>
    %cst_139 = arith.constant 1.000000e+00 : f32
    %425 = vector.broadcast %cst_139 : f32 to vector<2x128xf32>
    %426 = arith.addf %425, %424 : vector<2x128xf32>
    %427 = arith.divf %425, %426 : vector<2x128xf32>
    %428 = vector.extract_strided_slice %415 {offsets = [0, 256], sizes = [2, 128], strides = [1, 1]} : vector<2x512xf32> to vector<2x128xf32>
    %429 = math.tanh %428 : vector<2x128xf32>
    %430 = vector.extract_strided_slice %415 {offsets = [0, 384], sizes = [2, 128], strides = [1, 1]} : vector<2x512xf32> to vector<2x128xf32>
    %431 = arith.negf %430 : vector<2x128xf32>
    %432 = math.exp %431 : vector<2x128xf32>
    %cst_140 = arith.constant 1.000000e+00 : f32
    %433 = vector.broadcast %cst_140 : f32 to vector<2x128xf32>
    %434 = arith.addf %433, %432 : vector<2x128xf32>
    %435 = arith.divf %433, %434 : vector<2x128xf32>
    %436 = arith.mulf %427, %312 : vector<2x128xf32>
    %437 = arith.mulf %421, %429 : vector<2x128xf32>
    %438 = arith.addf %436, %437 : vector<2x128xf32>
    %439 = math.tanh %438 : vector<2x128xf32>
    %440 = arith.mulf %435, %439 : vector<2x128xf32>
    %441 = tpu.concatenate %440, %346 in 1 : vector<2x128xf32>, vector<2x128xf32> -> vector<2x256xf32>
    %c0_141 = arith.constant 0 : index
    %c0_142 = arith.constant 0 : index
    %442 = vector.load %arg4[%c0_141, %c0_142] : memref<256x384xf32, #tpu.memory_space<vmem>>, vector<256x384xf32>
    %cst_143 = arith.constant dense<0.000000e+00> : vector<2x384xf32>
    %443 = tpu.matmul %441, %442, %cst_143 {dimension_numbers = #tpu.dot_dimension_numbers<[1], [0], [0], [1], [0, 0, 1, 1], [], []>} : vector<2x256xf32>, vector<256x384xf32>, vector<2x384xf32> -> vector<2x384xf32>
    %c0_144 = arith.constant 0 : index
    %c0_145 = arith.constant 0 : index
    %444 = vector.load %arg6[%c0_144, %c0_145] : memref<1x384xf32, #tpu.memory_space<vmem>>, vector<1x384xf32>
    %445 = vector.broadcast %444 : vector<1x384xf32> to vector<2x384xf32>
    %446 = arith.addf %443, %445 : vector<2x384xf32>
    %c0_146 = arith.constant 0 : index
    %c0_147 = arith.constant 0 : index
    %447 = vector.load %arg5[%c0_146, %c0_147] : memref<128x128xf32, #tpu.memory_space<vmem>>, vector<128x128xf32>
    %cst_148 = arith.constant dense<0.000000e+00> : vector<2x128xf32>
    %448 = tpu.matmul %346, %447, %cst_148 {dimension_numbers = #tpu.dot_dimension_numbers<[1], [0], [0], [1], [0, 0, 1, 1], [], []>} : vector<2x128xf32>, vector<128x128xf32>, vector<2x128xf32> -> vector<2x128xf32>
    %c0_149 = arith.constant 0 : index
    %c0_150 = arith.constant 0 : index
    %449 = vector.load %arg7[%c0_149, %c0_150] : memref<1x128xf32, #tpu.memory_space<vmem>>, vector<1x128xf32>
    %450 = vector.broadcast %449 : vector<1x128xf32> to vector<2x128xf32>
    %451 = arith.addf %448, %450 : vector<2x128xf32>
    %452 = vector.extract_strided_slice %446 {offsets = [0, 0], sizes = [2, 128], strides = [1, 1]} : vector<2x384xf32> to vector<2x128xf32>
    %453 = arith.negf %452 : vector<2x128xf32>
    %454 = math.exp %453 : vector<2x128xf32>
    %cst_151 = arith.constant 1.000000e+00 : f32
    %455 = vector.broadcast %cst_151 : f32 to vector<2x128xf32>
    %456 = arith.addf %455, %454 : vector<2x128xf32>
    %457 = arith.divf %455, %456 : vector<2x128xf32>
    %458 = vector.extract_strided_slice %446 {offsets = [0, 128], sizes = [2, 128], strides = [1, 1]} : vector<2x384xf32> to vector<2x128xf32>
    %459 = arith.negf %458 : vector<2x128xf32>
    %460 = math.exp %459 : vector<2x128xf32>
    %cst_152 = arith.constant 1.000000e+00 : f32
    %461 = vector.broadcast %cst_152 : f32 to vector<2x128xf32>
    %462 = arith.addf %461, %460 : vector<2x128xf32>
    %463 = arith.divf %461, %462 : vector<2x128xf32>
    %464 = vector.extract_strided_slice %446 {offsets = [0, 256], sizes = [2, 128], strides = [1, 1]} : vector<2x384xf32> to vector<2x128xf32>
    %465 = arith.mulf %457, %451 : vector<2x128xf32>
    %466 = arith.addf %464, %465 : vector<2x128xf32>
    %467 = math.tanh %466 : vector<2x128xf32>
    %cst_153 = arith.constant 1.000000e+00 : f32
    %468 = vector.broadcast %cst_153 : f32 to vector<2x128xf32>
    %469 = arith.subf %468, %463 : vector<2x128xf32>
    %470 = arith.mulf %469, %467 : vector<2x128xf32>
    %471 = arith.mulf %463, %346 : vector<2x128xf32>
    %472 = arith.addf %470, %471 : vector<2x128xf32>
    %473 = tpu.concatenate %472, %378 in 1 : vector<2x128xf32>, vector<2x128xf32> -> vector<2x256xf32>
    %c0_154 = arith.constant 0 : index
    %c0_155 = arith.constant 0 : index
    %474 = vector.load %arg8[%c0_154, %c0_155] : memref<256x384xf32, #tpu.memory_space<vmem>>, vector<256x384xf32>
    %cst_156 = arith.constant dense<0.000000e+00> : vector<2x384xf32>
    %475 = tpu.matmul %473, %474, %cst_156 {dimension_numbers = #tpu.dot_dimension_numbers<[1], [0], [0], [1], [0, 0, 1, 1], [], []>} : vector<2x256xf32>, vector<256x384xf32>, vector<2x384xf32> -> vector<2x384xf32>
    %c0_157 = arith.constant 0 : index
    %c0_158 = arith.constant 0 : index
    %476 = vector.load %arg10[%c0_157, %c0_158] : memref<1x384xf32, #tpu.memory_space<vmem>>, vector<1x384xf32>
    %477 = vector.broadcast %476 : vector<1x384xf32> to vector<2x384xf32>
    %478 = arith.addf %475, %477 : vector<2x384xf32>
    %c0_159 = arith.constant 0 : index
    %c0_160 = arith.constant 0 : index
    %479 = vector.load %arg9[%c0_159, %c0_160] : memref<128x128xf32, #tpu.memory_space<vmem>>, vector<128x128xf32>
    %cst_161 = arith.constant dense<0.000000e+00> : vector<2x128xf32>
    %480 = tpu.matmul %378, %479, %cst_161 {dimension_numbers = #tpu.dot_dimension_numbers<[1], [0], [0], [1], [0, 0, 1, 1], [], []>} : vector<2x128xf32>, vector<128x128xf32>, vector<2x128xf32> -> vector<2x128xf32>
    %c0_162 = arith.constant 0 : index
    %c0_163 = arith.constant 0 : index
    %481 = vector.load %arg11[%c0_162, %c0_163] : memref<1x128xf32, #tpu.memory_space<vmem>>, vector<1x128xf32>
    %482 = vector.broadcast %481 : vector<1x128xf32> to vector<2x128xf32>
    %483 = arith.addf %480, %482 : vector<2x128xf32>
    %484 = vector.extract_strided_slice %478 {offsets = [0, 0], sizes = [2, 128], strides = [1, 1]} : vector<2x384xf32> to vector<2x128xf32>
    %485 = arith.negf %484 : vector<2x128xf32>
    %486 = math.exp %485 : vector<2x128xf32>
    %cst_164 = arith.constant 1.000000e+00 : f32
    %487 = vector.broadcast %cst_164 : f32 to vector<2x128xf32>
    %488 = arith.addf %487, %486 : vector<2x128xf32>
    %489 = arith.divf %487, %488 : vector<2x128xf32>
    %490 = vector.extract_strided_slice %478 {offsets = [0, 128], sizes = [2, 128], strides = [1, 1]} : vector<2x384xf32> to vector<2x128xf32>
    %491 = arith.negf %490 : vector<2x128xf32>
    %492 = math.exp %491 : vector<2x128xf32>
    %cst_165 = arith.constant 1.000000e+00 : f32
    %493 = vector.broadcast %cst_165 : f32 to vector<2x128xf32>
    %494 = arith.addf %493, %492 : vector<2x128xf32>
    %495 = arith.divf %493, %494 : vector<2x128xf32>
    %496 = vector.extract_strided_slice %478 {offsets = [0, 256], sizes = [2, 128], strides = [1, 1]} : vector<2x384xf32> to vector<2x128xf32>
    %497 = arith.mulf %489, %483 : vector<2x128xf32>
    %498 = arith.addf %496, %497 : vector<2x128xf32>
    %499 = math.tanh %498 : vector<2x128xf32>
    %cst_166 = arith.constant 1.000000e+00 : f32
    %500 = vector.broadcast %cst_166 : f32 to vector<2x128xf32>
    %501 = arith.subf %500, %495 : vector<2x128xf32>
    %502 = arith.mulf %501, %499 : vector<2x128xf32>
    %503 = arith.mulf %495, %378 : vector<2x128xf32>
    %504 = arith.addf %502, %503 : vector<2x128xf32>
    %c4_i32 = arith.constant 4 : i32
    %505 = arith.index_cast %c4_i32 : i32 to index
    %c0_167 = arith.constant 0 : index
    %c0_168 = arith.constant 0 : index
    %506 = vector.load %arg0[%505, %c0_167, %c0_168] : memref<8x2x512xf32, #tpu.memory_space<vmem>>, vector<1x2x512xf32>
    %507 = vector.shape_cast %506 : vector<1x2x512xf32> to vector<2x512xf32>
    %c0_169 = arith.constant 0 : index
    %c0_170 = arith.constant 0 : index
    %508 = vector.load %arg1[%c0_169, %c0_170] : memref<128x512xf32, #tpu.memory_space<vmem>>, vector<128x512xf32>
    %cst_171 = arith.constant dense<0.000000e+00> : vector<2x512xf32>
    %509 = tpu.matmul %409, %508, %cst_171 {dimension_numbers = #tpu.dot_dimension_numbers<[1], [0], [0], [1], [0, 0, 1, 1], [], []>} : vector<2x128xf32>, vector<128x512xf32>, vector<2x512xf32> -> vector<2x512xf32>
    %510 = arith.addf %507, %509 : vector<2x512xf32>
    %511 = vector.extract_strided_slice %510 {offsets = [0, 0], sizes = [2, 128], strides = [1, 1]} : vector<2x512xf32> to vector<2x128xf32>
    %512 = arith.negf %511 : vector<2x128xf32>
    %513 = math.exp %512 : vector<2x128xf32>
    %cst_172 = arith.constant 1.000000e+00 : f32
    %514 = vector.broadcast %cst_172 : f32 to vector<2x128xf32>
    %515 = arith.addf %514, %513 : vector<2x128xf32>
    %516 = arith.divf %514, %515 : vector<2x128xf32>
    %517 = vector.extract_strided_slice %510 {offsets = [0, 128], sizes = [2, 128], strides = [1, 1]} : vector<2x512xf32> to vector<2x128xf32>
    %518 = arith.negf %517 : vector<2x128xf32>
    %519 = math.exp %518 : vector<2x128xf32>
    %cst_173 = arith.constant 1.000000e+00 : f32
    %520 = vector.broadcast %cst_173 : f32 to vector<2x128xf32>
    %521 = arith.addf %520, %519 : vector<2x128xf32>
    %522 = arith.divf %520, %521 : vector<2x128xf32>
    %523 = vector.extract_strided_slice %510 {offsets = [0, 256], sizes = [2, 128], strides = [1, 1]} : vector<2x512xf32> to vector<2x128xf32>
    %524 = math.tanh %523 : vector<2x128xf32>
    %525 = vector.extract_strided_slice %510 {offsets = [0, 384], sizes = [2, 128], strides = [1, 1]} : vector<2x512xf32> to vector<2x128xf32>
    %526 = arith.negf %525 : vector<2x128xf32>
    %527 = math.exp %526 : vector<2x128xf32>
    %cst_174 = arith.constant 1.000000e+00 : f32
    %528 = vector.broadcast %cst_174 : f32 to vector<2x128xf32>
    %529 = arith.addf %528, %527 : vector<2x128xf32>
    %530 = arith.divf %528, %529 : vector<2x128xf32>
    %531 = arith.mulf %522, %407 : vector<2x128xf32>
    %532 = arith.mulf %516, %524 : vector<2x128xf32>
    %533 = arith.addf %531, %532 : vector<2x128xf32>
    %534 = math.tanh %533 : vector<2x128xf32>
    %535 = arith.mulf %530, %534 : vector<2x128xf32>
    %536 = tpu.concatenate %535, %440 in 1 : vector<2x128xf32>, vector<2x128xf32> -> vector<2x256xf32>
    %c0_175 = arith.constant 0 : index
    %c0_176 = arith.constant 0 : index
    %537 = vector.load %arg2[%c0_175, %c0_176] : memref<256x512xf32, #tpu.memory_space<vmem>>, vector<256x512xf32>
    %cst_177 = arith.constant dense<0.000000e+00> : vector<2x512xf32>
    %538 = tpu.matmul %536, %537, %cst_177 {dimension_numbers = #tpu.dot_dimension_numbers<[1], [0], [0], [1], [0, 0, 1, 1], [], []>} : vector<2x256xf32>, vector<256x512xf32>, vector<2x512xf32> -> vector<2x512xf32>
    %c0_178 = arith.constant 0 : index
    %c0_179 = arith.constant 0 : index
    %539 = vector.load %arg3[%c0_178, %c0_179] : memref<1x512xf32, #tpu.memory_space<vmem>>, vector<1x512xf32>
    %540 = vector.broadcast %539 : vector<1x512xf32> to vector<2x512xf32>
    %541 = arith.addf %538, %540 : vector<2x512xf32>
    %542 = vector.extract_strided_slice %541 {offsets = [0, 0], sizes = [2, 128], strides = [1, 1]} : vector<2x512xf32> to vector<2x128xf32>
    %543 = arith.negf %542 : vector<2x128xf32>
    %544 = math.exp %543 : vector<2x128xf32>
    %cst_180 = arith.constant 1.000000e+00 : f32
    %545 = vector.broadcast %cst_180 : f32 to vector<2x128xf32>
    %546 = arith.addf %545, %544 : vector<2x128xf32>
    %547 = arith.divf %545, %546 : vector<2x128xf32>
    %548 = vector.extract_strided_slice %541 {offsets = [0, 128], sizes = [2, 128], strides = [1, 1]} : vector<2x512xf32> to vector<2x128xf32>
    %549 = arith.negf %548 : vector<2x128xf32>
    %550 = math.exp %549 : vector<2x128xf32>
    %cst_181 = arith.constant 1.000000e+00 : f32
    %551 = vector.broadcast %cst_181 : f32 to vector<2x128xf32>
    %552 = arith.addf %551, %550 : vector<2x128xf32>
    %553 = arith.divf %551, %552 : vector<2x128xf32>
    %554 = vector.extract_strided_slice %541 {offsets = [0, 256], sizes = [2, 128], strides = [1, 1]} : vector<2x512xf32> to vector<2x128xf32>
    %555 = math.tanh %554 : vector<2x128xf32>
    %556 = vector.extract_strided_slice %541 {offsets = [0, 384], sizes = [2, 128], strides = [1, 1]} : vector<2x512xf32> to vector<2x128xf32>
    %557 = arith.negf %556 : vector<2x128xf32>
    %558 = math.exp %557 : vector<2x128xf32>
    %cst_182 = arith.constant 1.000000e+00 : f32
    %559 = vector.broadcast %cst_182 : f32 to vector<2x128xf32>
    %560 = arith.addf %559, %558 : vector<2x128xf32>
    %561 = arith.divf %559, %560 : vector<2x128xf32>
    %562 = arith.mulf %553, %438 : vector<2x128xf32>
    %563 = arith.mulf %547, %555 : vector<2x128xf32>
    %564 = arith.addf %562, %563 : vector<2x128xf32>
    %565 = math.tanh %564 : vector<2x128xf32>
    %566 = arith.mulf %561, %565 : vector<2x128xf32>
    %567 = tpu.concatenate %566, %472 in 1 : vector<2x128xf32>, vector<2x128xf32> -> vector<2x256xf32>
    %c0_183 = arith.constant 0 : index
    %c0_184 = arith.constant 0 : index
    %568 = vector.load %arg4[%c0_183, %c0_184] : memref<256x384xf32, #tpu.memory_space<vmem>>, vector<256x384xf32>
    %cst_185 = arith.constant dense<0.000000e+00> : vector<2x384xf32>
    %569 = tpu.matmul %567, %568, %cst_185 {dimension_numbers = #tpu.dot_dimension_numbers<[1], [0], [0], [1], [0, 0, 1, 1], [], []>} : vector<2x256xf32>, vector<256x384xf32>, vector<2x384xf32> -> vector<2x384xf32>
    %c0_186 = arith.constant 0 : index
    %c0_187 = arith.constant 0 : index
    %570 = vector.load %arg6[%c0_186, %c0_187] : memref<1x384xf32, #tpu.memory_space<vmem>>, vector<1x384xf32>
    %571 = vector.broadcast %570 : vector<1x384xf32> to vector<2x384xf32>
    %572 = arith.addf %569, %571 : vector<2x384xf32>
    %c0_188 = arith.constant 0 : index
    %c0_189 = arith.constant 0 : index
    %573 = vector.load %arg5[%c0_188, %c0_189] : memref<128x128xf32, #tpu.memory_space<vmem>>, vector<128x128xf32>
    %cst_190 = arith.constant dense<0.000000e+00> : vector<2x128xf32>
    %574 = tpu.matmul %472, %573, %cst_190 {dimension_numbers = #tpu.dot_dimension_numbers<[1], [0], [0], [1], [0, 0, 1, 1], [], []>} : vector<2x128xf32>, vector<128x128xf32>, vector<2x128xf32> -> vector<2x128xf32>
    %c0_191 = arith.constant 0 : index
    %c0_192 = arith.constant 0 : index
    %575 = vector.load %arg7[%c0_191, %c0_192] : memref<1x128xf32, #tpu.memory_space<vmem>>, vector<1x128xf32>
    %576 = vector.broadcast %575 : vector<1x128xf32> to vector<2x128xf32>
    %577 = arith.addf %574, %576 : vector<2x128xf32>
    %578 = vector.extract_strided_slice %572 {offsets = [0, 0], sizes = [2, 128], strides = [1, 1]} : vector<2x384xf32> to vector<2x128xf32>
    %579 = arith.negf %578 : vector<2x128xf32>
    %580 = math.exp %579 : vector<2x128xf32>
    %cst_193 = arith.constant 1.000000e+00 : f32
    %581 = vector.broadcast %cst_193 : f32 to vector<2x128xf32>
    %582 = arith.addf %581, %580 : vector<2x128xf32>
    %583 = arith.divf %581, %582 : vector<2x128xf32>
    %584 = vector.extract_strided_slice %572 {offsets = [0, 128], sizes = [2, 128], strides = [1, 1]} : vector<2x384xf32> to vector<2x128xf32>
    %585 = arith.negf %584 : vector<2x128xf32>
    %586 = math.exp %585 : vector<2x128xf32>
    %cst_194 = arith.constant 1.000000e+00 : f32
    %587 = vector.broadcast %cst_194 : f32 to vector<2x128xf32>
    %588 = arith.addf %587, %586 : vector<2x128xf32>
    %589 = arith.divf %587, %588 : vector<2x128xf32>
    %590 = vector.extract_strided_slice %572 {offsets = [0, 256], sizes = [2, 128], strides = [1, 1]} : vector<2x384xf32> to vector<2x128xf32>
    %591 = arith.mulf %583, %577 : vector<2x128xf32>
    %592 = arith.addf %590, %591 : vector<2x128xf32>
    %593 = math.tanh %592 : vector<2x128xf32>
    %cst_195 = arith.constant 1.000000e+00 : f32
    %594 = vector.broadcast %cst_195 : f32 to vector<2x128xf32>
    %595 = arith.subf %594, %589 : vector<2x128xf32>
    %596 = arith.mulf %595, %593 : vector<2x128xf32>
    %597 = arith.mulf %589, %472 : vector<2x128xf32>
    %598 = arith.addf %596, %597 : vector<2x128xf32>
    %599 = tpu.concatenate %598, %504 in 1 : vector<2x128xf32>, vector<2x128xf32> -> vector<2x256xf32>
    %c0_196 = arith.constant 0 : index
    %c0_197 = arith.constant 0 : index
    %600 = vector.load %arg8[%c0_196, %c0_197] : memref<256x384xf32, #tpu.memory_space<vmem>>, vector<256x384xf32>
    %cst_198 = arith.constant dense<0.000000e+00> : vector<2x384xf32>
    %601 = tpu.matmul %599, %600, %cst_198 {dimension_numbers = #tpu.dot_dimension_numbers<[1], [0], [0], [1], [0, 0, 1, 1], [], []>} : vector<2x256xf32>, vector<256x384xf32>, vector<2x384xf32> -> vector<2x384xf32>
    %c0_199 = arith.constant 0 : index
    %c0_200 = arith.constant 0 : index
    %602 = vector.load %arg10[%c0_199, %c0_200] : memref<1x384xf32, #tpu.memory_space<vmem>>, vector<1x384xf32>
    %603 = vector.broadcast %602 : vector<1x384xf32> to vector<2x384xf32>
    %604 = arith.addf %601, %603 : vector<2x384xf32>
    %c0_201 = arith.constant 0 : index
    %c0_202 = arith.constant 0 : index
    %605 = vector.load %arg9[%c0_201, %c0_202] : memref<128x128xf32, #tpu.memory_space<vmem>>, vector<128x128xf32>
    %cst_203 = arith.constant dense<0.000000e+00> : vector<2x128xf32>
    %606 = tpu.matmul %504, %605, %cst_203 {dimension_numbers = #tpu.dot_dimension_numbers<[1], [0], [0], [1], [0, 0, 1, 1], [], []>} : vector<2x128xf32>, vector<128x128xf32>, vector<2x128xf32> -> vector<2x128xf32>
    %c0_204 = arith.constant 0 : index
    %c0_205 = arith.constant 0 : index
    %607 = vector.load %arg11[%c0_204, %c0_205] : memref<1x128xf32, #tpu.memory_space<vmem>>, vector<1x128xf32>
    %608 = vector.broadcast %607 : vector<1x128xf32> to vector<2x128xf32>
    %609 = arith.addf %606, %608 : vector<2x128xf32>
    %610 = vector.extract_strided_slice %604 {offsets = [0, 0], sizes = [2, 128], strides = [1, 1]} : vector<2x384xf32> to vector<2x128xf32>
    %611 = arith.negf %610 : vector<2x128xf32>
    %612 = math.exp %611 : vector<2x128xf32>
    %cst_206 = arith.constant 1.000000e+00 : f32
    %613 = vector.broadcast %cst_206 : f32 to vector<2x128xf32>
    %614 = arith.addf %613, %612 : vector<2x128xf32>
    %615 = arith.divf %613, %614 : vector<2x128xf32>
    %616 = vector.extract_strided_slice %604 {offsets = [0, 128], sizes = [2, 128], strides = [1, 1]} : vector<2x384xf32> to vector<2x128xf32>
    %617 = arith.negf %616 : vector<2x128xf32>
    %618 = math.exp %617 : vector<2x128xf32>
    %cst_207 = arith.constant 1.000000e+00 : f32
    %619 = vector.broadcast %cst_207 : f32 to vector<2x128xf32>
    %620 = arith.addf %619, %618 : vector<2x128xf32>
    %621 = arith.divf %619, %620 : vector<2x128xf32>
    %622 = vector.extract_strided_slice %604 {offsets = [0, 256], sizes = [2, 128], strides = [1, 1]} : vector<2x384xf32> to vector<2x128xf32>
    %623 = arith.mulf %615, %609 : vector<2x128xf32>
    %624 = arith.addf %622, %623 : vector<2x128xf32>
    %625 = math.tanh %624 : vector<2x128xf32>
    %cst_208 = arith.constant 1.000000e+00 : f32
    %626 = vector.broadcast %cst_208 : f32 to vector<2x128xf32>
    %627 = arith.subf %626, %621 : vector<2x128xf32>
    %628 = arith.mulf %627, %625 : vector<2x128xf32>
    %629 = arith.mulf %621, %504 : vector<2x128xf32>
    %630 = arith.addf %628, %629 : vector<2x128xf32>
    %c5_i32 = arith.constant 5 : i32
    %631 = arith.index_cast %c5_i32 : i32 to index
    %c0_209 = arith.constant 0 : index
    %c0_210 = arith.constant 0 : index
    %632 = vector.load %arg0[%631, %c0_209, %c0_210] : memref<8x2x512xf32, #tpu.memory_space<vmem>>, vector<1x2x512xf32>
    %633 = vector.shape_cast %632 : vector<1x2x512xf32> to vector<2x512xf32>
    %c0_211 = arith.constant 0 : index
    %c0_212 = arith.constant 0 : index
    %634 = vector.load %arg1[%c0_211, %c0_212] : memref<128x512xf32, #tpu.memory_space<vmem>>, vector<128x512xf32>
    %cst_213 = arith.constant dense<0.000000e+00> : vector<2x512xf32>
    %635 = tpu.matmul %535, %634, %cst_213 {dimension_numbers = #tpu.dot_dimension_numbers<[1], [0], [0], [1], [0, 0, 1, 1], [], []>} : vector<2x128xf32>, vector<128x512xf32>, vector<2x512xf32> -> vector<2x512xf32>
    %636 = arith.addf %633, %635 : vector<2x512xf32>
    %637 = vector.extract_strided_slice %636 {offsets = [0, 0], sizes = [2, 128], strides = [1, 1]} : vector<2x512xf32> to vector<2x128xf32>
    %638 = arith.negf %637 : vector<2x128xf32>
    %639 = math.exp %638 : vector<2x128xf32>
    %cst_214 = arith.constant 1.000000e+00 : f32
    %640 = vector.broadcast %cst_214 : f32 to vector<2x128xf32>
    %641 = arith.addf %640, %639 : vector<2x128xf32>
    %642 = arith.divf %640, %641 : vector<2x128xf32>
    %643 = vector.extract_strided_slice %636 {offsets = [0, 128], sizes = [2, 128], strides = [1, 1]} : vector<2x512xf32> to vector<2x128xf32>
    %644 = arith.negf %643 : vector<2x128xf32>
    %645 = math.exp %644 : vector<2x128xf32>
    %cst_215 = arith.constant 1.000000e+00 : f32
    %646 = vector.broadcast %cst_215 : f32 to vector<2x128xf32>
    %647 = arith.addf %646, %645 : vector<2x128xf32>
    %648 = arith.divf %646, %647 : vector<2x128xf32>
    %649 = vector.extract_strided_slice %636 {offsets = [0, 256], sizes = [2, 128], strides = [1, 1]} : vector<2x512xf32> to vector<2x128xf32>
    %650 = math.tanh %649 : vector<2x128xf32>
    %651 = vector.extract_strided_slice %636 {offsets = [0, 384], sizes = [2, 128], strides = [1, 1]} : vector<2x512xf32> to vector<2x128xf32>
    %652 = arith.negf %651 : vector<2x128xf32>
    %653 = math.exp %652 : vector<2x128xf32>
    %cst_216 = arith.constant 1.000000e+00 : f32
    %654 = vector.broadcast %cst_216 : f32 to vector<2x128xf32>
    %655 = arith.addf %654, %653 : vector<2x128xf32>
    %656 = arith.divf %654, %655 : vector<2x128xf32>
    %657 = arith.mulf %648, %533 : vector<2x128xf32>
    %658 = arith.mulf %642, %650 : vector<2x128xf32>
    %659 = arith.addf %657, %658 : vector<2x128xf32>
    %660 = math.tanh %659 : vector<2x128xf32>
    %661 = arith.mulf %656, %660 : vector<2x128xf32>
    %662 = tpu.concatenate %661, %566 in 1 : vector<2x128xf32>, vector<2x128xf32> -> vector<2x256xf32>
    %c0_217 = arith.constant 0 : index
    %c0_218 = arith.constant 0 : index
    %663 = vector.load %arg2[%c0_217, %c0_218] : memref<256x512xf32, #tpu.memory_space<vmem>>, vector<256x512xf32>
    %cst_219 = arith.constant dense<0.000000e+00> : vector<2x512xf32>
    %664 = tpu.matmul %662, %663, %cst_219 {dimension_numbers = #tpu.dot_dimension_numbers<[1], [0], [0], [1], [0, 0, 1, 1], [], []>} : vector<2x256xf32>, vector<256x512xf32>, vector<2x512xf32> -> vector<2x512xf32>
    %c0_220 = arith.constant 0 : index
    %c0_221 = arith.constant 0 : index
    %665 = vector.load %arg3[%c0_220, %c0_221] : memref<1x512xf32, #tpu.memory_space<vmem>>, vector<1x512xf32>
    %666 = vector.broadcast %665 : vector<1x512xf32> to vector<2x512xf32>
    %667 = arith.addf %664, %666 : vector<2x512xf32>
    %668 = vector.extract_strided_slice %667 {offsets = [0, 0], sizes = [2, 128], strides = [1, 1]} : vector<2x512xf32> to vector<2x128xf32>
    %669 = arith.negf %668 : vector<2x128xf32>
    %670 = math.exp %669 : vector<2x128xf32>
    %cst_222 = arith.constant 1.000000e+00 : f32
    %671 = vector.broadcast %cst_222 : f32 to vector<2x128xf32>
    %672 = arith.addf %671, %670 : vector<2x128xf32>
    %673 = arith.divf %671, %672 : vector<2x128xf32>
    %674 = vector.extract_strided_slice %667 {offsets = [0, 128], sizes = [2, 128], strides = [1, 1]} : vector<2x512xf32> to vector<2x128xf32>
    %675 = arith.negf %674 : vector<2x128xf32>
    %676 = math.exp %675 : vector<2x128xf32>
    %cst_223 = arith.constant 1.000000e+00 : f32
    %677 = vector.broadcast %cst_223 : f32 to vector<2x128xf32>
    %678 = arith.addf %677, %676 : vector<2x128xf32>
    %679 = arith.divf %677, %678 : vector<2x128xf32>
    %680 = vector.extract_strided_slice %667 {offsets = [0, 256], sizes = [2, 128], strides = [1, 1]} : vector<2x512xf32> to vector<2x128xf32>
    %681 = math.tanh %680 : vector<2x128xf32>
    %682 = vector.extract_strided_slice %667 {offsets = [0, 384], sizes = [2, 128], strides = [1, 1]} : vector<2x512xf32> to vector<2x128xf32>
    %683 = arith.negf %682 : vector<2x128xf32>
    %684 = math.exp %683 : vector<2x128xf32>
    %cst_224 = arith.constant 1.000000e+00 : f32
    %685 = vector.broadcast %cst_224 : f32 to vector<2x128xf32>
    %686 = arith.addf %685, %684 : vector<2x128xf32>
    %687 = arith.divf %685, %686 : vector<2x128xf32>
    %688 = arith.mulf %679, %564 : vector<2x128xf32>
    %689 = arith.mulf %673, %681 : vector<2x128xf32>
    %690 = arith.addf %688, %689 : vector<2x128xf32>
    %691 = math.tanh %690 : vector<2x128xf32>
    %692 = arith.mulf %687, %691 : vector<2x128xf32>
    %693 = tpu.concatenate %692, %598 in 1 : vector<2x128xf32>, vector<2x128xf32> -> vector<2x256xf32>
    %c0_225 = arith.constant 0 : index
    %c0_226 = arith.constant 0 : index
    %694 = vector.load %arg4[%c0_225, %c0_226] : memref<256x384xf32, #tpu.memory_space<vmem>>, vector<256x384xf32>
    %cst_227 = arith.constant dense<0.000000e+00> : vector<2x384xf32>
    %695 = tpu.matmul %693, %694, %cst_227 {dimension_numbers = #tpu.dot_dimension_numbers<[1], [0], [0], [1], [0, 0, 1, 1], [], []>} : vector<2x256xf32>, vector<256x384xf32>, vector<2x384xf32> -> vector<2x384xf32>
    %c0_228 = arith.constant 0 : index
    %c0_229 = arith.constant 0 : index
    %696 = vector.load %arg6[%c0_228, %c0_229] : memref<1x384xf32, #tpu.memory_space<vmem>>, vector<1x384xf32>
    %697 = vector.broadcast %696 : vector<1x384xf32> to vector<2x384xf32>
    %698 = arith.addf %695, %697 : vector<2x384xf32>
    %c0_230 = arith.constant 0 : index
    %c0_231 = arith.constant 0 : index
    %699 = vector.load %arg5[%c0_230, %c0_231] : memref<128x128xf32, #tpu.memory_space<vmem>>, vector<128x128xf32>
    %cst_232 = arith.constant dense<0.000000e+00> : vector<2x128xf32>
    %700 = tpu.matmul %598, %699, %cst_232 {dimension_numbers = #tpu.dot_dimension_numbers<[1], [0], [0], [1], [0, 0, 1, 1], [], []>} : vector<2x128xf32>, vector<128x128xf32>, vector<2x128xf32> -> vector<2x128xf32>
    %c0_233 = arith.constant 0 : index
    %c0_234 = arith.constant 0 : index
    %701 = vector.load %arg7[%c0_233, %c0_234] : memref<1x128xf32, #tpu.memory_space<vmem>>, vector<1x128xf32>
    %702 = vector.broadcast %701 : vector<1x128xf32> to vector<2x128xf32>
    %703 = arith.addf %700, %702 : vector<2x128xf32>
    %704 = vector.extract_strided_slice %698 {offsets = [0, 0], sizes = [2, 128], strides = [1, 1]} : vector<2x384xf32> to vector<2x128xf32>
    %705 = arith.negf %704 : vector<2x128xf32>
    %706 = math.exp %705 : vector<2x128xf32>
    %cst_235 = arith.constant 1.000000e+00 : f32
    %707 = vector.broadcast %cst_235 : f32 to vector<2x128xf32>
    %708 = arith.addf %707, %706 : vector<2x128xf32>
    %709 = arith.divf %707, %708 : vector<2x128xf32>
    %710 = vector.extract_strided_slice %698 {offsets = [0, 128], sizes = [2, 128], strides = [1, 1]} : vector<2x384xf32> to vector<2x128xf32>
    %711 = arith.negf %710 : vector<2x128xf32>
    %712 = math.exp %711 : vector<2x128xf32>
    %cst_236 = arith.constant 1.000000e+00 : f32
    %713 = vector.broadcast %cst_236 : f32 to vector<2x128xf32>
    %714 = arith.addf %713, %712 : vector<2x128xf32>
    %715 = arith.divf %713, %714 : vector<2x128xf32>
    %716 = vector.extract_strided_slice %698 {offsets = [0, 256], sizes = [2, 128], strides = [1, 1]} : vector<2x384xf32> to vector<2x128xf32>
    %717 = arith.mulf %709, %703 : vector<2x128xf32>
    %718 = arith.addf %716, %717 : vector<2x128xf32>
    %719 = math.tanh %718 : vector<2x128xf32>
    %cst_237 = arith.constant 1.000000e+00 : f32
    %720 = vector.broadcast %cst_237 : f32 to vector<2x128xf32>
    %721 = arith.subf %720, %715 : vector<2x128xf32>
    %722 = arith.mulf %721, %719 : vector<2x128xf32>
    %723 = arith.mulf %715, %598 : vector<2x128xf32>
    %724 = arith.addf %722, %723 : vector<2x128xf32>
    %725 = tpu.concatenate %724, %630 in 1 : vector<2x128xf32>, vector<2x128xf32> -> vector<2x256xf32>
    %c0_238 = arith.constant 0 : index
    %c0_239 = arith.constant 0 : index
    %726 = vector.load %arg8[%c0_238, %c0_239] : memref<256x384xf32, #tpu.memory_space<vmem>>, vector<256x384xf32>
    %cst_240 = arith.constant dense<0.000000e+00> : vector<2x384xf32>
    %727 = tpu.matmul %725, %726, %cst_240 {dimension_numbers = #tpu.dot_dimension_numbers<[1], [0], [0], [1], [0, 0, 1, 1], [], []>} : vector<2x256xf32>, vector<256x384xf32>, vector<2x384xf32> -> vector<2x384xf32>
    %c0_241 = arith.constant 0 : index
    %c0_242 = arith.constant 0 : index
    %728 = vector.load %arg10[%c0_241, %c0_242] : memref<1x384xf32, #tpu.memory_space<vmem>>, vector<1x384xf32>
    %729 = vector.broadcast %728 : vector<1x384xf32> to vector<2x384xf32>
    %730 = arith.addf %727, %729 : vector<2x384xf32>
    %c0_243 = arith.constant 0 : index
    %c0_244 = arith.constant 0 : index
    %731 = vector.load %arg9[%c0_243, %c0_244] : memref<128x128xf32, #tpu.memory_space<vmem>>, vector<128x128xf32>
    %cst_245 = arith.constant dense<0.000000e+00> : vector<2x128xf32>
    %732 = tpu.matmul %630, %731, %cst_245 {dimension_numbers = #tpu.dot_dimension_numbers<[1], [0], [0], [1], [0, 0, 1, 1], [], []>} : vector<2x128xf32>, vector<128x128xf32>, vector<2x128xf32> -> vector<2x128xf32>
    %c0_246 = arith.constant 0 : index
    %c0_247 = arith.constant 0 : index
    %733 = vector.load %arg11[%c0_246, %c0_247] : memref<1x128xf32, #tpu.memory_space<vmem>>, vector<1x128xf32>
    %734 = vector.broadcast %733 : vector<1x128xf32> to vector<2x128xf32>
    %735 = arith.addf %732, %734 : vector<2x128xf32>
    %736 = vector.extract_strided_slice %730 {offsets = [0, 0], sizes = [2, 128], strides = [1, 1]} : vector<2x384xf32> to vector<2x128xf32>
    %737 = arith.negf %736 : vector<2x128xf32>
    %738 = math.exp %737 : vector<2x128xf32>
    %cst_248 = arith.constant 1.000000e+00 : f32
    %739 = vector.broadcast %cst_248 : f32 to vector<2x128xf32>
    %740 = arith.addf %739, %738 : vector<2x128xf32>
    %741 = arith.divf %739, %740 : vector<2x128xf32>
    %742 = vector.extract_strided_slice %730 {offsets = [0, 128], sizes = [2, 128], strides = [1, 1]} : vector<2x384xf32> to vector<2x128xf32>
    %743 = arith.negf %742 : vector<2x128xf32>
    %744 = math.exp %743 : vector<2x128xf32>
    %cst_249 = arith.constant 1.000000e+00 : f32
    %745 = vector.broadcast %cst_249 : f32 to vector<2x128xf32>
    %746 = arith.addf %745, %744 : vector<2x128xf32>
    %747 = arith.divf %745, %746 : vector<2x128xf32>
    %748 = vector.extract_strided_slice %730 {offsets = [0, 256], sizes = [2, 128], strides = [1, 1]} : vector<2x384xf32> to vector<2x128xf32>
    %749 = arith.mulf %741, %735 : vector<2x128xf32>
    %750 = arith.addf %748, %749 : vector<2x128xf32>
    %751 = math.tanh %750 : vector<2x128xf32>
    %cst_250 = arith.constant 1.000000e+00 : f32
    %752 = vector.broadcast %cst_250 : f32 to vector<2x128xf32>
    %753 = arith.subf %752, %747 : vector<2x128xf32>
    %754 = arith.mulf %753, %751 : vector<2x128xf32>
    %755 = arith.mulf %747, %630 : vector<2x128xf32>
    %756 = arith.addf %754, %755 : vector<2x128xf32>
    %c6_i32 = arith.constant 6 : i32
    %757 = arith.index_cast %c6_i32 : i32 to index
    %c0_251 = arith.constant 0 : index
    %c0_252 = arith.constant 0 : index
    %758 = vector.load %arg0[%757, %c0_251, %c0_252] : memref<8x2x512xf32, #tpu.memory_space<vmem>>, vector<1x2x512xf32>
    %759 = vector.shape_cast %758 : vector<1x2x512xf32> to vector<2x512xf32>
    %c0_253 = arith.constant 0 : index
    %c0_254 = arith.constant 0 : index
    %760 = vector.load %arg1[%c0_253, %c0_254] : memref<128x512xf32, #tpu.memory_space<vmem>>, vector<128x512xf32>
    %cst_255 = arith.constant dense<0.000000e+00> : vector<2x512xf32>
    %761 = tpu.matmul %661, %760, %cst_255 {dimension_numbers = #tpu.dot_dimension_numbers<[1], [0], [0], [1], [0, 0, 1, 1], [], []>} : vector<2x128xf32>, vector<128x512xf32>, vector<2x512xf32> -> vector<2x512xf32>
    %762 = arith.addf %759, %761 : vector<2x512xf32>
    %763 = vector.extract_strided_slice %762 {offsets = [0, 0], sizes = [2, 128], strides = [1, 1]} : vector<2x512xf32> to vector<2x128xf32>
    %764 = arith.negf %763 : vector<2x128xf32>
    %765 = math.exp %764 : vector<2x128xf32>
    %cst_256 = arith.constant 1.000000e+00 : f32
    %766 = vector.broadcast %cst_256 : f32 to vector<2x128xf32>
    %767 = arith.addf %766, %765 : vector<2x128xf32>
    %768 = arith.divf %766, %767 : vector<2x128xf32>
    %769 = vector.extract_strided_slice %762 {offsets = [0, 128], sizes = [2, 128], strides = [1, 1]} : vector<2x512xf32> to vector<2x128xf32>
    %770 = arith.negf %769 : vector<2x128xf32>
    %771 = math.exp %770 : vector<2x128xf32>
    %cst_257 = arith.constant 1.000000e+00 : f32
    %772 = vector.broadcast %cst_257 : f32 to vector<2x128xf32>
    %773 = arith.addf %772, %771 : vector<2x128xf32>
    %774 = arith.divf %772, %773 : vector<2x128xf32>
    %775 = vector.extract_strided_slice %762 {offsets = [0, 256], sizes = [2, 128], strides = [1, 1]} : vector<2x512xf32> to vector<2x128xf32>
    %776 = math.tanh %775 : vector<2x128xf32>
    %777 = vector.extract_strided_slice %762 {offsets = [0, 384], sizes = [2, 128], strides = [1, 1]} : vector<2x512xf32> to vector<2x128xf32>
    %778 = arith.negf %777 : vector<2x128xf32>
    %779 = math.exp %778 : vector<2x128xf32>
    %cst_258 = arith.constant 1.000000e+00 : f32
    %780 = vector.broadcast %cst_258 : f32 to vector<2x128xf32>
    %781 = arith.addf %780, %779 : vector<2x128xf32>
    %782 = arith.divf %780, %781 : vector<2x128xf32>
    %783 = arith.mulf %774, %659 : vector<2x128xf32>
    %784 = arith.mulf %768, %776 : vector<2x128xf32>
    %785 = arith.addf %783, %784 : vector<2x128xf32>
    %786 = math.tanh %785 : vector<2x128xf32>
    %787 = arith.mulf %782, %786 : vector<2x128xf32>
    %788 = tpu.concatenate %787, %692 in 1 : vector<2x128xf32>, vector<2x128xf32> -> vector<2x256xf32>
    %c0_259 = arith.constant 0 : index
    %c0_260 = arith.constant 0 : index
    %789 = vector.load %arg2[%c0_259, %c0_260] : memref<256x512xf32, #tpu.memory_space<vmem>>, vector<256x512xf32>
    %cst_261 = arith.constant dense<0.000000e+00> : vector<2x512xf32>
    %790 = tpu.matmul %788, %789, %cst_261 {dimension_numbers = #tpu.dot_dimension_numbers<[1], [0], [0], [1], [0, 0, 1, 1], [], []>} : vector<2x256xf32>, vector<256x512xf32>, vector<2x512xf32> -> vector<2x512xf32>
    %c0_262 = arith.constant 0 : index
    %c0_263 = arith.constant 0 : index
    %791 = vector.load %arg3[%c0_262, %c0_263] : memref<1x512xf32, #tpu.memory_space<vmem>>, vector<1x512xf32>
    %792 = vector.broadcast %791 : vector<1x512xf32> to vector<2x512xf32>
    %793 = arith.addf %790, %792 : vector<2x512xf32>
    %794 = vector.extract_strided_slice %793 {offsets = [0, 0], sizes = [2, 128], strides = [1, 1]} : vector<2x512xf32> to vector<2x128xf32>
    %795 = arith.negf %794 : vector<2x128xf32>
    %796 = math.exp %795 : vector<2x128xf32>
    %cst_264 = arith.constant 1.000000e+00 : f32
    %797 = vector.broadcast %cst_264 : f32 to vector<2x128xf32>
    %798 = arith.addf %797, %796 : vector<2x128xf32>
    %799 = arith.divf %797, %798 : vector<2x128xf32>
    %800 = vector.extract_strided_slice %793 {offsets = [0, 128], sizes = [2, 128], strides = [1, 1]} : vector<2x512xf32> to vector<2x128xf32>
    %801 = arith.negf %800 : vector<2x128xf32>
    %802 = math.exp %801 : vector<2x128xf32>
    %cst_265 = arith.constant 1.000000e+00 : f32
    %803 = vector.broadcast %cst_265 : f32 to vector<2x128xf32>
    %804 = arith.addf %803, %802 : vector<2x128xf32>
    %805 = arith.divf %803, %804 : vector<2x128xf32>
    %806 = vector.extract_strided_slice %793 {offsets = [0, 256], sizes = [2, 128], strides = [1, 1]} : vector<2x512xf32> to vector<2x128xf32>
    %807 = math.tanh %806 : vector<2x128xf32>
    %808 = vector.extract_strided_slice %793 {offsets = [0, 384], sizes = [2, 128], strides = [1, 1]} : vector<2x512xf32> to vector<2x128xf32>
    %809 = arith.negf %808 : vector<2x128xf32>
    %810 = math.exp %809 : vector<2x128xf32>
    %cst_266 = arith.constant 1.000000e+00 : f32
    %811 = vector.broadcast %cst_266 : f32 to vector<2x128xf32>
    %812 = arith.addf %811, %810 : vector<2x128xf32>
    %813 = arith.divf %811, %812 : vector<2x128xf32>
    %814 = arith.mulf %805, %690 : vector<2x128xf32>
    %815 = arith.mulf %799, %807 : vector<2x128xf32>
    %816 = arith.addf %814, %815 : vector<2x128xf32>
    %817 = math.tanh %816 : vector<2x128xf32>
    %818 = arith.mulf %813, %817 : vector<2x128xf32>
    %819 = tpu.concatenate %818, %724 in 1 : vector<2x128xf32>, vector<2x128xf32> -> vector<2x256xf32>
    %c0_267 = arith.constant 0 : index
    %c0_268 = arith.constant 0 : index
    %820 = vector.load %arg4[%c0_267, %c0_268] : memref<256x384xf32, #tpu.memory_space<vmem>>, vector<256x384xf32>
    %cst_269 = arith.constant dense<0.000000e+00> : vector<2x384xf32>
    %821 = tpu.matmul %819, %820, %cst_269 {dimension_numbers = #tpu.dot_dimension_numbers<[1], [0], [0], [1], [0, 0, 1, 1], [], []>} : vector<2x256xf32>, vector<256x384xf32>, vector<2x384xf32> -> vector<2x384xf32>
    %c0_270 = arith.constant 0 : index
    %c0_271 = arith.constant 0 : index
    %822 = vector.load %arg6[%c0_270, %c0_271] : memref<1x384xf32, #tpu.memory_space<vmem>>, vector<1x384xf32>
    %823 = vector.broadcast %822 : vector<1x384xf32> to vector<2x384xf32>
    %824 = arith.addf %821, %823 : vector<2x384xf32>
    %c0_272 = arith.constant 0 : index
    %c0_273 = arith.constant 0 : index
    %825 = vector.load %arg5[%c0_272, %c0_273] : memref<128x128xf32, #tpu.memory_space<vmem>>, vector<128x128xf32>
    %cst_274 = arith.constant dense<0.000000e+00> : vector<2x128xf32>
    %826 = tpu.matmul %724, %825, %cst_274 {dimension_numbers = #tpu.dot_dimension_numbers<[1], [0], [0], [1], [0, 0, 1, 1], [], []>} : vector<2x128xf32>, vector<128x128xf32>, vector<2x128xf32> -> vector<2x128xf32>
    %c0_275 = arith.constant 0 : index
    %c0_276 = arith.constant 0 : index
    %827 = vector.load %arg7[%c0_275, %c0_276] : memref<1x128xf32, #tpu.memory_space<vmem>>, vector<1x128xf32>
    %828 = vector.broadcast %827 : vector<1x128xf32> to vector<2x128xf32>
    %829 = arith.addf %826, %828 : vector<2x128xf32>
    %830 = vector.extract_strided_slice %824 {offsets = [0, 0], sizes = [2, 128], strides = [1, 1]} : vector<2x384xf32> to vector<2x128xf32>
    %831 = arith.negf %830 : vector<2x128xf32>
    %832 = math.exp %831 : vector<2x128xf32>
    %cst_277 = arith.constant 1.000000e+00 : f32
    %833 = vector.broadcast %cst_277 : f32 to vector<2x128xf32>
    %834 = arith.addf %833, %832 : vector<2x128xf32>
    %835 = arith.divf %833, %834 : vector<2x128xf32>
    %836 = vector.extract_strided_slice %824 {offsets = [0, 128], sizes = [2, 128], strides = [1, 1]} : vector<2x384xf32> to vector<2x128xf32>
    %837 = arith.negf %836 : vector<2x128xf32>
    %838 = math.exp %837 : vector<2x128xf32>
    %cst_278 = arith.constant 1.000000e+00 : f32
    %839 = vector.broadcast %cst_278 : f32 to vector<2x128xf32>
    %840 = arith.addf %839, %838 : vector<2x128xf32>
    %841 = arith.divf %839, %840 : vector<2x128xf32>
    %842 = vector.extract_strided_slice %824 {offsets = [0, 256], sizes = [2, 128], strides = [1, 1]} : vector<2x384xf32> to vector<2x128xf32>
    %843 = arith.mulf %835, %829 : vector<2x128xf32>
    %844 = arith.addf %842, %843 : vector<2x128xf32>
    %845 = math.tanh %844 : vector<2x128xf32>
    %cst_279 = arith.constant 1.000000e+00 : f32
    %846 = vector.broadcast %cst_279 : f32 to vector<2x128xf32>
    %847 = arith.subf %846, %841 : vector<2x128xf32>
    %848 = arith.mulf %847, %845 : vector<2x128xf32>
    %849 = arith.mulf %841, %724 : vector<2x128xf32>
    %850 = arith.addf %848, %849 : vector<2x128xf32>
    %851 = tpu.concatenate %850, %756 in 1 : vector<2x128xf32>, vector<2x128xf32> -> vector<2x256xf32>
    %c0_280 = arith.constant 0 : index
    %c0_281 = arith.constant 0 : index
    %852 = vector.load %arg8[%c0_280, %c0_281] : memref<256x384xf32, #tpu.memory_space<vmem>>, vector<256x384xf32>
    %cst_282 = arith.constant dense<0.000000e+00> : vector<2x384xf32>
    %853 = tpu.matmul %851, %852, %cst_282 {dimension_numbers = #tpu.dot_dimension_numbers<[1], [0], [0], [1], [0, 0, 1, 1], [], []>} : vector<2x256xf32>, vector<256x384xf32>, vector<2x384xf32> -> vector<2x384xf32>
    %c0_283 = arith.constant 0 : index
    %c0_284 = arith.constant 0 : index
    %854 = vector.load %arg10[%c0_283, %c0_284] : memref<1x384xf32, #tpu.memory_space<vmem>>, vector<1x384xf32>
    %855 = vector.broadcast %854 : vector<1x384xf32> to vector<2x384xf32>
    %856 = arith.addf %853, %855 : vector<2x384xf32>
    %c0_285 = arith.constant 0 : index
    %c0_286 = arith.constant 0 : index
    %857 = vector.load %arg9[%c0_285, %c0_286] : memref<128x128xf32, #tpu.memory_space<vmem>>, vector<128x128xf32>
    %cst_287 = arith.constant dense<0.000000e+00> : vector<2x128xf32>
    %858 = tpu.matmul %756, %857, %cst_287 {dimension_numbers = #tpu.dot_dimension_numbers<[1], [0], [0], [1], [0, 0, 1, 1], [], []>} : vector<2x128xf32>, vector<128x128xf32>, vector<2x128xf32> -> vector<2x128xf32>
    %c0_288 = arith.constant 0 : index
    %c0_289 = arith.constant 0 : index
    %859 = vector.load %arg11[%c0_288, %c0_289] : memref<1x128xf32, #tpu.memory_space<vmem>>, vector<1x128xf32>
    %860 = vector.broadcast %859 : vector<1x128xf32> to vector<2x128xf32>
    %861 = arith.addf %858, %860 : vector<2x128xf32>
    %862 = vector.extract_strided_slice %856 {offsets = [0, 0], sizes = [2, 128], strides = [1, 1]} : vector<2x384xf32> to vector<2x128xf32>
    %863 = arith.negf %862 : vector<2x128xf32>
    %864 = math.exp %863 : vector<2x128xf32>
    %cst_290 = arith.constant 1.000000e+00 : f32
    %865 = vector.broadcast %cst_290 : f32 to vector<2x128xf32>
    %866 = arith.addf %865, %864 : vector<2x128xf32>
    %867 = arith.divf %865, %866 : vector<2x128xf32>
    %868 = vector.extract_strided_slice %856 {offsets = [0, 128], sizes = [2, 128], strides = [1, 1]} : vector<2x384xf32> to vector<2x128xf32>
    %869 = arith.negf %868 : vector<2x128xf32>
    %870 = math.exp %869 : vector<2x128xf32>
    %cst_291 = arith.constant 1.000000e+00 : f32
    %871 = vector.broadcast %cst_291 : f32 to vector<2x128xf32>
    %872 = arith.addf %871, %870 : vector<2x128xf32>
    %873 = arith.divf %871, %872 : vector<2x128xf32>
    %874 = vector.extract_strided_slice %856 {offsets = [0, 256], sizes = [2, 128], strides = [1, 1]} : vector<2x384xf32> to vector<2x128xf32>
    %875 = arith.mulf %867, %861 : vector<2x128xf32>
    %876 = arith.addf %874, %875 : vector<2x128xf32>
    %877 = math.tanh %876 : vector<2x128xf32>
    %cst_292 = arith.constant 1.000000e+00 : f32
    %878 = vector.broadcast %cst_292 : f32 to vector<2x128xf32>
    %879 = arith.subf %878, %873 : vector<2x128xf32>
    %880 = arith.mulf %879, %877 : vector<2x128xf32>
    %881 = arith.mulf %873, %756 : vector<2x128xf32>
    %882 = arith.addf %880, %881 : vector<2x128xf32>
    %c7_i32 = arith.constant 7 : i32
    %883 = arith.index_cast %c7_i32 : i32 to index
    %c0_293 = arith.constant 0 : index
    %c0_294 = arith.constant 0 : index
    %884 = vector.load %arg0[%883, %c0_293, %c0_294] : memref<8x2x512xf32, #tpu.memory_space<vmem>>, vector<1x2x512xf32>
    %885 = vector.shape_cast %884 : vector<1x2x512xf32> to vector<2x512xf32>
    %c0_295 = arith.constant 0 : index
    %c0_296 = arith.constant 0 : index
    %886 = vector.load %arg1[%c0_295, %c0_296] : memref<128x512xf32, #tpu.memory_space<vmem>>, vector<128x512xf32>
    %cst_297 = arith.constant dense<0.000000e+00> : vector<2x512xf32>
    %887 = tpu.matmul %787, %886, %cst_297 {dimension_numbers = #tpu.dot_dimension_numbers<[1], [0], [0], [1], [0, 0, 1, 1], [], []>} : vector<2x128xf32>, vector<128x512xf32>, vector<2x512xf32> -> vector<2x512xf32>
    %888 = arith.addf %885, %887 : vector<2x512xf32>
    %889 = vector.extract_strided_slice %888 {offsets = [0, 0], sizes = [2, 128], strides = [1, 1]} : vector<2x512xf32> to vector<2x128xf32>
    %890 = arith.negf %889 : vector<2x128xf32>
    %891 = math.exp %890 : vector<2x128xf32>
    %cst_298 = arith.constant 1.000000e+00 : f32
    %892 = vector.broadcast %cst_298 : f32 to vector<2x128xf32>
    %893 = arith.addf %892, %891 : vector<2x128xf32>
    %894 = arith.divf %892, %893 : vector<2x128xf32>
    %895 = vector.extract_strided_slice %888 {offsets = [0, 128], sizes = [2, 128], strides = [1, 1]} : vector<2x512xf32> to vector<2x128xf32>
    %896 = arith.negf %895 : vector<2x128xf32>
    %897 = math.exp %896 : vector<2x128xf32>
    %cst_299 = arith.constant 1.000000e+00 : f32
    %898 = vector.broadcast %cst_299 : f32 to vector<2x128xf32>
    %899 = arith.addf %898, %897 : vector<2x128xf32>
    %900 = arith.divf %898, %899 : vector<2x128xf32>
    %901 = vector.extract_strided_slice %888 {offsets = [0, 256], sizes = [2, 128], strides = [1, 1]} : vector<2x512xf32> to vector<2x128xf32>
    %902 = math.tanh %901 : vector<2x128xf32>
    %903 = vector.extract_strided_slice %888 {offsets = [0, 384], sizes = [2, 128], strides = [1, 1]} : vector<2x512xf32> to vector<2x128xf32>
    %904 = arith.negf %903 : vector<2x128xf32>
    %905 = math.exp %904 : vector<2x128xf32>
    %cst_300 = arith.constant 1.000000e+00 : f32
    %906 = vector.broadcast %cst_300 : f32 to vector<2x128xf32>
    %907 = arith.addf %906, %905 : vector<2x128xf32>
    %908 = arith.divf %906, %907 : vector<2x128xf32>
    %909 = arith.mulf %900, %785 : vector<2x128xf32>
    %910 = arith.mulf %894, %902 : vector<2x128xf32>
    %911 = arith.addf %909, %910 : vector<2x128xf32>
    %912 = math.tanh %911 : vector<2x128xf32>
    %913 = arith.mulf %908, %912 : vector<2x128xf32>
    %914 = tpu.concatenate %913, %818 in 1 : vector<2x128xf32>, vector<2x128xf32> -> vector<2x256xf32>
    %c0_301 = arith.constant 0 : index
    %c0_302 = arith.constant 0 : index
    %915 = vector.load %arg2[%c0_301, %c0_302] : memref<256x512xf32, #tpu.memory_space<vmem>>, vector<256x512xf32>
    %cst_303 = arith.constant dense<0.000000e+00> : vector<2x512xf32>
    %916 = tpu.matmul %914, %915, %cst_303 {dimension_numbers = #tpu.dot_dimension_numbers<[1], [0], [0], [1], [0, 0, 1, 1], [], []>} : vector<2x256xf32>, vector<256x512xf32>, vector<2x512xf32> -> vector<2x512xf32>
    %c0_304 = arith.constant 0 : index
    %c0_305 = arith.constant 0 : index
    %917 = vector.load %arg3[%c0_304, %c0_305] : memref<1x512xf32, #tpu.memory_space<vmem>>, vector<1x512xf32>
    %918 = vector.broadcast %917 : vector<1x512xf32> to vector<2x512xf32>
    %919 = arith.addf %916, %918 : vector<2x512xf32>
    %920 = vector.extract_strided_slice %919 {offsets = [0, 0], sizes = [2, 128], strides = [1, 1]} : vector<2x512xf32> to vector<2x128xf32>
    %921 = arith.negf %920 : vector<2x128xf32>
    %922 = math.exp %921 : vector<2x128xf32>
    %cst_306 = arith.constant 1.000000e+00 : f32
    %923 = vector.broadcast %cst_306 : f32 to vector<2x128xf32>
    %924 = arith.addf %923, %922 : vector<2x128xf32>
    %925 = arith.divf %923, %924 : vector<2x128xf32>
    %926 = vector.extract_strided_slice %919 {offsets = [0, 128], sizes = [2, 128], strides = [1, 1]} : vector<2x512xf32> to vector<2x128xf32>
    %927 = arith.negf %926 : vector<2x128xf32>
    %928 = math.exp %927 : vector<2x128xf32>
    %cst_307 = arith.constant 1.000000e+00 : f32
    %929 = vector.broadcast %cst_307 : f32 to vector<2x128xf32>
    %930 = arith.addf %929, %928 : vector<2x128xf32>
    %931 = arith.divf %929, %930 : vector<2x128xf32>
    %932 = vector.extract_strided_slice %919 {offsets = [0, 256], sizes = [2, 128], strides = [1, 1]} : vector<2x512xf32> to vector<2x128xf32>
    %933 = math.tanh %932 : vector<2x128xf32>
    %934 = vector.extract_strided_slice %919 {offsets = [0, 384], sizes = [2, 128], strides = [1, 1]} : vector<2x512xf32> to vector<2x128xf32>
    %935 = arith.negf %934 : vector<2x128xf32>
    %936 = math.exp %935 : vector<2x128xf32>
    %cst_308 = arith.constant 1.000000e+00 : f32
    %937 = vector.broadcast %cst_308 : f32 to vector<2x128xf32>
    %938 = arith.addf %937, %936 : vector<2x128xf32>
    %939 = arith.divf %937, %938 : vector<2x128xf32>
    %940 = arith.mulf %931, %816 : vector<2x128xf32>
    %941 = arith.mulf %925, %933 : vector<2x128xf32>
    %942 = arith.addf %940, %941 : vector<2x128xf32>
    %943 = math.tanh %942 : vector<2x128xf32>
    %944 = arith.mulf %939, %943 : vector<2x128xf32>
    %945 = tpu.concatenate %944, %850 in 1 : vector<2x128xf32>, vector<2x128xf32> -> vector<2x256xf32>
    %c0_309 = arith.constant 0 : index
    %c0_310 = arith.constant 0 : index
    %946 = vector.load %arg4[%c0_309, %c0_310] : memref<256x384xf32, #tpu.memory_space<vmem>>, vector<256x384xf32>
    %cst_311 = arith.constant dense<0.000000e+00> : vector<2x384xf32>
    %947 = tpu.matmul %945, %946, %cst_311 {dimension_numbers = #tpu.dot_dimension_numbers<[1], [0], [0], [1], [0, 0, 1, 1], [], []>} : vector<2x256xf32>, vector<256x384xf32>, vector<2x384xf32> -> vector<2x384xf32>
    %c0_312 = arith.constant 0 : index
    %c0_313 = arith.constant 0 : index
    %948 = vector.load %arg6[%c0_312, %c0_313] : memref<1x384xf32, #tpu.memory_space<vmem>>, vector<1x384xf32>
    %949 = vector.broadcast %948 : vector<1x384xf32> to vector<2x384xf32>
    %950 = arith.addf %947, %949 : vector<2x384xf32>
    %c0_314 = arith.constant 0 : index
    %c0_315 = arith.constant 0 : index
    %951 = vector.load %arg5[%c0_314, %c0_315] : memref<128x128xf32, #tpu.memory_space<vmem>>, vector<128x128xf32>
    %cst_316 = arith.constant dense<0.000000e+00> : vector<2x128xf32>
    %952 = tpu.matmul %850, %951, %cst_316 {dimension_numbers = #tpu.dot_dimension_numbers<[1], [0], [0], [1], [0, 0, 1, 1], [], []>} : vector<2x128xf32>, vector<128x128xf32>, vector<2x128xf32> -> vector<2x128xf32>
    %c0_317 = arith.constant 0 : index
    %c0_318 = arith.constant 0 : index
    %953 = vector.load %arg7[%c0_317, %c0_318] : memref<1x128xf32, #tpu.memory_space<vmem>>, vector<1x128xf32>
    %954 = vector.broadcast %953 : vector<1x128xf32> to vector<2x128xf32>
    %955 = arith.addf %952, %954 : vector<2x128xf32>
    %956 = vector.extract_strided_slice %950 {offsets = [0, 0], sizes = [2, 128], strides = [1, 1]} : vector<2x384xf32> to vector<2x128xf32>
    %957 = arith.negf %956 : vector<2x128xf32>
    %958 = math.exp %957 : vector<2x128xf32>
    %cst_319 = arith.constant 1.000000e+00 : f32
    %959 = vector.broadcast %cst_319 : f32 to vector<2x128xf32>
    %960 = arith.addf %959, %958 : vector<2x128xf32>
    %961 = arith.divf %959, %960 : vector<2x128xf32>
    %962 = vector.extract_strided_slice %950 {offsets = [0, 128], sizes = [2, 128], strides = [1, 1]} : vector<2x384xf32> to vector<2x128xf32>
    %963 = arith.negf %962 : vector<2x128xf32>
    %964 = math.exp %963 : vector<2x128xf32>
    %cst_320 = arith.constant 1.000000e+00 : f32
    %965 = vector.broadcast %cst_320 : f32 to vector<2x128xf32>
    %966 = arith.addf %965, %964 : vector<2x128xf32>
    %967 = arith.divf %965, %966 : vector<2x128xf32>
    %968 = vector.extract_strided_slice %950 {offsets = [0, 256], sizes = [2, 128], strides = [1, 1]} : vector<2x384xf32> to vector<2x128xf32>
    %969 = arith.mulf %961, %955 : vector<2x128xf32>
    %970 = arith.addf %968, %969 : vector<2x128xf32>
    %971 = math.tanh %970 : vector<2x128xf32>
    %cst_321 = arith.constant 1.000000e+00 : f32
    %972 = vector.broadcast %cst_321 : f32 to vector<2x128xf32>
    %973 = arith.subf %972, %967 : vector<2x128xf32>
    %974 = arith.mulf %973, %971 : vector<2x128xf32>
    %975 = arith.mulf %967, %850 : vector<2x128xf32>
    %976 = arith.addf %974, %975 : vector<2x128xf32>
    %977 = tpu.concatenate %976, %882 in 1 : vector<2x128xf32>, vector<2x128xf32> -> vector<2x256xf32>
    %c0_322 = arith.constant 0 : index
    %c0_323 = arith.constant 0 : index
    %978 = vector.load %arg8[%c0_322, %c0_323] : memref<256x384xf32, #tpu.memory_space<vmem>>, vector<256x384xf32>
    %cst_324 = arith.constant dense<0.000000e+00> : vector<2x384xf32>
    %979 = tpu.matmul %977, %978, %cst_324 {dimension_numbers = #tpu.dot_dimension_numbers<[1], [0], [0], [1], [0, 0, 1, 1], [], []>} : vector<2x256xf32>, vector<256x384xf32>, vector<2x384xf32> -> vector<2x384xf32>
    %c0_325 = arith.constant 0 : index
    %c0_326 = arith.constant 0 : index
    %980 = vector.load %arg10[%c0_325, %c0_326] : memref<1x384xf32, #tpu.memory_space<vmem>>, vector<1x384xf32>
    %981 = vector.broadcast %980 : vector<1x384xf32> to vector<2x384xf32>
    %982 = arith.addf %979, %981 : vector<2x384xf32>
    %c0_327 = arith.constant 0 : index
    %c0_328 = arith.constant 0 : index
    %983 = vector.load %arg9[%c0_327, %c0_328] : memref<128x128xf32, #tpu.memory_space<vmem>>, vector<128x128xf32>
    %cst_329 = arith.constant dense<0.000000e+00> : vector<2x128xf32>
    %984 = tpu.matmul %882, %983, %cst_329 {dimension_numbers = #tpu.dot_dimension_numbers<[1], [0], [0], [1], [0, 0, 1, 1], [], []>} : vector<2x128xf32>, vector<128x128xf32>, vector<2x128xf32> -> vector<2x128xf32>
    %c0_330 = arith.constant 0 : index
    %c0_331 = arith.constant 0 : index
    %985 = vector.load %arg11[%c0_330, %c0_331] : memref<1x128xf32, #tpu.memory_space<vmem>>, vector<1x128xf32>
    %986 = vector.broadcast %985 : vector<1x128xf32> to vector<2x128xf32>
    %987 = arith.addf %984, %986 : vector<2x128xf32>
    %988 = vector.extract_strided_slice %982 {offsets = [0, 0], sizes = [2, 128], strides = [1, 1]} : vector<2x384xf32> to vector<2x128xf32>
    %989 = arith.negf %988 : vector<2x128xf32>
    %990 = math.exp %989 : vector<2x128xf32>
    %cst_332 = arith.constant 1.000000e+00 : f32
    %991 = vector.broadcast %cst_332 : f32 to vector<2x128xf32>
    %992 = arith.addf %991, %990 : vector<2x128xf32>
    %993 = arith.divf %991, %992 : vector<2x128xf32>
    %994 = vector.extract_strided_slice %982 {offsets = [0, 128], sizes = [2, 128], strides = [1, 1]} : vector<2x384xf32> to vector<2x128xf32>
    %995 = arith.negf %994 : vector<2x128xf32>
    %996 = math.exp %995 : vector<2x128xf32>
    %cst_333 = arith.constant 1.000000e+00 : f32
    %997 = vector.broadcast %cst_333 : f32 to vector<2x128xf32>
    %998 = arith.addf %997, %996 : vector<2x128xf32>
    %999 = arith.divf %997, %998 : vector<2x128xf32>
    %1000 = vector.extract_strided_slice %982 {offsets = [0, 256], sizes = [2, 128], strides = [1, 1]} : vector<2x384xf32> to vector<2x128xf32>
    %1001 = arith.mulf %993, %987 : vector<2x128xf32>
    %1002 = arith.addf %1000, %1001 : vector<2x128xf32>
    %1003 = math.tanh %1002 : vector<2x128xf32>
    %cst_334 = arith.constant 1.000000e+00 : f32
    %1004 = vector.broadcast %cst_334 : f32 to vector<2x128xf32>
    %1005 = arith.subf %1004, %999 : vector<2x128xf32>
    %1006 = arith.mulf %1005, %1003 : vector<2x128xf32>
    %1007 = arith.mulf %999, %882 : vector<2x128xf32>
    %1008 = arith.addf %1006, %1007 : vector<2x128xf32>
    %c8_i32 = arith.constant 8 : i32
    %c0_335 = arith.constant 0 : index
    %c0_336 = arith.constant 0 : index
    %1009 = vector.load %arg12[%c0_335, %c0_336] : memref<128x128xf32, #tpu.memory_space<vmem>>, vector<128x128xf32>
    %cst_337 = arith.constant dense<0.000000e+00> : vector<2x128xf32>
    %1010 = tpu.matmul %1008, %1009, %cst_337 {dimension_numbers = #tpu.dot_dimension_numbers<[1], [0], [0], [1], [0, 0, 1, 1], [], []>} : vector<2x128xf32>, vector<128x128xf32>, vector<2x128xf32> -> vector<2x128xf32>
    %c0_338 = arith.constant 0 : index
    %c0_339 = arith.constant 0 : index
    %1011 = vector.load %arg13[%c0_338, %c0_339] : memref<1x128xf32, #tpu.memory_space<vmem>>, vector<1x128xf32>
    %1012 = vector.broadcast %1011 : vector<1x128xf32> to vector<2x128xf32>
    %1013 = arith.addf %1010, %1012 : vector<2x128xf32>
    %c0_340 = arith.constant 0 : index
    %c0_341 = arith.constant 0 : index
    %1014 = vector.load %arg14[%c0_340, %c0_341] : memref<2x128xf32, #tpu.memory_space<vmem>>, vector<2x128xf32>
    tpu.vector_store %arg14[%c0_340, %c0_341], %1013 {strides = array<i32>} : memref<2x128xf32, #tpu.memory_space<vmem>>, vector<2x128xf32>,
    return
  }
}

</mosaic_0001>

<bundles_post_ra>
// kernel: bert_lstm_gru_forward.2
= control target key start
LH: loop header
LB: loop body
LE: loop exit
PB: predicated region body
PF: predicated region fallthrough
CT: control target
= control target key end

     0   :  { %8 = vsyncpa [#allocation3], 0  ;;  %s322_s12 = smov [#allocation2]   ;;  %s395_s0 = inlined_call_operand.vmem [shape: f32[16,64], index: 0, kind: input, shape index: {}]   ;;  %s396_s1 = inlined_call_operand.hbm [shape: f32[64,512], index: 1, kind: input, shape index: {}]   ;;  %s397_s2 = inlined_call_operand.vmem [shape: f32[1,512], index: 2, kind: input, shape index: {}]   ;;  %s398_s3 = inlined_call_operand.vmem [shape: f32[16,512], index: 3, kind: output, shape index: {}]  }
   0x1   :  { %s16_s13 = sshll.u32 %s322_s12, 4  ;;  %s298_s16 = scalar_lea.hbm %s396_s1, 4096  ;;  %s17_s13 = int_to_ptr.vmem [resolvable:$true] %s16_s13 }
   0x2   :  { %p299_p0 = scmp.ne.s32.totalorder %s396_s1, %s298_s16  ;;  %p302_p1 = scmp.lt.u32.totalorder %s298_s16, %s396_s1 }
   0x4   :  { %p304_p2 = pnand %p302_p1, %p299_p0 }
   0x6   :  { %307 = shalt.err (!%p304_p2)
}
   0x7   :  { %s308_s21 = scalar_lea.vmem %s17_s13, 4096  ;;  %p313_p4 = scmp.lt.s32.totalorder %s17_s13, %s17_s13 }
   0x8   :  { %p309_p3 = scmp.ne.s32.totalorder %s17_s13, %s308_s21  ;;  %p314_p5 = scmp.lt.s32.totalorder %s308_s21, %s308_s21 }
   0xa   :  { %p315_p6 = por %p314_p5, %p313_p4 }
   0xc   :  { %p316_p7 = pnand %p315_p6, %p309_p3 }
   0xe   :  { %319 = shalt.err (!%p316_p7)
}
   0xf   :  { %s323_s22 = smov 512   ;;  %s324_s23 = smov 32  }
  0x10   :  { %22 = dma.hbm_to_vmem [thread:$0]  %s396_s1, 4096, %s17_s13, [#allocation3], %s323_s22, %s323_s22, %s324_s23  }
  0x11   :  { %320 = dma.done.wait [#allocation3], 4096  }
  0x12   :  { %321 = vsyncadd [#allocation3], 4294963200  ;;  %v325_v0 = vmov 0.0   ;;  %v31_v1 = vld [vmem:[#allocation2 + $0x8] sm:$0xff]  ;;  %v33_v3 = vld [vmem:[#allocation2 + $0x18] sm:$0xff]  ;;  %vm84_vm0 = vcmask 523264   ;;  %v64_v51 = vlaneseq }
  0x13   :  { %155 = vmatprep.mubr.f32.mxu0 %v325_v0  ;;  %232 = vmatprep.mubr.f32.mxu1 %v325_v0  ;;  %v35_v2 = vld [vmem:[#allocation2 + $0x28] sm:$0xff]  ;;  %v37_v5 = vld [vmem:[#allocation2 + $0x38] sm:$0xff]  ;;  %v30_v6 = vld [vmem:[#allocation2] sm:$0xff] }
  0x14   :  { %v262_v4 = vpack.c.bf16 %v35_v2, %v31_v1  ;;  %v34_v7 = vld [vmem:[#allocation2 + $0x20] sm:$0xff]  ;;  %v278_v8 = vpack.c.bf16 %v37_v5, %v33_v3  ;;  %v32_v10 = vld [vmem:[#allocation2 + $0x10] sm:$0xff]  ;;  %v39_v12 = vld [vmem:[#allocation2 + $0x48] sm:$0xff]  ;;  %v65_v52 = vshrl.u32 %v64_v51, 7 }
  0x15   :  { %v264_v9 = vpack.c.bf16 %v34_v7, %v30_v6  ;;  %v36_v11 = vld [vmem:[#allocation2 + $0x30] sm:$0xff]  ;;  %v43_v14 = vld [vmem:[#allocation2 + $0x68] sm:$0xff]  ;;  %v41_v15 = vld [vmem:[#allocation2 + $0x58] sm:$0xff] }
  0x16   :  { %263 = vmatprep.subr.bf16.mxu0 %v262_v4  ;;  %v280_v13 = vpack.c.bf16 %v36_v11, %v32_v10  ;;  %v45_v16 = vld [vmem:[#allocation2 + $0x78] sm:$0xff]  ;;  %279 = vmatprep.subr.bf16.mxu1 %v278_v8  ;;  %v266_v17 = vpack.c.bf16 %v43_v14, %v39_v12  ;;  %v38_v19 = vld [vmem:[#allocation2 + $0x40] sm:$0xff]  ;;  %v40_v21 = vld [vmem:[#allocation2 + $0x50] sm:$0xff]  ;;  %v66_v53 = vsub.s32 0, %v65_v52  ;;  %v74_v55 = vsub.s32 2, %v65_v52 }
  0x17   :  { %265 = vmatpush1.bf16.msra.mxu0 %v264_v9  ;;  %v282_v18 = vpack.c.bf16 %v45_v16, %v41_v15  ;;  %v42_v20 = vld [vmem:[#allocation2 + $0x60] sm:$0xff]  ;;  %v44_v23 = vld [vmem:[#allocation2 + $0x70] sm:$0xff]  ;;  %v47_v24 = vld [vmem:[#allocation2 + $0x88] sm:$0xff]  ;;  %v70_v56 = vsub.s32 1, %v65_v52  ;;  %v78_v57 = vsub.s32 3, %v65_v52 }
  0x18   :  { %281 = vmatpush1.bf16.msra.mxu1 %v280_v13  ;;  %v268_v22 = vpack.c.bf16 %v42_v20, %v38_v19  ;;  %v51_v25 = vld [vmem:[#allocation2 + $0xa8] sm:$0xff]  ;;  %267 = vmatprep.subr.bf16.mxu0 %v266_v17  ;;  %v284_v26 = vpack.c.bf16 %v44_v23, %v40_v21  ;;  %v49_v28 = vld [vmem:[#allocation2 + $0x98] sm:$0xff]  ;;  %v46_v30 = vld [vmem:[#allocation2 + $0x80] sm:$0xff] }
  0x19   :  { %283 = vmatprep.subr.bf16.mxu1 %v282_v18  ;;  %v270_v27 = vpack.c.bf16 %v51_v25, %v47_v24  ;;  %v53_v29 = vld [vmem:[#allocation2 + $0xb8] sm:$0xff]  ;;  %v50_v32 = vld [vmem:[#allocation2 + $0xa0] sm:$0xff]  ;;  %v48_v33 = vld [vmem:[#allocation2 + $0x90] sm:$0xff] }
  0x1a   :  { %v286_v31 = vpack.c.bf16 %v53_v29, %v49_v28  ;;  %v52_v34 = vld [vmem:[#allocation2 + $0xb0] sm:$0xff]  ;;  %v272_v35 = vpack.c.bf16 %v50_v32, %v46_v30  ;;  %v55_v36 = vld [vmem:[#allocation2 + $0xc8] sm:$0xff]  ;;  %v57_v38 = vld [vmem:[#allocation2 + $0xd8] sm:$0xff] }
  0x1b   :  { %269 = vmatpush1.bf16.msra.mxu0 %v268_v22  ;;  %v59_v37 = vld [vmem:[#allocation2 + $0xe8] sm:$0xff]  ;;  %v288_v39 = vpack.c.bf16 %v52_v34, %v48_v33  ;;  %v61_v41 = vld [vmem:[#allocation2 + $0xf8] sm:$0xff]  ;;  %v54_v42 = vld [vmem:[#allocation2 + $0xc0] sm:$0xff] }
  0x1c   :  { %285 = vmatpush1.bf16.msra.mxu1 %v284_v26  ;;  %271 = vmatprep.subr.bf16.mxu0 %v270_v27  ;;  %v274_v40 = vpack.c.bf16 %v59_v37, %v55_v36  ;;  %v58_v43 = vld [vmem:[#allocation2 + $0xe0] sm:$0xff]  ;;  %v290_v44 = vpack.c.bf16 %v61_v41, %v57_v38  ;;  %v56_v45 = vld [vmem:[#allocation2 + $0xd0] sm:$0xff]  ;;  %v29_v50 = vld [vmem:[%s395_s0 + $0x8] sm:$0xff] }
  0x1d   :  { %287 = vmatprep.subr.bf16.mxu1 %v286_v31  ;;  %v60_v46 = vld [vmem:[#allocation2 + $0xf0] sm:$0xff]  ;;  %v276_v47 = vpack.c.bf16 %v58_v43, %v54_v42  ;;  %v28_v49 = vld [vmem:[%s395_s0] sm:$0xff] }
  0x1e   :  { %v292_v48 = vpack.c.bf16 %v60_v46, %v56_v45  ;;  %v62_v54 = vld [vmem:[%s397_s2] sm:$0xf] }
  0x1f   :  { %273 = vmatpush1.bf16.msra.mxu0 %v272_v35  ;;  %v67_v58 = vrot.slane %v62_v54, %v66_v53  ;;  %v75_v59 = vrot.slane %v62_v54, %v74_v55  ;;  %v71_v60 = vrot.slane %v62_v54, %v70_v56  ;;  %v79_v61 = vrot.slane %v62_v54, %v78_v57 }
  0x20   :  { %289 = vmatpush1.bf16.msra.mxu1 %v288_v39  ;;  %275 = vmatprep.subr.bf16.mxu0 %v274_v40 }
  0x21   :  { %291 = vmatprep.subr.bf16.mxu1 %v290_v44 }
  0x23   :  { %277 = vmatpush1.bf16.msra.mxu0 %v276_v47 }
  0x24   :  { %293 = vmatpush1.bf16.msra.mxu1 %v292_v48 }
  0x26   :  { %258 = vmatmul.mubr.msk.f32.vlgmr.msra.gmra.mrb[0].mxu0 %vm84_vm0, %v28_v49 }
  0x27   :  { %260 = vmatmul.mubr.msk.f32.vlgmr.msra.gmra.mrb[0].mxu1 %vm84_vm0, %v28_v49  ;;  %161 = vmatprep.mubr.f32.mxu0 %v325_v0 }
  0x28   :  { %238 = vmatprep.mubr.f32.mxu1 %v325_v0 }
  0x2a   :  { %259 = vmatmul.mubr.msk.f32.gmra.mrb[2].mxu0 %vm84_vm0, %v29_v50 }
  0x2b   :  { %261 = vmatmul.mubr.msk.f32.gmra.mrb[2].mxu1 %vm84_vm0, %v29_v50 }
  0xf9   :  { %v157_v62 = vpop.f32.mrb[0].mxu0 }
  0xfa   :  { %v158_v63 = vadd.f32 %v157_v62, %v67_v58  ;;  %v234_v1 = vpop.f32.mrb[0].mxu1  ;;  %v159_v0 = vpop.f32.mrb[1].mxu0 }
  0xfb   :  { %v235_v2 = vadd.f32 %v234_v1, %v75_v59  ;;  %v160_v3 = vadd.f32 %v159_v0, %v71_v60  ;;  %v236_v4 = vpop.f32.mrb[1].mxu1 }
  0xfc   :  { %245 = vst [vmem:[%s398_s3] sm:$0xff] %v158_v63  ;;  %v237_v5 = vadd.f32 %v236_v4, %v79_v61 }
  0xfd   :  { %247 = vst [vmem:[%s398_s3 + $0x10] sm:$0xff] %v235_v2  ;;  %246 = vst [vmem:[%s398_s3 + $0x8] sm:$0xff] %v160_v3  ;;  %v163_v6 = vpop.f32.mrb[2].mxu0 }
  0xfe   :  { %248 = vst [vmem:[%s398_s3 + $0x18] sm:$0xff] %v237_v5  ;;  %v164_v7 = vadd.f32 %v163_v6, %v67_v58  ;;  %v240_v8 = vpop.f32.mrb[2].mxu1  ;;  %v165_v9 = vpop.f32.mrb[3].mxu0 }
  0xff   :  { %v241_v10 = vadd.f32 %v240_v8, %v75_v59  ;;  %v166_v11 = vadd.f32 %v165_v9, %v71_v60  ;;  %v242_v12 = vpop.f32.mrb[3].mxu1 }
 0x100   :  { %249 = vst [vmem:[%s398_s3 + $0x20] sm:$0xff] %v164_v7  ;;  %v243_v13 = vadd.f32 %v242_v12, %v79_v61 }
 0x101   :  { %251 = vst [vmem:[%s398_s3 + $0x30] sm:$0xff] %v241_v10  ;;  %250 = vst [vmem:[%s398_s3 + $0x28] sm:$0xff] %v166_v11 }
 0x102   :  { %252 = vst [vmem:[%s398_s3 + $0x38] sm:$0xff] %v243_v13 }
 0x103   :  { %257 = vsyncpa [#allocation3], 1 }

// kernel: bert_lstm_gru_forward.3
= control target key start
LH: loop header
LB: loop body
LE: loop exit
PB: predicated region body
PF: predicated region fallthrough
CT: control target
= control target key end

     0   :  { %19 = vsyncpa [#allocation3], 0  ;;  %s16258_s0 = inlined_call_operand.vmem [shape: f32[8,2,512], index: 0, kind: input, shape index: {}]   ;;  %s16259_s1 = inlined_call_operand.hbm [shape: f32[128,512], index: 1, kind: input, shape index: {}]   ;;  %s16260_s2 = inlined_call_operand.vmem [shape: f32[256,512], index: 2, kind: input, shape index: {}]   ;;  %s16261_s3 = inlined_call_operand.vmem [shape: f32[1,512], index: 3, kind: input, shape index: {}]   ;;  %s16262_s4 = inlined_call_operand.hbm [shape: f32[256,384], index: 4, kind: input, shape index: {}]   ;;  %s16263_s5 = inlined_call_operand.hbm [shape: f32[128,128], index: 5, kind: input, shape index: {}]   ;;  %s16264_s6 = inlined_call_operand.vmem [shape: f32[1,384], index: 6, kind: input, shape index: {}]   ;;  %s16265_s7 = inlined_call_operand.vmem [shape: f32[1,128], index: 7, kind: input, shape index: {}]   ;;  %s16266_s8 = inlined_call_operand.hbm [shape: f32[256,384], index: 8, kind: input, shape index: {}]   ;;  %s16267_s9 = inlined_call_operand.hbm [shape: f32[128,128], index: 9, kind: input, shape index: {}]   ;;  %s16268_s10 = inlined_call_operand.vmem [shape: f32[1,384], index: 10, kind: input, shape index: {}]   ;;  %s16269_s11 = inlined_call_operand.vmem [shape: f32[1,128], index: 11, kind: input, shape index: {}]   ;;  %s16270_s12 = inlined_call_operand.hbm [shape: f32[128,128], index: 12, kind: input, shape index: {}]   ;;  %s16271_s13 = inlined_call_operand.vmem [shape: f32[1,128], index: 13, kind: input, shape index: {}]   ;;  %s16272_s14 = inlined_call_operand.hbm [shape: f32[2,128], index: 14, kind: output, shape index: {}]  }
   0x1   :  { %20 = vsyncpa [#allocation6], 0 }
   0x2   :  { %21 = vsyncpa [#allocation9], 0 }
   0x3   :  { %22 = vsyncpa [#allocation12], 0 }
   0x4   :  { %23 = vsyncpa [#allocation4], 0  ;;  %s12936_s29 = smov [#allocation5]   ;;  %s12772_s17 = scalar_lea.hbm %s16262_s4, 12288 }
   0x5   :  { %s47_s30 = sshll.u32 %s12936_s29, 4  ;;  %p12773_p0 = scmp.ne.s32.totalorder %s16262_s4, %s12772_s17  ;;  %s48_s30 = int_to_ptr.vmem [resolvable:$true] %s47_s30 }
   0x6   :  { %p12776_p1 = scmp.lt.u32.totalorder %s12772_s17, %s16262_s4 }
   0x8   :  { %p12778_p2 = pnand %p12776_p1, %p12773_p0 }
   0xa   :  { %12781 = shalt.err (!%p12778_p2)
}
   0xb   :  { %s12782_s22 = scalar_lea.vmem %s48_s30, 12288  ;;  %p12787_p4 = scmp.lt.s32.totalorder %s48_s30, %s48_s30 }
   0xc   :  { %p12783_p3 = scmp.ne.s32.totalorder %s48_s30, %s12782_s22  ;;  %p12788_p5 = scmp.lt.s32.totalorder %s12782_s22, %s12782_s22 }
   0xe   :  { %p12789_p6 = por %p12788_p5, %p12787_p4 }
  0x10   :  { %p12790_p7 = pnand %p12789_p6, %p12783_p3 }
  0x12   :  { %12793 = shalt.err (!%p12790_p7)
}
  0x13   :  { %s12937_s23 = smov 384   ;;  %s12938_s24 = smov 24  }
  0x14   :  { %53 = dma.hbm_to_vmem [thread:$0]  %s16262_s4, 12288, %s48_s30, [#allocation6], %s12937_s23, %s12937_s23, %s12938_s24  }
  0x15   :  { %s12939_s27 = smov [#allocation8]   ;;  %s12940_s29 = smov [#allocation2]  }
  0x16   :  { %s75_s28 = sshll.u32 %s12939_s27, 4  ;;  %s31_s15 = sshll.u32 %s12940_s29, 4  ;;  %s76_s28 = int_to_ptr.vmem [resolvable:$true] %s75_s28  ;;  %s32_s15 = int_to_ptr.vmem [resolvable:$true] %s31_s15 }
  0x17   :  { %s12794_s18 = scalar_lea.hbm %s16266_s8, 12288 }
  0x18   :  { %p12795_p8 = scmp.ne.s32.totalorder %s16266_s8, %s12794_s18  ;;  %p12798_p9 = scmp.lt.u32.totalorder %s12794_s18, %s16266_s8 }
  0x1a   :  { %p12800_p10 = pnand %p12798_p9, %p12795_p8 }
  0x1c   :  { %12803 = shalt.err (!%p12800_p10)
}
  0x1d   :  { %s12804_s4 = scalar_lea.vmem %s76_s28, 12288  ;;  %p12809_p12 = scmp.lt.s32.totalorder %s76_s28, %s76_s28 }
  0x1e   :  { %p12805_p11 = scmp.ne.s32.totalorder %s76_s28, %s12804_s4  ;;  %p12810_p13 = scmp.lt.s32.totalorder %s12804_s4, %s12804_s4 }
  0x20   :  { %p12811_p0 = por %p12810_p13, %p12809_p12 }
  0x22   :  { %p12812_p1 = pnand %p12811_p0, %p12805_p11 }
  0x24   :  { %12815 = shalt.err (!%p12812_p1)
}
  0x25   :  { %81 = dma.hbm_to_vmem [thread:$0]  %s16266_s8, 12288, %s76_s28, [#allocation9], %s12937_s23, %s12937_s23, %s12938_s24  }
  0x26   :  { %s12816_s29 = scalar_lea.hbm %s16259_s1, 8192 }
  0x27   :  { %p12817_p2 = scmp.ne.s32.totalorder %s16259_s1, %s12816_s29  ;;  %p12820_p3 = scmp.lt.u32.totalorder %s12816_s29, %s16259_s1 }
  0x29   :  { %p12822_p4 = pnand %p12820_p3, %p12817_p2 }
  0x2b   :  { %12825 = shalt.err (!%p12822_p4)
}
  0x2c   :  { %s12826_s20 = scalar_lea.vmem %s32_s15, 8192  ;;  %p12831_p6 = scmp.lt.s32.totalorder %s32_s15, %s32_s15 }
  0x2d   :  { %p12827_p5 = scmp.ne.s32.totalorder %s32_s15, %s12826_s20  ;;  %p12832_p7 = scmp.lt.s32.totalorder %s12826_s20, %s12826_s20 }
  0x2f   :  { %p12833_p8 = por %p12832_p7, %p12831_p6 }
  0x31   :  { %p12834_p9 = pnand %p12833_p8, %p12827_p5 }
  0x33   :  { %12837 = shalt.err (!%p12834_p9)
}
  0x34   :  { %s12941_s8 = smov 512   ;;  %s12942_s23 = smov 32  }
  0x35   :  { %37 = dma.hbm_to_vmem [thread:$0]  %s16259_s1, 8192, %s32_s15, [#allocation3], %s12941_s8, %s12941_s8, %s12942_s23  }
  0x36   :  { %s12943_s21 = smov [#allocation7]   ;;  %s12838_s25 = scalar_lea.hbm %s16263_s5, 2048 }
  0x37   :  { %s59_s22 = sshll.u32 %s12943_s21, 4  ;;  %p12839_p10 = scmp.ne.s32.totalorder %s16263_s5, %s12838_s25  ;;  %s60_s22 = int_to_ptr.vmem [resolvable:$true] %s59_s22 }
  0x38   :  { %p12842_p11 = scmp.lt.u32.totalorder %s12838_s25, %s16263_s5 }
  0x3a   :  { %p12844_p12 = pnand %p12842_p11, %p12839_p10 }
  0x3c   :  { %12847 = shalt.err (!%p12844_p12)
}
  0x3d   :  { %s12848_s17 = scalar_lea.vmem %s60_s22, 2048  ;;  %p12853_p0 = scmp.lt.s32.totalorder %s60_s22, %s60_s22 }
  0x3e   :  { %p12849_p13 = scmp.ne.s32.totalorder %s60_s22, %s12848_s17  ;;  %p12854_p1 = scmp.lt.s32.totalorder %s12848_s17, %s12848_s17 }
  0x40   :  { %p12855_p2 = por %p12854_p1, %p12853_p0 }
  0x42   :  { %p12856_p3 = pnand %p12855_p2, %p12849_p13 }
  0x44   :  { %12859 = shalt.err (!%p12856_p3)
}
  0x45   :  { %s12944_s1 = smov 128   ;;  %s12945_s15 = smov 8  }
  0x46   :  { %65 = dma.hbm_to_vmem [thread:$0]  %s16263_s5, 2048, %s60_s22, [#allocation6], %s12944_s1, %s12944_s1, %s12945_s15  }
  0x47   :  { %s12946_s20 = smov [#allocation10]   ;;  %s12947_s23 = smov [#allocation11]  }
  0x48   :  { %s87_s8 = sshll.u32 %s12946_s20, 4  ;;  %s103_s24 = sshll.u32 %s12947_s23, 4  ;;  %s88_s8 = int_to_ptr.vmem [resolvable:$true] %s87_s8  ;;  %s13079_s24 = int_to_ptr.vmem [resolvable:$true] %s103_s24 }
  0x49   :  { %s12860_s4 = scalar_lea.hbm %s16267_s9, 2048 }
  0x4a   :  { %p12861_p4 = scmp.ne.s32.totalorder %s16267_s9, %s12860_s4  ;;  %p12864_p5 = scmp.lt.u32.totalorder %s12860_s4, %s16267_s9 }
  0x4c   :  { %p12866_p6 = pnand %p12864_p5, %p12861_p4 }
  0x4e   :  { %12869 = shalt.err (!%p12866_p6)
}
  0x4f   :  { %s12870_s5 = scalar_lea.vmem %s88_s8, 2048  ;;  %p12875_p8 = scmp.lt.s32.totalorder %s88_s8, %s88_s8 }
  0x50   :  { %p12871_p7 = scmp.ne.s32.totalorder %s88_s8, %s12870_s5  ;;  %p12876_p9 = scmp.lt.s32.totalorder %s12870_s5, %s12870_s5 }
  0x52   :  { %p12877_p10 = por %p12876_p9, %p12875_p8 }
  0x54   :  { %p12878_p11 = pnand %p12877_p10, %p12871_p7 }
  0x56   :  { %12881 = shalt.err (!%p12878_p11)
}
  0x57   :  { %93 = dma.hbm_to_vmem [thread:$0]  %s16267_s9, 2048, %s88_s8, [#allocation9], %s12944_s1, %s12944_s1, %s12945_s15  }
  0x58   :  { %s12882_s18 = scalar_lea.hbm %s16270_s12, 2048 }
  0x59   :  { %p12883_p12 = scmp.ne.s32.totalorder %s16270_s12, %s12882_s18  ;;  %p12886_p13 = scmp.lt.u32.totalorder %s12882_s18, %s16270_s12 }
  0x5b   :  { %p12888_p0 = pnand %p12886_p13, %p12883_p12 }
  0x5d   :  { %12891 = shalt.err (!%p12888_p0)
}
  0x5e   :  { %s12892_s21 = scalar_lea.vmem %s13079_s24, 2048  ;;  %p12897_p2 = scmp.lt.s32.totalorder %s13079_s24, %s13079_s24 }
  0x5f   :  { %p12893_p1 = scmp.ne.s32.totalorder %s13079_s24, %s12892_s21  ;;  %p12898_p3 = scmp.lt.s32.totalorder %s12892_s21, %s12892_s21 }
  0x61   :  { %p12899_p4 = por %p12898_p3, %p12897_p2 }
  0x63   :  { %p12900_p5 = pnand %p12899_p4, %p12893_p1 }
  0x65   :  { %12903 = shalt.err (!%p12900_p5)
}
  0x66   :  { %109 = dma.hbm_to_vmem [thread:$0]  %s16270_s12, 2048, %s13079_s24, [#allocation12], %s12944_s1, %s12944_s1, %s12945_s15  }
  0x67   :  { %12926 = dma.done.wait [#allocation3], 8192  }
  0x68   :  { %12927 = vsyncadd [#allocation3], 4294959104 }
  0x69   :  { %12928 = dma.done.wait [#allocation6], 14336  }
  0x6a   :  { %12929 = vsyncadd [#allocation6], 4294952960 }
  0x6b   :  { %12930 = dma.done.wait [#allocation9], 14336  }
  0x6c   :  { %12931 = vsyncadd [#allocation9], 4294952960 }
  0x6d   :  { %12932 = dma.done.wait [#allocation12], 2048  }
  0x6e   :  { %12933 = vsyncadd [#allocation12], 4294965248  ;;  %v16273_v0 = vmov 0.0   ;;  %v132_v1 = vld [vmem:[#allocation2 + $0x8] sm:$0xff]  ;;  %v134_v3 = vld [vmem:[#allocation2 + $0x18] sm:$0xff]  ;;  %vm12951_vm0 = vmmov 0  }
  0x6f   :  { %259 = vmatprep.mubr.f32.mxu0 %v16273_v0  ;;  %330 = vmatprep.mubr.f32.mxu1 %v16273_v0  ;;  %v136_v2 = vld [vmem:[#allocation2 + $0x28] sm:$0xff]  ;;  %v138_v5 = vld [vmem:[#allocation2 + $0x38] sm:$0xff]  ;;  %v131_v6 = vld [vmem:[#allocation2] sm:$0xff]  ;;  %s12952_s8 = smov [#allocation13]  }
  0x70   :  { %v13118_v4 = vpack.c.bf16 %v136_v2, %v132_v1  ;;  %v135_v7 = vld [vmem:[#allocation2 + $0x20] sm:$0xff]  ;;  %v13120_v8 = vpack.c.bf16 %v138_v5, %v134_v3  ;;  %v133_v10 = vld [vmem:[#allocation2 + $0x10] sm:$0xff]  ;;  %v140_v12 = vld [vmem:[#allocation2 + $0x48] sm:$0xff]  ;;  %s7307_s12 = sshll.u32 %s12952_s8, 4  ;;  %s7308_s12 = int_to_ptr.vmem [resolvable:$true] %s7307_s12 }
  0x71   :  { %v13122_v9 = vpack.c.bf16 %v135_v7, %v131_v6  ;;  %v137_v11 = vld [vmem:[#allocation2 + $0x30] sm:$0xff]  ;;  %v144_v14 = vld [vmem:[#allocation2 + $0x68] sm:$0xff]  ;;  %v142_v15 = vld [vmem:[#allocation2 + $0x58] sm:$0xff]  ;;  %s12904_s1 = scalar_lea.vmem %s7308_s12, 32  ;;  %p12909_p7 = scmp.lt.s32.totalorder %s7308_s12, %s7308_s12 }
  0x72   :  { %16680 = vst [vmem:[#allocation19_spill] sm:$0xff] %v13118_v4  ;;  %8854 = vmatprep.subr.bf16.mxu0 %v13118_v4  ;;  %v13125_v13 = vpack.c.bf16 %v137_v11, %v133_v10  ;;  %v146_v16 = vld [vmem:[#allocation2 + $0x78] sm:$0xff]  ;;  %8886 = vmatprep.subr.bf16.mxu1 %v13120_v8  ;;  %v13129_v17 = vpack.c.bf16 %v144_v14, %v140_v12  ;;  %v139_v19 = vld [vmem:[#allocation2 + $0x40] sm:$0xff]  ;;  %v141_v21 = vld [vmem:[#allocation2 + $0x50] sm:$0xff]  ;;  %p12905_p6 = scmp.ne.s32.totalorder %s7308_s12, %s12904_s1  ;;  %p12910_p8 = scmp.lt.s32.totalorder %s12904_s1, %s12904_s1 }
  0x73   :  { %8856 = vmatpush1.bf16.msra.mxu0 %v13122_v9  ;;  %v13131_v18 = vpack.c.bf16 %v146_v16, %v142_v15  ;;  %v143_v20 = vld [vmem:[#allocation2 + $0x60] sm:$0xff]  ;;  %v145_v23 = vld [vmem:[#allocation2 + $0x70] sm:$0xff]  ;;  %v148_v24 = vld [vmem:[#allocation2 + $0x88] sm:$0xff] }
  0x74   :  { %8888 = vmatpush1.bf16.msra.mxu1 %v13125_v13  ;;  %v13134_v22 = vpack.c.bf16 %v143_v20, %v139_v19  ;;  %v152_v25 = vld [vmem:[#allocation2 + $0xa8] sm:$0xff]  ;;  %8858 = vmatprep.subr.bf16.mxu0 %v13129_v17  ;;  %v13138_v26 = vpack.c.bf16 %v145_v23, %v141_v21  ;;  %v150_v28 = vld [vmem:[#allocation2 + $0x98] sm:$0xff]  ;;  %v147_v30 = vld [vmem:[#allocation2 + $0x80] sm:$0xff]  ;;  %p12911_p9 = por %p12910_p8, %p12909_p7 }
  0x75   :  { %8890 = vmatprep.subr.bf16.mxu1 %v13131_v18  ;;  %v13140_v27 = vpack.c.bf16 %v152_v25, %v148_v24  ;;  %v154_v29 = vld [vmem:[#allocation2 + $0xb8] sm:$0xff]  ;;  %v151_v32 = vld [vmem:[#allocation2 + $0xa0] sm:$0xff]  ;;  %v149_v33 = vld [vmem:[#allocation2 + $0x90] sm:$0xff] }
  0x76   :  { %16681 = vst [vmem:[#allocation20_spill] sm:$0xff] %v13138_v26  ;;  %v13142_v31 = vpack.c.bf16 %v154_v29, %v150_v28  ;;  %v153_v34 = vld [vmem:[#allocation2 + $0xb0] sm:$0xff]  ;;  %v13145_v35 = vpack.c.bf16 %v151_v32, %v147_v30  ;;  %v156_v36 = vld [vmem:[#allocation2 + $0xc8] sm:$0xff]  ;;  %v158_v38 = vld [vmem:[#allocation2 + $0xd8] sm:$0xff]  ;;  %p12912_p10 = pnand %p12911_p9, %p12905_p6 }
  0x77   :  { %8860 = vmatpush1.bf16.msra.mxu0 %v13134_v22  ;;  %v160_v37 = vld [vmem:[#allocation2 + $0xe8] sm:$0xff]  ;;  %v13149_v39 = vpack.c.bf16 %v153_v34, %v149_v33  ;;  %v162_v41 = vld [vmem:[#allocation2 + $0xf8] sm:$0xff]  ;;  %v155_v42 = vld [vmem:[#allocation2 + $0xc0] sm:$0xff] }
  0x78   :  { %16682 = vst [vmem:[#allocation21_spill] sm:$0xff] %v13142_v31  ;;  %8892 = vmatpush1.bf16.msra.mxu1 %v13138_v26  ;;  %8862 = vmatprep.subr.bf16.mxu0 %v13140_v27  ;;  %v13151_v40 = vpack.c.bf16 %v160_v37, %v156_v36  ;;  %v159_v43 = vld [vmem:[#allocation2 + $0xe0] sm:$0xff]  ;;  %v13154_v44 = vpack.c.bf16 %v162_v41, %v158_v38  ;;  %v157_v45 = vld [vmem:[#allocation2 + $0xd0] sm:$0xff]  ;;  %v164_v47 = vld [vmem:[#allocation2 + $0x108] sm:$0xff] }
  0x79   :  { %16683 = vst [vmem:[#allocation22_spill] sm:$0xff] %v13149_v39  ;;  %8894 = vmatprep.subr.bf16.mxu1 %v13142_v31  ;;  %v161_v46 = vld [vmem:[#allocation2 + $0xf0] sm:$0xff]  ;;  %v168_v48 = vld [vmem:[#allocation2 + $0x128] sm:$0xff]  ;;  %v166_v49 = vld [vmem:[#allocation2 + $0x118] sm:$0xff]  ;;  %v13157_v51 = vpack.c.bf16 %v159_v43, %v155_v42 }
  0x7a   :  { %16684 = vst [vmem:[#allocation23_spill] sm:$0xff] %v13154_v44  ;;  %v170_v50 = vld [vmem:[#allocation2 + $0x138] sm:$0xff]  ;;  %v13161_v52 = vpack.c.bf16 %v161_v46, %v157_v45  ;;  %v13163_v53 = vpack.c.bf16 %v168_v48, %v164_v47  ;;  %v163_v54 = vld [vmem:[#allocation2 + $0x100] sm:$0xff]  ;;  %v165_v56 = vld [vmem:[#allocation2 + $0x110] sm:$0xff] }
  0x7b   :  { %8864 = vmatpush1.bf16.msra.mxu0 %v13145_v35  ;;  %v167_v55 = vld [vmem:[#allocation2 + $0x120] sm:$0xff]  ;;  %v13166_v57 = vpack.c.bf16 %v170_v50, %v166_v49  ;;  %v169_v58 = vld [vmem:[#allocation2 + $0x130] sm:$0xff]  ;;  %v172_v59 = vld [vmem:[#allocation2 + $0x148] sm:$0xff] }
  0x7c   :  { %8896 = vmatpush1.bf16.msra.mxu1 %v13149_v39  ;;  %8866 = vmatprep.subr.bf16.mxu0 %v13151_v40  ;;  %16685 = vst [vmem:[#allocation24_spill] sm:$0xff] %v13161_v52  ;;  %v176_v60 = vld [vmem:[#allocation2 + $0x168] sm:$0xff]  ;;  %v174_v61 = vld [vmem:[#allocation2 + $0x158] sm:$0xff]  ;;  %v13169_v63 = vpack.c.bf16 %v167_v55, %v163_v54  ;;  %v13173_v1 = vpack.c.bf16 %v169_v58, %v165_v56  ;;  %v171_v3 = vld [vmem:[#allocation2 + $0x140] sm:$0xff] }
  0x7d   :  { %8898 = vmatprep.subr.bf16.mxu1 %v13154_v44  ;;  %16686 = vst [vmem:[#allocation25_spill] sm:$0xff] %v13166_v57  ;;  %v178_v62 = vld [vmem:[#allocation2 + $0x178] sm:$0xff]  ;;  %v13175_v2 = vpack.c.bf16 %v176_v60, %v172_v59  ;;  %v175_v5 = vld [vmem:[#allocation2 + $0x160] sm:$0xff]  ;;  %v173_v6 = vld [vmem:[#allocation2 + $0x150] sm:$0xff] }
  0x7e   :  { %16687 = vst [vmem:[#allocation26_spill] sm:$0xff] %v13173_v1  ;;  %v13178_v7 = vpack.c.bf16 %v178_v62, %v174_v61  ;;  %v177_v10 = vld [vmem:[#allocation2 + $0x170] sm:$0xff]  ;;  %v180_v11 = vld [vmem:[#allocation2 + $0x188] sm:$0xff]  ;;  %v182_v14 = vld [vmem:[#allocation2 + $0x198] sm:$0xff]  ;;  %v13181_v16 = vpack.c.bf16 %v175_v5, %v171_v3 }
  0x7f   :  { %8868 = vmatpush1.bf16.msra.mxu0 %v13157_v51  ;;  %v184_v12 = vld [vmem:[#allocation2 + $0x1a8] sm:$0xff]  ;;  %v186_v15 = vld [vmem:[#allocation2 + $0x1b8] sm:$0xff]  ;;  %v13185_v19 = vpack.c.bf16 %v177_v10, %v173_v6  ;;  %v179_v21 = vld [vmem:[#allocation2 + $0x180] sm:$0xff] }
  0x80   :  { %8900 = vmatpush1.bf16.msra.mxu1 %v13161_v52  ;;  %8870 = vmatprep.subr.bf16.mxu0 %v13163_v53  ;;  %16688 = vst [vmem:[#allocation27_spill] sm:$0xff] %v13178_v7  ;;  %v13187_v20 = vpack.c.bf16 %v184_v12, %v180_v11  ;;  %v183_v23 = vld [vmem:[#allocation2 + $0x1a0] sm:$0xff]  ;;  %v181_v24 = vld [vmem:[#allocation2 + $0x190] sm:$0xff]  ;;  %v13190_v25 = vpack.c.bf16 %v186_v15, %v182_v14  ;;  %v188_v29 = vld [vmem:[#allocation2 + $0x1c8] sm:$0xff] }
  0x81   :  { %8902 = vmatprep.subr.bf16.mxu1 %v13166_v57  ;;  %16689 = vst [vmem:[#allocation28_spill] sm:$0xff] %v13185_v19  ;;  %v185_v28 = vld [vmem:[#allocation2 + $0x1b0] sm:$0xff]  ;;  %v192_v30 = vld [vmem:[#allocation2 + $0x1e8] sm:$0xff]  ;;  %v190_v32 = vld [vmem:[#allocation2 + $0x1d8] sm:$0xff]  ;;  %v13193_v34 = vpack.c.bf16 %v183_v23, %v179_v21 }
  0x82   :  { %16690 = vst [vmem:[#allocation29_spill] sm:$0xff] %v13190_v25  ;;  %v194_v33 = vld [vmem:[#allocation2 + $0x1f8] sm:$0xff]  ;;  %v13197_v36 = vpack.c.bf16 %v185_v28, %v181_v24  ;;  %v13199_v37 = vpack.c.bf16 %v192_v30, %v188_v29  ;;  %v187_v38 = vld [vmem:[#allocation2 + $0x1c0] sm:$0xff]  ;;  %v189_v42 = vld [vmem:[#allocation2 + $0x1d0] sm:$0xff] }
  0x83   :  { %8872 = vmatpush1.bf16.msra.mxu0 %v13169_v63  ;;  %v191_v41 = vld [vmem:[#allocation2 + $0x1e0] sm:$0xff]  ;;  %v13202_v43 = vpack.c.bf16 %v194_v33, %v190_v32  ;;  %v193_v45 = vld [vmem:[#allocation2 + $0x1f0] sm:$0xff]  ;;  %v392_v46 = vld [vmem:[%s16260_s2 + $0x8] sm:$0xff] }
  0x84   :  { %8904 = vmatpush1.bf16.msra.mxu1 %v13173_v1  ;;  %8874 = vmatprep.subr.bf16.mxu0 %v13175_v2  ;;  %16691 = vst [vmem:[#allocation30_spill] sm:$0xff] %v13197_v36  ;;  %v396_v47 = vld [vmem:[%s16260_s2 + $0x28] sm:$0xff]  ;;  %v394_v48 = vld [vmem:[%s16260_s2 + $0x18] sm:$0xff]  ;;  %v13217_v50 = vpack.c.bf16 %v191_v41, %v187_v38  ;;  %v13221_v54 = vpack.c.bf16 %v193_v45, %v189_v42  ;;  %v391_v56 = vld [vmem:[%s16260_s2] sm:$0xff] }
  0x85   :  { %8906 = vmatprep.subr.bf16.mxu1 %v13178_v7  ;;  %16692 = vst [vmem:[#allocation31_spill] sm:$0xff] %v13202_v43  ;;  %v398_v49 = vld [vmem:[%s16260_s2 + $0x38] sm:$0xff]  ;;  %v13223_v55 = vpack.c.bf16 %v396_v47, %v392_v46  ;;  %v395_v58 = vld [vmem:[%s16260_s2 + $0x20] sm:$0xff]  ;;  %v393_v59 = vld [vmem:[%s16260_s2 + $0x10] sm:$0xff] }
  0x86   :  { %16693 = vst [vmem:[#allocation32_spill] sm:$0xff] %v13221_v54  ;;  %v13235_v60 = vpack.c.bf16 %v398_v49, %v394_v48  ;;  %v397_v61 = vld [vmem:[%s16260_s2 + $0x30] sm:$0xff]  ;;  %v400_v62 = vld [vmem:[%s16260_s2 + $0x48] sm:$0xff]  ;;  %v402_v5 = vld [vmem:[%s16260_s2 + $0x58] sm:$0xff]  ;;  %v13253_v10 = vpack.c.bf16 %v395_v58, %v391_v56 }
  0x87   :  { %8876 = vmatpush1.bf16.msra.mxu0 %v13181_v16  ;;  %v404_v3 = vld [vmem:[%s16260_s2 + $0x68] sm:$0xff]  ;;  %v406_v6 = vld [vmem:[%s16260_s2 + $0x78] sm:$0xff]  ;;  %v13257_v11 = vpack.c.bf16 %v397_v61, %v393_v59  ;;  %v399_v14 = vld [vmem:[%s16260_s2 + $0x40] sm:$0xff] }
  0x88   :  { %8908 = vmatpush1.bf16.msra.mxu1 %v13185_v19  ;;  %8878 = vmatprep.subr.bf16.mxu0 %v13187_v20  ;;  %16694 = vst [vmem:[#allocation33_spill] sm:$0xff] %v13235_v60  ;;  %v13259_v12 = vpack.c.bf16 %v404_v3, %v400_v62  ;;  %v403_v15 = vld [vmem:[%s16260_s2 + $0x60] sm:$0xff]  ;;  %v401_v21 = vld [vmem:[%s16260_s2 + $0x50] sm:$0xff]  ;;  %v13271_v23 = vpack.c.bf16 %v406_v6, %v402_v5  ;;  %v408_v28 = vld [vmem:[%s16260_s2 + $0x88] sm:$0xff] }
  0x89   :  { %8910 = vmatprep.subr.bf16.mxu1 %v13190_v25  ;;  %16695 = vst [vmem:[#allocation34_spill] sm:$0xff] %v13257_v11  ;;  %v405_v24 = vld [vmem:[%s16260_s2 + $0x70] sm:$0xff]  ;;  %v412_v29 = vld [vmem:[%s16260_s2 + $0xa8] sm:$0xff]  ;;  %v410_v30 = vld [vmem:[%s16260_s2 + $0x98] sm:$0xff]  ;;  %v13291_v33 = vpack.c.bf16 %v403_v15, %v399_v14 }
  0x8a   :  { %16696 = vst [vmem:[#allocation35_spill] sm:$0xff] %v13259_v12  ;;  %16697 = vst [vmem:[#allocation36_spill] sm:$0xff] %v13271_v23  ;;  %v414_v32 = vld [vmem:[%s16260_s2 + $0xb8] sm:$0xff]  ;;  %v13295_v38 = vpack.c.bf16 %v405_v24, %v401_v21  ;;  %v13297_v41 = vpack.c.bf16 %v412_v29, %v408_v28  ;;  %v407_v45 = vld [vmem:[%s16260_s2 + $0x80] sm:$0xff] }
  0x8b   :  { %8880 = vmatpush1.bf16.msra.mxu0 %v13193_v34  ;;  %16698 = vst [vmem:[#allocation37_spill] sm:$0xff] %v13291_v33  ;;  %v13300_v42 = vpack.c.bf16 %v414_v32, %v410_v30  ;;  %v411_v46 = vld [vmem:[%s16260_s2 + $0xa0] sm:$0xff]  ;;  %v409_v47 = vld [vmem:[%s16260_s2 + $0x90] sm:$0xff]  ;;  %v416_v58 = vld [vmem:[%s16260_s2 + $0xc8] sm:$0xff] }
  0x8c   :  { %8912 = vmatpush1.bf16.msra.mxu1 %v13197_v36  ;;  %8882 = vmatprep.subr.bf16.mxu0 %v13199_v37  ;;  %16699 = vst [vmem:[#allocation38_spill] sm:$0xff] %v13295_v38  ;;  %16700 = vst [vmem:[#allocation39_spill] sm:$0xff] %v13297_v41  ;;  %v13317_v48 = vpack.c.bf16 %v411_v46, %v407_v45  ;;  %v413_v49 = vld [vmem:[%s16260_s2 + $0xb0] sm:$0xff]  ;;  %v420_v59 = vld [vmem:[%s16260_s2 + $0xe8] sm:$0xff] }
  0x8d   :  { %8914 = vmatprep.subr.bf16.mxu1 %v13202_v43  ;;  %16701 = vst [vmem:[#allocation40_spill] sm:$0xff] %v13300_v42  ;;  %v13322_v56 = vpack.c.bf16 %v413_v49, %v409_v47  ;;  %v418_v61 = vld [vmem:[%s16260_s2 + $0xd8] sm:$0xff]  ;;  %v13335_v62 = vpack.c.bf16 %v420_v59, %v416_v58  ;;  %v415_v5 = vld [vmem:[%s16260_s2 + $0xc0] sm:$0xff]  ;;  %v417_v21 = vld [vmem:[%s16260_s2 + $0xd0] sm:$0xff] }
  0x8e   :  { %16702 = vst [vmem:[#allocation41_spill] sm:$0xff] %v13317_v48  ;;  %v422_v3 = vld [vmem:[%s16260_s2 + $0xf8] sm:$0xff]  ;;  %v419_v6 = vld [vmem:[%s16260_s2 + $0xe0] sm:$0xff]  ;;  %v421_v24 = vld [vmem:[%s16260_s2 + $0xf0] sm:$0xff] }
  0x8f   :  { %8884 = vmatpush1.bf16.msra.mxu0 %v13217_v50  ;;  %16703 = vst [vmem:[#allocation42_spill] sm:$0xff] %v13322_v56  ;;  %16704 = vst [vmem:[#allocation43_spill] sm:$0xff] %v13335_v62  ;;  %v13346_v14 = vpack.c.bf16 %v422_v3, %v418_v61  ;;  %v13348_v15 = vpack.c.bf16 %v419_v6, %v415_v5  ;;  %v13357_v28 = vpack.c.bf16 %v421_v24, %v417_v21  ;;  %v424_v29 = vld [vmem:[%s16260_s2 + $0x108] sm:$0xff]  ;;  %v426_v32 = vld [vmem:[%s16260_s2 + $0x118] sm:$0xff] }
  0x90   :  { %8916 = vmatpush1.bf16.msra.mxu1 %v13221_v54  ;;  %8918 = vmatprep.subr.bf16.mxu0 %v13223_v55  ;;  %v428_v30 = vld [vmem:[%s16260_s2 + $0x128] sm:$0xff]  ;;  %v430_v46 = vld [vmem:[%s16260_s2 + $0x138] sm:$0xff]  ;;  %v423_v47 = vld [vmem:[%s16260_s2 + $0x100] sm:$0xff] }
  0x91   :  { %8982 = vmatprep.subr.bf16.mxu1 %v13235_v60  ;;  %16705 = vst [vmem:[#allocation44_spill] sm:$0xff] %v13346_v14  ;;  %16706 = vst [vmem:[#allocation45_spill] sm:$0xff] %v13348_v15  ;;  %v13371_v45 = vpack.c.bf16 %v428_v30, %v424_v29  ;;  %v427_v49 = vld [vmem:[%s16260_s2 + $0x120] sm:$0xff]  ;;  %v13382_v58 = vpack.c.bf16 %v430_v46, %v426_v32  ;;  %v425_v61 = vld [vmem:[%s16260_s2 + $0x110] sm:$0xff] }
  0x92   :  { %260 = vmatmul.mubr.f32.vlgmr.msra.gmra.mrb[0].mxu0 %v16273_v0  ;;  %16707 = vst [vmem:[#allocation46_spill] sm:$0xff] %v13357_v28  ;;  %v13384_v59 = vpack.c.bf16 %v427_v49, %v423_v47  ;;  %v429_v3 = vld [vmem:[%s16260_s2 + $0x130] sm:$0xff]  ;;  %v432_v6 = vld [vmem:[%s16260_s2 + $0x148] sm:$0xff]  ;;  %v434_v24 = vld [vmem:[%s16260_s2 + $0x158] sm:$0xff] }
  0x93   :  { %331 = vmatmul.mubr.f32.vlgmr.msra.gmra.mrb[0].mxu1 %v16273_v0  ;;  %8920 = vmatpush1.bf16.msra.mxu0 %v13253_v10  ;;  %16708 = vst [vmem:[#allocation47_spill] sm:$0xff] %v13371_v45  ;;  %16709 = vst [vmem:[#allocation48_spill] sm:$0xff] %v13382_v58  ;;  %v13393_v5 = vpack.c.bf16 %v429_v3, %v425_v61  ;;  %v436_v21 = vld [vmem:[%s16260_s2 + $0x168] sm:$0xff]  ;;  %v438_v30 = vld [vmem:[%s16260_s2 + $0x178] sm:$0xff] }
  0x94   :  { %8984 = vmatpush1.bf16.msra.mxu1 %v13257_v11  ;;  %8922 = vmatprep.subr.bf16.mxu0 %v13259_v12  ;;  %16710 = vst [vmem:[#allocation49_spill] sm:$0xff] %v13384_v59  ;;  %v13407_v29 = vpack.c.bf16 %v436_v21, %v432_v6  ;;  %v431_v32 = vld [vmem:[%s16260_s2 + $0x140] sm:$0xff]  ;;  %v13418_v47 = vpack.c.bf16 %v438_v30, %v434_v24  ;;  %v433_v61 = vld [vmem:[%s16260_s2 + $0x150] sm:$0xff]  ;;  %v440_v21 = vld [vmem:[%s16260_s2 + $0x188] sm:$0xff] }
  0x95   :  { %8986 = vmatprep.subr.bf16.mxu1 %v13271_v23  ;;  %605 = vmatprep.mubr.f32.mxu0 %v16273_v0  ;;  %16711 = vst [vmem:[#allocation50_spill] sm:$0xff] %v13393_v5  ;;  %v435_v46 = vld [vmem:[%s16260_s2 + $0x160] sm:$0xff]  ;;  %v437_v3 = vld [vmem:[%s16260_s2 + $0x170] sm:$0xff]  ;;  %v444_v24 = vld [vmem:[%s16260_s2 + $0x1a8] sm:$0xff] }
  0x96   :  { %676 = vmatprep.mubr.f32.mxu1 %v16273_v0  ;;  %16712 = vst [vmem:[#allocation51_spill] sm:$0xff] %v13407_v29  ;;  %16713 = vst [vmem:[#allocation52_spill] sm:$0xff] %v13418_v47  ;;  %v13420_v49 = vpack.c.bf16 %v435_v46, %v431_v32  ;;  %v13429_v6 = vpack.c.bf16 %v437_v3, %v433_v61  ;;  %v442_v30 = vld [vmem:[%s16260_s2 + $0x198] sm:$0xff]  ;;  %v13443_v32 = vpack.c.bf16 %v444_v24, %v440_v21  ;;  %v439_v61 = vld [vmem:[%s16260_s2 + $0x180] sm:$0xff] }
  0x97   :  { %8924 = vmatpush1.bf16.msra.mxu0 %v13291_v33  ;;  %v446_v46 = vld [vmem:[%s16260_s2 + $0x1b8] sm:$0xff]  ;;  %v443_v3 = vld [vmem:[%s16260_s2 + $0x1a0] sm:$0xff]  ;;  %v441_v21 = vld [vmem:[%s16260_s2 + $0x190] sm:$0xff] }
  0x98   :  { %8988 = vmatpush1.bf16.msra.mxu1 %v13295_v38  ;;  %8926 = vmatprep.subr.bf16.mxu0 %v13297_v41  ;;  %16714 = vst [vmem:[#allocation53_spill] sm:$0xff] %v13420_v49  ;;  %16715 = vst [vmem:[#allocation54_spill] sm:$0xff] %v13429_v6  ;;  %v13454_v0 = vpack.c.bf16 %v446_v46, %v442_v30  ;;  %v445_v24 = vld [vmem:[%s16260_s2 + $0x1b0] sm:$0xff]  ;;  %v448_v30 = vld [vmem:[%s16260_s2 + $0x1c8] sm:$0xff] }
  0x99   :  { %8990 = vmatprep.subr.bf16.mxu1 %v13300_v42  ;;  %16716 = vst [vmem:[#allocation55_spill] sm:$0xff] %v13443_v32  ;;  %v452_v46 = vld [vmem:[%s16260_s2 + $0x1e8] sm:$0xff]  ;;  %v515_v11 = vld [vmem:[%s16260_s2 + $0x3e0] sm:$0xff] }
  0x9a   :  { %16717 = vst [vmem:[#allocation56_spill] sm:$0xff] %v13454_v0 }
  0x9b   :  { %8928 = vmatpush1.bf16.msra.mxu0 %v13317_v48 }
  0x9c   :  { %8992 = vmatpush1.bf16.msra.mxu1 %v13322_v56  ;;  %8930 = vmatprep.subr.bf16.mxu0 %v13335_v62 }
  0x9d   :  { %8994 = vmatprep.subr.bf16.mxu1 %v13346_v14 }
  0x9f   :  { %8932 = vmatpush1.bf16.msra.mxu0 %v13348_v15 }
  0xa0   :  { %8996 = vmatpush1.bf16.msra.mxu1 %v13357_v28  ;;  %8934 = vmatprep.subr.bf16.mxu0 %v13371_v45 }
  0xa1   :  { %8998 = vmatprep.subr.bf16.mxu1 %v13382_v58 }
  0xa3   :  { %8936 = vmatpush1.bf16.msra.mxu0 %v13384_v59 }
  0xa4   :  { %9000 = vmatpush1.bf16.msra.mxu1 %v13393_v5  ;;  %8938 = vmatprep.subr.bf16.mxu0 %v13407_v29 }
  0xa5   :  { %9002 = vmatprep.subr.bf16.mxu1 %v13418_v47  ;;  %v13456_v47 = vpack.c.bf16 %v443_v3, %v439_v61  ;;  %v450_v61 = vld [vmem:[%s16260_s2 + $0x1d8] sm:$0xff]  ;;  %v13479_v3 = vpack.c.bf16 %v452_v46, %v448_v30  ;;  %v449_v30 = vld [vmem:[%s16260_s2 + $0x1d0] sm:$0xff] }
  0xa6   :  { %v453_v46 = vld [vmem:[%s16260_s2 + $0x1f0] sm:$0xff] }
  0xa7   :  { %8940 = vmatpush1.bf16.msra.mxu0 %v13420_v49  ;;  %16718 = vst [vmem:[#allocation57_spill] sm:$0xff] %v13456_v47  ;;  %16720 = vst [vmem:[#allocation59_spill] sm:$0xff] %v13479_v3 }
  0xa8   :  { %9004 = vmatpush1.bf16.msra.mxu1 %v13429_v6  ;;  %8942 = vmatprep.subr.bf16.mxu0 %v13443_v32  ;;  %v13465_v6 = vpack.c.bf16 %v445_v24, %v441_v21  ;;  %v454_v21 = vld [vmem:[%s16260_s2 + $0x1f8] sm:$0xff]  ;;  %v447_v24 = vld [vmem:[%s16260_s2 + $0x1c0] sm:$0xff] }
  0xa9   :  { %9006 = vmatprep.subr.bf16.mxu1 %v13454_v0  ;;  %v451_v0 = vld [vmem:[%s16260_s2 + $0x1e0] sm:$0xff]  ;;  %v13490_v5 = vpack.c.bf16 %v454_v21, %v450_v61  ;;  %v460_v61 = vld [vmem:[%s16260_s2 + $0x228] sm:$0xff]  ;;  %v458_v21 = vld [vmem:[%s16260_s2 + $0x218] sm:$0xff] }
  0xaa   :  { %16719 = vst [vmem:[#allocation58_spill] sm:$0xff] %v13465_v6  ;;  %v13492_v58 = vpack.c.bf16 %v451_v0, %v447_v24  ;;  %v456_v0 = vld [vmem:[%s16260_s2 + $0x208] sm:$0xff] }
  0xab   :  { %8944 = vmatpush1.bf16.msra.mxu0 %v13456_v47  ;;  %16721 = vst [vmem:[#allocation60_spill] sm:$0xff] %v13490_v5  ;;  %v13515_v24 = vpack.c.bf16 %v460_v61, %v456_v0  ;;  %v457_v0 = vld [vmem:[%s16260_s2 + $0x210] sm:$0xff] }
  0xac   :  { %9008 = vmatpush1.bf16.msra.mxu1 %v13465_v6  ;;  %16722 = vst [vmem:[#allocation61_spill] sm:$0xff] %v13492_v58  ;;  %8946 = vmatprep.subr.bf16.mxu0 %v13479_v3  ;;  %v13501_v6 = vpack.c.bf16 %v453_v46, %v449_v30  ;;  %v462_v30 = vld [vmem:[%s16260_s2 + $0x238] sm:$0xff]  ;;  %v455_v46 = vld [vmem:[%s16260_s2 + $0x200] sm:$0xff]  ;;  %v461_v61 = vld [vmem:[%s16260_s2 + $0x230] sm:$0xff] }
  0xad   :  { %9010 = vmatprep.subr.bf16.mxu1 %v13490_v5  ;;  %16724 = vst [vmem:[#allocation63_spill] sm:$0xff] %v13515_v24  ;;  %v459_v5 = vld [vmem:[%s16260_s2 + $0x220] sm:$0xff]  ;;  %v13526_v28 = vpack.c.bf16 %v462_v30, %v458_v21  ;;  %v468_v21 = vld [vmem:[%s16260_s2 + $0x268] sm:$0xff]  ;;  %v466_v30 = vld [vmem:[%s16260_s2 + $0x258] sm:$0xff] }
  0xae   :  { %16723 = vst [vmem:[#allocation62_spill] sm:$0xff] %v13501_v6  ;;  %v13528_v14 = vpack.c.bf16 %v459_v5, %v455_v46  ;;  %v464_v5 = vld [vmem:[%s16260_s2 + $0x248] sm:$0xff] }
  0xaf   :  { %8948 = vmatpush1.bf16.msra.mxu0 %v13492_v58  ;;  %16725 = vst [vmem:[#allocation64_spill] sm:$0xff] %v13526_v28  ;;  %v13551_v46 = vpack.c.bf16 %v468_v21, %v464_v5  ;;  %v465_v5 = vld [vmem:[%s16260_s2 + $0x250] sm:$0xff]  ;;  %v792_v3 = vld [vmem:[#allocation5 + $0x2a8] sm:$0xff] }
  0xb0   :  { %9012 = vmatpush1.bf16.msra.mxu1 %v13501_v6  ;;  %16726 = vst [vmem:[#allocation65_spill] sm:$0xff] %v13528_v14  ;;  %8950 = vmatprep.subr.bf16.mxu0 %v13515_v24  ;;  %v13537_v6 = vpack.c.bf16 %v461_v61, %v457_v0  ;;  %v470_v0 = vld [vmem:[%s16260_s2 + $0x278] sm:$0xff]  ;;  %v463_v61 = vld [vmem:[%s16260_s2 + $0x240] sm:$0xff]  ;;  %v469_v21 = vld [vmem:[%s16260_s2 + $0x270] sm:$0xff] }
  0xb1   :  { %9014 = vmatprep.subr.bf16.mxu1 %v13526_v28  ;;  %16728 = vst [vmem:[#allocation67_spill] sm:$0xff] %v13551_v46  ;;  %v467_v28 = vld [vmem:[%s16260_s2 + $0x260] sm:$0xff]  ;;  %v13562_v56 = vpack.c.bf16 %v470_v0, %v466_v30  ;;  %v476_v30 = vld [vmem:[%s16260_s2 + $0x2a8] sm:$0xff]  ;;  %v474_v0 = vld [vmem:[%s16260_s2 + $0x298] sm:$0xff] }
  0xb2   :  { %16727 = vst [vmem:[#allocation66_spill] sm:$0xff] %v13537_v6  ;;  %v13564_v42 = vpack.c.bf16 %v467_v28, %v463_v61  ;;  %v472_v28 = vld [vmem:[%s16260_s2 + $0x288] sm:$0xff] }
  0xb3   :  { %8952 = vmatpush1.bf16.msra.mxu0 %v13528_v14  ;;  %16729 = vst [vmem:[#allocation68_spill] sm:$0xff] %v13562_v56  ;;  %v13587_v61 = vpack.c.bf16 %v476_v30, %v472_v28  ;;  %v473_v28 = vld [vmem:[%s16260_s2 + $0x290] sm:$0xff] }
  0xb4   :  { %9016 = vmatpush1.bf16.msra.mxu1 %v13537_v6  ;;  %16730 = vst [vmem:[#allocation69_spill] sm:$0xff] %v13564_v42  ;;  %8954 = vmatprep.subr.bf16.mxu0 %v13551_v46  ;;  %v13573_v6 = vpack.c.bf16 %v469_v21, %v465_v5  ;;  %v478_v5 = vld [vmem:[%s16260_s2 + $0x2b8] sm:$0xff]  ;;  %v471_v21 = vld [vmem:[%s16260_s2 + $0x280] sm:$0xff]  ;;  %v477_v30 = vld [vmem:[%s16260_s2 + $0x2b0] sm:$0xff] }
  0xb5   :  { %9018 = vmatprep.subr.bf16.mxu1 %v13562_v56  ;;  %16732 = vst [vmem:[#allocation71_spill] sm:$0xff] %v13587_v61  ;;  %v475_v56 = vld [vmem:[%s16260_s2 + $0x2a0] sm:$0xff]  ;;  %v497_v14 = vld [vmem:[%s16260_s2 + $0x350] sm:$0xff] }
  0xb6   :  { %16731 = vst [vmem:[#allocation70_spill] sm:$0xff] %v13573_v6  ;;  %v13600_v38 = vpack.c.bf16 %v475_v56, %v471_v21  ;;  %v480_v56 = vld [vmem:[%s16260_s2 + $0x2c8] sm:$0xff] }
  0xb7   :  { %8956 = vmatpush1.bf16.msra.mxu0 %v13564_v42  ;;  %v13598_v42 = vpack.c.bf16 %v478_v5, %v474_v0  ;;  %v484_v0 = vld [vmem:[%s16260_s2 + $0x2e8] sm:$0xff]  ;;  %v482_v5 = vld [vmem:[%s16260_s2 + $0x2d8] sm:$0xff] }
  0xb8   :  { %9020 = vmatpush1.bf16.msra.mxu1 %v13573_v6  ;;  %16734 = vst [vmem:[#allocation73_spill] sm:$0xff] %v13600_v38  ;;  %8958 = vmatprep.subr.bf16.mxu0 %v13587_v61  ;;  %v13609_v6 = vpack.c.bf16 %v477_v30, %v473_v28  ;;  %v13623_v21 = vpack.c.bf16 %v484_v0, %v480_v56  ;;  %v486_v28 = vld [vmem:[%s16260_s2 + $0x2f8] sm:$0xff]  ;;  %v479_v30 = vld [vmem:[%s16260_s2 + $0x2c0] sm:$0xff]  ;;  %v481_v56 = vld [vmem:[%s16260_s2 + $0x2d0] sm:$0xff] }
  0xb9   :  { %16733 = vst [vmem:[#allocation72_spill] sm:$0xff] %v13598_v42  ;;  %9022 = vmatprep.subr.bf16.mxu1 %v13598_v42  ;;  %v483_v42 = vld [vmem:[%s16260_s2 + $0x2e0] sm:$0xff]  ;;  %v485_v0 = vld [vmem:[%s16260_s2 + $0x2f0] sm:$0xff] }
  0xba   :  { %16735 = vst [vmem:[#allocation74_spill] sm:$0xff] %v13609_v6  ;;  %16736 = vst [vmem:[#allocation75_spill] sm:$0xff] %v13623_v21  ;;  %v13636_v61 = vpack.c.bf16 %v483_v42, %v479_v30  ;;  %v488_v42 = vld [vmem:[%s16260_s2 + $0x308] sm:$0xff] }
  0xbb   :  { %8960 = vmatpush1.bf16.msra.mxu0 %v13600_v38  ;;  %v13634_v38 = vpack.c.bf16 %v486_v28, %v482_v5  ;;  %v492_v5 = vld [vmem:[%s16260_s2 + $0x328] sm:$0xff]  ;;  %v490_v28 = vld [vmem:[%s16260_s2 + $0x318] sm:$0xff] }
  0xbc   :  { %9024 = vmatpush1.bf16.msra.mxu1 %v13609_v6  ;;  %16738 = vst [vmem:[#allocation77_spill] sm:$0xff] %v13636_v61  ;;  %8962 = vmatprep.subr.bf16.mxu0 %v13623_v21  ;;  %v13645_v6 = vpack.c.bf16 %v485_v0, %v481_v56  ;;  %v13659_v30 = vpack.c.bf16 %v492_v5, %v488_v42  ;;  %v494_v56 = vld [vmem:[%s16260_s2 + $0x338] sm:$0xff]  ;;  %v487_v0 = vld [vmem:[%s16260_s2 + $0x300] sm:$0xff]  ;;  %v489_v42 = vld [vmem:[%s16260_s2 + $0x310] sm:$0xff] }
  0xbd   :  { %16737 = vst [vmem:[#allocation76_spill] sm:$0xff] %v13634_v38  ;;  %9026 = vmatprep.subr.bf16.mxu1 %v13634_v38  ;;  %v491_v38 = vld [vmem:[%s16260_s2 + $0x320] sm:$0xff]  ;;  %v493_v5 = vld [vmem:[%s16260_s2 + $0x330] sm:$0xff] }
  0xbe   :  { %16739 = vst [vmem:[#allocation78_spill] sm:$0xff] %v13645_v6  ;;  %16740 = vst [vmem:[#allocation79_spill] sm:$0xff] %v13659_v30  ;;  %v13672_v21 = vpack.c.bf16 %v491_v38, %v487_v0  ;;  %v13684_v46 = vpack.c.bf16 %v493_v5, %v489_v42  ;;  %v500_v38 = vld [vmem:[%s16260_s2 + $0x368] sm:$0xff]  ;;  %v495_v5 = vld [vmem:[%s16260_s2 + $0x340] sm:$0xff] }
  0xbf   :  { %8964 = vmatpush1.bf16.msra.mxu0 %v13636_v61  ;;  %v13670_v61 = vpack.c.bf16 %v494_v56, %v490_v28  ;;  %v498_v28 = vld [vmem:[%s16260_s2 + $0x358] sm:$0xff] }
  0xc0   :  { %9028 = vmatpush1.bf16.msra.mxu1 %v13645_v6  ;;  %16742 = vst [vmem:[#allocation81_spill] sm:$0xff] %v13672_v21  ;;  %v496_v6 = vld [vmem:[%s16260_s2 + $0x348] sm:$0xff]  ;;  %8966 = vmatprep.subr.bf16.mxu0 %v13659_v30  ;;  %16743 = vst [vmem:[#allocation82_spill] sm:$0xff] %v13684_v46  ;;  %v502_v56 = vld [vmem:[%s16260_s2 + $0x378] sm:$0xff] }
  0xc1   :  { %16741 = vst [vmem:[#allocation80_spill] sm:$0xff] %v13670_v61  ;;  %9030 = vmatprep.subr.bf16.mxu1 %v13670_v61  ;;  %v13697_v0 = vpack.c.bf16 %v500_v38, %v496_v6  ;;  %v13699_v42 = vpack.c.bf16 %v502_v56, %v498_v28  ;;  %v499_v30 = vld [vmem:[%s16260_s2 + $0x360] sm:$0xff]  ;;  %v501_v6 = vld [vmem:[%s16260_s2 + $0x370] sm:$0xff]  ;;  %v504_v38 = vld [vmem:[%s16260_s2 + $0x388] sm:$0xff] }
  0xc2   :  { %v13711_v61 = vpack.c.bf16 %v499_v30, %v495_v5  ;;  %v508_v28 = vld [vmem:[%s16260_s2 + $0x3a8] sm:$0xff]  ;;  %v13724_v56 = vpack.c.bf16 %v501_v6, %v497_v14  ;;  %v506_v5 = vld [vmem:[%s16260_s2 + $0x398] sm:$0xff]  ;;  %v507_v14 = vld [vmem:[%s16260_s2 + $0x3a0] sm:$0xff] }
  0xc3   :  { %8968 = vmatpush1.bf16.msra.mxu0 %v13672_v21  ;;  %16744 = vst [vmem:[#allocation83_spill] sm:$0xff] %v13697_v0  ;;  %16745 = vst [vmem:[#allocation84_spill] sm:$0xff] %v13699_v42  ;;  %v13726_v30 = vpack.c.bf16 %v508_v28, %v504_v38  ;;  %v503_v21 = vld [vmem:[%s16260_s2 + $0x380] sm:$0xff]  ;;  %v505_v6 = vld [vmem:[%s16260_s2 + $0x390] sm:$0xff] }
  0xc4   :  { %9032 = vmatpush1.bf16.msra.mxu1 %v13684_v46  ;;  %16746 = vst [vmem:[#allocation85_spill] sm:$0xff] %v13711_v61  ;;  %8970 = vmatprep.subr.bf16.mxu0 %v13697_v0  ;;  %16747 = vst [vmem:[#allocation86_spill] sm:$0xff] %v13724_v56  ;;  %v510_v46 = vld [vmem:[%s16260_s2 + $0x3b8] sm:$0xff]  ;;  %v509_v38 = vld [vmem:[%s16260_s2 + $0x3b0] sm:$0xff]  ;;  %v13749_v28 = vpack.c.bf16 %v507_v14, %v503_v21 }
  0xc5   :  { %9034 = vmatprep.subr.bf16.mxu1 %v13699_v42  ;;  %16748 = vst [vmem:[#allocation87_spill] sm:$0xff] %v13726_v30  ;;  %v13737_v23 = vpack.c.bf16 %v510_v46, %v506_v5  ;;  %v512_v46 = vld [vmem:[%s16260_s2 + $0x3c8] sm:$0xff]  ;;  %v514_v42 = vld [vmem:[%s16260_s2 + $0x3d8] sm:$0xff]  ;;  %v13762_v0 = vpack.c.bf16 %v509_v38, %v505_v6  ;;  %v513_v6 = vld [vmem:[%s16260_s2 + $0x3d0] sm:$0xff] }
  0xc6   :  { %16750 = vst [vmem:[#allocation89_spill] sm:$0xff] %v13749_v28  ;;  %v516_v5 = vld [vmem:[%s16260_s2 + $0x3e8] sm:$0xff]  ;;  %v518_v14 = vld [vmem:[%s16260_s2 + $0x3f8] sm:$0xff]  ;;  %v517_v38 = vld [vmem:[%s16260_s2 + $0x3f0] sm:$0xff] }
  0xc7   :  { %16749 = vst [vmem:[#allocation88_spill] sm:$0xff] %v13737_v23  ;;  %8972 = vmatpush1.bf16.msra.mxu0 %v13711_v61  ;;  %16751 = vst [vmem:[#allocation90_spill] sm:$0xff] %v13762_v0  ;;  %v13764_v21 = vpack.c.bf16 %v516_v5, %v512_v46  ;;  %v511_v61 = vld [vmem:[%s16260_s2 + $0x3c0] sm:$0xff]  ;;  %v13789_v5 = vpack.c.bf16 %v517_v38, %v513_v6 }
  0xc8   :  { %9036 = vmatpush1.bf16.msra.mxu1 %v13724_v56  ;;  %8974 = vmatprep.subr.bf16.mxu0 %v13726_v30  ;;  %v13776_v56 = vpack.c.bf16 %v518_v14, %v514_v42  ;;  %v13785_v46 = vpack.c.bf16 %v515_v11, %v511_v61  ;;  %v708_v42 = vld [vmem:[#allocation5 + $0x8] sm:$0xff]  ;;  %v711_v14 = vld [vmem:[#allocation5 + $0x20] sm:$0xff]  ;;  %v12949_v11 = vmov 1983009808  }
  0xc9   :  { %16752 = vst [vmem:[#allocation91_spill] sm:$0xff] %v13764_v21  ;;  %9038 = vmatprep.subr.bf16.mxu1 %v13737_v23  ;;  %16755 = vst [vmem:[#allocation94_spill] sm:$0xff] %v13789_v5  ;;  %v13794_v23 = vpack.c.bf16 %v711_v14, %v708_v42  ;;  %v344_v61 = vunpack.c.l.s4 %v12949_v11  ;;  %v130_v11 = vld [vmem:[%s16258_s0] sm:$0xff] }
  0xca   :  { %16753 = vst [vmem:[#allocation92_spill] sm:$0xff] %v13776_v56  ;;  %16754 = vst [vmem:[#allocation93_spill] sm:$0xff] %v13785_v46 }
  0xcb   :  { %8976 = vmatpush1.bf16.msra.mxu0 %v13749_v28  ;;  %16756 = vst [vmem:[#allocation95_spill] sm:$0xff] %v13794_v23  ;;  %v346_v28 = vlaneseq }
  0xcc   :  { %9040 = vmatpush1.bf16.msra.mxu1 %v13762_v0  ;;  %8978 = vmatprep.subr.bf16.mxu0 %v13764_v21  ;;  %v345_v0 = vunpack.c.0.s8 %v344_v61 }
  0xcd   :  { %9042 = vmatprep.subr.bf16.mxu1 %v13776_v56  ;;  %v13797_v30 = vshrl.u32 %v346_v28, 7 }
  0xcf   :  { %8980 = vmatpush1.bf16.msra.mxu0 %v13785_v46  ;;  %v13800_v38 = vsub.s32 %v345_v0, %v13797_v30 }
  0xd0   :  { %9044 = vmatpush1.bf16.msra.mxu1 %v13789_v5  ;;  %9046 = vmatprep.subr.bf16.mxu0 %v13794_v23 }
  0xd1   :  { %16757 = vst [vmem:[#allocation96_spill] sm:$0xff] %v13800_v38 }
 0x165   :  { %v261_v6 = vpop.f32.mrb[0].mxu0 }
 0x166   :  { %v332_v56 = vpop.f32.mrb[0].mxu1  ;;  %v263_v46 = vpop.f32.mrb[1].mxu0 }
 0x167   :  { %v341_v21 = vcombine.low %v261_v6, %v263_v46  ;;  %v334_v5 = vpop.f32.mrb[1].mxu1 }
 0x168   :  { %v342_v24 = vcombine.low %v332_v56, %v334_v5 }
 0x169   :  { %v349_v42 = vrot.slane %v341_v21, %v13800_v38 }
 0x16a   :  { %v356_v14 = vrot.slane %v342_v24, %v13800_v38 }
 0x16c   :  { %v357_v61 = vcombine.low %v349_v42, %v356_v14 }
 0x16e   :  { %v359_v28 = vadd.f32 %v357_v61, %v130_v11 }
 0x170   :  { %v7319_v23 = vmul.f32 -1.442695, %v359_v28  ;;  %v367_v58 = vrot.slane %v359_v28, 2  ;;  %v378_v60 = vrot.slane %v359_v28, 6  ;;  %v375_v6 = vrot.slane %v359_v28, 4  ;;  %v710_v28 = vld [vmem:[#allocation5 + $0x18] sm:$0xff] }
 0x172   :  { %12350 = vpow2.f32 %v7319_v23  ;;  %v7320_v0 = vmul.f32 -1.442695, %v367_v58  ;;  %v7321_v54 = vmul.f32 -1.442695, %v378_v60  ;;  %v707_v60 = vld [vmem:[#allocation5] sm:$0xff] }
 0x174   :  { %12352 = vpow2.f32 %v7320_v0  ;;  %v714_v0 = vld [vmem:[#allocation5 + $0x38] sm:$0xff] }
 0x175   :  { %12354 = vpow2.f32 %v7321_v54  ;;  %v717_v54 = vld [vmem:[#allocation5 + $0x50] sm:$0xff] }
 0x17c   :  { %v12351_v46 = vpop.eup %12350 }
 0x17d   :  { %v363_v56 = vadd.f32 1.0, %v12351_v46 }
 0x17e   :  { %v12353_v5 = vpop.eup %12352 }
 0x17f   :  { %12356 = vrcp.f32 %v363_v56  ;;  %v372_v24 = vadd.f32 1.0, %v12353_v5  ;;  %v12355_v21 = vpop.eup %12354 }
 0x180   :  { %12358 = vtanh.f32 %v375_v6  ;;  %v383_v11 = vadd.f32 1.0, %v12355_v21  ;;  %v13810_v6 = vpack.c.bf16 %v710_v28, %v707_v60  ;;  %v713_v21 = vld [vmem:[#allocation5 + $0x30] sm:$0xff]  ;;  %v719_v60 = vld [vmem:[#allocation5 + $0x60] sm:$0xff]  ;;  %v722_v28 = vld [vmem:[#allocation5 + $0x78] sm:$0xff] }
 0x181   :  { %12360 = vrcp.f32 %v372_v24  ;;  %v13814_v24 = vpack.c.bf16 %v717_v54, %v714_v0  ;;  %v726_v0 = vld [vmem:[#allocation5 + $0x98] sm:$0xff]  ;;  %v729_v54 = vld [vmem:[#allocation5 + $0xb0] sm:$0xff] }
 0x182   :  { %12362 = vrcp.f32 %v383_v11  ;;  %16759 = vst [vmem:[#allocation98_spill] sm:$0xff] %v13810_v6 }
 0x183   :  { %16760 = vst [vmem:[#allocation99_spill] sm:$0xff] %v13814_v24 }
 0x189   :  { %v12357_v38 = vpop.eup %12356 }
 0x18a   :  { %v12359_v42 = vpop.eup %12358 }
 0x18b   :  { %v12361_v14 = vpop.eup %12360  ;;  %v387_v23 = vmul.f32 %v12359_v42, %v12357_v38  ;;  %v720_v38 = vld [vmem:[#allocation5 + $0x68] sm:$0xff]  ;;  %v723_v42 = vld [vmem:[#allocation5 + $0x80] sm:$0xff] }
 0x18c   :  { %v386_v61 = vmul.f32 0.0, %v12361_v14  ;;  %v12363_v46 = vpop.eup %12362  ;;  %v716_v14 = vld [vmem:[#allocation5 + $0x48] sm:$0xff] }
 0x18d   :  { %v13819_v11 = vpack.c.bf16 %v716_v14, %v713_v21  ;;  %v725_v21 = vld [vmem:[#allocation5 + $0x90] sm:$0xff]  ;;  %v728_v14 = vld [vmem:[#allocation5 + $0xa8] sm:$0xff] }
 0x18e   :  { %v13807_v58 = vadd.f32 %v387_v23, %v386_v61  ;;  %v16762_v61 = vmov 0.0   ;;  %v13823_v23 = vpack.c.bf16 %v723_v42, %v720_v38  ;;  %v13833_v38 = vpack.c.bf16 %v728_v14, %v725_v21  ;;  %v737_v21 = vld [vmem:[#allocation5 + $0xf0] sm:$0xff]  ;;  %v740_v14 = vld [vmem:[#allocation5 + $0x108] sm:$0xff] }
 0x18f   :  { %16761 = vst [vmem:[#allocation100_spill] sm:$0xff] %v13819_v11 }
 0x190   :  { %16758 = vst [vmem:[#allocation97_spill] sm:$0xff] %v13807_v58  ;;  %12364 = vtanh.f32 %v13807_v58  ;;  %16763 = vst [vmem:[#allocation101_spill] sm:$0xff] %v13823_v23 }
 0x191   :  { %16766 = vst [vmem:[#allocation104_spill] sm:$0xff] %v13833_v38 }
 0x19a   :  { %v12365_v56 = vpop.eup %12364 }
 0x19b   :  { %v13812_v5 = vmul.f32 %v12365_v56, %v12363_v46  ;;  %v13827_v46 = vpack.c.bf16 %v722_v28, %v719_v60  ;;  %v13830_v56 = vpack.c.bf16 %v729_v54, %v726_v0  ;;  %v731_v60 = vld [vmem:[#allocation5 + $0xc0] sm:$0xff]  ;;  %v734_v28 = vld [vmem:[#allocation5 + $0xd8] sm:$0xff] }
 0x19c   :  { %v13840_v0 = vpack.c.bf16 %v734_v28, %v731_v60  ;;  %v738_v54 = vld [vmem:[#allocation5 + $0xf8] sm:$0xff]  ;;  %v743_v60 = vld [vmem:[#allocation5 + $0x120] sm:$0xff] }
 0x19d   :  { %606 = vmatmul.mubr.f32.vlgmr.msra.gmra.mrb[2].mxu0 %v13812_v5  ;;  %677 = vmatmul.mubr.f32.vlgmr.msra.gmra.mrb[2].mxu1 %v13812_v5  ;;  %16764 = vst [vmem:[#allocation102_spill] sm:$0xff] %v13827_v46  ;;  %16765 = vst [vmem:[#allocation103_spill] sm:$0xff] %v13830_v56  ;;  %v746_v28 = vld [vmem:[#allocation5 + $0x138] sm:$0xff] }
 0x19e   :  { %9048 = vmatpush1.bf16.msra.mxu0 %v13810_v6  ;;  %884 = vmatprep.mubr.f32.mxu0 %v16762_v61  ;;  %v732_v6 = vld [vmem:[#allocation5 + $0xc8] sm:$0xff]  ;;  %16768 = vst [vmem:[#allocation106_spill] sm:$0xff] %v13840_v0 }
 0x19f   :  { %9050 = vmatprep.subr.bf16.mxu0 %v13814_v24  ;;  %955 = vmatprep.mubr.f32.mxu1 %v16762_v61  ;;  %v735_v24 = vld [vmem:[#allocation5 + $0xe0] sm:$0xff] }
 0x1a0   :  { %v13836_v42 = vpack.c.bf16 %v735_v24, %v732_v6  ;;  %v744_v6 = vld [vmem:[#allocation5 + $0x128] sm:$0xff]  ;;  %v747_v24 = vld [vmem:[#allocation5 + $0x140] sm:$0xff] }
 0x1a2   :  { %9052 = vmatpush1.bf16.msra.mxu0 %v13819_v11  ;;  %16767 = vst [vmem:[#allocation105_spill] sm:$0xff] %v13836_v42 }
 0x1a3   :  { %9054 = vmatprep.subr.bf16.mxu0 %v13823_v23  ;;  %v741_v23 = vld [vmem:[#allocation5 + $0x110] sm:$0xff] }
 0x1a4   :  { %v13843_v11 = vpack.c.bf16 %v741_v23, %v738_v54  ;;  %v750_v23 = vld [vmem:[#allocation5 + $0x158] sm:$0xff]  ;;  %v753_v54 = vld [vmem:[#allocation5 + $0x170] sm:$0xff] }
 0x1a6   :  { %9056 = vmatpush1.bf16.msra.mxu0 %v13827_v46  ;;  %16769 = vst [vmem:[#allocation107_spill] sm:$0xff] %v13843_v11  ;;  %v13845_v46 = vpack.c.bf16 %v740_v14, %v737_v21  ;;  %v13855_v21 = vpack.c.bf16 %v753_v54, %v750_v23  ;;  %v749_v14 = vld [vmem:[#allocation5 + $0x150] sm:$0xff]  ;;  %v755_v23 = vld [vmem:[#allocation5 + $0x180] sm:$0xff]  ;;  %v758_v54 = vld [vmem:[#allocation5 + $0x198] sm:$0xff] }
 0x1a7   :  { %9058 = vmatprep.subr.bf16.mxu0 %v13830_v56  ;;  %v712_v56 = vld [vmem:[#allocation5 + $0x28] sm:$0xff] }
 0x1a8   :  { %16770 = vst [vmem:[#allocation108_spill] sm:$0xff] %v13845_v46  ;;  %16773 = vst [vmem:[#allocation111_spill] sm:$0xff] %v13855_v21 }
 0x1aa   :  { %9060 = vmatpush1.bf16.msra.mxu0 %v13833_v38  ;;  %v13851_v38 = vpack.c.bf16 %v746_v28, %v743_v60  ;;  %v756_v28 = vld [vmem:[#allocation5 + $0x188] sm:$0xff] }
 0x1ab   :  { %9062 = vmatprep.subr.bf16.mxu0 %v13836_v42  ;;  %v13849_v42 = vpack.c.bf16 %v747_v24, %v744_v6  ;;  %v757_v6 = vld [vmem:[#allocation5 + $0x190] sm:$0xff]  ;;  %v760_v24 = vld [vmem:[#allocation5 + $0x1a8] sm:$0xff] }
 0x1ac   :  { %16772 = vst [vmem:[#allocation110_spill] sm:$0xff] %v13851_v38  ;;  %v13861_v60 = vpack.c.bf16 %v760_v24, %v757_v6  ;;  %v765_v24 = vld [vmem:[#allocation5 + $0x1d0] sm:$0xff] }
 0x1ad   :  { %16771 = vst [vmem:[#allocation109_spill] sm:$0xff] %v13849_v42 }
 0x1ae   :  { %9064 = vmatpush1.bf16.msra.mxu0 %v13840_v0  ;;  %16775 = vst [vmem:[#allocation113_spill] sm:$0xff] %v13861_v60  ;;  %9110 = vmatprep.subr.bf16.mxu1 %v13861_v60  ;;  %v718_v60 = vld [vmem:[#allocation5 + $0x58] sm:$0xff] }
 0x1af   :  { %9066 = vmatprep.subr.bf16.mxu0 %v13843_v11  ;;  %v752_v11 = vld [vmem:[#allocation5 + $0x168] sm:$0xff] }
 0x1b0   :  { %v13857_v0 = vpack.c.bf16 %v752_v11, %v749_v14  ;;  %v13868_v14 = vpack.c.bf16 %v758_v54, %v755_v23 }
 0x1b2   :  { %9068 = vmatpush1.bf16.msra.mxu0 %v13845_v46  ;;  %16774 = vst [vmem:[#allocation112_spill] sm:$0xff] %v13857_v0  ;;  %v709_v46 = vld [vmem:[#allocation5 + $0x10] sm:$0xff]  ;;  %16778 = vst [vmem:[#allocation116_spill] sm:$0xff] %v13868_v14 }
 0x1b3   :  { %9070 = vmatprep.subr.bf16.mxu0 %v13849_v42  ;;  %v759_v42 = vld [vmem:[#allocation5 + $0x1a0] sm:$0xff]  ;;  %v13866_v11 = vpack.c.bf16 %v712_v56, %v709_v46  ;;  %v761_v46 = vld [vmem:[#allocation5 + $0x1b0] sm:$0xff]  ;;  %v764_v56 = vld [vmem:[#allocation5 + $0x1c8] sm:$0xff] }
 0x1b4   :  { %v13880_v54 = vpack.c.bf16 %v764_v56, %v761_v46 }
 0x1b5   :  { %16777 = vst [vmem:[#allocation115_spill] sm:$0xff] %v13866_v11  ;;  %9112 = vmatpush3.bf16.msra.mxu1 %v13866_v11 }
 0x1b6   :  { %9072 = vmatpush1.bf16.msra.mxu0 %v13851_v38  ;;  %v13863_v38 = vpack.c.bf16 %v759_v42, %v756_v28  ;;  %v762_v42 = vld [vmem:[#allocation5 + $0x1b8] sm:$0xff]  ;;  %v715_v28 = vld [vmem:[#allocation5 + $0x40] sm:$0xff]  ;;  %16782 = vst [vmem:[#allocation120_spill] sm:$0xff] %v13880_v54 }
 0x1b7   :  { %9074 = vmatprep.subr.bf16.mxu0 %v13855_v21  ;;  %v763_v21 = vld [vmem:[#allocation5 + $0x1c0] sm:$0xff]  ;;  %v13875_v58 = vpack.c.bf16 %v765_v24, %v762_v42  ;;  %v13878_v23 = vpack.c.bf16 %v718_v60, %v715_v28  ;;  %v721_v24 = vld [vmem:[#allocation5 + $0x70] sm:$0xff]  ;;  %v770_v28 = vld [vmem:[#allocation5 + $0x1f8] sm:$0xff] }
 0x1b8   :  { %16776 = vst [vmem:[#allocation114_spill] sm:$0xff] %v13863_v38  ;;  %v771_v42 = vld [vmem:[#allocation5 + $0x200] sm:$0xff] }
 0x1b9   :  { %16780 = vst [vmem:[#allocation118_spill] sm:$0xff] %v13875_v58  ;;  %16781 = vst [vmem:[#allocation119_spill] sm:$0xff] %v13878_v23  ;;  %v767_v60 = vld [vmem:[#allocation5 + $0x1e0] sm:$0xff] }
 0x1ba   :  { %9076 = vmatpush1.bf16.msra.mxu0 %v13857_v0  ;;  %v766_v0 = vld [vmem:[#allocation5 + $0x1d8] sm:$0xff]  ;;  %v13892_v56 = vpack.c.bf16 %v770_v28, %v767_v60 }
 0x1bb   :  { %9078 = vmatprep.subr.bf16.mxu0 %v13863_v38  ;;  %v13873_v6 = vpack.c.bf16 %v766_v0, %v763_v21  ;;  %v769_v38 = vld [vmem:[#allocation5 + $0x1f0] sm:$0xff]  ;;  %v768_v21 = vld [vmem:[#allocation5 + $0x1e8] sm:$0xff] }
 0x1bc   :  { %v13887_v11 = vpack.c.bf16 %v771_v42, %v768_v21  ;;  %16786 = vst [vmem:[#allocation124_spill] sm:$0xff] %v13892_v56  ;;  %v777_v21 = vld [vmem:[#allocation5 + $0x230] sm:$0xff]  ;;  %v727_v42 = vld [vmem:[#allocation5 + $0xa0] sm:$0xff] }
 0x1bd   :  { %16779 = vst [vmem:[#allocation117_spill] sm:$0xff] %v13873_v6  ;;  %9114 = vmatprep.subr.bf16.mxu1 %v13873_v6  ;;  %v724_v6 = vld [vmem:[#allocation5 + $0x88] sm:$0xff] }
 0x1be   :  { %9080 = vmatpush1.bf16.msra.mxu0 %v13868_v14  ;;  %v772_v14 = vld [vmem:[#allocation5 + $0x208] sm:$0xff]  ;;  %9116 = vmatpush3.bf16.msra.mxu1 %v13878_v23  ;;  %16784 = vst [vmem:[#allocation122_spill] sm:$0xff] %v13887_v11  ;;  %v13890_v46 = vpack.c.bf16 %v724_v6, %v721_v24  ;;  %v773_v6 = vld [vmem:[#allocation5 + $0x210] sm:$0xff] }
 0x1bf   :  { %9082 = vmatprep.subr.bf16.mxu0 %v13875_v58  ;;  %v13885_v0 = vpack.c.bf16 %v772_v14, %v769_v38  ;;  %v775_v58 = vld [vmem:[#allocation5 + $0x220] sm:$0xff]  ;;  %v774_v14 = vld [vmem:[#allocation5 + $0x218] sm:$0xff]  ;;  %v776_v24 = vld [vmem:[#allocation5 + $0x228] sm:$0xff] }
 0x1c0   :  { %16785 = vst [vmem:[#allocation123_spill] sm:$0xff] %v13890_v46  ;;  %v13899_v23 = vpack.c.bf16 %v777_v21, %v774_v14  ;;  %v13904_v28 = vpack.c.bf16 %v776_v24, %v773_v6  ;;  %v783_v14 = vld [vmem:[#allocation5 + $0x260] sm:$0xff]  ;;  %v733_v21 = vld [vmem:[#allocation5 + $0xd0] sm:$0xff] }
 0x1c1   :  { %16783 = vst [vmem:[#allocation121_spill] sm:$0xff] %v13885_v0  ;;  %9118 = vmatprep.subr.bf16.mxu1 %v13885_v0  ;;  %v730_v0 = vld [vmem:[#allocation5 + $0xb8] sm:$0xff] }
 0x1c2   :  { %9084 = vmatpush1.bf16.msra.mxu0 %v13880_v54  ;;  %v778_v54 = vld [vmem:[#allocation5 + $0x238] sm:$0xff]  ;;  %9120 = vmatpush3.bf16.msra.mxu1 %v13890_v46  ;;  %16788 = vst [vmem:[#allocation126_spill] sm:$0xff] %v13899_v23  ;;  %v13902_v60 = vpack.c.bf16 %v730_v0, %v727_v42  ;;  %16790 = vst [vmem:[#allocation128_spill] sm:$0xff] %v13904_v28  ;;  %v779_v0 = vld [vmem:[#allocation5 + $0x240] sm:$0xff] }
 0x1c3   :  { %9086 = vmatprep.subr.bf16.mxu0 %v13887_v11  ;;  %v13897_v38 = vpack.c.bf16 %v778_v54, %v775_v58  ;;  %v781_v11 = vld [vmem:[#allocation5 + $0x250] sm:$0xff]  ;;  %v780_v54 = vld [vmem:[#allocation5 + $0x248] sm:$0xff]  ;;  %v782_v42 = vld [vmem:[#allocation5 + $0x258] sm:$0xff] }
 0x1c4   :  { %16789 = vst [vmem:[#allocation127_spill] sm:$0xff] %v13902_v60  ;;  %v13911_v46 = vpack.c.bf16 %v783_v14, %v780_v54  ;;  %v13916_v24 = vpack.c.bf16 %v782_v42, %v779_v0  ;;  %v789_v54 = vld [vmem:[#allocation5 + $0x290] sm:$0xff]  ;;  %v739_v14 = vld [vmem:[#allocation5 + $0x100] sm:$0xff] }
 0x1c5   :  { %16787 = vst [vmem:[#allocation125_spill] sm:$0xff] %v13897_v38  ;;  %9122 = vmatprep.subr.bf16.mxu1 %v13897_v38  ;;  %v736_v38 = vld [vmem:[#allocation5 + $0xe8] sm:$0xff] }
 0x1c6   :  { %9088 = vmatpush1.bf16.msra.mxu0 %v13892_v56  ;;  %v784_v56 = vld [vmem:[#allocation5 + $0x268] sm:$0xff]  ;;  %9124 = vmatpush3.bf16.msra.mxu1 %v13902_v60  ;;  %16792 = vst [vmem:[#allocation130_spill] sm:$0xff] %v13911_v46  ;;  %v13914_v6 = vpack.c.bf16 %v736_v38, %v733_v21  ;;  %16794 = vst [vmem:[#allocation132_spill] sm:$0xff] %v13916_v24  ;;  %v785_v38 = vld [vmem:[#allocation5 + $0x270] sm:$0xff] }
 0x1c7   :  { %9090 = vmatprep.subr.bf16.mxu0 %v13899_v23  ;;  %v13909_v58 = vpack.c.bf16 %v784_v56, %v781_v11  ;;  %v787_v23 = vld [vmem:[#allocation5 + $0x280] sm:$0xff]  ;;  %v786_v56 = vld [vmem:[#allocation5 + $0x278] sm:$0xff]  ;;  %v788_v21 = vld [vmem:[#allocation5 + $0x288] sm:$0xff] }
 0x1c8   :  { %16793 = vst [vmem:[#allocation131_spill] sm:$0xff] %v13914_v6  ;;  %v13923_v60 = vpack.c.bf16 %v789_v54, %v786_v56  ;;  %v13928_v42 = vpack.c.bf16 %v788_v21, %v785_v38  ;;  %v748_v56 = vld [vmem:[#allocation5 + $0x148] sm:$0xff]  ;;  %v794_v38 = vld [vmem:[#allocation5 + $0x2b8] sm:$0xff]  ;;  %v799_v21 = vld [vmem:[#allocation5 + $0x2e0] sm:$0xff] }
 0x1c9   :  { %16791 = vst [vmem:[#allocation129_spill] sm:$0xff] %v13909_v58  ;;  %9126 = vmatprep.subr.bf16.mxu1 %v13909_v58  ;;  %v742_v58 = vld [vmem:[#allocation5 + $0x118] sm:$0xff] }
 0x1ca   :  { %9092 = vmatpush1.bf16.msra.mxu0 %v13904_v28  ;;  %v790_v28 = vld [vmem:[#allocation5 + $0x298] sm:$0xff]  ;;  %9128 = vmatpush3.bf16.msra.mxu1 %v13914_v6  ;;  %16796 = vst [vmem:[#allocation134_spill] sm:$0xff] %v13923_v60  ;;  %v13926_v0 = vpack.c.bf16 %v742_v58, %v739_v14  ;;  %16798 = vst [vmem:[#allocation136_spill] sm:$0xff] %v13928_v42  ;;  %v796_v6 = vld [vmem:[#allocation5 + $0x2c8] sm:$0xff] }
 0x1cb   :  { %9094 = vmatprep.subr.bf16.mxu0 %v13911_v46  ;;  %v13921_v11 = vpack.c.bf16 %v790_v28, %v787_v23  ;;  %v793_v46 = vld [vmem:[#allocation5 + $0x2b0] sm:$0xff]  ;;  %v795_v28 = vld [vmem:[#allocation5 + $0x2c0] sm:$0xff] }
 0x1cc   :  { %16797 = vst [vmem:[#allocation135_spill] sm:$0xff] %v13926_v0  ;;  %v13931_v23 = vpack.c.bf16 %v796_v6, %v793_v46  ;;  %v13935_v54 = vpack.c.bf16 %v795_v28, %v792_v3  ;;  %v791_v14 = vld [vmem:[#allocation5 + $0x2a0] sm:$0xff]  ;;  %v802_v46 = vld [vmem:[#allocation5 + $0x2f8] sm:$0xff] }
 0x1cd   :  { %16795 = vst [vmem:[#allocation133_spill] sm:$0xff] %v13921_v11  ;;  %9130 = vmatprep.subr.bf16.mxu1 %v13921_v11  ;;  %v13940_v11 = vpack.c.bf16 %v794_v38, %v791_v14  ;;  %v798_v6 = vld [vmem:[#allocation5 + $0x2d8] sm:$0xff]  ;;  %v13943_v47 = vpack.c.bf16 %v802_v46, %v799_v21  ;;  %v751_v3 = vld [vmem:[#allocation5 + $0x160] sm:$0xff]  ;;  %v1074_v38 = vld [vmem:[#allocation8 + $0x8] sm:$0xff] }
 0x1ce   :  { %9096 = vmatpush1.bf16.msra.mxu0 %v13916_v24  ;;  %16799 = vst [vmem:[#allocation137_spill] sm:$0xff] %v13931_v23  ;;  %v745_v24 = vld [vmem:[#allocation5 + $0x130] sm:$0xff]  ;;  %9132 = vmatpush3.bf16.msra.mxu1 %v13926_v0  ;;  %16800 = vst [vmem:[#allocation138_spill] sm:$0xff] %v13935_v54  ;;  %v754_v28 = vld [vmem:[#allocation5 + $0x178] sm:$0xff] }
 0x1cf   :  { %9098 = vmatprep.subr.bf16.mxu0 %v13923_v60  ;;  %v13937_v58 = vpack.c.bf16 %v748_v56, %v745_v24  ;;  %9134 = vmatprep.subr.bf16.mxu1 %v13931_v23  ;;  %16802 = vst [vmem:[#allocation140_spill] sm:$0xff] %v13940_v11  ;;  %v801_v60 = vld [vmem:[#allocation5 + $0x2f0] sm:$0xff]  ;;  %16803 = vst [vmem:[#allocation141_spill] sm:$0xff] %v13943_v47  ;;  %v800_v56 = vld [vmem:[#allocation5 + $0x2e8] sm:$0xff] }
 0x1d0   :  { %v13945_v0 = vpack.c.bf16 %v801_v60, %v798_v6  ;;  %v797_v24 = vld [vmem:[#allocation5 + $0x2d0] sm:$0xff]  ;;  %v16462_v60 = vmov 0.0|0.0   ;;  %v1077_v21 = vld [vmem:[#allocation8 + $0x20] sm:$0xff]  ;;  %v13962_v6 = vsub.s32 0, %v13797_v30 }
 0x1d1   :  { %16801 = vst [vmem:[#allocation139_spill] sm:$0xff] %v13937_v58  ;;  %v13951_v14 = vpack.c.bf16 %v800_v56, %v797_v24  ;;  %v13958_v46 = vpack.c.bf16 %v1077_v21, %v1074_v38 }
 0x1d2   :  { %9100 = vmatpush1.bf16.msra.mxu0 %v13928_v42  ;;  %16804 = vst [vmem:[#allocation142_spill] sm:$0xff] %v13945_v0  ;;  %9136 = vmatpush3.bf16.msra.mxu1 %v13937_v58  ;;  %v13949_v42 = vpack.c.bf16 %v754_v28, %v751_v3  ;;  %16808 = vst [vmem:[#allocation146_spill] sm:$0xff] %v13962_v6  ;;  %v519_v3 = vld [vmem:[%s16261_s3] sm:$0xf]  ;;  %v13968_v28 = vsub.s32 1, %v13797_v30  ;;  %v13982_v58 = vsub.s32 2, %v13797_v30 }
 0x1d3   :  { %9102 = vmatprep.subr.bf16.mxu0 %v13935_v54  ;;  %16806 = vst [vmem:[#allocation144_spill] sm:$0xff] %v13951_v14  ;;  %9138 = vmatprep.subr.bf16.mxu1 %v13943_v47  ;;  %16807 = vst [vmem:[#allocation145_spill] sm:$0xff] %v13958_v46  ;;  %v13971_v24 = vrot.slane %v519_v3, %v13962_v6 }
 0x1d4   :  { %16805 = vst [vmem:[#allocation143_spill] sm:$0xff] %v13949_v42  ;;  %16809 = vst [vmem:[#allocation147_spill] sm:$0xff] %v13968_v28  ;;  %v13974_v56 = vrot.slane %v519_v3, %v13968_v28  ;;  %v13986_v43 = vrot.slane %v519_v3, %v13982_v58 }
 0x1d5   :  { %16810 = vst [vmem:[#allocation148_spill] sm:$0xff] %v13971_v24  ;;  %16813 = vst [vmem:[#allocation151_spill] sm:$0xff] %v13982_v58 }
 0x1d6   :  { %9104 = vmatpush1.bf16.msra.mxu0 %v13940_v11  ;;  %9140 = vmatpush3.bf16.msra.mxu1 %v13949_v42  ;;  %16811 = vst [vmem:[#allocation149_spill] sm:$0xff] %v13974_v56  ;;  %16814 = vst [vmem:[#allocation152_spill] sm:$0xff] %v13986_v43 }
 0x1d7   :  { %9106 = vmatprep.subr.bf16.mxu0 %v13945_v0  ;;  %9141 = vmatprep.subr.bf16.mxu1 %v16462_v60  ;;  %v535_v60 = vsub.s32 3, %v13797_v30 }
 0x1d9   :  { %v13979_v47 = vrot.slane %v519_v3, %v535_v60 }
 0x1da   :  { %9108 = vmatpush1.bf16.msra.mxu0 %v13951_v14 }
 0x1db   :  { %9166 = vmatprep.subr.bf16.mxu0 %v13958_v46  ;;  %16812 = vst [vmem:[#allocation150_spill] sm:$0xff] %v13979_v47 }
 0x270   :  { %v607_v38 = vpop.f32.mrb[2].mxu0  ;;  %v678_v21 = vpop.f32.mrb[2].mxu1 }
 0x271   :  { %v608_v46 = vadd.f32 %v607_v38, %v13971_v24  ;;  %v609_v14 = vpop.f32.mrb[3].mxu0  ;;  %v680_v0 = vpop.f32.mrb[3].mxu1  ;;  %v679_v38 = vadd.f32 %v678_v21, %v13986_v43  ;;  %v962_v21 = vld [vmem:[#allocation7 + $0x8] sm:$0xff] }
 0x272   :  { %v610_v11 = vadd.f32 %v609_v14, %v13974_v56  ;;  %v681_v23 = vadd.f32 %v680_v0, %v13979_v47 }
 0x273   :  { %v7322_v54 = vmul.f32 -1.442695, %v608_v46 }
 0x274   :  { %v7323_v42 = vmul.f32 -1.442695, %v610_v11  ;;  %v7324_v36 = vmul.f32 -1.442695, %v681_v23  ;;  %v961_v23 = vld [vmem:[#allocation7] sm:$0xff] }
 0x275   :  { %12366 = vpow2.f32 %v7322_v54  ;;  %v13992_v43 = vpack.c.bf16 %v962_v21, %v961_v23  ;;  %v16820_v21 = vmov 0.0|0.0  }
 0x276   :  { %12368 = vpow2.f32 %v7323_v42 }
 0x277   :  { %12370 = vpow2.f32 %v7324_v36  ;;  %v1076_v36 = vld [vmem:[#allocation8 + $0x18] sm:$0xff]  ;;  %16816 = vst [vmem:[#allocation154_spill] sm:$0xff] %v13992_v43 }
 0x278   :  { %12372 = vtanh.f32 %v679_v38 }
 0x27f   :  { %v12367_v24 = vpop.eup %12366 }
 0x280   :  { %v12369_v32 = vpop.eup %12368  ;;  %v686_v14 = vadd.f32 1.0, %v12367_v24  ;;  %v1073_v24 = vld [vmem:[#allocation8] sm:$0xff] }
 0x281   :  { %v692_v11 = vadd.f32 1.0, %v12369_v32  ;;  %v12371_v54 = vpop.eup %12370  ;;  %v1080_v32 = vld [vmem:[#allocation8 + $0x38] sm:$0xff] }
 0x282   :  { %12374 = vrcp.f32 %v686_v14  ;;  %v12373_v30 = vpop.eup %12372  ;;  %v699_v0 = vadd.f32 1.0, %v12371_v54  ;;  %v1083_v14 = vld [vmem:[#allocation8 + $0x50] sm:$0xff]  ;;  %v964_v54 = vld [vmem:[#allocation7 + $0x18] sm:$0xff] }
 0x283   :  { %12376 = vrcp.f32 %v692_v11 }
 0x284   :  { %12378 = vrcp.f32 %v699_v0  ;;  %v1086_v0 = vld [vmem:[#allocation8 + $0x68] sm:$0xff] }
 0x28c   :  { %v12375_v60 = vpop.eup %12374 }
 0x28d   :  { %v12377_v42 = vpop.eup %12376  ;;  %v703_v46 = vmul.f32 %v12375_v60, %v12373_v30  ;;  %v963_v30 = vld [vmem:[#allocation7 + $0x10] sm:$0xff]  ;;  %v13996_v60 = vpack.c.bf16 %v1076_v36, %v1073_v24  ;;  %v965_v24 = vld [vmem:[#allocation7 + $0x20] sm:$0xff]  ;;  %v966_v36 = vld [vmem:[#allocation7 + $0x28] sm:$0xff] }
 0x28e   :  { %v702_v47 = vmul.f32 0.0, %v12377_v42  ;;  %v12379_v38 = vpop.eup %12378  ;;  %v1079_v42 = vld [vmem:[#allocation8 + $0x30] sm:$0xff]  ;;  %v14003_v23 = vpack.c.bf16 %v964_v54, %v963_v30  ;;  %v14016_v30 = vpack.c.bf16 %v966_v36, %v965_v24 }
 0x28f   :  { %16817 = vst [vmem:[#allocation155_spill] sm:$0xff] %v13996_v60  ;;  %v967_v54 = vld [vmem:[#allocation7 + $0x30] sm:$0xff] }
 0x290   :  { %v13989_v3 = vadd.f32 %v703_v46, %v702_v47  ;;  %v13998_v47 = vpack.c.bf16 %v1083_v14, %v1080_v32  ;;  %v1082_v46 = vld [vmem:[#allocation8 + $0x48] sm:$0xff]  ;;  %16819 = vst [vmem:[#allocation157_spill] sm:$0xff] %v14003_v23  ;;  %v1085_v14 = vld [vmem:[#allocation8 + $0x60] sm:$0xff]  ;;  %16823 = vst [vmem:[#allocation160_spill] sm:$0xff] %v14016_v30 }
 0x291   :  { %v971_v36 = vld [vmem:[#allocation7 + $0x50] sm:$0xff] }
 0x292   :  { %16815 = vst [vmem:[#allocation153_spill] sm:$0xff] %v13989_v3  ;;  %12380 = vtanh.f32 %v13989_v3  ;;  %16818 = vst [vmem:[#allocation156_spill] sm:$0xff] %v13998_v47  ;;  %v1089_v3 = vld [vmem:[#allocation8 + $0x80] sm:$0xff] }
 0x293   :  { %v14012_v32 = vpack.c.bf16 %v1089_v3, %v1086_v0  ;;  %v970_v0 = vld [vmem:[#allocation7 + $0x48] sm:$0xff] }
 0x295   :  { %16822 = vst [vmem:[#allocation159_spill] sm:$0xff] %v14012_v32 }
 0x29c   :  { %v12381_v11 = vpop.eup %12380 }
 0x29d   :  { %v13994_v56 = vmul.f32 %v12381_v11, %v12379_v38  ;;  %v14009_v38 = vpack.c.bf16 %v1082_v46, %v1079_v42  ;;  %v1088_v11 = vld [vmem:[#allocation8 + $0x78] sm:$0xff]  ;;  %v969_v46 = vld [vmem:[#allocation7 + $0x40] sm:$0xff] }
 0x29e   :  { %v14020_v42 = vpack.c.bf16 %v1088_v11, %v1085_v14  ;;  %v14029_v24 = vpack.c.bf16 %v970_v0, %v969_v46  ;;  %v972_v14 = vld [vmem:[#allocation7 + $0x58] sm:$0xff]  ;;  %v975_v46 = vld [vmem:[#allocation7 + $0x70] sm:$0xff] }
 0x29f   :  { %885 = vmatmul.mubr.f32.vlgmr.msra.gmra.mrb[4].mxu0 %v13994_v56  ;;  %956 = vmatmul.mubr.f32.vlgmr.msra.gmra.mrb[4].mxu1 %v13994_v56  ;;  %16821 = vst [vmem:[#allocation158_spill] sm:$0xff] %v14009_v38  ;;  %v14033_v11 = vpack.c.bf16 %v972_v14, %v971_v36  ;;  %v976_v0 = vld [vmem:[#allocation7 + $0x78] sm:$0xff]  ;;  %v1095_v14 = vld [vmem:[#allocation8 + $0xb0] sm:$0xff] }
 0x2a0   :  { %9143 = vmatpush3.bf16.msra.mxu1 %v13992_v43  ;;  %8290 = vmatprep.mubr.msk.f32.mxu1 %vm12951_vm0, %v16762_v61  ;;  %v968_v43 = vld [vmem:[#allocation7 + $0x38] sm:$0xff]  ;;  %16824 = vst [vmem:[#allocation161_spill] sm:$0xff] %v14020_v42  ;;  %16826 = vst [vmem:[#allocation163_spill] sm:$0xff] %v14029_v24 }
 0x2a1   :  { %9144 = vmatprep.subr.bf16.mxu1 %v16820_v21  ;;  %9168 = vmatpush1.bf16.msra.mxu0 %v13996_v60  ;;  %v14024_v3 = vpack.c.bf16 %v968_v43, %v967_v54  ;;  %16827 = vst [vmem:[#allocation164_spill] sm:$0xff] %v14033_v11  ;;  %v973_v43 = vld [vmem:[#allocation7 + $0x60] sm:$0xff]  ;;  %v974_v54 = vld [vmem:[#allocation7 + $0x68] sm:$0xff]  ;;  %v1092_v36 = vld [vmem:[#allocation8 + $0x98] sm:$0xff] }
 0x2a2   :  { %9170 = vmatprep.subr.bf16.mxu0 %v13998_v47  ;;  %1250 = vmatprep.mubr.f32.mxu0 %v16762_v61  ;;  %v1078_v47 = vld [vmem:[#allocation8 + $0x28] sm:$0xff] }
 0x2a3   :  { %16825 = vst [vmem:[#allocation162_spill] sm:$0xff] %v14024_v3 }
 0x2a4   :  { %9146 = vmatpush3.bf16.msra.mxu1 %v14003_v23 }
 0x2a5   :  { %9147 = vmatprep.subr.bf16.mxu1 %v16820_v21  ;;  %9172 = vmatpush1.bf16.msra.mxu0 %v14009_v38 }
 0x2a6   :  { %9174 = vmatprep.subr.bf16.mxu0 %v14012_v32 }
 0x2a8   :  { %9149 = vmatpush3.bf16.msra.mxu1 %v14016_v30  ;;  %v14037_v30 = vpack.c.bf16 %v974_v54, %v973_v43  ;;  %v14047_v43 = vpack.c.bf16 %v1095_v14, %v1092_v36  ;;  %v1091_v54 = vld [vmem:[#allocation8 + $0x90] sm:$0xff]  ;;  %v1104_v36 = vld [vmem:[#allocation8 + $0xf8] sm:$0xff] }
 0x2a9   :  { %9150 = vmatprep.subr.bf16.mxu1 %v16820_v21  ;;  %9176 = vmatpush1.bf16.msra.mxu0 %v14020_v42  ;;  %v1100_v42 = vld [vmem:[#allocation8 + $0xd8] sm:$0xff]  ;;  %v1107_v14 = vld [vmem:[#allocation8 + $0x110] sm:$0xff] }
 0x2aa   :  { %16828 = vst [vmem:[#allocation165_spill] sm:$0xff] %v14037_v30  ;;  %16830 = vst [vmem:[#allocation167_spill] sm:$0xff] %v14047_v43  ;;  %9178 = vmatprep.subr.bf16.mxu0 %v14047_v43  ;;  %v1106_v43 = vld [vmem:[#allocation8 + $0x108] sm:$0xff] }
 0x2ac   :  { %9152 = vmatpush3.bf16.msra.mxu1 %v14024_v3  ;;  %v14041_v3 = vpack.c.bf16 %v976_v0, %v975_v46  ;;  %v1098_v46 = vld [vmem:[#allocation8 + $0xc8] sm:$0xff]  ;;  %v1101_v0 = vld [vmem:[#allocation8 + $0xe0] sm:$0xff] }
 0x2ad   :  { %9153 = vmatprep.subr.bf16.mxu1 %v16820_v21 }
 0x2ae   :  { %16829 = vst [vmem:[#allocation166_spill] sm:$0xff] %v14041_v3 }
 0x2b0   :  { %9155 = vmatpush3.bf16.msra.mxu1 %v14029_v24 }
 0x2b1   :  { %9156 = vmatprep.subr.bf16.mxu1 %v16820_v21 }
 0x2b4   :  { %9158 = vmatpush3.bf16.msra.mxu1 %v14033_v11  ;;  %v1094_v11 = vld [vmem:[#allocation8 + $0xa8] sm:$0xff] }
 0x2b5   :  { %9159 = vmatprep.subr.bf16.mxu1 %v16820_v21  ;;  %v14049_v24 = vpack.c.bf16 %v1094_v11, %v1091_v54  ;;  %v14059_v11 = vpack.c.bf16 %v1107_v14, %v1104_v36  ;;  %v1103_v54 = vld [vmem:[#allocation8 + $0xf0] sm:$0xff]  ;;  %v1116_v36 = vld [vmem:[#allocation8 + $0x158] sm:$0xff] }
 0x2b6   :  { %v14061_v38 = vpack.c.bf16 %v1106_v43, %v1103_v54  ;;  %v1119_v14 = vld [vmem:[#allocation8 + $0x170] sm:$0xff] }
 0x2b7   :  { %16831 = vst [vmem:[#allocation168_spill] sm:$0xff] %v14049_v24  ;;  %9180 = vmatpush1.bf16.msra.mxu0 %v14049_v24  ;;  %16834 = vst [vmem:[#allocation171_spill] sm:$0xff] %v14059_v11  ;;  %v14071_v43 = vpack.c.bf16 %v1119_v14, %v1116_v36  ;;  %v1115_v54 = vld [vmem:[#allocation8 + $0x150] sm:$0xff] }
 0x2b8   :  { %9161 = vmatpush3.bf16.msra.mxu1 %v14037_v30  ;;  %v14053_v30 = vpack.c.bf16 %v1101_v0, %v1098_v46  ;;  %16835 = vst [vmem:[#allocation172_spill] sm:$0xff] %v14061_v38  ;;  %v1110_v46 = vld [vmem:[#allocation8 + $0x128] sm:$0xff]  ;;  %v1113_v0 = vld [vmem:[#allocation8 + $0x140] sm:$0xff]  ;;  %v1075_v14 = vld [vmem:[#allocation8 + $0x10] sm:$0xff] }
 0x2b9   :  { %9162 = vmatprep.subr.bf16.mxu1 %v16820_v21  ;;  %16838 = vst [vmem:[#allocation175_spill] sm:$0xff] %v14071_v43 }
 0x2ba   :  { %16832 = vst [vmem:[#allocation169_spill] sm:$0xff] %v14053_v30  ;;  %9182 = vmatprep.subr.bf16.mxu0 %v14053_v30  ;;  %v1112_v30 = vld [vmem:[#allocation8 + $0x138] sm:$0xff] }
 0x2bc   :  { %9164 = vmatpush3.bf16.msra.mxu1 %v14041_v3  ;;  %v1097_v3 = vld [vmem:[#allocation8 + $0xc0] sm:$0xff] }
 0x2bd   :  { %v14055_v32 = vpack.c.bf16 %v1100_v42, %v1097_v3  ;;  %v14065_v42 = vpack.c.bf16 %v1113_v0, %v1110_v46  ;;  %v1109_v3 = vld [vmem:[#allocation8 + $0x120] sm:$0xff]  ;;  %v1122_v46 = vld [vmem:[#allocation8 + $0x188] sm:$0xff] }
 0x2be   :  { %v14067_v24 = vpack.c.bf16 %v1112_v30, %v1109_v3  ;;  %v1125_v0 = vld [vmem:[#allocation8 + $0x1a0] sm:$0xff]  ;;  %v1123_v30 = vld [vmem:[#allocation8 + $0x190] sm:$0xff] }
 0x2bf   :  { %8291 = vmatmul.mubr.f32.vlgmr.msra.gmra.mrb[6].mxu1 %v16762_v61  ;;  %16833 = vst [vmem:[#allocation170_spill] sm:$0xff] %v14055_v32  ;;  %9184 = vmatpush1.bf16.msra.mxu0 %v14055_v32  ;;  %16836 = vst [vmem:[#allocation173_spill] sm:$0xff] %v14065_v42  ;;  %v14077_v3 = vpack.c.bf16 %v1125_v0, %v1122_v46  ;;  %v1131_v46 = vld [vmem:[#allocation8 + $0x1d0] sm:$0xff]  ;;  %v1129_v0 = vld [vmem:[#allocation8 + $0x1c0] sm:$0xff] }
 0x2c0   :  { %1321 = vmatprep.mubr.f32.mxu1 %v16762_v61  ;;  %9186 = vmatprep.subr.bf16.mxu0 %v14059_v11  ;;  %16837 = vst [vmem:[#allocation174_spill] sm:$0xff] %v14067_v24  ;;  %v1118_v11 = vld [vmem:[#allocation8 + $0x168] sm:$0xff] }
 0x2c1   :  { %v14073_v32 = vpack.c.bf16 %v1118_v11, %v1115_v54  ;;  %16840 = vst [vmem:[#allocation177_spill] sm:$0xff] %v14077_v3  ;;  %v14084_v11 = vpack.c.bf16 %v1078_v47, %v1075_v14  ;;  %v1128_v54 = vld [vmem:[#allocation8 + $0x1b8] sm:$0xff]  ;;  %v1081_v47 = vld [vmem:[#allocation8 + $0x40] sm:$0xff] }
 0x2c2   :  { %v1084_v14 = vld [vmem:[#allocation8 + $0x58] sm:$0xff] }
 0x2c3   :  { %9188 = vmatpush1.bf16.msra.mxu0 %v14061_v38  ;;  %16839 = vst [vmem:[#allocation176_spill] sm:$0xff] %v14073_v32  ;;  %v1121_v38 = vld [vmem:[#allocation8 + $0x180] sm:$0xff]  ;;  %16843 = vst [vmem:[#allocation180_spill] sm:$0xff] %v14084_v11 }
 0x2c4   :  { %9190 = vmatprep.subr.bf16.mxu0 %v14065_v42  ;;  %v1126_v42 = vld [vmem:[#allocation8 + $0x1a8] sm:$0xff] }
 0x2c5   :  { %v14079_v23 = vpack.c.bf16 %v1126_v42, %v1123_v30  ;;  %v1132_v42 = vld [vmem:[#allocation8 + $0x1d8] sm:$0xff] }
 0x2c6   :  { %v14091_v30 = vpack.c.bf16 %v1132_v42, %v1129_v0  ;;  %v1138_v0 = vld [vmem:[#allocation8 + $0x208] sm:$0xff]  ;;  %v1133_v42 = vld [vmem:[#allocation8 + $0x1e0] sm:$0xff] }
 0x2c7   :  { %9192 = vmatpush1.bf16.msra.mxu0 %v14067_v24  ;;  %v1124_v24 = vld [vmem:[#allocation8 + $0x198] sm:$0xff]  ;;  %16841 = vst [vmem:[#allocation178_spill] sm:$0xff] %v14079_v23  ;;  %9230 = vmatprep.subr.bf16.mxu1 %v14079_v23 }
 0x2c8   :  { %9194 = vmatprep.subr.bf16.mxu0 %v14071_v43  ;;  %v14081_v36 = vpack.c.bf16 %v1124_v24, %v1121_v38  ;;  %9232 = vmatpush3.bf16.msra.mxu1 %v14084_v11  ;;  %v1127_v38 = vld [vmem:[#allocation8 + $0x1b0] sm:$0xff]  ;;  %v1130_v24 = vld [vmem:[#allocation8 + $0x1c8] sm:$0xff]  ;;  %16845 = vst [vmem:[#allocation182_spill] sm:$0xff] %v14091_v30 }
 0x2c9   :  { %v14093_v43 = vpack.c.bf16 %v1130_v24, %v1127_v38  ;;  %9234 = vmatprep.subr.bf16.mxu1 %v14091_v30  ;;  %v1136_v38 = vld [vmem:[#allocation8 + $0x1f8] sm:$0xff]  ;;  %v1093_v30 = vld [vmem:[#allocation8 + $0xa0] sm:$0xff] }
 0x2ca   :  { %16842 = vst [vmem:[#allocation179_spill] sm:$0xff] %v14081_v36  ;;  %v14105_v23 = vpack.c.bf16 %v1136_v38, %v1133_v42  ;;  %v1139_v42 = vld [vmem:[#allocation8 + $0x210] sm:$0xff] }
 0x2cb   :  { %9196 = vmatpush1.bf16.msra.mxu0 %v14073_v32  ;;  %v14089_v32 = vpack.c.bf16 %v1131_v46, %v1128_v54  ;;  %16846 = vst [vmem:[#allocation183_spill] sm:$0xff] %v14093_v43  ;;  %v1137_v54 = vld [vmem:[#allocation8 + $0x200] sm:$0xff]  ;;  %v1135_v46 = vld [vmem:[#allocation8 + $0x1f0] sm:$0xff] }
 0x2cc   :  { %9198 = vmatprep.subr.bf16.mxu0 %v14077_v3  ;;  %v14096_v3 = vpack.c.bf16 %v1084_v14, %v1081_v47  ;;  %v14103_v24 = vpack.c.bf16 %v1138_v0, %v1135_v46  ;;  %16850 = vst [vmem:[#allocation187_spill] sm:$0xff] %v14105_v23  ;;  %v1087_v47 = vld [vmem:[#allocation8 + $0x70] sm:$0xff]  ;;  %v1090_v14 = vld [vmem:[#allocation8 + $0x88] sm:$0xff]  ;;  %v1141_v46 = vld [vmem:[#allocation8 + $0x220] sm:$0xff] }
 0x2cd   :  { %16844 = vst [vmem:[#allocation181_spill] sm:$0xff] %v14089_v32  ;;  %v1144_v0 = vld [vmem:[#allocation8 + $0x238] sm:$0xff] }
 0x2ce   :  { %16847 = vst [vmem:[#allocation184_spill] sm:$0xff] %v14096_v3  ;;  %9236 = vmatpush3.bf16.msra.mxu1 %v14096_v3  ;;  %16849 = vst [vmem:[#allocation186_spill] sm:$0xff] %v14103_v24  ;;  %v14115_v38 = vpack.c.bf16 %v1144_v0, %v1141_v46  ;;  %v1142_v3 = vld [vmem:[#allocation8 + $0x228] sm:$0xff]  ;;  %v1145_v0 = vld [vmem:[#allocation8 + $0x240] sm:$0xff] }
 0x2cf   :  { %9200 = vmatpush1.bf16.msra.mxu0 %v14081_v36  ;;  %v1134_v36 = vld [vmem:[#allocation8 + $0x1e8] sm:$0xff]  ;;  %9238 = vmatprep.subr.bf16.mxu1 %v14103_v24  ;;  %v1148_v24 = vld [vmem:[#allocation8 + $0x258] sm:$0xff] }
 0x2d0   :  { %9202 = vmatprep.subr.bf16.mxu0 %v14089_v32  ;;  %v14101_v11 = vpack.c.bf16 %v1137_v54, %v1134_v36  ;;  %v14108_v32 = vpack.c.bf16 %v1090_v14, %v1087_v47  ;;  %v1143_v36 = vld [vmem:[#allocation8 + $0x230] sm:$0xff]  ;;  %16853 = vst [vmem:[#allocation190_spill] sm:$0xff] %v14115_v38  ;;  %v14118_v47 = vpack.c.bf16 %v1142_v3, %v1139_v42  ;;  %v1150_v46 = vld [vmem:[#allocation8 + $0x268] sm:$0xff] }
 0x2d1   :  { %v14129_v3 = vpack.c.bf16 %v1148_v24, %v1145_v0  ;;  %v1151_v24 = vld [vmem:[#allocation8 + $0x270] sm:$0xff] }
 0x2d2   :  { %16848 = vst [vmem:[#allocation185_spill] sm:$0xff] %v14101_v11  ;;  %16851 = vst [vmem:[#allocation188_spill] sm:$0xff] %v14108_v32  ;;  %9240 = vmatpush3.bf16.msra.mxu1 %v14108_v32  ;;  %v1149_v32 = vld [vmem:[#allocation8 + $0x260] sm:$0xff] }
 0x2d3   :  { %9204 = vmatpush1.bf16.msra.mxu0 %v14093_v43  ;;  %v1140_v43 = vld [vmem:[#allocation8 + $0x218] sm:$0xff]  ;;  %16854 = vst [vmem:[#allocation191_spill] sm:$0xff] %v14118_v47  ;;  %9242 = vmatprep.subr.bf16.mxu1 %v14115_v38  ;;  %16858 = vst [vmem:[#allocation195_spill] sm:$0xff] %v14129_v3  ;;  %v1328_v38 = vld [vmem:[#allocation10 + $0x8] sm:$0xff] }
 0x2d4   :  { %9206 = vmatprep.subr.bf16.mxu0 %v14101_v11  ;;  %v14113_v54 = vpack.c.bf16 %v1143_v36, %v1140_v43  ;;  %v1096_v11 = vld [vmem:[#allocation8 + $0xb8] sm:$0xff]  ;;  %v1147_v43 = vld [vmem:[#allocation8 + $0x250] sm:$0xff] }
 0x2d5   :  { %v14120_v14 = vpack.c.bf16 %v1096_v11, %v1093_v30  ;;  %v14127_v60 = vpack.c.bf16 %v1150_v46, %v1147_v43  ;;  %v1099_v11 = vld [vmem:[#allocation8 + $0xd0] sm:$0xff]  ;;  %v1102_v30 = vld [vmem:[#allocation8 + $0xe8] sm:$0xff] }
 0x2d6   :  { %16852 = vst [vmem:[#allocation189_spill] sm:$0xff] %v14113_v54  ;;  %v14132_v42 = vpack.c.bf16 %v1102_v30, %v1099_v11  ;;  %v1154_v43 = vld [vmem:[#allocation8 + $0x288] sm:$0xff]  ;;  %v1105_v11 = vld [vmem:[#allocation8 + $0x100] sm:$0xff]  ;;  %v1108_v30 = vld [vmem:[#allocation8 + $0x118] sm:$0xff] }
 0x2d7   :  { %9208 = vmatpush1.bf16.msra.mxu0 %v14105_v23  ;;  %16855 = vst [vmem:[#allocation192_spill] sm:$0xff] %v14120_v14  ;;  %v1146_v23 = vld [vmem:[#allocation8 + $0x248] sm:$0xff]  ;;  %9244 = vmatpush3.bf16.msra.mxu1 %v14120_v14  ;;  %16857 = vst [vmem:[#allocation194_spill] sm:$0xff] %v14127_v60  ;;  %v1153_v14 = vld [vmem:[#allocation8 + $0x280] sm:$0xff]  ;;  %v14141_v0 = vpack.c.bf16 %v1154_v43, %v1151_v24 }
 0x2d8   :  { %9210 = vmatprep.subr.bf16.mxu0 %v14113_v54  ;;  %v14125_v36 = vpack.c.bf16 %v1149_v32, %v1146_v23  ;;  %16859 = vst [vmem:[#allocation196_spill] sm:$0xff] %v14132_v42  ;;  %9246 = vmatprep.subr.bf16.mxu1 %v14127_v60  ;;  %v1155_v54 = vld [vmem:[#allocation8 + $0x290] sm:$0xff]  ;;  %v1156_v32 = vld [vmem:[#allocation8 + $0x298] sm:$0xff]  ;;  %v1161_v60 = vld [vmem:[#allocation8 + $0x2c0] sm:$0xff] }
 0x2d9   :  { %v14139_v46 = vpack.c.bf16 %v1156_v32, %v1153_v14  ;;  %16862 = vst [vmem:[#allocation199_spill] sm:$0xff] %v14141_v0  ;;  %v1157_v14 = vld [vmem:[#allocation8 + $0x2a0] sm:$0xff]  ;;  %v1160_v32 = vld [vmem:[#allocation8 + $0x2b8] sm:$0xff] }
 0x2da   :  { %16856 = vst [vmem:[#allocation193_spill] sm:$0xff] %v14125_v36  ;;  %v14153_v43 = vpack.c.bf16 %v1160_v32, %v1157_v14 }
 0x2db   :  { %9212 = vmatpush1.bf16.msra.mxu0 %v14118_v47  ;;  %v1152_v47 = vld [vmem:[#allocation8 + $0x278] sm:$0xff]  ;;  %9248 = vmatpush3.bf16.msra.mxu1 %v14132_v42  ;;  %16861 = vst [vmem:[#allocation198_spill] sm:$0xff] %v14139_v46  ;;  %v1159_v42 = vld [vmem:[#allocation8 + $0x2b0] sm:$0xff] }
 0x2dc   :  { %9214 = vmatprep.subr.bf16.mxu0 %v14125_v36  ;;  %v14137_v23 = vpack.c.bf16 %v1155_v54, %v1152_v47  ;;  %v14144_v36 = vpack.c.bf16 %v1108_v30, %v1105_v11  ;;  %9250 = vmatprep.subr.bf16.mxu1 %v14139_v46  ;;  %v1162_v47 = vld [vmem:[#allocation8 + $0x2c8] sm:$0xff]  ;;  %16866 = vst [vmem:[#allocation203_spill] sm:$0xff] %v14153_v43  ;;  %v1111_v11 = vld [vmem:[#allocation8 + $0x130] sm:$0xff] }
 0x2dd   :  { %v14151_v24 = vpack.c.bf16 %v1162_v47, %v1159_v42  ;;  %v1114_v30 = vld [vmem:[#allocation8 + $0x148] sm:$0xff]  ;;  %v1167_v46 = vld [vmem:[#allocation8 + $0x2f0] sm:$0xff] }
 0x2de   :  { %16860 = vst [vmem:[#allocation197_spill] sm:$0xff] %v14137_v23  ;;  %16863 = vst [vmem:[#allocation200_spill] sm:$0xff] %v14144_v36  ;;  %v1163_v42 = vld [vmem:[#allocation8 + $0x2d0] sm:$0xff]  ;;  %v1166_v47 = vld [vmem:[#allocation8 + $0x2e8] sm:$0xff] }
 0x2df   :  { %9216 = vmatpush1.bf16.msra.mxu0 %v14129_v3  ;;  %v1158_v3 = vld [vmem:[#allocation8 + $0x2a8] sm:$0xff]  ;;  %9252 = vmatpush3.bf16.msra.mxu1 %v14144_v36  ;;  %16865 = vst [vmem:[#allocation202_spill] sm:$0xff] %v14151_v24  ;;  %v1165_v36 = vld [vmem:[#allocation8 + $0x2e0] sm:$0xff]  ;;  %v14165_v32 = vpack.c.bf16 %v1166_v47, %v1163_v42 }
 0x2e0   :  { %9218 = vmatprep.subr.bf16.mxu0 %v14137_v23  ;;  %v14149_v54 = vpack.c.bf16 %v1161_v60, %v1158_v3  ;;  %v14156_v23 = vpack.c.bf16 %v1114_v30, %v1111_v11  ;;  %9254 = vmatprep.subr.bf16.mxu1 %v14151_v24  ;;  %v1168_v3 = vld [vmem:[#allocation8 + $0x2f8] sm:$0xff]  ;;  %v1117_v11 = vld [vmem:[#allocation8 + $0x160] sm:$0xff] }
 0x2e1   :  { %v14163_v14 = vpack.c.bf16 %v1168_v3, %v1165_v36  ;;  %16870 = vst [vmem:[#allocation207_spill] sm:$0xff] %v14165_v32  ;;  %v1120_v30 = vld [vmem:[#allocation8 + $0x178] sm:$0xff]  ;;  %v803_v36 = vld [vmem:[%s16264_s6] sm:$0x7] }
 0x2e2   :  { %16864 = vst [vmem:[#allocation201_spill] sm:$0xff] %v14149_v54  ;;  %16867 = vst [vmem:[#allocation204_spill] sm:$0xff] %v14156_v23  ;;  %v1327_v24 = vld [vmem:[#allocation10] sm:$0xff] }
 0x2e3   :  { %9220 = vmatpush1.bf16.msra.mxu0 %v14141_v0  ;;  %v1164_v0 = vld [vmem:[#allocation8 + $0x2d8] sm:$0xff]  ;;  %9256 = vmatpush3.bf16.msra.mxu1 %v14156_v23  ;;  %16869 = vst [vmem:[#allocation206_spill] sm:$0xff] %v14163_v14 }
 0x2e4   :  { %9222 = vmatprep.subr.bf16.mxu0 %v14149_v54  ;;  %v14161_v60 = vpack.c.bf16 %v1167_v46, %v1164_v0  ;;  %v14168_v54 = vpack.c.bf16 %v1120_v30, %v1117_v11  ;;  %9258 = vmatprep.subr.bf16.mxu1 %v14163_v14  ;;  %v14179_v46 = vrot.slane %v803_v36, %v13962_v6 }
 0x2e6   :  { %16868 = vst [vmem:[#allocation205_spill] sm:$0xff] %v14161_v60  ;;  %16871 = vst [vmem:[#allocation208_spill] sm:$0xff] %v14168_v54 }
 0x2e7   :  { %9224 = vmatpush1.bf16.msra.mxu0 %v14153_v43  ;;  %9260 = vmatpush3.bf16.msra.mxu1 %v14168_v54  ;;  %16872 = vst [vmem:[#allocation209_spill] sm:$0xff] %v14179_v46  ;;  %v14183_v54 = vrot.slane %v803_v36, %v13968_v28 }
 0x2e8   :  { %9226 = vmatprep.subr.bf16.mxu0 %v14161_v60  ;;  %9261 = vmatprep.subr.bf16.mxu1 %v16820_v21 }
 0x2e9   :  { %16873 = vst [vmem:[#allocation210_spill] sm:$0xff] %v14183_v54 }
 0x2eb   :  { %9228 = vmatpush1.bf16.msra.mxu0 %v14165_v32 }
 0x2ec   :  { %9286 = vmatprep.subr.bf16.mxu0 %v13118_v4 }
 0x372   :  { %v886_v0 = vpop.f32.mrb[4].mxu0  ;;  %v7441_v3 = vpop.f32.mrb[4].mxu1 }
 0x373   :  { %v887_v42 = vadd.f32 %v886_v0, %v14179_v46  ;;  %v888_v47 = vpop.f32.mrb[5].mxu0  ;;  %v7442_v11 = vpop.f32.mrb[5].mxu1  ;;  %v14189_v0 = vld [vmem:[%s16265_s7] ss:$0 sm:$0xff] }
 0x374   :  { %v7443_v30 = vadd.f32 %v7442_v11, %v7441_v3  ;;  %v889_v4 = vadd.f32 %v888_v47, %v14183_v54  ;;  %v14192_v3 = vrot.slane %v803_v36, %v13982_v58  ;;  %v14196_v36 = vpack.c.bf16 %v1328_v38, %v1327_v24  ;;  %v1332_v38 = vld [vmem:[#allocation10 + $0x28] sm:$0xff]  ;;  %v1334_v24 = vld [vmem:[#allocation10 + $0x38] sm:$0xff] }
 0x375   :  { %v7326_v32 = vmul.f32 -1.442695, %v887_v42 }
 0x376   :  { %v7327_v60 = vmul.f32 -1.442695, %v889_v4  ;;  %v958_v4 = vadd.f32 %v7443_v30, %v14192_v3 }
 0x377   :  { %12382 = vpow2.f32 %v7326_v32 }
 0x378   :  { %12384 = vpow2.f32 %v7327_v60 }
 0x381   :  { %v12383_v43 = vpop.eup %12382 }
 0x382   :  { %v1057_v14 = vadd.f32 1.0, %v12383_v43  ;;  %v12385_v23 = vpop.eup %12384 }
 0x383   :  { %v1063_v46 = vadd.f32 1.0, %v12385_v23 }
 0x384   :  { %12386 = vrcp.f32 %v1057_v14 }
 0x385   :  { %12388 = vrcp.f32 %v1063_v46 }
 0x38e   :  { %v12387_v47 = vpop.eup %12386 }
 0x38f   :  { %v12389_v14 = vpop.eup %12388 }
 0x390   :  { %v1069_v54 = vsub.f32 1.0, %v12389_v14  ;;  %v1071_v23 = vmul.f32 0.0, %v12389_v14 }
 0x392   :  { %v1050_v42 = vpop.f32.mrb[6].mxu1 }
 0x393   :  { %v1051_v32 = vadd.f32 %v14189_v0, %v1050_v42  ;;  %v8292_v11 = vpop.f32.mrb[7].mxu1  ;;  %v1329_v42 = vld [vmem:[#allocation10 + $0x10] sm:$0xff] }
 0x394   :  { %v1330_v11 = vld [vmem:[#allocation10 + $0x18] sm:$0xff] }
 0x395   :  { %v1066_v43 = vmul.f32 %v12387_v47, %v1051_v32  ;;  %v14204_v46 = vpack.c.bf16 %v1330_v11, %v1329_v42  ;;  %v1335_v32 = vld [vmem:[#allocation10 + $0x40] sm:$0xff]  ;;  %v1336_v47 = vld [vmem:[#allocation10 + $0x48] sm:$0xff] }
 0x396   :  { %v1340_v42 = vld [vmem:[#allocation10 + $0x68] sm:$0xff] }
 0x397   :  { %v1067_v60 = vadd.f32 %v1066_v43, %v958_v4  ;;  %v14225_v4 = vpack.c.bf16 %v1336_v47, %v1335_v32  ;;  %v1337_v43 = vld [vmem:[#allocation10 + $0x50] sm:$0xff]  ;;  %v16875_v32 = vld [vmem:[#allocation30_spill] sm:$0xff]  ;;  %v16876_v47 = vld [vmem:[#allocation31_spill] sm:$0xff] }
 0x399   :  { %12390 = vtanh.f32 %v1067_v60  ;;  %v1338_v60 = vld [vmem:[#allocation10 + $0x58] sm:$0xff] }
 0x39a   :  { %v14231_v14 = vpack.c.bf16 %v1338_v60, %v1337_v43  ;;  %v16877_v43 = vld [vmem:[#allocation57_spill] sm:$0xff]  ;;  %v16878_v60 = vld [vmem:[#allocation59_spill] sm:$0xff] }
 0x3a3   :  { %v12391_v28 = vpop.eup %12390 }
 0x3a4   :  { %v1070_v6 = vmul.f32 %v12391_v28, %v1069_v54  ;;  %v1331_v28 = vld [vmem:[#allocation10 + $0x20] sm:$0xff]  ;;  %v1333_v54 = vld [vmem:[#allocation10 + $0x30] sm:$0xff] }
 0x3a5   :  { %v14219_v30 = vpack.c.bf16 %v1334_v24, %v1333_v54  ;;  %v16874_v24 = vld [vmem:[#allocation55_spill] sm:$0xff] }
 0x3a6   :  { %v14198_v58 = vadd.f32 %v1071_v23, %v1070_v6  ;;  %v14213_v6 = vpack.c.bf16 %v1332_v38, %v1331_v28  ;;  %v1339_v23 = vld [vmem:[#allocation10 + $0x60] sm:$0xff]  ;;  %v1341_v28 = vld [vmem:[#allocation10 + $0x70] sm:$0xff]  ;;  %v1342_v38 = vld [vmem:[#allocation10 + $0x78] sm:$0xff] }
 0x3a7   :  { %v14237_v11 = vpack.c.bf16 %v1340_v42, %v1339_v23  ;;  %v14243_v54 = vpack.c.bf16 %v1342_v38, %v1341_v28  ;;  %v16879_v23 = vld [vmem:[#allocation32_spill] sm:$0xff]  ;;  %v16880_v42 = vld [vmem:[#allocation33_spill] sm:$0xff]  ;;  %v16882_v38 = vld [vmem:[#allocation63_spill] sm:$0xff] }
 0x3a8   :  { %1251 = vmatmul.mubr.f32.vlgmr.msra.gmra.mrb[6].mxu0 %v14198_v58  ;;  %1322 = vmatmul.mubr.f32.vlgmr.msra.gmra.mrb[8].mxu1 %v14198_v58  ;;  %v16881_v28 = vld [vmem:[#allocation61_spill] sm:$0xff] }
 0x3a9   :  { %9263 = vmatpush3.bf16.msra.mxu1 %v14196_v36  ;;  %9288 = vmatpush1.bf16.msra.mxu0 %v13122_v9 }
 0x3aa   :  { %9264 = vmatprep.subr.bf16.mxu1 %v16820_v21  ;;  %9290 = vmatprep.subr.bf16.mxu0 %v13129_v17 }
 0x3ab   :  { %8325 = vmatprep.mubr.msk.f32.mxu1 %vm12951_vm0, %v16762_v61  ;;  %1505 = vmatprep.mubr.f32.mxu0 %v16762_v61 }
 0x3ad   :  { %9266 = vmatpush3.bf16.msra.mxu1 %v14204_v46  ;;  %9292 = vmatpush1.bf16.msra.mxu0 %v13134_v22 }
 0x3ae   :  { %9267 = vmatprep.subr.bf16.mxu1 %v16820_v21  ;;  %9294 = vmatprep.subr.bf16.mxu0 %v13140_v27 }
 0x3b1   :  { %9269 = vmatpush3.bf16.msra.mxu1 %v14213_v6  ;;  %9296 = vmatpush1.bf16.msra.mxu0 %v13145_v35 }
 0x3b2   :  { %9270 = vmatprep.subr.bf16.mxu1 %v16820_v21  ;;  %9298 = vmatprep.subr.bf16.mxu0 %v13151_v40 }
 0x3b5   :  { %9272 = vmatpush3.bf16.msra.mxu1 %v14219_v30  ;;  %9300 = vmatpush1.bf16.msra.mxu0 %v13157_v51 }
 0x3b6   :  { %9273 = vmatprep.subr.bf16.mxu1 %v16820_v21  ;;  %9302 = vmatprep.subr.bf16.mxu0 %v13163_v53 }
 0x3b9   :  { %9275 = vmatpush3.bf16.msra.mxu1 %v14225_v4  ;;  %9304 = vmatpush1.bf16.msra.mxu0 %v13169_v63 }
 0x3ba   :  { %9276 = vmatprep.subr.bf16.mxu1 %v16820_v21  ;;  %9306 = vmatprep.subr.bf16.mxu0 %v13175_v2 }
 0x3bd   :  { %9278 = vmatpush3.bf16.msra.mxu1 %v14231_v14  ;;  %9308 = vmatpush1.bf16.msra.mxu0 %v13181_v16 }
 0x3be   :  { %9279 = vmatprep.subr.bf16.mxu1 %v16820_v21  ;;  %9310 = vmatprep.subr.bf16.mxu0 %v13187_v20 }
 0x3c1   :  { %9281 = vmatpush3.bf16.msra.mxu1 %v14237_v11  ;;  %9312 = vmatpush1.bf16.msra.mxu0 %v13193_v34 }
 0x3c2   :  { %9282 = vmatprep.subr.bf16.mxu1 %v16820_v21  ;;  %9314 = vmatprep.subr.bf16.mxu0 %v13199_v37 }
 0x3c5   :  { %9284 = vmatpush3.bf16.msra.mxu1 %v14243_v54  ;;  %9316 = vmatpush1.bf16.msra.mxu0 %v13217_v50 }
 0x3c6   :  { %9318 = vmatprep.subr.bf16.mxu1 %v13120_v8  ;;  %9350 = vmatprep.subr.bf16.mxu0 %v13223_v55 }
 0x3c8   :  { %8326 = vmatmul.mubr.f32.vlgmr.msra.gmra.mrb[10].mxu1 %v16762_v61  ;;  %1506 = vmatmul.mubr.f32.vlgmr.msra.gmra.mrb[8].mxu0 %v13812_v5 }
 0x3c9   :  { %9320 = vmatpush1.bf16.msra.mxu1 %v13125_v13  ;;  %1701 = vmatprep.mubr.f32.mxu0 %v13994_v56 }
 0x3ca   :  { %9322 = vmatprep.subr.bf16.mxu1 %v13131_v18  ;;  %1576 = vmatprep.mubr.f32.mxu1 %v16762_v61 }
 0x3cb   :  { %9352 = vmatpush1.bf16.msra.mxu0 %v13253_v10 }
 0x3cc   :  { %9354 = vmatprep.subr.bf16.mxu0 %v13259_v12 }
 0x3cd   :  { %9324 = vmatpush1.bf16.msra.mxu1 %v13138_v26 }
 0x3ce   :  { %9326 = vmatprep.subr.bf16.mxu1 %v13142_v31 }
 0x3cf   :  { %9356 = vmatpush1.bf16.msra.mxu0 %v13291_v33 }
 0x3d0   :  { %9358 = vmatprep.subr.bf16.mxu0 %v13297_v41 }
 0x3d1   :  { %9328 = vmatpush1.bf16.msra.mxu1 %v13149_v39 }
 0x3d2   :  { %9330 = vmatprep.subr.bf16.mxu1 %v13154_v44 }
 0x3d3   :  { %9360 = vmatpush1.bf16.msra.mxu0 %v13317_v48 }
 0x3d4   :  { %9362 = vmatprep.subr.bf16.mxu0 %v13335_v62 }
 0x3d5   :  { %9332 = vmatpush1.bf16.msra.mxu1 %v13161_v52 }
 0x3d6   :  { %9334 = vmatprep.subr.bf16.mxu1 %v13166_v57 }
 0x3d7   :  { %9364 = vmatpush1.bf16.msra.mxu0 %v13348_v15 }
 0x3d8   :  { %9366 = vmatprep.subr.bf16.mxu0 %v13371_v45 }
 0x3d9   :  { %9336 = vmatpush1.bf16.msra.mxu1 %v13173_v1 }
 0x3da   :  { %9338 = vmatprep.subr.bf16.mxu1 %v13178_v7 }
 0x3db   :  { %9368 = vmatpush1.bf16.msra.mxu0 %v13384_v59 }
 0x3dc   :  { %9370 = vmatprep.subr.bf16.mxu0 %v13407_v29 }
 0x3dd   :  { %9340 = vmatpush1.bf16.msra.mxu1 %v13185_v19 }
 0x3de   :  { %9342 = vmatprep.subr.bf16.mxu1 %v13190_v25 }
 0x3df   :  { %9372 = vmatpush1.bf16.msra.mxu0 %v13420_v49 }
 0x3e0   :  { %9374 = vmatprep.subr.bf16.mxu0 %v16874_v24  ;;  %v16883_v24 = vld [vmem:[#allocation34_spill] sm:$0xff] }
 0x3e1   :  { %9344 = vmatpush1.bf16.msra.mxu1 %v16875_v32  ;;  %v16884_v32 = vld [vmem:[#allocation36_spill] sm:$0xff] }
 0x3e2   :  { %9346 = vmatprep.subr.bf16.mxu1 %v16876_v47  ;;  %v16885_v47 = vld [vmem:[#allocation65_spill] sm:$0xff] }
 0x3e3   :  { %9376 = vmatpush1.bf16.msra.mxu0 %v16877_v43  ;;  %v16886_v43 = vld [vmem:[#allocation67_spill] sm:$0xff] }
 0x3e4   :  { %9378 = vmatprep.subr.bf16.mxu0 %v16878_v60  ;;  %v16887_v60 = vld [vmem:[#allocation38_spill] sm:$0xff] }
 0x3e5   :  { %9348 = vmatpush1.bf16.msra.mxu1 %v16879_v23  ;;  %v16888_v23 = vld [vmem:[#allocation40_spill] sm:$0xff] }
 0x3e6   :  { %9414 = vmatprep.subr.bf16.mxu1 %v16880_v42  ;;  %v16889_v42 = vld [vmem:[#allocation69_spill] sm:$0xff] }
 0x3e7   :  { %9380 = vmatpush1.bf16.msra.mxu0 %v16881_v28  ;;  %v16890_v28 = vld [vmem:[#allocation71_spill] sm:$0xff] }
 0x3e8   :  { %1577 = vmatmul.mubr.f32.vlgmr.msra.gmra.mrb[12].mxu1 %v13812_v5  ;;  %9382 = vmatprep.subr.bf16.mxu0 %v16882_v38  ;;  %v16891_v5 = vld [vmem:[#allocation42_spill] sm:$0xff]  ;;  %v16892_v38 = vld [vmem:[#allocation44_spill] sm:$0xff] }
 0x3e9   :  { %1772 = vmatprep.mubr.f32.mxu1 %v13994_v56  ;;  %9416 = vmatpush1.bf16.msra.mxu1 %v16883_v24  ;;  %v16893_v56 = vld [vmem:[#allocation73_spill] sm:$0xff]  ;;  %v16894_v24 = vld [vmem:[#allocation75_spill] sm:$0xff] }
 0x3ea   :  { %9418 = vmatprep.subr.bf16.mxu1 %v16884_v32  ;;  %v16895_v32 = vld [vmem:[#allocation46_spill] sm:$0xff] }
 0x3eb   :  { %9384 = vmatpush1.bf16.msra.mxu0 %v16885_v47  ;;  %v16896_v47 = vld [vmem:[#allocation48_spill] sm:$0xff] }
 0x3ec   :  { %9386 = vmatprep.subr.bf16.mxu0 %v16886_v43  ;;  %v16897_v43 = vld [vmem:[#allocation77_spill] sm:$0xff] }
 0x3ed   :  { %9420 = vmatpush1.bf16.msra.mxu1 %v16887_v60  ;;  %v16898_v60 = vld [vmem:[#allocation79_spill] sm:$0xff] }
 0x3ee   :  { %9422 = vmatprep.subr.bf16.mxu1 %v16888_v23  ;;  %v16899_v23 = vld [vmem:[#allocation50_spill] sm:$0xff] }
 0x3ef   :  { %9388 = vmatpush1.bf16.msra.mxu0 %v16889_v42  ;;  %v16900_v42 = vld [vmem:[#allocation52_spill] sm:$0xff] }
 0x3f0   :  { %9390 = vmatprep.subr.bf16.mxu0 %v16890_v28  ;;  %v16901_v28 = vld [vmem:[#allocation81_spill] sm:$0xff] }
 0x3f1   :  { %9424 = vmatpush1.bf16.msra.mxu1 %v16891_v5  ;;  %v16902_v5 = vld [vmem:[#allocation83_spill] sm:$0xff] }
 0x3f2   :  { %9426 = vmatprep.subr.bf16.mxu1 %v16892_v38  ;;  %v16903_v38 = vld [vmem:[#allocation54_spill] sm:$0xff] }
 0x3f3   :  { %9392 = vmatpush1.bf16.msra.mxu0 %v16893_v56  ;;  %v16904_v56 = vld [vmem:[#allocation56_spill] sm:$0xff] }
 0x3f4   :  { %9394 = vmatprep.subr.bf16.mxu0 %v16894_v24  ;;  %v16905_v24 = vld [vmem:[#allocation85_spill] sm:$0xff] }
 0x3f5   :  { %9428 = vmatpush1.bf16.msra.mxu1 %v16895_v32  ;;  %v16906_v32 = vld [vmem:[#allocation87_spill] sm:$0xff] }
 0x3f6   :  { %9430 = vmatprep.subr.bf16.mxu1 %v16896_v47  ;;  %v16907_v47 = vld [vmem:[#allocation58_spill] sm:$0xff] }
 0x3f7   :  { %9396 = vmatpush1.bf16.msra.mxu0 %v16897_v43  ;;  %v16908_v43 = vld [vmem:[#allocation60_spill] sm:$0xff] }
 0x3f8   :  { %9398 = vmatprep.subr.bf16.mxu0 %v16898_v60  ;;  %v16909_v60 = vld [vmem:[#allocation89_spill] sm:$0xff] }
 0x3f9   :  { %9432 = vmatpush1.bf16.msra.mxu1 %v16899_v23  ;;  %v16910_v23 = vld [vmem:[#allocation91_spill] sm:$0xff] }
 0x3fa   :  { %9434 = vmatprep.subr.bf16.mxu1 %v16900_v42  ;;  %v16911_v42 = vld [vmem:[#allocation62_spill] sm:$0xff] }
 0x3fb   :  { %9400 = vmatpush1.bf16.msra.mxu0 %v16901_v28  ;;  %v16912_v28 = vld [vmem:[#allocation64_spill] sm:$0xff] }
 0x3fc   :  { %9402 = vmatprep.subr.bf16.mxu0 %v16902_v5  ;;  %v16913_v5 = vld [vmem:[#allocation93_spill] sm:$0xff] }
 0x3fd   :  { %9436 = vmatpush1.bf16.msra.mxu1 %v16903_v38  ;;  %v16914_v38 = vld [vmem:[#allocation95_spill] sm:$0xff] }
 0x3fe   :  { %9438 = vmatprep.subr.bf16.mxu1 %v16904_v56  ;;  %v16915_v56 = vld [vmem:[#allocation66_spill] sm:$0xff] }
 0x3ff   :  { %9404 = vmatpush1.bf16.msra.mxu0 %v16905_v24  ;;  %v16916_v24 = vld [vmem:[#allocation68_spill] sm:$0xff] }
 0x400   :  { %9406 = vmatprep.subr.bf16.mxu0 %v16906_v32  ;;  %v16917_v32 = vld [vmem:[#allocation70_spill] sm:$0xff] }
 0x401   :  { %9440 = vmatpush1.bf16.msra.mxu1 %v16907_v47  ;;  %v16918_v47 = vld [vmem:[#allocation72_spill] sm:$0xff] }
 0x402   :  { %9442 = vmatprep.subr.bf16.mxu1 %v16908_v43  ;;  %v16919_v43 = vld [vmem:[#allocation74_spill] sm:$0xff] }
 0x403   :  { %9408 = vmatpush1.bf16.msra.mxu0 %v16909_v60  ;;  %v16920_v60 = vld [vmem:[#allocation76_spill] sm:$0xff] }
 0x404   :  { %9410 = vmatprep.subr.bf16.mxu0 %v16910_v23  ;;  %v16921_v23 = vld [vmem:[#allocation78_spill] sm:$0xff] }
 0x405   :  { %9444 = vmatpush1.bf16.msra.mxu1 %v16911_v42  ;;  %v16922_v42 = vld [vmem:[#allocation80_spill] sm:$0xff] }
 0x406   :  { %9446 = vmatprep.subr.bf16.mxu1 %v16912_v28  ;;  %v16923_v28 = vld [vmem:[#allocation82_spill] sm:$0xff] }
 0x407   :  { %9412 = vmatpush1.bf16.msra.mxu0 %v16913_v5  ;;  %v16924_v5 = vld [vmem:[#allocation84_spill] sm:$0xff] }
 0x408   :  { %9478 = vmatprep.subr.bf16.mxu0 %v16914_v38  ;;  %v16925_v38 = vld [vmem:[#allocation86_spill] sm:$0xff] }
 0x409   :  { %9448 = vmatpush1.bf16.msra.mxu1 %v16915_v56  ;;  %v16926_v56 = vld [vmem:[#allocation88_spill] sm:$0xff] }
 0x40a   :  { %9450 = vmatprep.subr.bf16.mxu1 %v16916_v24  ;;  %v16927_v24 = vld [vmem:[#allocation90_spill] sm:$0xff] }
 0x40d   :  { %9452 = vmatpush1.bf16.msra.mxu1 %v16917_v32  ;;  %v16928_v32 = vld [vmem:[#allocation92_spill] sm:$0xff] }
 0x40e   :  { %9454 = vmatprep.subr.bf16.mxu1 %v16918_v47  ;;  %v16929_v47 = vld [vmem:[#allocation94_spill] sm:$0xff] }
 0x411   :  { %9456 = vmatpush1.bf16.msra.mxu1 %v16919_v43  ;;  %v16930_v43 = vld [vmem:[#allocation113_spill] sm:$0xff] }
 0x412   :  { %9458 = vmatprep.subr.bf16.mxu1 %v16920_v60 }
 0x415   :  { %9460 = vmatpush1.bf16.msra.mxu1 %v16921_v23  ;;  %v16931_v23 = vld [vmem:[#allocation146_spill] sm:$0xff] }
 0x416   :  { %9462 = vmatprep.subr.bf16.mxu1 %v16922_v42  ;;  %v1169_v42 = vld [vmem:[%s16268_s10] sm:$0x7] }
 0x419   :  { %9464 = vmatpush1.bf16.msra.mxu1 %v16923_v28  ;;  %v14341_v28 = vrot.slane %v1169_v42, %v16931_v23 }
 0x41a   :  { %9466 = vmatprep.subr.bf16.mxu1 %v16924_v5 }
 0x41b   :  { %16932 = vst [vmem:[#allocation146_spill] sm:$0xff] %v14341_v28 }
 0x41d   :  { %9468 = vmatpush1.bf16.msra.mxu1 %v16925_v38 }
 0x41e   :  { %9470 = vmatprep.subr.bf16.mxu1 %v16926_v56 }
 0x421   :  { %9472 = vmatpush1.bf16.msra.mxu1 %v16927_v24 }
 0x422   :  { %9474 = vmatprep.subr.bf16.mxu1 %v16928_v32  ;;  %v16933_v32 = vld [vmem:[#allocation147_spill] sm:$0xff] }
 0x423   :  { %v14345_v19 = vrot.slane %v1169_v42, %v16933_v32 }
 0x425   :  { %9476 = vmatpush1.bf16.msra.mxu1 %v16929_v47  ;;  %16934 = vst [vmem:[#allocation147_spill] sm:$0xff] %v14345_v19 }
 0x426   :  { %9542 = vmatprep.subr.bf16.mxu1 %v16930_v43 }
 0x47b   :  { %v1252_v5 = vpop.f32.mrb[6].mxu0  ;;  %v7493_v60 = vpop.f32.mrb[8].mxu1 }
 0x47c   :  { %v1253_v38 = vadd.f32 %v1252_v5, %v14341_v28  ;;  %v1254_v56 = vpop.f32.mrb[7].mxu0  ;;  %v7494_v49 = vpop.f32.mrb[9].mxu1  ;;  %v14351_v5 = vld [vmem:[%s16269_s11] ss:$0 sm:$0xff] }
 0x47d   :  { %v7495_v24 = vadd.f32 %v7494_v49, %v7493_v60  ;;  %v1255_v43 = vadd.f32 %v1254_v56, %v14345_v19  ;;  %16935 = vst [vmem:[#allocation211_spill] sm:$0xff] %v14351_v5  ;;  %v16936_v49 = vld [vmem:[#allocation151_spill] sm:$0xff] }
 0x47e   :  { %v7329_v25 = vmul.f32 -1.442695, %v1253_v38  ;;  %v14354_v60 = vrot.slane %v1169_v42, %v16936_v49 }
 0x47f   :  { %v7330_v47 = vmul.f32 -1.442695, %v1255_v43 }
 0x480   :  { %12392 = vpow2.f32 %v7329_v25  ;;  %16937 = vst [vmem:[#allocation151_spill] sm:$0xff] %v14354_v60 }
 0x481   :  { %12394 = vpow2.f32 %v7330_v47 }
 0x48a   :  { %v12393_v29 = vpop.eup %12392 }
 0x48b   :  { %v1423_v59 = vadd.f32 1.0, %v12393_v29  ;;  %v12395_v23 = vpop.eup %12394 }
 0x48c   :  { %v1429_v28 = vadd.f32 1.0, %v12395_v23 }
 0x48d   :  { %12396 = vrcp.f32 %v1423_v59  ;;  %v1324_v59 = vadd.f32 %v7495_v24, %v14354_v60 }
 0x48e   :  { %12398 = vrcp.f32 %v1429_v28 }
 0x497   :  { %v12397_v19 = vpop.eup %12396 }
 0x498   :  { %v12399_v1 = vpop.eup %12398 }
 0x499   :  { %v1435_v45 = vsub.f32 1.0, %v12399_v1  ;;  %v1437_v42 = vmul.f32 0.0, %v12399_v1 }
 0x49b   :  { %v1416_v32 = vpop.f32.mrb[10].mxu1  ;;  %v1507_v38 = vpop.f32.mrb[8].mxu0 }
 0x49c   :  { %v1417_v25 = vadd.f32 %v14351_v5, %v1416_v32  ;;  %v8327_v56 = vpop.f32.mrb[11].mxu1  ;;  %v1509_v43 = vpop.f32.mrb[9].mxu0 }
 0x49d   :  { %v1587_v47 = vcombine.low %v1507_v38, %v1509_v43  ;;  %v16938_v56 = vld [vmem:[#allocation96_spill] sm:$0xff] }
 0x49e   :  { %v1432_v29 = vmul.f32 %v12397_v19, %v1417_v25  ;;  %v7331_v19 = vld [vmem:[%s16258_s0 + $0x8] sm:$0xff] }
 0x49f   :  { %v1595_v5 = vrot.slane %v1587_v47, %v16938_v56 }
 0x4a0   :  { %v1433_v7 = vadd.f32 %v1432_v29, %v1324_v59 }
 0x4a2   :  { %12400 = vtanh.f32 %v1433_v7 }
 0x4ac   :  { %v12401_v23 = vpop.eup %12400 }
 0x4ad   :  { %v1436_v15 = vmul.f32 %v12401_v23, %v1435_v45 }
 0x4af   :  { %v14358_v49 = vadd.f32 %v1437_v42, %v1436_v15 }
 0x4bb   :  { %v1578_v57 = vpop.f32.mrb[12].mxu1 }
 0x4bc   :  { %v1580_v52 = vpop.f32.mrb[13].mxu1 }
 0x4bd   :  { %v1588_v32 = vcombine.low %v1578_v57, %v1580_v52 }
 0x4bf   :  { %v1602_v38 = vrot.slane %v1588_v32, %v16938_v56 }
 0x4c1   :  { %v1603_v24 = vcombine.low %v1595_v5, %v1602_v38  ;;  %v16939_v38 = vld [vmem:[#allocation97_spill] sm:$0xff] }
 0x4c3   :  { %v1605_v7 = vadd.f32 %v7331_v19, %v1603_v24 }
 0x4c5   :  { %v7332_v28 = vmul.f32 -1.442695, %v1605_v7  ;;  %v1613_v25 = vrot.slane %v1605_v7, 2  ;;  %v1624_v1 = vrot.slane %v1605_v7, 6  ;;  %v1621_v59 = vrot.slane %v1605_v7, 4 }
 0x4c7   :  { %12402 = vpow2.f32 %v7332_v28  ;;  %v7333_v45 = vmul.f32 -1.442695, %v1613_v25  ;;  %v7334_v15 = vmul.f32 -1.442695, %v1624_v1  ;;  %v16941_v1 = vld [vmem:[#allocation98_spill] sm:$0xff] }
 0x4c9   :  { %12404 = vpow2.f32 %v7333_v45 }
 0x4ca   :  { %12406 = vpow2.f32 %v7334_v15  ;;  %v16942_v15 = vld [vmem:[#allocation115_spill] sm:$0xff] }
 0x4d1   :  { %v12403_v43 = vpop.eup %12402 }
 0x4d2   :  { %v1609_v52 = vadd.f32 1.0, %v12403_v43  ;;  %v16943_v43 = vld [vmem:[#allocation99_spill] sm:$0xff] }
 0x4d3   :  { %v12405_v57 = vpop.eup %12404 }
 0x4d4   :  { %12408 = vrcp.f32 %v1609_v52  ;;  %v1618_v47 = vadd.f32 1.0, %v12405_v57  ;;  %v12407_v29 = vpop.eup %12406  ;;  %v16945_v52 = vld [vmem:[#allocation100_spill] sm:$0xff]  ;;  %v16946_v57 = vld [vmem:[#allocation119_spill] sm:$0xff] }
 0x4d5   :  { %12410 = vtanh.f32 %v1621_v59  ;;  %v1629_v32 = vadd.f32 1.0, %v12407_v29  ;;  %v16944_v59 = vld [vmem:[#allocation117_spill] sm:$0xff] }
 0x4d6   :  { %12412 = vrcp.f32 %v1618_v47  ;;  %v16947_v47 = vld [vmem:[#allocation101_spill] sm:$0xff] }
 0x4d7   :  { %12414 = vrcp.f32 %v1629_v32  ;;  %v16948_v29 = vld [vmem:[#allocation121_spill] sm:$0xff] }
 0x4d8   :  { %v16952_v32 = vld [vmem:[#allocation125_spill] sm:$0xff] }
 0x4de   :  { %v12409_v23 = vpop.eup %12408 }
 0x4df   :  { %v12411_v5 = vpop.eup %12410 }
 0x4e0   :  { %v12413_v42 = vpop.eup %12412  ;;  %v1633_v24 = vmul.f32 %v12411_v5, %v12409_v23  ;;  %v16949_v23 = vld [vmem:[#allocation102_spill] sm:$0xff]  ;;  %v16950_v5 = vld [vmem:[#allocation123_spill] sm:$0xff] }
 0x4e1   :  { %v1632_v19 = vmul.f32 %v12413_v42, %v16939_v38  ;;  %v12415_v7 = vpop.eup %12414  ;;  %v16951_v42 = vld [vmem:[#allocation103_spill] sm:$0xff]  ;;  %v16953_v38 = vld [vmem:[#allocation104_spill] sm:$0xff] }
 0x4e3   :  { %v14366_v28 = vadd.f32 %v1633_v24, %v1632_v19  ;;  %v16954_v19 = vld [vmem:[#allocation127_spill] sm:$0xff]  ;;  %v16955_v24 = vld [vmem:[#allocation105_spill] sm:$0xff] }
 0x4e5   :  { %16940 = vst [vmem:[#allocation97_spill] sm:$0xff] %v14366_v28  ;;  %12416 = vtanh.f32 %v14366_v28 }
 0x4ef   :  { %v12417_v25 = vpop.eup %12416 }
 0x4f0   :  { %v14369_v45 = vmul.f32 %v12417_v25, %v12415_v7  ;;  %v16956_v7 = vld [vmem:[#allocation129_spill] sm:$0xff]  ;;  %v16957_v25 = vld [vmem:[#allocation106_spill] sm:$0xff] }
 0x4f2   :  { %1702 = vmatmul.mubr.f32.vlgmr.msra.gmra.mrb[10].mxu0 %v14369_v45  ;;  %1773 = vmatmul.mubr.f32.vlgmr.msra.gmra.mrb[14].mxu1 %v14369_v45 }
 0x4f3   :  { %1867 = vmatprep.mubr.f32.mxu0 %v14198_v58  ;;  %1938 = vmatprep.mubr.f32.mxu1 %v14198_v58 }
 0x4f4   :  { %9480 = vmatpush1.bf16.msra.mxu0 %v16941_v1  ;;  %9544 = vmatpush3.bf16.msra.mxu1 %v16942_v15 }
 0x4f5   :  { %9482 = vmatprep.subr.bf16.mxu0 %v16943_v43  ;;  %9546 = vmatprep.subr.bf16.mxu1 %v16944_v59  ;;  %v16989_v59 = vld [vmem:[#allocation149_spill] sm:$0xff] }
 0x4f8   :  { %9484 = vmatpush1.bf16.msra.mxu0 %v16945_v52  ;;  %9548 = vmatpush3.bf16.msra.mxu1 %v16946_v57  ;;  %v16988_v57 = vld [vmem:[#allocation148_spill] sm:$0xff] }
 0x4f9   :  { %9486 = vmatprep.subr.bf16.mxu0 %v16947_v47  ;;  %9550 = vmatprep.subr.bf16.mxu1 %v16948_v29  ;;  %v16958_v47 = vld [vmem:[#allocation131_spill] sm:$0xff] }
 0x4fa   :  { %v16959_v29 = vld [vmem:[#allocation107_spill] sm:$0xff] }
 0x4fc   :  { %9488 = vmatpush1.bf16.msra.mxu0 %v16949_v23  ;;  %9552 = vmatpush3.bf16.msra.mxu1 %v16950_v5  ;;  %v16960_v23 = vld [vmem:[#allocation133_spill] sm:$0xff]  ;;  %v16961_v5 = vld [vmem:[#allocation108_spill] sm:$0xff] }
 0x4fd   :  { %9490 = vmatprep.subr.bf16.mxu0 %v16951_v42  ;;  %9554 = vmatprep.subr.bf16.mxu1 %v16952_v32  ;;  %v16962_v42 = vld [vmem:[#allocation135_spill] sm:$0xff]  ;;  %v16963_v32 = vld [vmem:[#allocation109_spill] sm:$0xff] }
 0x500   :  { %9492 = vmatpush1.bf16.msra.mxu0 %v16953_v38  ;;  %9556 = vmatpush3.bf16.msra.mxu1 %v16954_v19  ;;  %v16964_v38 = vld [vmem:[#allocation137_spill] sm:$0xff]  ;;  %v16965_v19 = vld [vmem:[#allocation110_spill] sm:$0xff] }
 0x501   :  { %9494 = vmatprep.subr.bf16.mxu0 %v16955_v24  ;;  %9558 = vmatprep.subr.bf16.mxu1 %v16956_v7  ;;  %v16966_v24 = vld [vmem:[#allocation139_spill] sm:$0xff] }
 0x502   :  { %v16967_v7 = vld [vmem:[#allocation111_spill] sm:$0xff] }
 0x504   :  { %9496 = vmatpush1.bf16.msra.mxu0 %v16957_v25  ;;  %9560 = vmatpush3.bf16.msra.mxu1 %v16958_v47  ;;  %v16968_v25 = vld [vmem:[#allocation141_spill] sm:$0xff]  ;;  %v16969_v47 = vld [vmem:[#allocation112_spill] sm:$0xff] }
 0x505   :  { %9498 = vmatprep.subr.bf16.mxu0 %v16959_v29  ;;  %9562 = vmatprep.subr.bf16.mxu1 %v16960_v23  ;;  %v16970_v29 = vld [vmem:[#allocation143_spill] sm:$0xff]  ;;  %v16971_v23 = vld [vmem:[#allocation114_spill] sm:$0xff] }
 0x508   :  { %9500 = vmatpush1.bf16.msra.mxu0 %v16961_v5  ;;  %9564 = vmatpush3.bf16.msra.mxu1 %v16962_v42  ;;  %v16972_v42 = vld [vmem:[#allocation116_spill] sm:$0xff] }
 0x509   :  { %9502 = vmatprep.subr.bf16.mxu0 %v16963_v32  ;;  %9566 = vmatprep.subr.bf16.mxu1 %v16964_v38  ;;  %v16973_v32 = vld [vmem:[#allocation118_spill] sm:$0xff]  ;;  %v16974_v38 = vld [vmem:[#allocation120_spill] sm:$0xff] }
 0x50a   :  { %v16982_v5 = vld [vmem:[#allocation136_spill] sm:$0xff] }
 0x50c   :  { %9504 = vmatpush1.bf16.msra.mxu0 %v16965_v19  ;;  %9568 = vmatpush3.bf16.msra.mxu1 %v16966_v24  ;;  %v16975_v19 = vld [vmem:[#allocation122_spill] sm:$0xff]  ;;  %v16976_v24 = vld [vmem:[#allocation124_spill] sm:$0xff] }
 0x50d   :  { %9506 = vmatprep.subr.bf16.mxu0 %v16967_v7  ;;  %9570 = vmatprep.subr.bf16.mxu1 %v16968_v25  ;;  %v16977_v7 = vld [vmem:[#allocation126_spill] sm:$0xff]  ;;  %v16978_v25 = vld [vmem:[#allocation128_spill] sm:$0xff] }
 0x510   :  { %9508 = vmatpush1.bf16.msra.mxu0 %v16969_v47  ;;  %9572 = vmatpush3.bf16.msra.mxu1 %v16970_v29  ;;  %v16979_v47 = vld [vmem:[#allocation130_spill] sm:$0xff]  ;;  %v16980_v29 = vld [vmem:[#allocation132_spill] sm:$0xff] }
 0x511   :  { %9510 = vmatprep.subr.bf16.mxu0 %v16971_v23  ;;  %9573 = vmatprep.subr.bf16.mxu1 %v16820_v21  ;;  %v16981_v23 = vld [vmem:[#allocation134_spill] sm:$0xff] }
 0x514   :  { %9512 = vmatpush1.bf16.msra.mxu0 %v16972_v42  ;;  %v16983_v42 = vld [vmem:[#allocation138_spill] sm:$0xff] }
 0x515   :  { %9514 = vmatprep.subr.bf16.mxu0 %v16973_v32  ;;  %v16984_v32 = vld [vmem:[#allocation140_spill] sm:$0xff] }
 0x518   :  { %9516 = vmatpush1.bf16.msra.mxu0 %v16974_v38  ;;  %v16985_v38 = vld [vmem:[#allocation142_spill] sm:$0xff] }
 0x519   :  { %9518 = vmatprep.subr.bf16.mxu0 %v16975_v19  ;;  %v16986_v19 = vld [vmem:[#allocation144_spill] sm:$0xff] }
 0x51c   :  { %9520 = vmatpush1.bf16.msra.mxu0 %v16976_v24  ;;  %v16987_v24 = vld [vmem:[#allocation145_spill] sm:$0xff] }
 0x51d   :  { %9522 = vmatprep.subr.bf16.mxu0 %v16977_v7 }
 0x520   :  { %9524 = vmatpush1.bf16.msra.mxu0 %v16978_v25 }
 0x521   :  { %9526 = vmatprep.subr.bf16.mxu0 %v16979_v47 }
 0x524   :  { %9528 = vmatpush1.bf16.msra.mxu0 %v16980_v29 }
 0x525   :  { %9530 = vmatprep.subr.bf16.mxu0 %v16981_v23 }
 0x528   :  { %9532 = vmatpush1.bf16.msra.mxu0 %v16982_v5 }
 0x529   :  { %9534 = vmatprep.subr.bf16.mxu0 %v16983_v42  ;;  %v16990_v42 = vld [vmem:[#allocation150_spill] sm:$0xff] }
 0x52c   :  { %9536 = vmatpush1.bf16.msra.mxu0 %v16984_v32 }
 0x52d   :  { %9538 = vmatprep.subr.bf16.mxu0 %v16985_v38  ;;  %v16991_v38 = vld [vmem:[#allocation152_spill] sm:$0xff] }
 0x530   :  { %9540 = vmatpush1.bf16.msra.mxu0 %v16986_v19 }
 0x531   :  { %9598 = vmatprep.subr.bf16.mxu0 %v16987_v24 }
 0x5c5   :  { %v1703_v7 = vpop.f32.mrb[10].mxu0  ;;  %v1774_v25 = vpop.f32.mrb[14].mxu1 }
 0x5c6   :  { %v1704_v47 = vadd.f32 %v1703_v7, %v16988_v57  ;;  %v1705_v52 = vpop.f32.mrb[11].mxu0  ;;  %v1776_v29 = vpop.f32.mrb[15].mxu1  ;;  %v1775_v1 = vadd.f32 %v1774_v25, %v16991_v38  ;;  %v17000_v25 = vld [vmem:[#allocation160_spill] sm:$0xff] }
 0x5c7   :  { %v1706_v23 = vadd.f32 %v1705_v52, %v16989_v59  ;;  %v1777_v32 = vadd.f32 %v1776_v29, %v16990_v42 }
 0x5c8   :  { %v7335_v43 = vmul.f32 -1.442695, %v1704_v47 }
 0x5c9   :  { %v7336_v5 = vmul.f32 -1.442695, %v1706_v23  ;;  %v7337_v15 = vmul.f32 -1.442695, %v1777_v32 }
 0x5ca   :  { %12418 = vpow2.f32 %v7335_v43 }
 0x5cb   :  { %12420 = vpow2.f32 %v7336_v5  ;;  %v16992_v5 = vld [vmem:[#allocation153_spill] sm:$0xff] }
 0x5cc   :  { %12422 = vpow2.f32 %v7337_v15 }
 0x5cd   :  { %12424 = vtanh.f32 %v1775_v1  ;;  %v16996_v1 = vld [vmem:[#allocation156_spill] sm:$0xff] }
 0x5d4   :  { %v12419_v19 = vpop.eup %12418 }
 0x5d5   :  { %v12421_v28 = vpop.eup %12420  ;;  %v1782_v24 = vadd.f32 1.0, %v12419_v19 }
 0x5d6   :  { %v1788_v56 = vadd.f32 1.0, %v12421_v28  ;;  %v12423_v7 = vpop.eup %12422  ;;  %v16995_v28 = vld [vmem:[#allocation155_spill] sm:$0xff] }
 0x5d7   :  { %12426 = vrcp.f32 %v1782_v24  ;;  %v12425_v57 = vpop.eup %12424  ;;  %v1795_v43 = vadd.f32 1.0, %v12423_v7  ;;  %v16999_v24 = vld [vmem:[#allocation159_spill] sm:$0xff]  ;;  %v17001_v7 = vld [vmem:[#allocation161_spill] sm:$0xff] }
 0x5d8   :  { %12428 = vrcp.f32 %v1788_v56  ;;  %v16994_v56 = vld [vmem:[#allocation154_spill] sm:$0xff] }
 0x5d9   :  { %12430 = vrcp.f32 %v1795_v43  ;;  %v17005_v43 = vld [vmem:[#allocation169_spill] sm:$0xff] }
 0x5e1   :  { %v12427_v52 = vpop.eup %12426 }
 0x5e2   :  { %v12429_v47 = vpop.eup %12428  ;;  %v1799_v23 = vmul.f32 %v12427_v52, %v12425_v57  ;;  %v16998_v57 = vld [vmem:[#allocation158_spill] sm:$0xff]  ;;  %v17002_v52 = vld [vmem:[#allocation167_spill] sm:$0xff] }
 0x5e3   :  { %v1798_v59 = vmul.f32 %v12429_v47, %v16992_v5  ;;  %v12431_v32 = vpop.eup %12430  ;;  %v17003_v47 = vld [vmem:[#allocation162_spill] sm:$0xff]  ;;  %v17006_v5 = vld [vmem:[#allocation163_spill] sm:$0xff] }
 0x5e5   :  { %v14428_v29 = vadd.f32 %v1799_v23, %v1798_v59  ;;  %v16997_v59 = vld [vmem:[#allocation157_spill] sm:$0xff]  ;;  %v17004_v23 = vld [vmem:[#allocation168_spill] sm:$0xff] }
 0x5e7   :  { %16993 = vst [vmem:[#allocation153_spill] sm:$0xff] %v14428_v29  ;;  %12432 = vtanh.f32 %v14428_v29 }
 0x5f1   :  { %v12433_v19 = vpop.eup %12432 }
 0x5f2   :  { %v14431_v15 = vmul.f32 %v12433_v19, %v12431_v32  ;;  %v17007_v32 = vld [vmem:[#allocation170_spill] sm:$0xff]  ;;  %v17008_v19 = vld [vmem:[#allocation171_spill] sm:$0xff] }
 0x5f4   :  { %1868 = vmatmul.mubr.f32.vlgmr.msra.gmra.mrb[12].mxu0 %v14431_v15  ;;  %1939 = vmatmul.mubr.f32.vlgmr.msra.gmra.mrb[16].mxu1 %v14431_v15 }
 0x5f5   :  { %9575 = vmatpush3.bf16.msra.mxu1 %v16994_v56  ;;  %2097 = vmatprep.mubr.f32.mxu0 %v14358_v49 }
 0x5f6   :  { %9576 = vmatprep.subr.bf16.mxu1 %v16820_v21  ;;  %8360 = vmatprep.mubr.msk.f32.mxu1 %vm12951_vm0, %v16762_v61 }
 0x5f7   :  { %9600 = vmatpush1.bf16.msra.mxu0 %v16995_v28 }
 0x5f8   :  { %9602 = vmatprep.subr.bf16.mxu0 %v16996_v1 }
 0x5f9   :  { %9578 = vmatpush3.bf16.msra.mxu1 %v16997_v59 }
 0x5fa   :  { %9579 = vmatprep.subr.bf16.mxu1 %v16820_v21 }
 0x5fb   :  { %9604 = vmatpush1.bf16.msra.mxu0 %v16998_v57  ;;  %v17029_v57 = vld [vmem:[#allocation187_spill] sm:$0xff] }
 0x5fc   :  { %9606 = vmatprep.subr.bf16.mxu0 %v16999_v24  ;;  %v17027_v24 = vld [vmem:[#allocation188_spill] sm:$0xff] }
 0x5fd   :  { %9581 = vmatpush3.bf16.msra.mxu1 %v17000_v25  ;;  %v17009_v25 = vld [vmem:[#allocation164_spill] sm:$0xff] }
 0x5fe   :  { %9582 = vmatprep.subr.bf16.mxu1 %v16820_v21 }
 0x5ff   :  { %9608 = vmatpush1.bf16.msra.mxu0 %v17001_v7  ;;  %v17012_v7 = vld [vmem:[#allocation165_spill] sm:$0xff] }
 0x600   :  { %9610 = vmatprep.subr.bf16.mxu0 %v17002_v52  ;;  %v17010_v52 = vld [vmem:[#allocation172_spill] sm:$0xff] }
 0x601   :  { %9584 = vmatpush3.bf16.msra.mxu1 %v17003_v47  ;;  %v17011_v47 = vld [vmem:[#allocation173_spill] sm:$0xff] }
 0x602   :  { %9585 = vmatprep.subr.bf16.mxu1 %v16820_v21 }
 0x603   :  { %9612 = vmatpush1.bf16.msra.mxu0 %v17004_v23  ;;  %v17015_v23 = vld [vmem:[#allocation166_spill] sm:$0xff] }
 0x604   :  { %9614 = vmatprep.subr.bf16.mxu0 %v17005_v43  ;;  %v17013_v43 = vld [vmem:[#allocation174_spill] sm:$0xff] }
 0x605   :  { %9587 = vmatpush3.bf16.msra.mxu1 %v17006_v5  ;;  %v17014_v5 = vld [vmem:[#allocation175_spill] sm:$0xff] }
 0x606   :  { %9588 = vmatprep.subr.bf16.mxu1 %v16820_v21 }
 0x607   :  { %9616 = vmatpush1.bf16.msra.mxu0 %v17007_v32  ;;  %v17016_v32 = vld [vmem:[#allocation178_spill] sm:$0xff] }
 0x608   :  { %9618 = vmatprep.subr.bf16.mxu0 %v17008_v19  ;;  %v17017_v19 = vld [vmem:[#allocation176_spill] sm:$0xff] }
 0x609   :  { %9590 = vmatpush3.bf16.msra.mxu1 %v17009_v25  ;;  %v17018_v25 = vld [vmem:[#allocation177_spill] sm:$0xff] }
 0x60a   :  { %9591 = vmatprep.subr.bf16.mxu1 %v16820_v21 }
 0x60b   :  { %9620 = vmatpush1.bf16.msra.mxu0 %v17010_v52  ;;  %v17021_v52 = vld [vmem:[#allocation179_spill] sm:$0xff] }
 0x60c   :  { %9622 = vmatprep.subr.bf16.mxu0 %v17011_v47  ;;  %v17019_v47 = vld [vmem:[#allocation180_spill] sm:$0xff] }
 0x60d   :  { %9593 = vmatpush3.bf16.msra.mxu1 %v17012_v7  ;;  %v17020_v7 = vld [vmem:[#allocation182_spill] sm:$0xff] }
 0x60e   :  { %9594 = vmatprep.subr.bf16.mxu1 %v16820_v21 }
 0x60f   :  { %9624 = vmatpush1.bf16.msra.mxu0 %v17013_v43  ;;  %v17022_v43 = vld [vmem:[#allocation181_spill] sm:$0xff] }
 0x610   :  { %9626 = vmatprep.subr.bf16.mxu0 %v17014_v5  ;;  %v17023_v5 = vld [vmem:[#allocation184_spill] sm:$0xff] }
 0x611   :  { %9596 = vmatpush3.bf16.msra.mxu1 %v17015_v23  ;;  %v17024_v23 = vld [vmem:[#allocation186_spill] sm:$0xff] }
 0x612   :  { %9662 = vmatprep.subr.bf16.mxu1 %v17016_v32  ;;  %v17025_v32 = vld [vmem:[#allocation183_spill] sm:$0xff] }
 0x613   :  { %9628 = vmatpush1.bf16.msra.mxu0 %v17017_v19  ;;  %v17026_v19 = vld [vmem:[#allocation185_spill] sm:$0xff] }
 0x614   :  { %8361 = vmatmul.mubr.f32.vlgmr.msra.gmra.mrb[18].mxu1 %v14198_v58  ;;  %9630 = vmatprep.subr.bf16.mxu0 %v17018_v25  ;;  %v17028_v25 = vld [vmem:[#allocation190_spill] sm:$0xff] }
 0x615   :  { %2168 = vmatprep.mubr.f32.mxu1 %v14358_v49  ;;  %9664 = vmatpush3.bf16.msra.mxu1 %v17019_v47  ;;  %v17030_v47 = vld [vmem:[#allocation189_spill] sm:$0xff] }
 0x616   :  { %9666 = vmatprep.subr.bf16.mxu1 %v17020_v7  ;;  %v17031_v7 = vld [vmem:[#allocation192_spill] sm:$0xff] }
 0x617   :  { %9632 = vmatpush1.bf16.msra.mxu0 %v17021_v52  ;;  %v17032_v52 = vld [vmem:[#allocation194_spill] sm:$0xff] }
 0x618   :  { %9634 = vmatprep.subr.bf16.mxu0 %v17022_v43  ;;  %v17033_v43 = vld [vmem:[#allocation191_spill] sm:$0xff] }
 0x619   :  { %9668 = vmatpush3.bf16.msra.mxu1 %v17023_v5  ;;  %v17034_v5 = vld [vmem:[#allocation193_spill] sm:$0xff] }
 0x61a   :  { %9670 = vmatprep.subr.bf16.mxu1 %v17024_v23  ;;  %v17035_v23 = vld [vmem:[#allocation196_spill] sm:$0xff] }
 0x61b   :  { %9636 = vmatpush1.bf16.msra.mxu0 %v17025_v32  ;;  %v17036_v32 = vld [vmem:[#allocation198_spill] sm:$0xff] }
 0x61c   :  { %9638 = vmatprep.subr.bf16.mxu0 %v17026_v19  ;;  %v17037_v19 = vld [vmem:[#allocation195_spill] sm:$0xff] }
 0x61d   :  { %9672 = vmatpush3.bf16.msra.mxu1 %v17027_v24  ;;  %v17038_v24 = vld [vmem:[#allocation197_spill] sm:$0xff] }
 0x61e   :  { %9674 = vmatprep.subr.bf16.mxu1 %v17028_v25  ;;  %v17039_v25 = vld [vmem:[#allocation200_spill] sm:$0xff] }
 0x61f   :  { %9640 = vmatpush1.bf16.msra.mxu0 %v17029_v57  ;;  %v17040_v57 = vld [vmem:[#allocation202_spill] sm:$0xff] }
 0x620   :  { %9642 = vmatprep.subr.bf16.mxu0 %v17030_v47  ;;  %v17041_v47 = vld [vmem:[#allocation199_spill] sm:$0xff] }
 0x621   :  { %9676 = vmatpush3.bf16.msra.mxu1 %v17031_v7  ;;  %v17042_v7 = vld [vmem:[#allocation201_spill] sm:$0xff] }
 0x622   :  { %9678 = vmatprep.subr.bf16.mxu1 %v17032_v52  ;;  %v17043_v52 = vld [vmem:[#allocation204_spill] sm:$0xff] }
 0x623   :  { %9644 = vmatpush1.bf16.msra.mxu0 %v17033_v43  ;;  %v17044_v43 = vld [vmem:[#allocation206_spill] sm:$0xff] }
 0x624   :  { %9646 = vmatprep.subr.bf16.mxu0 %v17034_v5  ;;  %v17045_v5 = vld [vmem:[#allocation203_spill] sm:$0xff] }
 0x625   :  { %9680 = vmatpush3.bf16.msra.mxu1 %v17035_v23  ;;  %v17046_v23 = vld [vmem:[#allocation205_spill] sm:$0xff] }
 0x626   :  { %9682 = vmatprep.subr.bf16.mxu1 %v17036_v32  ;;  %v17047_v32 = vld [vmem:[#allocation208_spill] sm:$0xff] }
 0x627   :  { %9648 = vmatpush1.bf16.msra.mxu0 %v17037_v19  ;;  %v17050_v19 = vld [vmem:[#allocation209_spill] sm:$0xff] }
 0x628   :  { %9650 = vmatprep.subr.bf16.mxu0 %v17038_v24  ;;  %v17048_v24 = vld [vmem:[#allocation207_spill] sm:$0xff] }
 0x629   :  { %9684 = vmatpush3.bf16.msra.mxu1 %v17039_v25  ;;  %v17049_v25 = vld [vmem:[#allocation19_spill] sm:$0xff] }
 0x62a   :  { %9686 = vmatprep.subr.bf16.mxu1 %v17040_v57 }
 0x62b   :  { %9652 = vmatpush1.bf16.msra.mxu0 %v17041_v47 }
 0x62c   :  { %9654 = vmatprep.subr.bf16.mxu0 %v17042_v7 }
 0x62d   :  { %9688 = vmatpush3.bf16.msra.mxu1 %v17043_v52 }
 0x62e   :  { %9690 = vmatprep.subr.bf16.mxu1 %v17044_v43 }
 0x62f   :  { %9656 = vmatpush1.bf16.msra.mxu0 %v17045_v5  ;;  %v17051_v5 = vld [vmem:[#allocation210_spill] sm:$0xff] }
 0x630   :  { %9658 = vmatprep.subr.bf16.mxu0 %v17046_v23 }
 0x631   :  { %9692 = vmatpush3.bf16.msra.mxu1 %v17047_v32 }
 0x632   :  { %9693 = vmatprep.subr.bf16.mxu1 %v16820_v21 }
 0x633   :  { %9660 = vmatpush1.bf16.msra.mxu0 %v17048_v24 }
 0x634   :  { %9718 = vmatprep.subr.bf16.mxu0 %v17049_v25 }
 0x6c7   :  { %v1869_v57 = vpop.f32.mrb[12].mxu0  ;;  %v7545_v47 = vpop.f32.mrb[16].mxu1 }
 0x6c8   :  { %v1870_v7 = vadd.f32 %v1869_v57, %v17050_v19  ;;  %v1871_v59 = vpop.f32.mrb[13].mxu0  ;;  %v7546_v52 = vpop.f32.mrb[17].mxu1 }
 0x6c9   :  { %v7547_v1 = vadd.f32 %v7546_v52, %v7545_v47  ;;  %v1872_v28 = vadd.f32 %v1871_v59, %v17051_v5 }
 0x6ca   :  { %v7338_v43 = vmul.f32 -1.442695, %v1870_v7 }
 0x6cb   :  { %v7339_v23 = vmul.f32 -1.442695, %v1872_v28  ;;  %v1941_v57 = vadd.f32 %v7547_v1, %v14192_v3  ;;  %v17058_v1 = vld [vmem:[#allocation49_spill] sm:$0xff] }
 0x6cc   :  { %12434 = vpow2.f32 %v7338_v43 }
 0x6cd   :  { %12436 = vpow2.f32 %v7339_v23 }
 0x6d6   :  { %v12435_v56 = vpop.eup %12434 }
 0x6d7   :  { %v2017_v32 = vadd.f32 1.0, %v12435_v56  ;;  %v12437_v29 = vpop.eup %12436 }
 0x6d8   :  { %v2023_v24 = vadd.f32 1.0, %v12437_v29  ;;  %v17057_v29 = vld [vmem:[#allocation27_spill] sm:$0xff] }
 0x6d9   :  { %12438 = vrcp.f32 %v2017_v32  ;;  %v17061_v32 = vld [vmem:[#allocation29_spill] sm:$0xff] }
 0x6da   :  { %12440 = vrcp.f32 %v2023_v24  ;;  %v17059_v24 = vld [vmem:[#allocation51_spill] sm:$0xff] }
 0x6e3   :  { %v12439_v60 = vpop.eup %12438 }
 0x6e4   :  { %v12441_v47 = vpop.eup %12440 }
 0x6e5   :  { %v2029_v59 = vsub.f32 1.0, %v12441_v47  ;;  %v2031_v23 = vmul.f32 %v12441_v47, %v14198_v58  ;;  %v17052_v58 = vld [vmem:[#allocation24_spill] sm:$0xff]  ;;  %v17065_v47 = vld [vmem:[#allocation31_spill] sm:$0xff] }
 0x6e7   :  { %v2010_v38 = vpop.f32.mrb[18].mxu1 }
 0x6e8   :  { %v2011_v25 = vadd.f32 %v14189_v0, %v2010_v38  ;;  %v8362_v42 = vpop.f32.mrb[19].mxu1  ;;  %v17053_v0 = vld [vmem:[#allocation25_spill] sm:$0xff]  ;;  %v17056_v38 = vld [vmem:[#allocation26_spill] sm:$0xff] }
 0x6e9   :  { %v17055_v42 = vld [vmem:[#allocation47_spill] sm:$0xff] }
 0x6ea   :  { %v2026_v52 = vmul.f32 %v12439_v60, %v2011_v25  ;;  %v17054_v60 = vld [vmem:[#allocation45_spill] sm:$0xff]  ;;  %v17060_v25 = vld [vmem:[#allocation28_spill] sm:$0xff] }
 0x6ec   :  { %v2027_v7 = vadd.f32 %v2026_v52, %v1941_v57  ;;  %v17062_v57 = vld [vmem:[#allocation53_spill] sm:$0xff]  ;;  %v17063_v52 = vld [vmem:[#allocation55_spill] sm:$0xff] }
 0x6ee   :  { %12442 = vtanh.f32 %v2027_v7  ;;  %v17064_v7 = vld [vmem:[#allocation30_spill] sm:$0xff] }
 0x6f8   :  { %v12443_v28 = vpop.eup %12442 }
 0x6f9   :  { %v2030_v56 = vmul.f32 %v12443_v28, %v2029_v59  ;;  %v17066_v59 = vld [vmem:[#allocation57_spill] sm:$0xff]  ;;  %v17067_v28 = vld [vmem:[#allocation59_spill] sm:$0xff] }
 0x6fb   :  { %v14509_v43 = vadd.f32 %v2031_v23, %v2030_v56  ;;  %v17068_v23 = vld [vmem:[#allocation32_spill] sm:$0xff]  ;;  %v17069_v56 = vld [vmem:[#allocation33_spill] sm:$0xff] }
 0x6fd   :  { %2098 = vmatmul.mubr.f32.vlgmr.msra.gmra.mrb[14].mxu0 %v14509_v43  ;;  %2169 = vmatmul.mubr.f32.vlgmr.msra.gmra.mrb[20].mxu1 %v14509_v43 }
 0x6fe   :  { %9695 = vmatpush3.bf16.msra.mxu1 %v14196_v36  ;;  %9720 = vmatpush1.bf16.msra.mxu0 %v13122_v9 }
 0x6ff   :  { %9696 = vmatprep.subr.bf16.mxu1 %v16820_v21  ;;  %9722 = vmatprep.subr.bf16.mxu0 %v13129_v17 }
 0x700   :  { %8395 = vmatprep.mubr.msk.f32.mxu1 %vm12951_vm0, %v16762_v61  ;;  %2329 = vmatprep.mubr.f32.mxu0 %v16762_v61 }
 0x702   :  { %9698 = vmatpush3.bf16.msra.mxu1 %v14204_v46  ;;  %9724 = vmatpush1.bf16.msra.mxu0 %v13134_v22 }
 0x703   :  { %9699 = vmatprep.subr.bf16.mxu1 %v16820_v21  ;;  %9726 = vmatprep.subr.bf16.mxu0 %v13140_v27 }
 0x706   :  { %9701 = vmatpush3.bf16.msra.mxu1 %v14213_v6  ;;  %9728 = vmatpush1.bf16.msra.mxu0 %v13145_v35 }
 0x707   :  { %9702 = vmatprep.subr.bf16.mxu1 %v16820_v21  ;;  %9730 = vmatprep.subr.bf16.mxu0 %v13151_v40 }
 0x70a   :  { %9704 = vmatpush3.bf16.msra.mxu1 %v14219_v30  ;;  %9732 = vmatpush1.bf16.msra.mxu0 %v13157_v51 }
 0x70b   :  { %9705 = vmatprep.subr.bf16.mxu1 %v16820_v21  ;;  %9734 = vmatprep.subr.bf16.mxu0 %v13163_v53 }
 0x70e   :  { %9707 = vmatpush3.bf16.msra.mxu1 %v14225_v4  ;;  %9736 = vmatpush1.bf16.msra.mxu0 %v13169_v63 }
 0x70f   :  { %9708 = vmatprep.subr.bf16.mxu1 %v16820_v21  ;;  %9738 = vmatprep.subr.bf16.mxu0 %v13175_v2 }
 0x712   :  { %9710 = vmatpush3.bf16.msra.mxu1 %v14231_v14  ;;  %9740 = vmatpush1.bf16.msra.mxu0 %v13181_v16 }
 0x713   :  { %9711 = vmatprep.subr.bf16.mxu1 %v16820_v21  ;;  %9742 = vmatprep.subr.bf16.mxu0 %v13187_v20 }
 0x716   :  { %9713 = vmatpush3.bf16.msra.mxu1 %v14237_v11  ;;  %9744 = vmatpush1.bf16.msra.mxu0 %v13193_v34 }
 0x717   :  { %9714 = vmatprep.subr.bf16.mxu1 %v16820_v21  ;;  %9746 = vmatprep.subr.bf16.mxu0 %v13199_v37 }
 0x71a   :  { %9716 = vmatpush3.bf16.msra.mxu1 %v14243_v54  ;;  %9748 = vmatpush1.bf16.msra.mxu0 %v13217_v50 }
 0x71b   :  { %9750 = vmatprep.subr.bf16.mxu1 %v13120_v8  ;;  %9782 = vmatprep.subr.bf16.mxu0 %v13223_v55 }
 0x71d   :  { %8396 = vmatmul.mubr.f32.vlgmr.msra.gmra.mrb[22].mxu1 %v14358_v49  ;;  %2330 = vmatmul.mubr.f32.vlgmr.msra.gmra.mrb[16].mxu0 %v14369_v45 }
 0x71e   :  { %9752 = vmatpush1.bf16.msra.mxu1 %v13125_v13  ;;  %2525 = vmatprep.mubr.f32.mxu0 %v14431_v15 }
 0x71f   :  { %9754 = vmatprep.subr.bf16.mxu1 %v13131_v18  ;;  %2400 = vmatprep.mubr.f32.mxu1 %v16762_v61 }
 0x720   :  { %9784 = vmatpush1.bf16.msra.mxu0 %v13253_v10 }
 0x721   :  { %9786 = vmatprep.subr.bf16.mxu0 %v13259_v12 }
 0x722   :  { %9756 = vmatpush1.bf16.msra.mxu1 %v13138_v26 }
 0x723   :  { %9758 = vmatprep.subr.bf16.mxu1 %v13142_v31 }
 0x724   :  { %9788 = vmatpush1.bf16.msra.mxu0 %v13291_v33 }
 0x725   :  { %9790 = vmatprep.subr.bf16.mxu0 %v13297_v41 }
 0x726   :  { %9760 = vmatpush1.bf16.msra.mxu1 %v13149_v39 }
 0x727   :  { %9762 = vmatprep.subr.bf16.mxu1 %v13154_v44 }
 0x728   :  { %9792 = vmatpush1.bf16.msra.mxu0 %v13317_v48 }
 0x729   :  { %9794 = vmatprep.subr.bf16.mxu0 %v13335_v62 }
 0x72a   :  { %9764 = vmatpush1.bf16.msra.mxu1 %v17052_v58 }
 0x72b   :  { %9766 = vmatprep.subr.bf16.mxu1 %v17053_v0 }
 0x72c   :  { %9796 = vmatpush1.bf16.msra.mxu0 %v17054_v60  ;;  %v17122_v60 = vld [vmem:[#allocation211_spill] sm:$0xff] }
 0x72d   :  { %9798 = vmatprep.subr.bf16.mxu0 %v17055_v42 }
 0x72e   :  { %9768 = vmatpush1.bf16.msra.mxu1 %v17056_v38 }
 0x72f   :  { %9770 = vmatprep.subr.bf16.mxu1 %v17057_v29 }
 0x730   :  { %9800 = vmatpush1.bf16.msra.mxu0 %v17058_v1 }
 0x731   :  { %9802 = vmatprep.subr.bf16.mxu0 %v17059_v24  ;;  %v17070_v24 = vld [vmem:[#allocation61_spill] sm:$0xff] }
 0x732   :  { %9772 = vmatpush1.bf16.msra.mxu1 %v17060_v25 }
 0x733   :  { %9774 = vmatprep.subr.bf16.mxu1 %v17061_v32  ;;  %v17071_v32 = vld [vmem:[#allocation63_spill] sm:$0xff] }
 0x734   :  { %9804 = vmatpush1.bf16.msra.mxu0 %v17062_v57  ;;  %v17120_v57 = vld [vmem:[#allocation146_spill] sm:$0xff] }
 0x735   :  { %9806 = vmatprep.subr.bf16.mxu0 %v17063_v52  ;;  %v17072_v52 = vld [vmem:[#allocation34_spill] sm:$0xff] }
 0x736   :  { %9776 = vmatpush1.bf16.msra.mxu1 %v17064_v7  ;;  %v17073_v7 = vld [vmem:[#allocation36_spill] sm:$0xff] }
 0x737   :  { %9778 = vmatprep.subr.bf16.mxu1 %v17065_v47  ;;  %v17074_v47 = vld [vmem:[#allocation65_spill] sm:$0xff] }
 0x738   :  { %9808 = vmatpush1.bf16.msra.mxu0 %v17066_v59  ;;  %v17075_v59 = vld [vmem:[#allocation67_spill] sm:$0xff] }
 0x739   :  { %9810 = vmatprep.subr.bf16.mxu0 %v17067_v28  ;;  %v17076_v28 = vld [vmem:[#allocation38_spill] sm:$0xff] }
 0x73a   :  { %9780 = vmatpush1.bf16.msra.mxu1 %v17068_v23  ;;  %v17077_v23 = vld [vmem:[#allocation40_spill] sm:$0xff] }
 0x73b   :  { %9846 = vmatprep.subr.bf16.mxu1 %v17069_v56  ;;  %v17078_v56 = vld [vmem:[#allocation69_spill] sm:$0xff] }
 0x73c   :  { %9812 = vmatpush1.bf16.msra.mxu0 %v17070_v24  ;;  %v17079_v24 = vld [vmem:[#allocation71_spill] sm:$0xff] }
 0x73d   :  { %2401 = vmatmul.mubr.f32.vlgmr.msra.gmra.mrb[24].mxu1 %v14369_v45  ;;  %9814 = vmatprep.subr.bf16.mxu0 %v17071_v32  ;;  %v17080_v45 = vld [vmem:[#allocation42_spill] sm:$0xff]  ;;  %v17081_v32 = vld [vmem:[#allocation44_spill] sm:$0xff] }
 0x73e   :  { %2596 = vmatprep.mubr.f32.mxu1 %v14431_v15  ;;  %9848 = vmatpush1.bf16.msra.mxu1 %v17072_v52  ;;  %v17082_v15 = vld [vmem:[#allocation73_spill] sm:$0xff]  ;;  %v17083_v52 = vld [vmem:[#allocation75_spill] sm:$0xff] }
 0x73f   :  { %9850 = vmatprep.subr.bf16.mxu1 %v17073_v7  ;;  %v17084_v7 = vld [vmem:[#allocation46_spill] sm:$0xff] }
 0x740   :  { %9816 = vmatpush1.bf16.msra.mxu0 %v17074_v47  ;;  %v17085_v47 = vld [vmem:[#allocation48_spill] sm:$0xff] }
 0x741   :  { %9818 = vmatprep.subr.bf16.mxu0 %v17075_v59  ;;  %v17086_v59 = vld [vmem:[#allocation77_spill] sm:$0xff] }
 0x742   :  { %9852 = vmatpush1.bf16.msra.mxu1 %v17076_v28  ;;  %v17087_v28 = vld [vmem:[#allocation79_spill] sm:$0xff] }
 0x743   :  { %9854 = vmatprep.subr.bf16.mxu1 %v17077_v23  ;;  %v17088_v23 = vld [vmem:[#allocation50_spill] sm:$0xff] }
 0x744   :  { %9820 = vmatpush1.bf16.msra.mxu0 %v17078_v56  ;;  %v17089_v56 = vld [vmem:[#allocation52_spill] sm:$0xff] }
 0x745   :  { %9822 = vmatprep.subr.bf16.mxu0 %v17079_v24  ;;  %v17090_v24 = vld [vmem:[#allocation81_spill] sm:$0xff] }
 0x746   :  { %9856 = vmatpush1.bf16.msra.mxu1 %v17080_v45  ;;  %v17091_v45 = vld [vmem:[#allocation83_spill] sm:$0xff] }
 0x747   :  { %9858 = vmatprep.subr.bf16.mxu1 %v17081_v32  ;;  %v17092_v32 = vld [vmem:[#allocation54_spill] sm:$0xff] }
 0x748   :  { %9824 = vmatpush1.bf16.msra.mxu0 %v17082_v15  ;;  %v17093_v15 = vld [vmem:[#allocation56_spill] sm:$0xff] }
 0x749   :  { %9826 = vmatprep.subr.bf16.mxu0 %v17083_v52  ;;  %v17094_v52 = vld [vmem:[#allocation85_spill] sm:$0xff] }
 0x74a   :  { %9860 = vmatpush1.bf16.msra.mxu1 %v17084_v7  ;;  %v17095_v7 = vld [vmem:[#allocation87_spill] sm:$0xff] }
 0x74b   :  { %9862 = vmatprep.subr.bf16.mxu1 %v17085_v47  ;;  %v17096_v47 = vld [vmem:[#allocation58_spill] sm:$0xff] }
 0x74c   :  { %9828 = vmatpush1.bf16.msra.mxu0 %v17086_v59  ;;  %v17097_v59 = vld [vmem:[#allocation60_spill] sm:$0xff] }
 0x74d   :  { %9830 = vmatprep.subr.bf16.mxu0 %v17087_v28  ;;  %v17098_v28 = vld [vmem:[#allocation89_spill] sm:$0xff] }
 0x74e   :  { %9864 = vmatpush1.bf16.msra.mxu1 %v17088_v23  ;;  %v17099_v23 = vld [vmem:[#allocation91_spill] sm:$0xff] }
 0x74f   :  { %9866 = vmatprep.subr.bf16.mxu1 %v17089_v56  ;;  %v17100_v56 = vld [vmem:[#allocation62_spill] sm:$0xff] }
 0x750   :  { %9832 = vmatpush1.bf16.msra.mxu0 %v17090_v24  ;;  %v17101_v24 = vld [vmem:[#allocation64_spill] sm:$0xff] }
 0x751   :  { %9834 = vmatprep.subr.bf16.mxu0 %v17091_v45  ;;  %v17102_v45 = vld [vmem:[#allocation93_spill] sm:$0xff] }
 0x752   :  { %9868 = vmatpush1.bf16.msra.mxu1 %v17092_v32  ;;  %v17103_v32 = vld [vmem:[#allocation95_spill] sm:$0xff] }
 0x753   :  { %9870 = vmatprep.subr.bf16.mxu1 %v17093_v15  ;;  %v17104_v15 = vld [vmem:[#allocation66_spill] sm:$0xff] }
 0x754   :  { %9836 = vmatpush1.bf16.msra.mxu0 %v17094_v52  ;;  %v17105_v52 = vld [vmem:[#allocation68_spill] sm:$0xff] }
 0x755   :  { %9838 = vmatprep.subr.bf16.mxu0 %v17095_v7  ;;  %v17106_v7 = vld [vmem:[#allocation70_spill] sm:$0xff] }
 0x756   :  { %9872 = vmatpush1.bf16.msra.mxu1 %v17096_v47  ;;  %v17107_v47 = vld [vmem:[#allocation72_spill] sm:$0xff] }
 0x757   :  { %9874 = vmatprep.subr.bf16.mxu1 %v17097_v59  ;;  %v17108_v59 = vld [vmem:[#allocation74_spill] sm:$0xff] }
 0x758   :  { %9840 = vmatpush1.bf16.msra.mxu0 %v17098_v28  ;;  %v17109_v28 = vld [vmem:[#allocation76_spill] sm:$0xff] }
 0x759   :  { %9842 = vmatprep.subr.bf16.mxu0 %v17099_v23  ;;  %v17110_v23 = vld [vmem:[#allocation78_spill] sm:$0xff] }
 0x75a   :  { %9876 = vmatpush1.bf16.msra.mxu1 %v17100_v56  ;;  %v17111_v56 = vld [vmem:[#allocation80_spill] sm:$0xff] }
 0x75b   :  { %9878 = vmatprep.subr.bf16.mxu1 %v17101_v24  ;;  %v17112_v24 = vld [vmem:[#allocation82_spill] sm:$0xff] }
 0x75c   :  { %9844 = vmatpush1.bf16.msra.mxu0 %v17102_v45  ;;  %v17113_v45 = vld [vmem:[#allocation84_spill] sm:$0xff] }
 0x75d   :  { %9910 = vmatprep.subr.bf16.mxu0 %v17103_v32  ;;  %v17114_v32 = vld [vmem:[#allocation86_spill] sm:$0xff] }
 0x75e   :  { %9880 = vmatpush1.bf16.msra.mxu1 %v17104_v15  ;;  %v17115_v15 = vld [vmem:[#allocation88_spill] sm:$0xff] }
 0x75f   :  { %9882 = vmatprep.subr.bf16.mxu1 %v17105_v52  ;;  %v17116_v52 = vld [vmem:[#allocation90_spill] sm:$0xff] }
 0x762   :  { %9884 = vmatpush1.bf16.msra.mxu1 %v17106_v7  ;;  %v17117_v7 = vld [vmem:[#allocation92_spill] sm:$0xff] }
 0x763   :  { %9886 = vmatprep.subr.bf16.mxu1 %v17107_v47  ;;  %v17118_v47 = vld [vmem:[#allocation94_spill] sm:$0xff] }
 0x766   :  { %9888 = vmatpush1.bf16.msra.mxu1 %v17108_v59  ;;  %v17119_v59 = vld [vmem:[#allocation113_spill] sm:$0xff] }
 0x767   :  { %9890 = vmatprep.subr.bf16.mxu1 %v17109_v28 }
 0x76a   :  { %9892 = vmatpush1.bf16.msra.mxu1 %v17110_v23 }
 0x76b   :  { %9894 = vmatprep.subr.bf16.mxu1 %v17111_v56 }
 0x76e   :  { %9896 = vmatpush1.bf16.msra.mxu1 %v17112_v24 }
 0x76f   :  { %9898 = vmatprep.subr.bf16.mxu1 %v17113_v45 }
 0x772   :  { %9900 = vmatpush1.bf16.msra.mxu1 %v17114_v32  ;;  %v17121_v32 = vld [vmem:[#allocation147_spill] sm:$0xff] }
 0x773   :  { %9902 = vmatprep.subr.bf16.mxu1 %v17115_v15 }
 0x776   :  { %9904 = vmatpush1.bf16.msra.mxu1 %v17116_v52 }
 0x777   :  { %9906 = vmatprep.subr.bf16.mxu1 %v17117_v7 }
 0x77a   :  { %9908 = vmatpush1.bf16.msra.mxu1 %v17118_v47 }
 0x77b   :  { %9974 = vmatprep.subr.bf16.mxu1 %v17119_v59 }
 0x7d0   :  { %v2099_v28 = vpop.f32.mrb[14].mxu0  ;;  %v7597_v23 = vpop.f32.mrb[20].mxu1 }
 0x7d1   :  { %v2100_v56 = vadd.f32 %v2099_v28, %v17120_v57  ;;  %v2101_v25 = vpop.f32.mrb[15].mxu0  ;;  %v7598_v24 = vpop.f32.mrb[21].mxu1 }
 0x7d2   :  { %v7599_v1 = vadd.f32 %v7598_v24, %v7597_v23  ;;  %v2102_v29 = vadd.f32 %v2101_v25, %v17121_v32  ;;  %v17123_v24 = vld [vmem:[#allocation151_spill] sm:$0xff] }
 0x7d3   :  { %v7340_v45 = vmul.f32 -1.442695, %v2100_v56 }
 0x7d4   :  { %v7341_v15 = vmul.f32 -1.442695, %v2102_v29  ;;  %v2171_v23 = vadd.f32 %v7599_v1, %v17123_v24 }
 0x7d5   :  { %12444 = vpow2.f32 %v7340_v45 }
 0x7d6   :  { %12446 = vpow2.f32 %v7341_v15 }
 0x7df   :  { %v12445_v38 = vpop.eup %12444 }
 0x7e0   :  { %v2247_v52 = vadd.f32 1.0, %v12445_v38  ;;  %v12447_v7 = vpop.eup %12446 }
 0x7e1   :  { %v2253_v47 = vadd.f32 1.0, %v12447_v7 }
 0x7e2   :  { %12448 = vrcp.f32 %v2247_v52 }
 0x7e3   :  { %12450 = vrcp.f32 %v2253_v47 }
 0x7ec   :  { %v12449_v57 = vpop.eup %12448 }
 0x7ed   :  { %v12451_v29 = vpop.eup %12450 }
 0x7ee   :  { %v2259_v45 = vsub.f32 1.0, %v12451_v29  ;;  %v2261_v7 = vmul.f32 %v12451_v29, %v14358_v49 }
 0x7f0   :  { %v2240_v42 = vpop.f32.mrb[22].mxu1  ;;  %v2331_v59 = vpop.f32.mrb[16].mxu0 }
 0x7f1   :  { %v2241_v0 = vadd.f32 %v17122_v60, %v2240_v42  ;;  %v8397_v58 = vpop.f32.mrb[23].mxu1  ;;  %v2333_v28 = vpop.f32.mrb[17].mxu0  ;;  %v17124_v42 = vld [vmem:[#allocation96_spill] sm:$0xff] }
 0x7f2   :  { %v2411_v62 = vcombine.low %v2331_v59, %v2333_v28 }
 0x7f3   :  { %v2256_v56 = vmul.f32 %v12449_v57, %v2241_v0  ;;  %v7342_v0 = vld [vmem:[%s16258_s0 + $0x10] sm:$0xff] }
 0x7f4   :  { %v2419_v48 = vrot.slane %v2411_v62, %v17124_v42 }
 0x7f5   :  { %v2257_v25 = vadd.f32 %v2256_v56, %v2171_v23 }
 0x7f7   :  { %12452 = vtanh.f32 %v2257_v25 }
 0x801   :  { %v12453_v38 = vpop.eup %12452 }
 0x802   :  { %v2260_v52 = vmul.f32 %v12453_v38, %v2259_v45 }
 0x804   :  { %v14639_v15 = vadd.f32 %v2261_v7, %v2260_v52 }
 0x810   :  { %v2402_v32 = vpop.f32.mrb[24].mxu1 }
 0x811   :  { %v2404_v60 = vpop.f32.mrb[25].mxu1 }
 0x812   :  { %v2412_v58 = vcombine.low %v2402_v32, %v2404_v60 }
 0x814   :  { %v2426_v47 = vrot.slane %v2412_v58, %v17124_v42  ;;  %v17125_v58 = vld [vmem:[#allocation97_spill] sm:$0xff] }
 0x816   :  { %v2427_v1 = vcombine.low %v2419_v48, %v2426_v47 }
 0x818   :  { %v2429_v57 = vadd.f32 %v7342_v0, %v2427_v1 }
 0x81a   :  { %v7343_v59 = vmul.f32 -1.442695, %v2429_v57  ;;  %v2437_v28 = vrot.slane %v2429_v57, 2  ;;  %v2448_v49 = vrot.slane %v2429_v57, 6  ;;  %v2445_v29 = vrot.slane %v2429_v57, 4 }
 0x81c   :  { %12454 = vpow2.f32 %v7343_v59  ;;  %v7344_v23 = vmul.f32 -1.442695, %v2437_v28  ;;  %v7345_v56 = vmul.f32 -1.442695, %v2448_v49  ;;  %v17128_v49 = vld [vmem:[#allocation115_spill] sm:$0xff] }
 0x81e   :  { %12456 = vpow2.f32 %v7344_v23  ;;  %v17127_v23 = vld [vmem:[#allocation98_spill] sm:$0xff] }
 0x81f   :  { %12458 = vpow2.f32 %v7345_v56  ;;  %v17129_v56 = vld [vmem:[#allocation99_spill] sm:$0xff] }
 0x826   :  { %v12455_v25 = vpop.eup %12454 }
 0x827   :  { %v2433_v32 = vadd.f32 1.0, %v12455_v25  ;;  %v17130_v25 = vld [vmem:[#allocation117_spill] sm:$0xff] }
 0x828   :  { %v12457_v45 = vpop.eup %12456 }
 0x829   :  { %12460 = vrcp.f32 %v2433_v32  ;;  %v2442_v62 = vadd.f32 1.0, %v12457_v45  ;;  %v12459_v38 = vpop.eup %12458  ;;  %v17132_v32 = vld [vmem:[#allocation119_spill] sm:$0xff]  ;;  %v17133_v45 = vld [vmem:[#allocation101_spill] sm:$0xff] }
 0x82a   :  { %12462 = vtanh.f32 %v2445_v29  ;;  %v2453_v60 = vadd.f32 1.0, %v12459_v38  ;;  %v17131_v29 = vld [vmem:[#allocation100_spill] sm:$0xff]  ;;  %v17135_v38 = vld [vmem:[#allocation102_spill] sm:$0xff] }
 0x82b   :  { %12464 = vrcp.f32 %v2442_v62  ;;  %v17134_v62 = vld [vmem:[#allocation121_spill] sm:$0xff] }
 0x82c   :  { %12466 = vrcp.f32 %v2453_v60  ;;  %v17139_v60 = vld [vmem:[#allocation104_spill] sm:$0xff] }
 0x833   :  { %v12461_v52 = vpop.eup %12460 }
 0x834   :  { %v12463_v48 = vpop.eup %12462 }
 0x835   :  { %v12465_v7 = vpop.eup %12464  ;;  %v2457_v0 = vmul.f32 %v12463_v48, %v12461_v52  ;;  %v17136_v52 = vld [vmem:[#allocation123_spill] sm:$0xff] }
 0x836   :  { %v2456_v47 = vmul.f32 %v12465_v7, %v17125_v58  ;;  %v12467_v57 = vpop.eup %12466  ;;  %v17137_v48 = vld [vmem:[#allocation103_spill] sm:$0xff]  ;;  %v17138_v7 = vld [vmem:[#allocation125_spill] sm:$0xff] }
 0x837   :  { %v17140_v58 = vld [vmem:[#allocation127_spill] sm:$0xff] }
 0x838   :  { %v14647_v1 = vadd.f32 %v2457_v0, %v2456_v47  ;;  %v17141_v47 = vld [vmem:[#allocation105_spill] sm:$0xff] }
 0x839   :  { %v17142_v0 = vld [vmem:[#allocation129_spill] sm:$0xff] }
 0x83a   :  { %17126 = vst [vmem:[#allocation209_spill] sm:$0xff] %v14647_v1  ;;  %12468 = vtanh.f32 %v14647_v1 }
 0x844   :  { %v12469_v59 = vpop.eup %12468 }
 0x845   :  { %v14650_v28 = vmul.f32 %v12469_v59, %v12467_v57  ;;  %v17143_v57 = vld [vmem:[#allocation106_spill] sm:$0xff]  ;;  %v17144_v59 = vld [vmem:[#allocation131_spill] sm:$0xff] }
 0x847   :  { %2526 = vmatmul.mubr.f32.vlgmr.msra.gmra.mrb[18].mxu0 %v14650_v28  ;;  %2597 = vmatmul.mubr.f32.vlgmr.msra.gmra.mrb[26].mxu1 %v14650_v28 }
 0x848   :  { %2691 = vmatprep.mubr.f32.mxu0 %v14509_v43  ;;  %2762 = vmatprep.mubr.f32.mxu1 %v14509_v43 }
 0x849   :  { %9912 = vmatpush1.bf16.msra.mxu0 %v17127_v23  ;;  %9976 = vmatpush3.bf16.msra.mxu1 %v17128_v49 }
 0x84a   :  { %9914 = vmatprep.subr.bf16.mxu0 %v17129_v56  ;;  %9978 = vmatprep.subr.bf16.mxu1 %v17130_v25 }
 0x84d   :  { %9916 = vmatpush1.bf16.msra.mxu0 %v17131_v29  ;;  %9980 = vmatpush3.bf16.msra.mxu1 %v17132_v32  ;;  %v17175_v29 = vld [vmem:[#allocation149_spill] sm:$0xff] }
 0x84e   :  { %9918 = vmatprep.subr.bf16.mxu0 %v17133_v45  ;;  %9982 = vmatprep.subr.bf16.mxu1 %v17134_v62  ;;  %v17145_v62 = vld [vmem:[#allocation107_spill] sm:$0xff]  ;;  %v17174_v45 = vld [vmem:[#allocation148_spill] sm:$0xff] }
 0x851   :  { %9920 = vmatpush1.bf16.msra.mxu0 %v17135_v38  ;;  %9984 = vmatpush3.bf16.msra.mxu1 %v17136_v52  ;;  %v17146_v38 = vld [vmem:[#allocation133_spill] sm:$0xff]  ;;  %v17147_v52 = vld [vmem:[#allocation108_spill] sm:$0xff] }
 0x852   :  { %9922 = vmatprep.subr.bf16.mxu0 %v17137_v48  ;;  %9986 = vmatprep.subr.bf16.mxu1 %v17138_v7  ;;  %v17148_v48 = vld [vmem:[#allocation135_spill] sm:$0xff]  ;;  %v17149_v7 = vld [vmem:[#allocation109_spill] sm:$0xff] }
 0x855   :  { %9924 = vmatpush1.bf16.msra.mxu0 %v17139_v60  ;;  %9988 = vmatpush3.bf16.msra.mxu1 %v17140_v58  ;;  %v17150_v60 = vld [vmem:[#allocation137_spill] sm:$0xff]  ;;  %v17151_v58 = vld [vmem:[#allocation110_spill] sm:$0xff] }
 0x856   :  { %9926 = vmatprep.subr.bf16.mxu0 %v17141_v47  ;;  %9990 = vmatprep.subr.bf16.mxu1 %v17142_v0  ;;  %v17152_v47 = vld [vmem:[#allocation139_spill] sm:$0xff] }
 0x857   :  { %v17153_v0 = vld [vmem:[#allocation111_spill] sm:$0xff] }
 0x859   :  { %9928 = vmatpush1.bf16.msra.mxu0 %v17143_v57  ;;  %9992 = vmatpush3.bf16.msra.mxu1 %v17144_v59  ;;  %v17154_v57 = vld [vmem:[#allocation141_spill] sm:$0xff]  ;;  %v17155_v59 = vld [vmem:[#allocation112_spill] sm:$0xff] }
 0x85a   :  { %9930 = vmatprep.subr.bf16.mxu0 %v17145_v62  ;;  %9994 = vmatprep.subr.bf16.mxu1 %v17146_v38  ;;  %v17156_v62 = vld [vmem:[#allocation143_spill] sm:$0xff]  ;;  %v17157_v38 = vld [vmem:[#allocation114_spill] sm:$0xff] }
 0x85d   :  { %9932 = vmatpush1.bf16.msra.mxu0 %v17147_v52  ;;  %9996 = vmatpush3.bf16.msra.mxu1 %v17148_v48  ;;  %v17158_v48 = vld [vmem:[#allocation116_spill] sm:$0xff] }
 0x85e   :  { %9934 = vmatprep.subr.bf16.mxu0 %v17149_v7  ;;  %9998 = vmatprep.subr.bf16.mxu1 %v17150_v60  ;;  %v17159_v7 = vld [vmem:[#allocation118_spill] sm:$0xff]  ;;  %v17160_v60 = vld [vmem:[#allocation120_spill] sm:$0xff] }
 0x85f   :  { %v17168_v52 = vld [vmem:[#allocation136_spill] sm:$0xff] }
 0x861   :  { %9936 = vmatpush1.bf16.msra.mxu0 %v17151_v58  ;;  %10000 = vmatpush3.bf16.msra.mxu1 %v17152_v47  ;;  %v17161_v58 = vld [vmem:[#allocation122_spill] sm:$0xff]  ;;  %v17162_v47 = vld [vmem:[#allocation124_spill] sm:$0xff] }
 0x862   :  { %9938 = vmatprep.subr.bf16.mxu0 %v17153_v0  ;;  %10002 = vmatprep.subr.bf16.mxu1 %v17154_v57  ;;  %v17163_v0 = vld [vmem:[#allocation126_spill] sm:$0xff]  ;;  %v17164_v57 = vld [vmem:[#allocation128_spill] sm:$0xff] }
 0x865   :  { %9940 = vmatpush1.bf16.msra.mxu0 %v17155_v59  ;;  %10004 = vmatpush3.bf16.msra.mxu1 %v17156_v62  ;;  %v17165_v59 = vld [vmem:[#allocation130_spill] sm:$0xff]  ;;  %v17166_v62 = vld [vmem:[#allocation132_spill] sm:$0xff] }
 0x866   :  { %9942 = vmatprep.subr.bf16.mxu0 %v17157_v38  ;;  %10005 = vmatprep.subr.bf16.mxu1 %v16820_v21  ;;  %v17167_v38 = vld [vmem:[#allocation134_spill] sm:$0xff] }
 0x869   :  { %9944 = vmatpush1.bf16.msra.mxu0 %v17158_v48  ;;  %v17169_v48 = vld [vmem:[#allocation138_spill] sm:$0xff] }
 0x86a   :  { %9946 = vmatprep.subr.bf16.mxu0 %v17159_v7  ;;  %v17170_v7 = vld [vmem:[#allocation140_spill] sm:$0xff] }
 0x86d   :  { %9948 = vmatpush1.bf16.msra.mxu0 %v17160_v60  ;;  %v17171_v60 = vld [vmem:[#allocation142_spill] sm:$0xff] }
 0x86e   :  { %9950 = vmatprep.subr.bf16.mxu0 %v17161_v58  ;;  %v17172_v58 = vld [vmem:[#allocation144_spill] sm:$0xff] }
 0x871   :  { %9952 = vmatpush1.bf16.msra.mxu0 %v17162_v47  ;;  %v17173_v47 = vld [vmem:[#allocation145_spill] sm:$0xff] }
 0x872   :  { %9954 = vmatprep.subr.bf16.mxu0 %v17163_v0 }
 0x875   :  { %9956 = vmatpush1.bf16.msra.mxu0 %v17164_v57 }
 0x876   :  { %9958 = vmatprep.subr.bf16.mxu0 %v17165_v59 }
 0x879   :  { %9960 = vmatpush1.bf16.msra.mxu0 %v17166_v62 }
 0x87a   :  { %9962 = vmatprep.subr.bf16.mxu0 %v17167_v38 }
 0x87d   :  { %9964 = vmatpush1.bf16.msra.mxu0 %v17168_v52 }
 0x87e   :  { %9966 = vmatprep.subr.bf16.mxu0 %v17169_v48  ;;  %v17176_v48 = vld [vmem:[#allocation150_spill] sm:$0xff] }
 0x881   :  { %9968 = vmatpush1.bf16.msra.mxu0 %v17170_v7 }
 0x882   :  { %9970 = vmatprep.subr.bf16.mxu0 %v17171_v60  ;;  %v17177_v60 = vld [vmem:[#allocation152_spill] sm:$0xff] }
 0x885   :  { %9972 = vmatpush1.bf16.msra.mxu0 %v17172_v58 }
 0x886   :  { %10030 = vmatprep.subr.bf16.mxu0 %v17173_v47 }
 0x91a   :  { %v2527_v0 = vpop.f32.mrb[18].mxu0  ;;  %v2598_v57 = vpop.f32.mrb[26].mxu1 }
 0x91b   :  { %v2528_v59 = vadd.f32 %v2527_v0, %v17174_v45  ;;  %v2529_v32 = vpop.f32.mrb[19].mxu0  ;;  %v2600_v62 = vpop.f32.mrb[27].mxu1  ;;  %v2599_v49 = vadd.f32 %v2598_v57, %v17177_v60  ;;  %v17185_v57 = vld [vmem:[#allocation160_spill] sm:$0xff] }
 0x91c   :  { %v2530_v38 = vadd.f32 %v2529_v32, %v17175_v29  ;;  %v2601_v7 = vadd.f32 %v2600_v62, %v17176_v48 }
 0x91d   :  { %v7346_v25 = vmul.f32 -1.442695, %v2528_v59 }
 0x91e   :  { %v7347_v52 = vmul.f32 -1.442695, %v2530_v38  ;;  %v7348_v56 = vmul.f32 -1.442695, %v2601_v7 }
 0x91f   :  { %12470 = vpow2.f32 %v7346_v25 }
 0x920   :  { %12472 = vpow2.f32 %v7347_v52  ;;  %v17178_v52 = vld [vmem:[#allocation153_spill] sm:$0xff] }
 0x921   :  { %12474 = vpow2.f32 %v7348_v56 }
 0x922   :  { %12476 = vtanh.f32 %v2599_v49  ;;  %v17181_v49 = vld [vmem:[#allocation156_spill] sm:$0xff] }
 0x929   :  { %v12471_v58 = vpop.eup %12470 }
 0x92a   :  { %v12473_v23 = vpop.eup %12472  ;;  %v2606_v47 = vadd.f32 1.0, %v12471_v58 }
 0x92b   :  { %v2612_v1 = vadd.f32 1.0, %v12473_v23  ;;  %v12475_v0 = vpop.eup %12474  ;;  %v17180_v23 = vld [vmem:[#allocation155_spill] sm:$0xff] }
 0x92c   :  { %12478 = vrcp.f32 %v2606_v47  ;;  %v12477_v45 = vpop.eup %12476  ;;  %v2619_v25 = vadd.f32 1.0, %v12475_v0  ;;  %v17184_v47 = vld [vmem:[#allocation159_spill] sm:$0xff]  ;;  %v17186_v0 = vld [vmem:[#allocation161_spill] sm:$0xff] }
 0x92d   :  { %12480 = vrcp.f32 %v2612_v1  ;;  %v17179_v1 = vld [vmem:[#allocation154_spill] sm:$0xff] }
 0x92e   :  { %12482 = vrcp.f32 %v2619_v25  ;;  %v17190_v25 = vld [vmem:[#allocation169_spill] sm:$0xff] }
 0x936   :  { %v12479_v32 = vpop.eup %12478 }
 0x937   :  { %v12481_v59 = vpop.eup %12480  ;;  %v2623_v38 = vmul.f32 %v12479_v32, %v12477_v45  ;;  %v17183_v45 = vld [vmem:[#allocation158_spill] sm:$0xff]  ;;  %v17187_v32 = vld [vmem:[#allocation167_spill] sm:$0xff] }
 0x938   :  { %v2622_v29 = vmul.f32 %v12481_v59, %v17178_v52  ;;  %v12483_v7 = vpop.eup %12482  ;;  %v17188_v59 = vld [vmem:[#allocation162_spill] sm:$0xff]  ;;  %v17191_v52 = vld [vmem:[#allocation163_spill] sm:$0xff] }
 0x93a   :  { %v14709_v62 = vadd.f32 %v2623_v38, %v2622_v29  ;;  %v17182_v29 = vld [vmem:[#allocation157_spill] sm:$0xff]  ;;  %v17189_v38 = vld [vmem:[#allocation168_spill] sm:$0xff] }
 0x93c   :  { %12484 = vtanh.f32 %v14709_v62 }
 0x946   :  { %v12485_v58 = vpop.eup %12484 }
 0x947   :  { %v14712_v56 = vmul.f32 %v12485_v58, %v12483_v7  ;;  %v17192_v7 = vld [vmem:[#allocation170_spill] sm:$0xff]  ;;  %v17193_v58 = vld [vmem:[#allocation171_spill] sm:$0xff] }
 0x949   :  { %2692 = vmatmul.mubr.f32.vlgmr.msra.gmra.mrb[20].mxu0 %v14712_v56  ;;  %2763 = vmatmul.mubr.f32.vlgmr.msra.gmra.mrb[28].mxu1 %v14712_v56 }
 0x94a   :  { %10007 = vmatpush3.bf16.msra.mxu1 %v17179_v1  ;;  %2921 = vmatprep.mubr.f32.mxu0 %v14639_v15 }
 0x94b   :  { %10008 = vmatprep.subr.bf16.mxu1 %v16820_v21  ;;  %8430 = vmatprep.mubr.msk.f32.mxu1 %vm12951_vm0, %v16762_v61 }
 0x94c   :  { %10032 = vmatpush1.bf16.msra.mxu0 %v17180_v23 }
 0x94d   :  { %10034 = vmatprep.subr.bf16.mxu0 %v17181_v49 }
 0x94e   :  { %10010 = vmatpush3.bf16.msra.mxu1 %v17182_v29 }
 0x94f   :  { %10011 = vmatprep.subr.bf16.mxu1 %v16820_v21 }
 0x950   :  { %10036 = vmatpush1.bf16.msra.mxu0 %v17183_v45  ;;  %v17214_v45 = vld [vmem:[#allocation187_spill] sm:$0xff] }
 0x951   :  { %10038 = vmatprep.subr.bf16.mxu0 %v17184_v47  ;;  %v17212_v47 = vld [vmem:[#allocation188_spill] sm:$0xff] }
 0x952   :  { %10013 = vmatpush3.bf16.msra.mxu1 %v17185_v57  ;;  %v17194_v57 = vld [vmem:[#allocation164_spill] sm:$0xff] }
 0x953   :  { %10014 = vmatprep.subr.bf16.mxu1 %v16820_v21 }
 0x954   :  { %10040 = vmatpush1.bf16.msra.mxu0 %v17186_v0  ;;  %v17197_v0 = vld [vmem:[#allocation165_spill] sm:$0xff] }
 0x955   :  { %10042 = vmatprep.subr.bf16.mxu0 %v17187_v32  ;;  %v17195_v32 = vld [vmem:[#allocation172_spill] sm:$0xff] }
 0x956   :  { %10016 = vmatpush3.bf16.msra.mxu1 %v17188_v59  ;;  %v17196_v59 = vld [vmem:[#allocation173_spill] sm:$0xff] }
 0x957   :  { %10017 = vmatprep.subr.bf16.mxu1 %v16820_v21 }
 0x958   :  { %10044 = vmatpush1.bf16.msra.mxu0 %v17189_v38  ;;  %v17200_v38 = vld [vmem:[#allocation166_spill] sm:$0xff] }
 0x959   :  { %10046 = vmatprep.subr.bf16.mxu0 %v17190_v25  ;;  %v17198_v25 = vld [vmem:[#allocation174_spill] sm:$0xff] }
 0x95a   :  { %10019 = vmatpush3.bf16.msra.mxu1 %v17191_v52  ;;  %v17199_v52 = vld [vmem:[#allocation175_spill] sm:$0xff] }
 0x95b   :  { %10020 = vmatprep.subr.bf16.mxu1 %v16820_v21 }
 0x95c   :  { %10048 = vmatpush1.bf16.msra.mxu0 %v17192_v7  ;;  %v17201_v7 = vld [vmem:[#allocation178_spill] sm:$0xff] }
 0x95d   :  { %10050 = vmatprep.subr.bf16.mxu0 %v17193_v58  ;;  %v17202_v58 = vld [vmem:[#allocation176_spill] sm:$0xff] }
 0x95e   :  { %10022 = vmatpush3.bf16.msra.mxu1 %v17194_v57  ;;  %v17203_v57 = vld [vmem:[#allocation177_spill] sm:$0xff] }
 0x95f   :  { %10023 = vmatprep.subr.bf16.mxu1 %v16820_v21 }
 0x960   :  { %10052 = vmatpush1.bf16.msra.mxu0 %v17195_v32  ;;  %v17206_v32 = vld [vmem:[#allocation179_spill] sm:$0xff] }
 0x961   :  { %10054 = vmatprep.subr.bf16.mxu0 %v17196_v59  ;;  %v17204_v59 = vld [vmem:[#allocation180_spill] sm:$0xff] }
 0x962   :  { %10025 = vmatpush3.bf16.msra.mxu1 %v17197_v0  ;;  %v17205_v0 = vld [vmem:[#allocation182_spill] sm:$0xff] }
 0x963   :  { %10026 = vmatprep.subr.bf16.mxu1 %v16820_v21 }
 0x964   :  { %10056 = vmatpush1.bf16.msra.mxu0 %v17198_v25  ;;  %v17207_v25 = vld [vmem:[#allocation181_spill] sm:$0xff] }
 0x965   :  { %10058 = vmatprep.subr.bf16.mxu0 %v17199_v52  ;;  %v17208_v52 = vld [vmem:[#allocation184_spill] sm:$0xff] }
 0x966   :  { %10028 = vmatpush3.bf16.msra.mxu1 %v17200_v38  ;;  %v17209_v38 = vld [vmem:[#allocation186_spill] sm:$0xff] }
 0x967   :  { %10094 = vmatprep.subr.bf16.mxu1 %v17201_v7  ;;  %v17210_v7 = vld [vmem:[#allocation183_spill] sm:$0xff] }
 0x968   :  { %10060 = vmatpush1.bf16.msra.mxu0 %v17202_v58  ;;  %v17211_v58 = vld [vmem:[#allocation185_spill] sm:$0xff] }
 0x969   :  { %8431 = vmatmul.mubr.f32.vlgmr.msra.gmra.mrb[30].mxu1 %v14509_v43  ;;  %10062 = vmatprep.subr.bf16.mxu0 %v17203_v57  ;;  %v17213_v57 = vld [vmem:[#allocation190_spill] sm:$0xff] }
 0x96a   :  { %2992 = vmatprep.mubr.f32.mxu1 %v14639_v15  ;;  %10096 = vmatpush3.bf16.msra.mxu1 %v17204_v59  ;;  %v17215_v59 = vld [vmem:[#allocation189_spill] sm:$0xff] }
 0x96b   :  { %10098 = vmatprep.subr.bf16.mxu1 %v17205_v0  ;;  %v17216_v0 = vld [vmem:[#allocation192_spill] sm:$0xff] }
 0x96c   :  { %10064 = vmatpush1.bf16.msra.mxu0 %v17206_v32  ;;  %v17217_v32 = vld [vmem:[#allocation194_spill] sm:$0xff] }
 0x96d   :  { %10066 = vmatprep.subr.bf16.mxu0 %v17207_v25  ;;  %v17218_v25 = vld [vmem:[#allocation191_spill] sm:$0xff] }
 0x96e   :  { %10100 = vmatpush3.bf16.msra.mxu1 %v17208_v52  ;;  %v17219_v52 = vld [vmem:[#allocation193_spill] sm:$0xff] }
 0x96f   :  { %10102 = vmatprep.subr.bf16.mxu1 %v17209_v38  ;;  %v17220_v38 = vld [vmem:[#allocation196_spill] sm:$0xff] }
 0x970   :  { %10068 = vmatpush1.bf16.msra.mxu0 %v17210_v7  ;;  %v17221_v7 = vld [vmem:[#allocation198_spill] sm:$0xff] }
 0x971   :  { %10070 = vmatprep.subr.bf16.mxu0 %v17211_v58  ;;  %v17222_v58 = vld [vmem:[#allocation195_spill] sm:$0xff] }
 0x972   :  { %10104 = vmatpush3.bf16.msra.mxu1 %v17212_v47  ;;  %v17223_v47 = vld [vmem:[#allocation197_spill] sm:$0xff] }
 0x973   :  { %10106 = vmatprep.subr.bf16.mxu1 %v17213_v57  ;;  %v17224_v57 = vld [vmem:[#allocation200_spill] sm:$0xff] }
 0x974   :  { %10072 = vmatpush1.bf16.msra.mxu0 %v17214_v45  ;;  %v17225_v45 = vld [vmem:[#allocation202_spill] sm:$0xff] }
 0x975   :  { %10074 = vmatprep.subr.bf16.mxu0 %v17215_v59  ;;  %v17226_v59 = vld [vmem:[#allocation199_spill] sm:$0xff] }
 0x976   :  { %10108 = vmatpush3.bf16.msra.mxu1 %v17216_v0  ;;  %v17227_v0 = vld [vmem:[#allocation201_spill] sm:$0xff] }
 0x977   :  { %10110 = vmatprep.subr.bf16.mxu1 %v17217_v32  ;;  %v17228_v32 = vld [vmem:[#allocation204_spill] sm:$0xff] }
 0x978   :  { %10076 = vmatpush1.bf16.msra.mxu0 %v17218_v25  ;;  %v17229_v25 = vld [vmem:[#allocation206_spill] sm:$0xff] }
 0x979   :  { %10078 = vmatprep.subr.bf16.mxu0 %v17219_v52  ;;  %v17230_v52 = vld [vmem:[#allocation203_spill] sm:$0xff] }
 0x97a   :  { %10112 = vmatpush3.bf16.msra.mxu1 %v17220_v38  ;;  %v17231_v38 = vld [vmem:[#allocation205_spill] sm:$0xff] }
 0x97b   :  { %10114 = vmatprep.subr.bf16.mxu1 %v17221_v7  ;;  %v17232_v7 = vld [vmem:[#allocation208_spill] sm:$0xff] }
 0x97c   :  { %10080 = vmatpush1.bf16.msra.mxu0 %v17222_v58 }
 0x97d   :  { %10082 = vmatprep.subr.bf16.mxu0 %v17223_v47  ;;  %v17233_v47 = vld [vmem:[#allocation207_spill] sm:$0xff] }
 0x97e   :  { %10116 = vmatpush3.bf16.msra.mxu1 %v17224_v57  ;;  %v17234_v57 = vld [vmem:[#allocation19_spill] sm:$0xff] }
 0x97f   :  { %10118 = vmatprep.subr.bf16.mxu1 %v17225_v45 }
 0x980   :  { %10084 = vmatpush1.bf16.msra.mxu0 %v17226_v59 }
 0x981   :  { %10086 = vmatprep.subr.bf16.mxu0 %v17227_v0 }
 0x982   :  { %10120 = vmatpush3.bf16.msra.mxu1 %v17228_v32 }
 0x983   :  { %10122 = vmatprep.subr.bf16.mxu1 %v17229_v25 }
 0x984   :  { %10088 = vmatpush1.bf16.msra.mxu0 %v17230_v52 }
 0x985   :  { %10090 = vmatprep.subr.bf16.mxu0 %v17231_v38 }
 0x986   :  { %10124 = vmatpush3.bf16.msra.mxu1 %v17232_v7 }
 0x987   :  { %10125 = vmatprep.subr.bf16.mxu1 %v16820_v21 }
 0x988   :  { %10092 = vmatpush1.bf16.msra.mxu0 %v17233_v47 }
 0x989   :  { %10150 = vmatprep.subr.bf16.mxu0 %v17234_v57  ;;  %v14790_v57 = vld [vmem:[%s16265_s7] ss:$0 sm:$0xff] }
 0xa1c   :  { %v2693_v45 = vpop.f32.mrb[20].mxu0  ;;  %v7649_v59 = vpop.f32.mrb[28].mxu1 }
 0xa1d   :  { %v2694_v0 = vadd.f32 %v2693_v45, %v17050_v19  ;;  %v2695_v58 = vpop.f32.mrb[21].mxu0  ;;  %v7650_v32 = vpop.f32.mrb[29].mxu1 }
 0xa1e   :  { %v7651_v29 = vadd.f32 %v7650_v32, %v7649_v59  ;;  %v2696_v52 = vadd.f32 %v2695_v58, %v17051_v5 }
 0xa1f   :  { %v7349_v25 = vmul.f32 -1.442695, %v2694_v0 }
 0xa20   :  { %v7350_v38 = vmul.f32 -1.442695, %v2696_v52  ;;  %v2765_v59 = vadd.f32 %v7651_v29, %v14192_v3  ;;  %v17237_v29 = vld [vmem:[#allocation24_spill] sm:$0xff] }
 0xa21   :  { %12486 = vpow2.f32 %v7349_v25 }
 0xa22   :  { %12488 = vpow2.f32 %v7350_v38 }
 0xa2b   :  { %v12487_v49 = vpop.eup %12486 }
 0xa2c   :  { %v2841_v7 = vadd.f32 1.0, %v12487_v49  ;;  %v12489_v23 = vpop.eup %12488 }
 0xa2d   :  { %v2847_v47 = vadd.f32 1.0, %v12489_v23 }
 0xa2e   :  { %12490 = vrcp.f32 %v2841_v7 }
 0xa2f   :  { %12492 = vrcp.f32 %v2847_v47  ;;  %v17238_v47 = vld [vmem:[#allocation25_spill] sm:$0xff] }
 0xa38   :  { %v12491_v0 = vpop.eup %12490 }
 0xa39   :  { %v12493_v49 = vpop.eup %12492 }
 0xa3a   :  { %v2853_v38 = vsub.f32 1.0, %v12493_v49  ;;  %v2855_v23 = vmul.f32 %v12493_v49, %v14509_v43  ;;  %v17235_v43 = vld [vmem:[#allocation41_spill] sm:$0xff]  ;;  %v17245_v49 = vld [vmem:[#allocation28_spill] sm:$0xff] }
 0xa3c   :  { %v2834_v1 = vpop.f32.mrb[30].mxu1 }
 0xa3d   :  { %v2835_v45 = vadd.f32 %v14790_v57, %v2834_v1  ;;  %v8432_v32 = vpop.f32.mrb[31].mxu1  ;;  %v17236_v1 = vld [vmem:[#allocation43_spill] sm:$0xff] }
 0xa3e   :  { %v17240_v32 = vld [vmem:[#allocation47_spill] sm:$0xff] }
 0xa3f   :  { %v2850_v25 = vmul.f32 %v12491_v0, %v2835_v45  ;;  %v17239_v45 = vld [vmem:[#allocation45_spill] sm:$0xff]  ;;  %v17241_v0 = vld [vmem:[#allocation26_spill] sm:$0xff] }
 0xa41   :  { %v2851_v52 = vadd.f32 %v2850_v25, %v2765_v59  ;;  %v17242_v59 = vld [vmem:[#allocation27_spill] sm:$0xff]  ;;  %v17243_v25 = vld [vmem:[#allocation49_spill] sm:$0xff] }
 0xa43   :  { %12494 = vtanh.f32 %v2851_v52  ;;  %v17244_v52 = vld [vmem:[#allocation51_spill] sm:$0xff] }
 0xa4d   :  { %v12495_v7 = vpop.eup %12494 }
 0xa4e   :  { %v2854_v58 = vmul.f32 %v12495_v7, %v2853_v38  ;;  %v17246_v38 = vld [vmem:[#allocation29_spill] sm:$0xff] }
 0xa4f   :  { %v17247_v7 = vld [vmem:[#allocation53_spill] sm:$0xff] }
 0xa50   :  { %v14795_v5 = vadd.f32 %v2855_v23, %v2854_v58  ;;  %v17248_v23 = vld [vmem:[#allocation55_spill] sm:$0xff]  ;;  %v17249_v58 = vld [vmem:[#allocation30_spill] sm:$0xff] }
 0xa52   :  { %2922 = vmatmul.mubr.f32.vlgmr.msra.gmra.mrb[22].mxu0 %v14795_v5  ;;  %2993 = vmatmul.mubr.f32.vlgmr.msra.gmra.mrb[32].mxu1 %v14795_v5 }
 0xa53   :  { %10127 = vmatpush3.bf16.msra.mxu1 %v14196_v36  ;;  %10152 = vmatpush1.bf16.msra.mxu0 %v13122_v9 }
 0xa54   :  { %10128 = vmatprep.subr.bf16.mxu1 %v16820_v21  ;;  %10154 = vmatprep.subr.bf16.mxu0 %v13129_v17 }
 0xa55   :  { %8465 = vmatprep.mubr.msk.f32.mxu1 %vm12951_vm0, %v16762_v61  ;;  %3153 = vmatprep.mubr.f32.mxu0 %v16762_v61 }
 0xa57   :  { %10130 = vmatpush3.bf16.msra.mxu1 %v14204_v46  ;;  %10156 = vmatpush1.bf16.msra.mxu0 %v13134_v22 }
 0xa58   :  { %10131 = vmatprep.subr.bf16.mxu1 %v16820_v21  ;;  %10158 = vmatprep.subr.bf16.mxu0 %v13140_v27 }
 0xa5b   :  { %10133 = vmatpush3.bf16.msra.mxu1 %v14213_v6  ;;  %10160 = vmatpush1.bf16.msra.mxu0 %v13145_v35 }
 0xa5c   :  { %10134 = vmatprep.subr.bf16.mxu1 %v16820_v21  ;;  %10162 = vmatprep.subr.bf16.mxu0 %v13151_v40 }
 0xa5f   :  { %10136 = vmatpush3.bf16.msra.mxu1 %v14219_v30  ;;  %10164 = vmatpush1.bf16.msra.mxu0 %v13157_v51 }
 0xa60   :  { %10137 = vmatprep.subr.bf16.mxu1 %v16820_v21  ;;  %10166 = vmatprep.subr.bf16.mxu0 %v13163_v53 }
 0xa63   :  { %10139 = vmatpush3.bf16.msra.mxu1 %v14225_v4  ;;  %10168 = vmatpush1.bf16.msra.mxu0 %v13169_v63 }
 0xa64   :  { %10140 = vmatprep.subr.bf16.mxu1 %v16820_v21  ;;  %10170 = vmatprep.subr.bf16.mxu0 %v13175_v2 }
 0xa67   :  { %10142 = vmatpush3.bf16.msra.mxu1 %v14231_v14  ;;  %10172 = vmatpush1.bf16.msra.mxu0 %v13181_v16 }
 0xa68   :  { %10143 = vmatprep.subr.bf16.mxu1 %v16820_v21  ;;  %10174 = vmatprep.subr.bf16.mxu0 %v13187_v20 }
 0xa6b   :  { %10145 = vmatpush3.bf16.msra.mxu1 %v14237_v11  ;;  %10176 = vmatpush1.bf16.msra.mxu0 %v13193_v34 }
 0xa6c   :  { %10146 = vmatprep.subr.bf16.mxu1 %v16820_v21  ;;  %10178 = vmatprep.subr.bf16.mxu0 %v13199_v37 }
 0xa6f   :  { %10148 = vmatpush3.bf16.msra.mxu1 %v14243_v54  ;;  %10180 = vmatpush1.bf16.msra.mxu0 %v13217_v50 }
 0xa70   :  { %10182 = vmatprep.subr.bf16.mxu1 %v13120_v8  ;;  %10214 = vmatprep.subr.bf16.mxu0 %v13223_v55 }
 0xa72   :  { %8466 = vmatmul.mubr.f32.vlgmr.msra.gmra.mrb[34].mxu1 %v14639_v15  ;;  %3154 = vmatmul.mubr.f32.vlgmr.msra.gmra.mrb[24].mxu0 %v14650_v28 }
 0xa73   :  { %10184 = vmatpush1.bf16.msra.mxu1 %v13125_v13  ;;  %3349 = vmatprep.mubr.f32.mxu0 %v14712_v56 }
 0xa74   :  { %10186 = vmatprep.subr.bf16.mxu1 %v13131_v18  ;;  %3224 = vmatprep.mubr.f32.mxu1 %v16762_v61 }
 0xa75   :  { %10216 = vmatpush1.bf16.msra.mxu0 %v13253_v10 }
 0xa76   :  { %10218 = vmatprep.subr.bf16.mxu0 %v13259_v12 }
 0xa77   :  { %10188 = vmatpush1.bf16.msra.mxu1 %v13138_v26 }
 0xa78   :  { %10190 = vmatprep.subr.bf16.mxu1 %v13142_v31 }
 0xa79   :  { %10220 = vmatpush1.bf16.msra.mxu0 %v13291_v33 }
 0xa7a   :  { %10222 = vmatprep.subr.bf16.mxu0 %v13297_v41 }
 0xa7b   :  { %10192 = vmatpush1.bf16.msra.mxu1 %v13149_v39 }
 0xa7c   :  { %10194 = vmatprep.subr.bf16.mxu1 %v13154_v44 }
 0xa7d   :  { %10224 = vmatpush1.bf16.msra.mxu0 %v17235_v43 }
 0xa7e   :  { %10226 = vmatprep.subr.bf16.mxu0 %v17236_v1 }
 0xa7f   :  { %10196 = vmatpush1.bf16.msra.mxu1 %v17237_v29 }
 0xa80   :  { %10198 = vmatprep.subr.bf16.mxu1 %v17238_v47 }
 0xa81   :  { %10228 = vmatpush1.bf16.msra.mxu0 %v17239_v45  ;;  %v17250_v45 = vld [vmem:[#allocation31_spill] sm:$0xff] }
 0xa82   :  { %10230 = vmatprep.subr.bf16.mxu0 %v17240_v32  ;;  %v17251_v32 = vld [vmem:[#allocation57_spill] sm:$0xff] }
 0xa83   :  { %10200 = vmatpush1.bf16.msra.mxu1 %v17241_v0  ;;  %v17252_v0 = vld [vmem:[#allocation59_spill] sm:$0xff] }
 0xa84   :  { %10202 = vmatprep.subr.bf16.mxu1 %v17242_v59  ;;  %v17253_v59 = vld [vmem:[#allocation32_spill] sm:$0xff] }
 0xa85   :  { %10232 = vmatpush1.bf16.msra.mxu0 %v17243_v25  ;;  %v17254_v25 = vld [vmem:[#allocation33_spill] sm:$0xff] }
 0xa86   :  { %10234 = vmatprep.subr.bf16.mxu0 %v17244_v52  ;;  %v17255_v52 = vld [vmem:[#allocation61_spill] sm:$0xff] }
 0xa87   :  { %10204 = vmatpush1.bf16.msra.mxu1 %v17245_v49 }
 0xa88   :  { %10206 = vmatprep.subr.bf16.mxu1 %v17246_v38  ;;  %v17256_v38 = vld [vmem:[#allocation63_spill] sm:$0xff] }
 0xa89   :  { %10236 = vmatpush1.bf16.msra.mxu0 %v17247_v7  ;;  %v17305_v7 = vld [vmem:[#allocation146_spill] sm:$0xff] }
 0xa8a   :  { %10238 = vmatprep.subr.bf16.mxu0 %v17248_v23  ;;  %v17257_v23 = vld [vmem:[#allocation34_spill] sm:$0xff] }
 0xa8b   :  { %10208 = vmatpush1.bf16.msra.mxu1 %v17249_v58  ;;  %v17258_v58 = vld [vmem:[#allocation36_spill] sm:$0xff] }
 0xa8c   :  { %10210 = vmatprep.subr.bf16.mxu1 %v17250_v45  ;;  %v17259_v45 = vld [vmem:[#allocation65_spill] sm:$0xff] }
 0xa8d   :  { %10240 = vmatpush1.bf16.msra.mxu0 %v17251_v32  ;;  %v17260_v32 = vld [vmem:[#allocation67_spill] sm:$0xff] }
 0xa8e   :  { %10242 = vmatprep.subr.bf16.mxu0 %v17252_v0  ;;  %v17261_v0 = vld [vmem:[#allocation38_spill] sm:$0xff] }
 0xa8f   :  { %10212 = vmatpush1.bf16.msra.mxu1 %v17253_v59  ;;  %v17262_v59 = vld [vmem:[#allocation40_spill] sm:$0xff] }
 0xa90   :  { %10278 = vmatprep.subr.bf16.mxu1 %v17254_v25  ;;  %v17263_v25 = vld [vmem:[#allocation69_spill] sm:$0xff] }
 0xa91   :  { %10244 = vmatpush1.bf16.msra.mxu0 %v17255_v52  ;;  %v17264_v52 = vld [vmem:[#allocation71_spill] sm:$0xff] }
 0xa92   :  { %3225 = vmatmul.mubr.f32.vlgmr.msra.gmra.mrb[36].mxu1 %v14650_v28  ;;  %10246 = vmatprep.subr.bf16.mxu0 %v17256_v38  ;;  %v17265_v28 = vld [vmem:[#allocation42_spill] sm:$0xff]  ;;  %v17266_v38 = vld [vmem:[#allocation44_spill] sm:$0xff] }
 0xa93   :  { %3420 = vmatprep.mubr.f32.mxu1 %v14712_v56  ;;  %10280 = vmatpush1.bf16.msra.mxu1 %v17257_v23  ;;  %v17267_v56 = vld [vmem:[#allocation73_spill] sm:$0xff]  ;;  %v17268_v23 = vld [vmem:[#allocation75_spill] sm:$0xff] }
 0xa94   :  { %10282 = vmatprep.subr.bf16.mxu1 %v17258_v58  ;;  %v17269_v58 = vld [vmem:[#allocation46_spill] sm:$0xff] }
 0xa95   :  { %10248 = vmatpush1.bf16.msra.mxu0 %v17259_v45  ;;  %v17270_v45 = vld [vmem:[#allocation48_spill] sm:$0xff] }
 0xa96   :  { %10250 = vmatprep.subr.bf16.mxu0 %v17260_v32  ;;  %v17271_v32 = vld [vmem:[#allocation77_spill] sm:$0xff] }
 0xa97   :  { %10284 = vmatpush1.bf16.msra.mxu1 %v17261_v0  ;;  %v17272_v0 = vld [vmem:[#allocation79_spill] sm:$0xff] }
 0xa98   :  { %10286 = vmatprep.subr.bf16.mxu1 %v17262_v59  ;;  %v17273_v59 = vld [vmem:[#allocation50_spill] sm:$0xff] }
 0xa99   :  { %10252 = vmatpush1.bf16.msra.mxu0 %v17263_v25  ;;  %v17274_v25 = vld [vmem:[#allocation52_spill] sm:$0xff] }
 0xa9a   :  { %10254 = vmatprep.subr.bf16.mxu0 %v17264_v52  ;;  %v17275_v52 = vld [vmem:[#allocation81_spill] sm:$0xff] }
 0xa9b   :  { %10288 = vmatpush1.bf16.msra.mxu1 %v17265_v28  ;;  %v17276_v28 = vld [vmem:[#allocation83_spill] sm:$0xff] }
 0xa9c   :  { %10290 = vmatprep.subr.bf16.mxu1 %v17266_v38  ;;  %v17277_v38 = vld [vmem:[#allocation54_spill] sm:$0xff] }
 0xa9d   :  { %10256 = vmatpush1.bf16.msra.mxu0 %v17267_v56  ;;  %v17278_v56 = vld [vmem:[#allocation56_spill] sm:$0xff] }
 0xa9e   :  { %10258 = vmatprep.subr.bf16.mxu0 %v17268_v23  ;;  %v17279_v23 = vld [vmem:[#allocation85_spill] sm:$0xff] }
 0xa9f   :  { %10292 = vmatpush1.bf16.msra.mxu1 %v17269_v58  ;;  %v17280_v58 = vld [vmem:[#allocation87_spill] sm:$0xff] }
 0xaa0   :  { %10294 = vmatprep.subr.bf16.mxu1 %v17270_v45  ;;  %v17281_v45 = vld [vmem:[#allocation58_spill] sm:$0xff] }
 0xaa1   :  { %10260 = vmatpush1.bf16.msra.mxu0 %v17271_v32  ;;  %v17282_v32 = vld [vmem:[#allocation60_spill] sm:$0xff] }
 0xaa2   :  { %10262 = vmatprep.subr.bf16.mxu0 %v17272_v0  ;;  %v17283_v0 = vld [vmem:[#allocation89_spill] sm:$0xff] }
 0xaa3   :  { %10296 = vmatpush1.bf16.msra.mxu1 %v17273_v59  ;;  %v17284_v59 = vld [vmem:[#allocation91_spill] sm:$0xff] }
 0xaa4   :  { %10298 = vmatprep.subr.bf16.mxu1 %v17274_v25  ;;  %v17285_v25 = vld [vmem:[#allocation62_spill] sm:$0xff] }
 0xaa5   :  { %10264 = vmatpush1.bf16.msra.mxu0 %v17275_v52  ;;  %v17286_v52 = vld [vmem:[#allocation64_spill] sm:$0xff] }
 0xaa6   :  { %10266 = vmatprep.subr.bf16.mxu0 %v17276_v28  ;;  %v17287_v28 = vld [vmem:[#allocation93_spill] sm:$0xff] }
 0xaa7   :  { %10300 = vmatpush1.bf16.msra.mxu1 %v17277_v38  ;;  %v17288_v38 = vld [vmem:[#allocation95_spill] sm:$0xff] }
 0xaa8   :  { %10302 = vmatprep.subr.bf16.mxu1 %v17278_v56  ;;  %v17289_v56 = vld [vmem:[#allocation66_spill] sm:$0xff] }
 0xaa9   :  { %10268 = vmatpush1.bf16.msra.mxu0 %v17279_v23  ;;  %v17290_v23 = vld [vmem:[#allocation68_spill] sm:$0xff] }
 0xaaa   :  { %10270 = vmatprep.subr.bf16.mxu0 %v17280_v58  ;;  %v17291_v58 = vld [vmem:[#allocation70_spill] sm:$0xff] }
 0xaab   :  { %10304 = vmatpush1.bf16.msra.mxu1 %v17281_v45  ;;  %v17292_v45 = vld [vmem:[#allocation72_spill] sm:$0xff] }
 0xaac   :  { %10306 = vmatprep.subr.bf16.mxu1 %v17282_v32  ;;  %v17293_v32 = vld [vmem:[#allocation74_spill] sm:$0xff] }
 0xaad   :  { %10272 = vmatpush1.bf16.msra.mxu0 %v17283_v0  ;;  %v17294_v0 = vld [vmem:[#allocation76_spill] sm:$0xff] }
 0xaae   :  { %10274 = vmatprep.subr.bf16.mxu0 %v17284_v59  ;;  %v17295_v59 = vld [vmem:[#allocation78_spill] sm:$0xff] }
 0xaaf   :  { %10308 = vmatpush1.bf16.msra.mxu1 %v17285_v25  ;;  %v17296_v25 = vld [vmem:[#allocation80_spill] sm:$0xff] }
 0xab0   :  { %10310 = vmatprep.subr.bf16.mxu1 %v17286_v52  ;;  %v17297_v52 = vld [vmem:[#allocation82_spill] sm:$0xff] }
 0xab1   :  { %10276 = vmatpush1.bf16.msra.mxu0 %v17287_v28  ;;  %v17298_v28 = vld [vmem:[#allocation84_spill] sm:$0xff] }
 0xab2   :  { %10342 = vmatprep.subr.bf16.mxu0 %v17288_v38  ;;  %v17299_v38 = vld [vmem:[#allocation86_spill] sm:$0xff] }
 0xab3   :  { %10312 = vmatpush1.bf16.msra.mxu1 %v17289_v56  ;;  %v17300_v56 = vld [vmem:[#allocation88_spill] sm:$0xff] }
 0xab4   :  { %10314 = vmatprep.subr.bf16.mxu1 %v17290_v23  ;;  %v17301_v23 = vld [vmem:[#allocation90_spill] sm:$0xff] }
 0xab7   :  { %10316 = vmatpush1.bf16.msra.mxu1 %v17291_v58  ;;  %v17302_v58 = vld [vmem:[#allocation92_spill] sm:$0xff] }
 0xab8   :  { %10318 = vmatprep.subr.bf16.mxu1 %v17292_v45  ;;  %v17303_v45 = vld [vmem:[#allocation94_spill] sm:$0xff] }
 0xabb   :  { %10320 = vmatpush1.bf16.msra.mxu1 %v17293_v32  ;;  %v17304_v32 = vld [vmem:[#allocation113_spill] sm:$0xff] }
 0xabc   :  { %10322 = vmatprep.subr.bf16.mxu1 %v17294_v0 }
 0xabf   :  { %10324 = vmatpush1.bf16.msra.mxu1 %v17295_v59 }
 0xac0   :  { %10326 = vmatprep.subr.bf16.mxu1 %v17296_v25 }
 0xac3   :  { %10328 = vmatpush1.bf16.msra.mxu1 %v17297_v52 }
 0xac4   :  { %10330 = vmatprep.subr.bf16.mxu1 %v17298_v28 }
 0xac7   :  { %10332 = vmatpush1.bf16.msra.mxu1 %v17299_v38  ;;  %v17306_v38 = vld [vmem:[#allocation147_spill] sm:$0xff] }
 0xac8   :  { %10334 = vmatprep.subr.bf16.mxu1 %v17300_v56 }
 0xacb   :  { %10336 = vmatpush1.bf16.msra.mxu1 %v17301_v23 }
 0xacc   :  { %10338 = vmatprep.subr.bf16.mxu1 %v17302_v58 }
 0xacf   :  { %10340 = vmatpush1.bf16.msra.mxu1 %v17303_v45 }
 0xad0   :  { %10406 = vmatprep.subr.bf16.mxu1 %v17304_v32 }
 0xb25   :  { %v2923_v0 = vpop.f32.mrb[22].mxu0  ;;  %v7701_v59 = vpop.f32.mrb[32].mxu1 }
 0xb26   :  { %v2924_v25 = vadd.f32 %v2923_v0, %v17305_v7  ;;  %v2925_v49 = vpop.f32.mrb[23].mxu0  ;;  %v7702_v52 = vpop.f32.mrb[33].mxu1  ;;  %v14925_v0 = vld [vmem:[%s16269_s11] ss:$0 sm:$0xff] }
 0xb27   :  { %v7703_v47 = vadd.f32 %v7702_v52, %v7701_v59  ;;  %v2926_v29 = vadd.f32 %v2925_v49, %v17306_v38  ;;  %17307 = vst [vmem:[#allocation211_spill] sm:$0xff] %v14925_v0 }
 0xb28   :  { %v7351_v28 = vmul.f32 -1.442695, %v2924_v25 }
 0xb29   :  { %v7352_v56 = vmul.f32 -1.442695, %v2926_v29  ;;  %v2995_v29 = vadd.f32 %v7703_v47, %v17123_v24  ;;  %v7353_v47 = vld [vmem:[%s16258_s0 + $0x18] sm:$0xff] }
 0xb2a   :  { %12496 = vpow2.f32 %v7351_v28 }
 0xb2b   :  { %12498 = vpow2.f32 %v7352_v56 }
 0xb34   :  { %v12497_v1 = vpop.eup %12496 }
 0xb35   :  { %v3071_v23 = vadd.f32 1.0, %v12497_v1  ;;  %v12499_v58 = vpop.eup %12498 }
 0xb36   :  { %v3077_v45 = vadd.f32 1.0, %v12499_v58 }
 0xb37   :  { %12500 = vrcp.f32 %v3071_v23 }
 0xb38   :  { %12502 = vrcp.f32 %v3077_v45 }
 0xb41   :  { %v12501_v28 = vpop.eup %12500 }
 0xb42   :  { %v12503_v58 = vpop.eup %12502 }
 0xb43   :  { %v3083_v56 = vsub.f32 1.0, %v12503_v58  ;;  %v3085_v44 = vmul.f32 %v12503_v58, %v14639_v15 }
 0xb45   :  { %v3064_v43 = vpop.f32.mrb[34].mxu1  ;;  %v3155_v32 = vpop.f32.mrb[24].mxu0 }
 0xb46   :  { %v3065_v59 = vadd.f32 %v14925_v0, %v3064_v43  ;;  %v8467_v25 = vpop.f32.mrb[35].mxu1  ;;  %v3157_v52 = vpop.f32.mrb[25].mxu0 }
 0xb47   :  { %v3235_v49 = vcombine.low %v3155_v32, %v3157_v52 }
 0xb48   :  { %v3080_v1 = vmul.f32 %v12501_v28, %v3065_v59 }
 0xb49   :  { %v3243_v0 = vrot.slane %v3235_v49, %v17124_v42 }
 0xb4a   :  { %v3081_v23 = vadd.f32 %v3080_v1, %v2995_v29 }
 0xb4c   :  { %12504 = vtanh.f32 %v3081_v23 }
 0xb56   :  { %v12505_v38 = vpop.eup %12504 }
 0xb57   :  { %v3084_v7 = vmul.f32 %v12505_v38, %v3083_v56 }
 0xb59   :  { %v14930_v39 = vadd.f32 %v3085_v44, %v3084_v7 }
 0xb65   :  { %v3226_v41 = vpop.f32.mrb[36].mxu1 }
 0xb66   :  { %v3228_v43 = vpop.f32.mrb[37].mxu1 }
 0xb67   :  { %v3236_v25 = vcombine.low %v3226_v41, %v3228_v43 }
 0xb69   :  { %v3250_v45 = vrot.slane %v3236_v25, %v17124_v42  ;;  %v17308_v25 = vld [vmem:[#allocation209_spill] sm:$0xff] }
 0xb6b   :  { %v3251_v32 = vcombine.low %v3243_v0, %v3250_v45 }
 0xb6d   :  { %v3253_v59 = vadd.f32 %v7353_v47, %v3251_v32 }
 0xb6f   :  { %v7354_v52 = vmul.f32 -1.442695, %v3253_v59  ;;  %v3261_v28 = vrot.slane %v3253_v59, 2  ;;  %v3272_v44 = vrot.slane %v3253_v59, 6  ;;  %v3269_v29 = vrot.slane %v3253_v59, 4 }
 0xb71   :  { %12506 = vpow2.f32 %v7354_v52  ;;  %v7355_v38 = vmul.f32 -1.442695, %v3261_v28  ;;  %v7356_v15 = vmul.f32 -1.442695, %v3272_v44  ;;  %v17310_v44 = vld [vmem:[#allocation115_spill] sm:$0xff] }
 0xb73   :  { %12508 = vpow2.f32 %v7355_v38  ;;  %v17309_v38 = vld [vmem:[#allocation98_spill] sm:$0xff] }
 0xb74   :  { %12510 = vpow2.f32 %v7356_v15  ;;  %v17311_v15 = vld [vmem:[#allocation99_spill] sm:$0xff] }
 0xb7b   :  { %v12507_v7 = vpop.eup %12506 }
 0xb7c   :  { %v3257_v41 = vadd.f32 1.0, %v12507_v7  ;;  %v17312_v7 = vld [vmem:[#allocation117_spill] sm:$0xff] }
 0xb7d   :  { %v12509_v1 = vpop.eup %12508 }
 0xb7e   :  { %12512 = vrcp.f32 %v3257_v41  ;;  %v3266_v49 = vadd.f32 1.0, %v12509_v1  ;;  %v12511_v23 = vpop.eup %12510  ;;  %v17314_v41 = vld [vmem:[#allocation119_spill] sm:$0xff]  ;;  %v17315_v1 = vld [vmem:[#allocation101_spill] sm:$0xff] }
 0xb7f   :  { %12514 = vtanh.f32 %v3269_v29  ;;  %v3277_v43 = vadd.f32 1.0, %v12511_v23  ;;  %v17313_v29 = vld [vmem:[#allocation100_spill] sm:$0xff]  ;;  %v17317_v23 = vld [vmem:[#allocation102_spill] sm:$0xff] }
 0xb80   :  { %12516 = vrcp.f32 %v3266_v49  ;;  %v17316_v49 = vld [vmem:[#allocation121_spill] sm:$0xff] }
 0xb81   :  { %12518 = vrcp.f32 %v3277_v43  ;;  %v17321_v43 = vld [vmem:[#allocation104_spill] sm:$0xff] }
 0xb88   :  { %v12513_v58 = vpop.eup %12512 }
 0xb89   :  { %v12515_v0 = vpop.eup %12514 }
 0xb8a   :  { %v12517_v56 = vpop.eup %12516  ;;  %v3281_v47 = vmul.f32 %v12515_v0, %v12513_v58  ;;  %v17318_v58 = vld [vmem:[#allocation123_spill] sm:$0xff] }
 0xb8b   :  { %v3280_v45 = vmul.f32 %v12517_v56, %v17308_v25  ;;  %v12519_v59 = vpop.eup %12518  ;;  %v17319_v0 = vld [vmem:[#allocation103_spill] sm:$0xff]  ;;  %v17320_v56 = vld [vmem:[#allocation125_spill] sm:$0xff] }
 0xb8c   :  { %v17322_v25 = vld [vmem:[#allocation127_spill] sm:$0xff] }
 0xb8d   :  { %v14938_v32 = vadd.f32 %v3281_v47, %v3280_v45  ;;  %v17323_v45 = vld [vmem:[#allocation105_spill] sm:$0xff] }
 0xb8e   :  { %v17324_v47 = vld [vmem:[#allocation129_spill] sm:$0xff] }
 0xb8f   :  { %12520 = vtanh.f32 %v14938_v32 }
 0xb99   :  { %v12521_v52 = vpop.eup %12520 }
 0xb9a   :  { %v14941_v28 = vmul.f32 %v12521_v52, %v12519_v59  ;;  %v17325_v59 = vld [vmem:[#allocation106_spill] sm:$0xff]  ;;  %v17326_v52 = vld [vmem:[#allocation131_spill] sm:$0xff] }
 0xb9c   :  { %3350 = vmatmul.mubr.f32.vlgmr.msra.gmra.mrb[26].mxu0 %v14941_v28  ;;  %3421 = vmatmul.mubr.f32.vlgmr.msra.gmra.mrb[38].mxu1 %v14941_v28 }
 0xb9d   :  { %3515 = vmatprep.mubr.f32.mxu0 %v14795_v5  ;;  %3586 = vmatprep.mubr.f32.mxu1 %v14795_v5 }
 0xb9e   :  { %10344 = vmatpush1.bf16.msra.mxu0 %v17309_v38  ;;  %10408 = vmatpush3.bf16.msra.mxu1 %v17310_v44 }
 0xb9f   :  { %10346 = vmatprep.subr.bf16.mxu0 %v17311_v15  ;;  %10410 = vmatprep.subr.bf16.mxu1 %v17312_v7 }
 0xba2   :  { %10348 = vmatpush1.bf16.msra.mxu0 %v17313_v29  ;;  %10412 = vmatpush3.bf16.msra.mxu1 %v17314_v41  ;;  %v17357_v29 = vld [vmem:[#allocation149_spill] sm:$0xff] }
 0xba3   :  { %10350 = vmatprep.subr.bf16.mxu0 %v17315_v1  ;;  %10414 = vmatprep.subr.bf16.mxu1 %v17316_v49  ;;  %v17327_v49 = vld [vmem:[#allocation107_spill] sm:$0xff]  ;;  %v17356_v1 = vld [vmem:[#allocation148_spill] sm:$0xff] }
 0xba6   :  { %10352 = vmatpush1.bf16.msra.mxu0 %v17317_v23  ;;  %10416 = vmatpush3.bf16.msra.mxu1 %v17318_v58  ;;  %v17328_v23 = vld [vmem:[#allocation133_spill] sm:$0xff]  ;;  %v17329_v58 = vld [vmem:[#allocation108_spill] sm:$0xff] }
 0xba7   :  { %10354 = vmatprep.subr.bf16.mxu0 %v17319_v0  ;;  %10418 = vmatprep.subr.bf16.mxu1 %v17320_v56  ;;  %v17330_v0 = vld [vmem:[#allocation135_spill] sm:$0xff]  ;;  %v17331_v56 = vld [vmem:[#allocation109_spill] sm:$0xff] }
 0xbaa   :  { %10356 = vmatpush1.bf16.msra.mxu0 %v17321_v43  ;;  %10420 = vmatpush3.bf16.msra.mxu1 %v17322_v25  ;;  %v17332_v43 = vld [vmem:[#allocation137_spill] sm:$0xff]  ;;  %v17333_v25 = vld [vmem:[#allocation110_spill] sm:$0xff] }
 0xbab   :  { %10358 = vmatprep.subr.bf16.mxu0 %v17323_v45  ;;  %10422 = vmatprep.subr.bf16.mxu1 %v17324_v47  ;;  %v17334_v45 = vld [vmem:[#allocation139_spill] sm:$0xff] }
 0xbac   :  { %v17335_v47 = vld [vmem:[#allocation111_spill] sm:$0xff] }
 0xbae   :  { %10360 = vmatpush1.bf16.msra.mxu0 %v17325_v59  ;;  %10424 = vmatpush3.bf16.msra.mxu1 %v17326_v52  ;;  %v17336_v59 = vld [vmem:[#allocation141_spill] sm:$0xff]  ;;  %v17337_v52 = vld [vmem:[#allocation112_spill] sm:$0xff] }
 0xbaf   :  { %10362 = vmatprep.subr.bf16.mxu0 %v17327_v49  ;;  %10426 = vmatprep.subr.bf16.mxu1 %v17328_v23  ;;  %v17338_v49 = vld [vmem:[#allocation143_spill] sm:$0xff]  ;;  %v17339_v23 = vld [vmem:[#allocation114_spill] sm:$0xff] }
 0xbb2   :  { %10364 = vmatpush1.bf16.msra.mxu0 %v17329_v58  ;;  %10428 = vmatpush3.bf16.msra.mxu1 %v17330_v0  ;;  %v17340_v0 = vld [vmem:[#allocation116_spill] sm:$0xff] }
 0xbb3   :  { %10366 = vmatprep.subr.bf16.mxu0 %v17331_v56  ;;  %10430 = vmatprep.subr.bf16.mxu1 %v17332_v43  ;;  %v17341_v56 = vld [vmem:[#allocation118_spill] sm:$0xff]  ;;  %v17342_v43 = vld [vmem:[#allocation120_spill] sm:$0xff] }
 0xbb4   :  { %v17350_v58 = vld [vmem:[#allocation136_spill] sm:$0xff] }
 0xbb6   :  { %10368 = vmatpush1.bf16.msra.mxu0 %v17333_v25  ;;  %10432 = vmatpush3.bf16.msra.mxu1 %v17334_v45  ;;  %v17343_v25 = vld [vmem:[#allocation122_spill] sm:$0xff]  ;;  %v17344_v45 = vld [vmem:[#allocation124_spill] sm:$0xff] }
 0xbb7   :  { %10370 = vmatprep.subr.bf16.mxu0 %v17335_v47  ;;  %10434 = vmatprep.subr.bf16.mxu1 %v17336_v59  ;;  %v17345_v47 = vld [vmem:[#allocation126_spill] sm:$0xff]  ;;  %v17346_v59 = vld [vmem:[#allocation128_spill] sm:$0xff] }
 0xbba   :  { %10372 = vmatpush1.bf16.msra.mxu0 %v17337_v52  ;;  %10436 = vmatpush3.bf16.msra.mxu1 %v17338_v49  ;;  %v17347_v52 = vld [vmem:[#allocation130_spill] sm:$0xff]  ;;  %v17348_v49 = vld [vmem:[#allocation132_spill] sm:$0xff] }
 0xbbb   :  { %10374 = vmatprep.subr.bf16.mxu0 %v17339_v23  ;;  %10437 = vmatprep.subr.bf16.mxu1 %v16820_v21  ;;  %v17349_v23 = vld [vmem:[#allocation134_spill] sm:$0xff] }
 0xbbe   :  { %10376 = vmatpush1.bf16.msra.mxu0 %v17340_v0  ;;  %v17351_v0 = vld [vmem:[#allocation138_spill] sm:$0xff] }
 0xbbf   :  { %10378 = vmatprep.subr.bf16.mxu0 %v17341_v56  ;;  %v17352_v56 = vld [vmem:[#allocation140_spill] sm:$0xff] }
 0xbc2   :  { %10380 = vmatpush1.bf16.msra.mxu0 %v17342_v43  ;;  %v17353_v43 = vld [vmem:[#allocation142_spill] sm:$0xff] }
 0xbc3   :  { %10382 = vmatprep.subr.bf16.mxu0 %v17343_v25  ;;  %v17354_v25 = vld [vmem:[#allocation144_spill] sm:$0xff] }
 0xbc6   :  { %10384 = vmatpush1.bf16.msra.mxu0 %v17344_v45  ;;  %v17355_v45 = vld [vmem:[#allocation145_spill] sm:$0xff] }
 0xbc7   :  { %10386 = vmatprep.subr.bf16.mxu0 %v17345_v47 }
 0xbca   :  { %10388 = vmatpush1.bf16.msra.mxu0 %v17346_v59 }
 0xbcb   :  { %10390 = vmatprep.subr.bf16.mxu0 %v17347_v52 }
 0xbce   :  { %10392 = vmatpush1.bf16.msra.mxu0 %v17348_v49 }
 0xbcf   :  { %10394 = vmatprep.subr.bf16.mxu0 %v17349_v23 }
 0xbd2   :  { %10396 = vmatpush1.bf16.msra.mxu0 %v17350_v58 }
 0xbd3   :  { %10398 = vmatprep.subr.bf16.mxu0 %v17351_v0 }
 0xbd6   :  { %10400 = vmatpush1.bf16.msra.mxu0 %v17352_v56 }
 0xbd7   :  { %10402 = vmatprep.subr.bf16.mxu0 %v17353_v43 }
 0xbda   :  { %10404 = vmatpush1.bf16.msra.mxu0 %v17354_v25 }
 0xbdb   :  { %10462 = vmatprep.subr.bf16.mxu0 %v17355_v45 }
 0xc6f   :  { %v3351_v47 = vpop.f32.mrb[26].mxu0  ;;  %v3422_v59 = vpop.f32.mrb[38].mxu1 }
 0xc70   :  { %v3352_v52 = vadd.f32 %v3351_v47, %v17356_v1  ;;  %v3353_v41 = vpop.f32.mrb[27].mxu0  ;;  %v3424_v49 = vpop.f32.mrb[39].mxu1  ;;  %v3423_v43 = vadd.f32 %v3422_v59, %v17177_v60  ;;  %v17365_v59 = vld [vmem:[#allocation160_spill] sm:$0xff] }
 0xc71   :  { %v3354_v23 = vadd.f32 %v3353_v41, %v17357_v29  ;;  %v3425_v56 = vadd.f32 %v3424_v49, %v17176_v48 }
 0xc72   :  { %v7357_v7 = vmul.f32 -1.442695, %v3352_v52 }
 0xc73   :  { %v7358_v58 = vmul.f32 -1.442695, %v3354_v23  ;;  %v7359_v0 = vmul.f32 -1.442695, %v3425_v56 }
 0xc74   :  { %12522 = vpow2.f32 %v7357_v7 }
 0xc75   :  { %12524 = vpow2.f32 %v7358_v58 }
 0xc76   :  { %12526 = vpow2.f32 %v7359_v0 }
 0xc77   :  { %12528 = vtanh.f32 %v3423_v43  ;;  %v17363_v43 = vld [vmem:[#allocation158_spill] sm:$0xff] }
 0xc7e   :  { %v12523_v25 = vpop.eup %12522 }
 0xc7f   :  { %v12525_v15 = vpop.eup %12524  ;;  %v3430_v45 = vadd.f32 1.0, %v12523_v25 }
 0xc80   :  { %v3436_v44 = vadd.f32 1.0, %v12525_v15  ;;  %v12527_v47 = vpop.eup %12526  ;;  %v17361_v15 = vld [vmem:[#allocation156_spill] sm:$0xff] }
 0xc81   :  { %12530 = vrcp.f32 %v3430_v45  ;;  %v12529_v1 = vpop.eup %12528  ;;  %v3443_v7 = vadd.f32 1.0, %v12527_v47  ;;  %v17364_v45 = vld [vmem:[#allocation159_spill] sm:$0xff]  ;;  %v17366_v47 = vld [vmem:[#allocation161_spill] sm:$0xff] }
 0xc82   :  { %12532 = vrcp.f32 %v3436_v44  ;;  %v17359_v44 = vld [vmem:[#allocation154_spill] sm:$0xff] }
 0xc83   :  { %12534 = vrcp.f32 %v3443_v7  ;;  %v17370_v7 = vld [vmem:[#allocation169_spill] sm:$0xff] }
 0xc8b   :  { %v12531_v41 = vpop.eup %12530 }
 0xc8c   :  { %v12533_v52 = vpop.eup %12532  ;;  %v3447_v23 = vmul.f32 %v12531_v41, %v12529_v1  ;;  %v17362_v1 = vld [vmem:[#allocation157_spill] sm:$0xff]  ;;  %v17367_v41 = vld [vmem:[#allocation167_spill] sm:$0xff] }
 0xc8d   :  { %v3446_v58 = vmul.f32 %v12533_v52, %v14709_v62  ;;  %v12535_v56 = vpop.eup %12534  ;;  %v17360_v62 = vld [vmem:[#allocation155_spill] sm:$0xff]  ;;  %v17368_v52 = vld [vmem:[#allocation162_spill] sm:$0xff] }
 0xc8f   :  { %v15000_v49 = vadd.f32 %v3447_v23, %v3446_v58  ;;  %v17369_v23 = vld [vmem:[#allocation168_spill] sm:$0xff]  ;;  %v17371_v58 = vld [vmem:[#allocation163_spill] sm:$0xff] }
 0xc91   :  { %17358 = vst [vmem:[#allocation151_spill] sm:$0xff] %v15000_v49  ;;  %12536 = vtanh.f32 %v15000_v49 }
 0xc9b   :  { %v12537_v25 = vpop.eup %12536 }
 0xc9c   :  { %v15003_v0 = vmul.f32 %v12537_v25, %v12535_v56  ;;  %v17372_v56 = vld [vmem:[#allocation170_spill] sm:$0xff]  ;;  %v17373_v25 = vld [vmem:[#allocation171_spill] sm:$0xff] }
 0xc9e   :  { %3516 = vmatmul.mubr.f32.vlgmr.msra.gmra.mrb[28].mxu0 %v15003_v0  ;;  %3587 = vmatmul.mubr.f32.vlgmr.msra.gmra.mrb[40].mxu1 %v15003_v0 }
 0xc9f   :  { %10439 = vmatpush3.bf16.msra.mxu1 %v17359_v44  ;;  %3745 = vmatprep.mubr.f32.mxu0 %v14930_v39 }
 0xca0   :  { %10440 = vmatprep.subr.bf16.mxu1 %v16820_v21  ;;  %8500 = vmatprep.mubr.msk.f32.mxu1 %vm12951_vm0, %v16762_v61 }
 0xca1   :  { %10464 = vmatpush1.bf16.msra.mxu0 %v17360_v62 }
 0xca2   :  { %10466 = vmatprep.subr.bf16.mxu0 %v17361_v15 }
 0xca3   :  { %10442 = vmatpush3.bf16.msra.mxu1 %v17362_v1 }
 0xca4   :  { %10443 = vmatprep.subr.bf16.mxu1 %v16820_v21 }
 0xca5   :  { %10468 = vmatpush1.bf16.msra.mxu0 %v17363_v43  ;;  %v17394_v43 = vld [vmem:[#allocation187_spill] sm:$0xff] }
 0xca6   :  { %10470 = vmatprep.subr.bf16.mxu0 %v17364_v45  ;;  %v17392_v45 = vld [vmem:[#allocation188_spill] sm:$0xff] }
 0xca7   :  { %10445 = vmatpush3.bf16.msra.mxu1 %v17365_v59  ;;  %v17374_v59 = vld [vmem:[#allocation164_spill] sm:$0xff] }
 0xca8   :  { %10446 = vmatprep.subr.bf16.mxu1 %v16820_v21 }
 0xca9   :  { %10472 = vmatpush1.bf16.msra.mxu0 %v17366_v47  ;;  %v17377_v47 = vld [vmem:[#allocation165_spill] sm:$0xff] }
 0xcaa   :  { %10474 = vmatprep.subr.bf16.mxu0 %v17367_v41  ;;  %v17375_v41 = vld [vmem:[#allocation172_spill] sm:$0xff] }
 0xcab   :  { %10448 = vmatpush3.bf16.msra.mxu1 %v17368_v52  ;;  %v17376_v52 = vld [vmem:[#allocation173_spill] sm:$0xff] }
 0xcac   :  { %10449 = vmatprep.subr.bf16.mxu1 %v16820_v21 }
 0xcad   :  { %10476 = vmatpush1.bf16.msra.mxu0 %v17369_v23  ;;  %v17380_v23 = vld [vmem:[#allocation166_spill] sm:$0xff] }
 0xcae   :  { %10478 = vmatprep.subr.bf16.mxu0 %v17370_v7  ;;  %v17378_v7 = vld [vmem:[#allocation174_spill] sm:$0xff] }
 0xcaf   :  { %10451 = vmatpush3.bf16.msra.mxu1 %v17371_v58  ;;  %v17379_v58 = vld [vmem:[#allocation175_spill] sm:$0xff] }
 0xcb0   :  { %10452 = vmatprep.subr.bf16.mxu1 %v16820_v21 }
 0xcb1   :  { %10480 = vmatpush1.bf16.msra.mxu0 %v17372_v56  ;;  %v17381_v56 = vld [vmem:[#allocation178_spill] sm:$0xff] }
 0xcb2   :  { %10482 = vmatprep.subr.bf16.mxu0 %v17373_v25  ;;  %v17382_v25 = vld [vmem:[#allocation176_spill] sm:$0xff] }
 0xcb3   :  { %10454 = vmatpush3.bf16.msra.mxu1 %v17374_v59  ;;  %v17383_v59 = vld [vmem:[#allocation177_spill] sm:$0xff] }
 0xcb4   :  { %10455 = vmatprep.subr.bf16.mxu1 %v16820_v21 }
 0xcb5   :  { %10484 = vmatpush1.bf16.msra.mxu0 %v17375_v41  ;;  %v17386_v41 = vld [vmem:[#allocation179_spill] sm:$0xff] }
 0xcb6   :  { %10486 = vmatprep.subr.bf16.mxu0 %v17376_v52  ;;  %v17384_v52 = vld [vmem:[#allocation180_spill] sm:$0xff] }
 0xcb7   :  { %10457 = vmatpush3.bf16.msra.mxu1 %v17377_v47  ;;  %v17385_v47 = vld [vmem:[#allocation182_spill] sm:$0xff] }
 0xcb8   :  { %10458 = vmatprep.subr.bf16.mxu1 %v16820_v21 }
 0xcb9   :  { %10488 = vmatpush1.bf16.msra.mxu0 %v17378_v7  ;;  %v17387_v7 = vld [vmem:[#allocation181_spill] sm:$0xff] }
 0xcba   :  { %10490 = vmatprep.subr.bf16.mxu0 %v17379_v58  ;;  %v17388_v58 = vld [vmem:[#allocation184_spill] sm:$0xff] }
 0xcbb   :  { %10460 = vmatpush3.bf16.msra.mxu1 %v17380_v23  ;;  %v17389_v23 = vld [vmem:[#allocation186_spill] sm:$0xff] }
 0xcbc   :  { %10526 = vmatprep.subr.bf16.mxu1 %v17381_v56  ;;  %v17390_v56 = vld [vmem:[#allocation183_spill] sm:$0xff] }
 0xcbd   :  { %10492 = vmatpush1.bf16.msra.mxu0 %v17382_v25  ;;  %v17391_v25 = vld [vmem:[#allocation185_spill] sm:$0xff] }
 0xcbe   :  { %8501 = vmatmul.mubr.f32.vlgmr.msra.gmra.mrb[42].mxu1 %v14795_v5  ;;  %10494 = vmatprep.subr.bf16.mxu0 %v17383_v59  ;;  %v17393_v59 = vld [vmem:[#allocation190_spill] sm:$0xff] }
 0xcbf   :  { %3816 = vmatprep.mubr.f32.mxu1 %v14930_v39  ;;  %10528 = vmatpush3.bf16.msra.mxu1 %v17384_v52  ;;  %v17395_v52 = vld [vmem:[#allocation189_spill] sm:$0xff] }
 0xcc0   :  { %10530 = vmatprep.subr.bf16.mxu1 %v17385_v47  ;;  %v17396_v47 = vld [vmem:[#allocation192_spill] sm:$0xff] }
 0xcc1   :  { %10496 = vmatpush1.bf16.msra.mxu0 %v17386_v41  ;;  %v17397_v41 = vld [vmem:[#allocation194_spill] sm:$0xff] }
 0xcc2   :  { %10498 = vmatprep.subr.bf16.mxu0 %v17387_v7  ;;  %v17398_v7 = vld [vmem:[#allocation191_spill] sm:$0xff] }
 0xcc3   :  { %10532 = vmatpush3.bf16.msra.mxu1 %v17388_v58  ;;  %v17399_v58 = vld [vmem:[#allocation193_spill] sm:$0xff] }
 0xcc4   :  { %10534 = vmatprep.subr.bf16.mxu1 %v17389_v23  ;;  %v17400_v23 = vld [vmem:[#allocation196_spill] sm:$0xff] }
 0xcc5   :  { %10500 = vmatpush1.bf16.msra.mxu0 %v17390_v56  ;;  %v17401_v56 = vld [vmem:[#allocation198_spill] sm:$0xff] }
 0xcc6   :  { %10502 = vmatprep.subr.bf16.mxu0 %v17391_v25  ;;  %v17402_v25 = vld [vmem:[#allocation195_spill] sm:$0xff] }
 0xcc7   :  { %10536 = vmatpush3.bf16.msra.mxu1 %v17392_v45  ;;  %v17403_v45 = vld [vmem:[#allocation197_spill] sm:$0xff] }
 0xcc8   :  { %10538 = vmatprep.subr.bf16.mxu1 %v17393_v59  ;;  %v17404_v59 = vld [vmem:[#allocation200_spill] sm:$0xff] }
 0xcc9   :  { %10504 = vmatpush1.bf16.msra.mxu0 %v17394_v43  ;;  %v17405_v43 = vld [vmem:[#allocation202_spill] sm:$0xff] }
 0xcca   :  { %10506 = vmatprep.subr.bf16.mxu0 %v17395_v52  ;;  %v17406_v52 = vld [vmem:[#allocation199_spill] sm:$0xff] }
 0xccb   :  { %10540 = vmatpush3.bf16.msra.mxu1 %v17396_v47  ;;  %v17407_v47 = vld [vmem:[#allocation201_spill] sm:$0xff] }
 0xccc   :  { %10542 = vmatprep.subr.bf16.mxu1 %v17397_v41  ;;  %v17408_v41 = vld [vmem:[#allocation204_spill] sm:$0xff] }
 0xccd   :  { %10508 = vmatpush1.bf16.msra.mxu0 %v17398_v7  ;;  %v17409_v7 = vld [vmem:[#allocation206_spill] sm:$0xff] }
 0xcce   :  { %10510 = vmatprep.subr.bf16.mxu0 %v17399_v58  ;;  %v17410_v58 = vld [vmem:[#allocation203_spill] sm:$0xff] }
 0xccf   :  { %10544 = vmatpush3.bf16.msra.mxu1 %v17400_v23  ;;  %v17411_v23 = vld [vmem:[#allocation205_spill] sm:$0xff] }
 0xcd0   :  { %10546 = vmatprep.subr.bf16.mxu1 %v17401_v56  ;;  %v17412_v56 = vld [vmem:[#allocation208_spill] sm:$0xff] }
 0xcd1   :  { %10512 = vmatpush1.bf16.msra.mxu0 %v17402_v25 }
 0xcd2   :  { %10514 = vmatprep.subr.bf16.mxu0 %v17403_v45  ;;  %v17413_v45 = vld [vmem:[#allocation207_spill] sm:$0xff] }
 0xcd3   :  { %10548 = vmatpush3.bf16.msra.mxu1 %v17404_v59  ;;  %v17414_v59 = vld [vmem:[#allocation19_spill] sm:$0xff] }
 0xcd4   :  { %10550 = vmatprep.subr.bf16.mxu1 %v17405_v43 }
 0xcd5   :  { %10516 = vmatpush1.bf16.msra.mxu0 %v17406_v52 }
 0xcd6   :  { %10518 = vmatprep.subr.bf16.mxu0 %v17407_v47 }
 0xcd7   :  { %10552 = vmatpush3.bf16.msra.mxu1 %v17408_v41 }
 0xcd8   :  { %10554 = vmatprep.subr.bf16.mxu1 %v17409_v7 }
 0xcd9   :  { %10520 = vmatpush1.bf16.msra.mxu0 %v17410_v58  ;;  %v17415_v58 = vld [vmem:[#allocation210_spill] sm:$0xff] }
 0xcda   :  { %10522 = vmatprep.subr.bf16.mxu0 %v17411_v23 }
 0xcdb   :  { %10556 = vmatpush3.bf16.msra.mxu1 %v17412_v56 }
 0xcdc   :  { %10557 = vmatprep.subr.bf16.mxu1 %v16820_v21 }
 0xcdd   :  { %10524 = vmatpush1.bf16.msra.mxu0 %v17413_v45 }
 0xcde   :  { %10582 = vmatprep.subr.bf16.mxu0 %v17414_v59 }
 0xd71   :  { %v3517_v43 = vpop.f32.mrb[28].mxu0  ;;  %v7753_v52 = vpop.f32.mrb[40].mxu1 }
 0xd72   :  { %v3518_v47 = vadd.f32 %v3517_v43, %v17050_v19  ;;  %v3519_v25 = vpop.f32.mrb[29].mxu0  ;;  %v7754_v41 = vpop.f32.mrb[41].mxu1 }
 0xd73   :  { %v7755_v1 = vadd.f32 %v7754_v41, %v7753_v52  ;;  %v3520_v15 = vadd.f32 %v3519_v25, %v17415_v58  ;;  %v17425_v25 = vld [vmem:[#allocation26_spill] sm:$0xff] }
 0xd74   :  { %v7360_v7 = vmul.f32 -1.442695, %v3518_v47 }
 0xd75   :  { %v7361_v23 = vmul.f32 -1.442695, %v3520_v15  ;;  %v3589_v43 = vadd.f32 %v7755_v1, %v14192_v3  ;;  %v17422_v1 = vld [vmem:[#allocation25_spill] sm:$0xff] }
 0xd76   :  { %12538 = vpow2.f32 %v7360_v7 }
 0xd77   :  { %12540 = vpow2.f32 %v7361_v23 }
 0xd80   :  { %v12539_v62 = vpop.eup %12538 }
 0xd81   :  { %v3665_v56 = vadd.f32 1.0, %v12539_v62  ;;  %v12541_v44 = vpop.eup %12540 }
 0xd82   :  { %v3671_v45 = vadd.f32 1.0, %v12541_v44  ;;  %v17421_v44 = vld [vmem:[#allocation24_spill] sm:$0xff] }
 0xd83   :  { %12542 = vrcp.f32 %v3665_v56 }
 0xd84   :  { %12544 = vrcp.f32 %v3671_v45  ;;  %v17423_v45 = vld [vmem:[#allocation45_spill] sm:$0xff] }
 0xd8d   :  { %v12543_v48 = vpop.eup %12542 }
 0xd8e   :  { %v12545_v52 = vpop.eup %12544 }
 0xd8f   :  { %v3677_v7 = vsub.f32 1.0, %v12545_v52  ;;  %v3679_v23 = vmul.f32 %v12545_v52, %v14795_v5  ;;  %v17416_v5 = vld [vmem:[#allocation39_spill] sm:$0xff]  ;;  %v17429_v52 = vld [vmem:[#allocation28_spill] sm:$0xff] }
 0xd91   :  { %v3658_v49 = vpop.f32.mrb[42].mxu1 }
 0xd92   :  { %v3659_v59 = vadd.f32 %v14790_v57, %v3658_v49  ;;  %v8502_v60 = vpop.f32.mrb[43].mxu1  ;;  %v17419_v57 = vld [vmem:[#allocation41_spill] sm:$0xff]  ;;  %v17420_v49 = vld [vmem:[#allocation43_spill] sm:$0xff] }
 0xd93   :  { %v17418_v60 = vld [vmem:[#allocation23_spill] sm:$0xff] }
 0xd94   :  { %v3674_v41 = vmul.f32 %v12543_v48, %v3659_v59  ;;  %v17417_v48 = vld [vmem:[#allocation22_spill] sm:$0xff]  ;;  %v17424_v59 = vld [vmem:[#allocation47_spill] sm:$0xff] }
 0xd96   :  { %v3675_v47 = vadd.f32 %v3674_v41, %v3589_v43  ;;  %v17426_v43 = vld [vmem:[#allocation27_spill] sm:$0xff]  ;;  %v17427_v41 = vld [vmem:[#allocation49_spill] sm:$0xff] }
 0xd98   :  { %12546 = vtanh.f32 %v3675_v47  ;;  %v17428_v47 = vld [vmem:[#allocation51_spill] sm:$0xff] }
 0xda2   :  { %v12547_v15 = vpop.eup %12546 }
 0xda3   :  { %v3678_v62 = vmul.f32 %v12547_v15, %v3677_v7  ;;  %v17430_v7 = vld [vmem:[#allocation29_spill] sm:$0xff] }
 0xda4   :  { %v17431_v15 = vld [vmem:[#allocation53_spill] sm:$0xff] }
 0xda5   :  { %v15081_v56 = vadd.f32 %v3679_v23, %v3678_v62  ;;  %v17432_v23 = vld [vmem:[#allocation55_spill] sm:$0xff]  ;;  %v17433_v62 = vld [vmem:[#allocation30_spill] sm:$0xff] }
 0xda7   :  { %3746 = vmatmul.mubr.f32.vlgmr.msra.gmra.mrb[30].mxu0 %v15081_v56  ;;  %3817 = vmatmul.mubr.f32.vlgmr.msra.gmra.mrb[44].mxu1 %v15081_v56 }
 0xda8   :  { %10559 = vmatpush3.bf16.msra.mxu1 %v14196_v36  ;;  %10584 = vmatpush1.bf16.msra.mxu0 %v13122_v9 }
 0xda9   :  { %10560 = vmatprep.subr.bf16.mxu1 %v16820_v21  ;;  %10586 = vmatprep.subr.bf16.mxu0 %v13129_v17 }
 0xdaa   :  { %8535 = vmatprep.mubr.msk.f32.mxu1 %vm12951_vm0, %v16762_v61  ;;  %3977 = vmatprep.mubr.f32.mxu0 %v16762_v61 }
 0xdac   :  { %10562 = vmatpush3.bf16.msra.mxu1 %v14204_v46  ;;  %10588 = vmatpush1.bf16.msra.mxu0 %v13134_v22 }
 0xdad   :  { %10563 = vmatprep.subr.bf16.mxu1 %v16820_v21  ;;  %10590 = vmatprep.subr.bf16.mxu0 %v13140_v27 }
 0xdb0   :  { %10565 = vmatpush3.bf16.msra.mxu1 %v14213_v6  ;;  %10592 = vmatpush1.bf16.msra.mxu0 %v13145_v35 }
 0xdb1   :  { %10566 = vmatprep.subr.bf16.mxu1 %v16820_v21  ;;  %10594 = vmatprep.subr.bf16.mxu0 %v13151_v40 }
 0xdb4   :  { %10568 = vmatpush3.bf16.msra.mxu1 %v14219_v30  ;;  %10596 = vmatpush1.bf16.msra.mxu0 %v13157_v51 }
 0xdb5   :  { %10569 = vmatprep.subr.bf16.mxu1 %v16820_v21  ;;  %10598 = vmatprep.subr.bf16.mxu0 %v13163_v53 }
 0xdb8   :  { %10571 = vmatpush3.bf16.msra.mxu1 %v14225_v4  ;;  %10600 = vmatpush1.bf16.msra.mxu0 %v13169_v63 }
 0xdb9   :  { %10572 = vmatprep.subr.bf16.mxu1 %v16820_v21  ;;  %10602 = vmatprep.subr.bf16.mxu0 %v13175_v2 }
 0xdbc   :  { %10574 = vmatpush3.bf16.msra.mxu1 %v14231_v14  ;;  %10604 = vmatpush1.bf16.msra.mxu0 %v13181_v16 }
 0xdbd   :  { %10575 = vmatprep.subr.bf16.mxu1 %v16820_v21  ;;  %10606 = vmatprep.subr.bf16.mxu0 %v13187_v20 }
 0xdc0   :  { %10577 = vmatpush3.bf16.msra.mxu1 %v14237_v11  ;;  %10608 = vmatpush1.bf16.msra.mxu0 %v13193_v34 }
 0xdc1   :  { %10578 = vmatprep.subr.bf16.mxu1 %v16820_v21  ;;  %10610 = vmatprep.subr.bf16.mxu0 %v13199_v37 }
 0xdc4   :  { %10580 = vmatpush3.bf16.msra.mxu1 %v14243_v54  ;;  %10612 = vmatpush1.bf16.msra.mxu0 %v13217_v50 }
 0xdc5   :  { %10614 = vmatprep.subr.bf16.mxu1 %v13120_v8  ;;  %10646 = vmatprep.subr.bf16.mxu0 %v13223_v55 }
 0xdc7   :  { %8536 = vmatmul.mubr.f32.vlgmr.msra.gmra.mrb[46].mxu1 %v14930_v39  ;;  %3978 = vmatmul.mubr.f32.vlgmr.msra.gmra.mrb[32].mxu0 %v14941_v28 }
 0xdc8   :  { %10616 = vmatpush1.bf16.msra.mxu1 %v13125_v13  ;;  %4173 = vmatprep.mubr.f32.mxu0 %v15003_v0 }
 0xdc9   :  { %10618 = vmatprep.subr.bf16.mxu1 %v13131_v18  ;;  %4048 = vmatprep.mubr.f32.mxu1 %v16762_v61 }
 0xdca   :  { %10648 = vmatpush1.bf16.msra.mxu0 %v13253_v10 }
 0xdcb   :  { %10650 = vmatprep.subr.bf16.mxu0 %v13259_v12 }
 0xdcc   :  { %10620 = vmatpush1.bf16.msra.mxu1 %v13138_v26 }
 0xdcd   :  { %10622 = vmatprep.subr.bf16.mxu1 %v13142_v31 }
 0xdce   :  { %10652 = vmatpush1.bf16.msra.mxu0 %v13291_v33 }
 0xdcf   :  { %10654 = vmatprep.subr.bf16.mxu0 %v17416_v5 }
 0xdd0   :  { %10624 = vmatpush1.bf16.msra.mxu1 %v17417_v48 }
 0xdd1   :  { %10626 = vmatprep.subr.bf16.mxu1 %v17418_v60  ;;  %v17491_v60 = vld [vmem:[#allocation211_spill] sm:$0xff] }
 0xdd2   :  { %10656 = vmatpush1.bf16.msra.mxu0 %v17419_v57 }
 0xdd3   :  { %10658 = vmatprep.subr.bf16.mxu0 %v17420_v49 }
 0xdd4   :  { %10628 = vmatpush1.bf16.msra.mxu1 %v17421_v44 }
 0xdd5   :  { %10630 = vmatprep.subr.bf16.mxu1 %v17422_v1 }
 0xdd6   :  { %10660 = vmatpush1.bf16.msra.mxu0 %v17423_v45  ;;  %v17434_v45 = vld [vmem:[#allocation31_spill] sm:$0xff] }
 0xdd7   :  { %10662 = vmatprep.subr.bf16.mxu0 %v17424_v59  ;;  %v17435_v59 = vld [vmem:[#allocation57_spill] sm:$0xff] }
 0xdd8   :  { %10632 = vmatpush1.bf16.msra.mxu1 %v17425_v25  ;;  %v17436_v25 = vld [vmem:[#allocation59_spill] sm:$0xff] }
 0xdd9   :  { %10634 = vmatprep.subr.bf16.mxu1 %v17426_v43  ;;  %v17437_v43 = vld [vmem:[#allocation32_spill] sm:$0xff] }
 0xdda   :  { %10664 = vmatpush1.bf16.msra.mxu0 %v17427_v41  ;;  %v17438_v41 = vld [vmem:[#allocation33_spill] sm:$0xff] }
 0xddb   :  { %10666 = vmatprep.subr.bf16.mxu0 %v17428_v47  ;;  %v17439_v47 = vld [vmem:[#allocation61_spill] sm:$0xff] }
 0xddc   :  { %10636 = vmatpush1.bf16.msra.mxu1 %v17429_v52 }
 0xddd   :  { %10638 = vmatprep.subr.bf16.mxu1 %v17430_v7  ;;  %v17440_v7 = vld [vmem:[#allocation63_spill] sm:$0xff] }
 0xdde   :  { %10668 = vmatpush1.bf16.msra.mxu0 %v17431_v15  ;;  %v17489_v15 = vld [vmem:[#allocation146_spill] sm:$0xff] }
 0xddf   :  { %10670 = vmatprep.subr.bf16.mxu0 %v17432_v23  ;;  %v17441_v23 = vld [vmem:[#allocation34_spill] sm:$0xff] }
 0xde0   :  { %10640 = vmatpush1.bf16.msra.mxu1 %v17433_v62  ;;  %v17442_v62 = vld [vmem:[#allocation36_spill] sm:$0xff] }
 0xde1   :  { %10642 = vmatprep.subr.bf16.mxu1 %v17434_v45  ;;  %v17443_v45 = vld [vmem:[#allocation65_spill] sm:$0xff] }
 0xde2   :  { %10672 = vmatpush1.bf16.msra.mxu0 %v17435_v59  ;;  %v17444_v59 = vld [vmem:[#allocation67_spill] sm:$0xff] }
 0xde3   :  { %10674 = vmatprep.subr.bf16.mxu0 %v17436_v25  ;;  %v17445_v25 = vld [vmem:[#allocation38_spill] sm:$0xff] }
 0xde4   :  { %10644 = vmatpush1.bf16.msra.mxu1 %v17437_v43  ;;  %v17446_v43 = vld [vmem:[#allocation40_spill] sm:$0xff] }
 0xde5   :  { %10710 = vmatprep.subr.bf16.mxu1 %v17438_v41  ;;  %v17447_v41 = vld [vmem:[#allocation69_spill] sm:$0xff] }
 0xde6   :  { %10676 = vmatpush1.bf16.msra.mxu0 %v17439_v47  ;;  %v17448_v47 = vld [vmem:[#allocation71_spill] sm:$0xff] }
 0xde7   :  { %4049 = vmatmul.mubr.f32.vlgmr.msra.gmra.mrb[48].mxu1 %v14941_v28  ;;  %10678 = vmatprep.subr.bf16.mxu0 %v17440_v7  ;;  %v17449_v28 = vld [vmem:[#allocation42_spill] sm:$0xff]  ;;  %v17450_v7 = vld [vmem:[#allocation44_spill] sm:$0xff] }
 0xde8   :  { %4244 = vmatprep.mubr.f32.mxu1 %v15003_v0  ;;  %10712 = vmatpush1.bf16.msra.mxu1 %v17441_v23  ;;  %v17451_v0 = vld [vmem:[#allocation73_spill] sm:$0xff]  ;;  %v17452_v23 = vld [vmem:[#allocation75_spill] sm:$0xff] }
 0xde9   :  { %10714 = vmatprep.subr.bf16.mxu1 %v17442_v62  ;;  %v17453_v62 = vld [vmem:[#allocation46_spill] sm:$0xff] }
 0xdea   :  { %10680 = vmatpush1.bf16.msra.mxu0 %v17443_v45  ;;  %v17454_v45 = vld [vmem:[#allocation48_spill] sm:$0xff] }
 0xdeb   :  { %10682 = vmatprep.subr.bf16.mxu0 %v17444_v59  ;;  %v17455_v59 = vld [vmem:[#allocation77_spill] sm:$0xff] }
 0xdec   :  { %10716 = vmatpush1.bf16.msra.mxu1 %v17445_v25  ;;  %v17456_v25 = vld [vmem:[#allocation79_spill] sm:$0xff] }
 0xded   :  { %10718 = vmatprep.subr.bf16.mxu1 %v17446_v43  ;;  %v17457_v43 = vld [vmem:[#allocation50_spill] sm:$0xff] }
 0xdee   :  { %10684 = vmatpush1.bf16.msra.mxu0 %v17447_v41  ;;  %v17458_v41 = vld [vmem:[#allocation52_spill] sm:$0xff] }
 0xdef   :  { %10686 = vmatprep.subr.bf16.mxu0 %v17448_v47  ;;  %v17459_v47 = vld [vmem:[#allocation81_spill] sm:$0xff] }
 0xdf0   :  { %10720 = vmatpush1.bf16.msra.mxu1 %v17449_v28  ;;  %v17460_v28 = vld [vmem:[#allocation83_spill] sm:$0xff] }
 0xdf1   :  { %10722 = vmatprep.subr.bf16.mxu1 %v17450_v7  ;;  %v17461_v7 = vld [vmem:[#allocation54_spill] sm:$0xff] }
 0xdf2   :  { %10688 = vmatpush1.bf16.msra.mxu0 %v17451_v0  ;;  %v17462_v0 = vld [vmem:[#allocation56_spill] sm:$0xff] }
 0xdf3   :  { %10690 = vmatprep.subr.bf16.mxu0 %v17452_v23  ;;  %v17463_v23 = vld [vmem:[#allocation85_spill] sm:$0xff] }
 0xdf4   :  { %10724 = vmatpush1.bf16.msra.mxu1 %v17453_v62  ;;  %v17464_v62 = vld [vmem:[#allocation87_spill] sm:$0xff] }
 0xdf5   :  { %10726 = vmatprep.subr.bf16.mxu1 %v17454_v45  ;;  %v17465_v45 = vld [vmem:[#allocation58_spill] sm:$0xff] }
 0xdf6   :  { %10692 = vmatpush1.bf16.msra.mxu0 %v17455_v59  ;;  %v17466_v59 = vld [vmem:[#allocation60_spill] sm:$0xff] }
 0xdf7   :  { %10694 = vmatprep.subr.bf16.mxu0 %v17456_v25  ;;  %v17467_v25 = vld [vmem:[#allocation89_spill] sm:$0xff] }
 0xdf8   :  { %10728 = vmatpush1.bf16.msra.mxu1 %v17457_v43  ;;  %v17468_v43 = vld [vmem:[#allocation91_spill] sm:$0xff] }
 0xdf9   :  { %10730 = vmatprep.subr.bf16.mxu1 %v17458_v41  ;;  %v17469_v41 = vld [vmem:[#allocation62_spill] sm:$0xff] }
 0xdfa   :  { %10696 = vmatpush1.bf16.msra.mxu0 %v17459_v47  ;;  %v17470_v47 = vld [vmem:[#allocation64_spill] sm:$0xff] }
 0xdfb   :  { %10698 = vmatprep.subr.bf16.mxu0 %v17460_v28  ;;  %v17471_v28 = vld [vmem:[#allocation93_spill] sm:$0xff] }
 0xdfc   :  { %10732 = vmatpush1.bf16.msra.mxu1 %v17461_v7  ;;  %v17472_v7 = vld [vmem:[#allocation95_spill] sm:$0xff] }
 0xdfd   :  { %10734 = vmatprep.subr.bf16.mxu1 %v17462_v0  ;;  %v17473_v0 = vld [vmem:[#allocation66_spill] sm:$0xff] }
 0xdfe   :  { %10700 = vmatpush1.bf16.msra.mxu0 %v17463_v23  ;;  %v17474_v23 = vld [vmem:[#allocation68_spill] sm:$0xff] }
 0xdff   :  { %10702 = vmatprep.subr.bf16.mxu0 %v17464_v62  ;;  %v17475_v62 = vld [vmem:[#allocation70_spill] sm:$0xff] }
 0xe00   :  { %10736 = vmatpush1.bf16.msra.mxu1 %v17465_v45  ;;  %v17476_v45 = vld [vmem:[#allocation72_spill] sm:$0xff] }
 0xe01   :  { %10738 = vmatprep.subr.bf16.mxu1 %v17466_v59  ;;  %v17477_v59 = vld [vmem:[#allocation74_spill] sm:$0xff] }
 0xe02   :  { %10704 = vmatpush1.bf16.msra.mxu0 %v17467_v25  ;;  %v17478_v25 = vld [vmem:[#allocation76_spill] sm:$0xff] }
 0xe03   :  { %10706 = vmatprep.subr.bf16.mxu0 %v17468_v43  ;;  %v17479_v43 = vld [vmem:[#allocation78_spill] sm:$0xff] }
 0xe04   :  { %10740 = vmatpush1.bf16.msra.mxu1 %v17469_v41  ;;  %v17480_v41 = vld [vmem:[#allocation80_spill] sm:$0xff] }
 0xe05   :  { %10742 = vmatprep.subr.bf16.mxu1 %v17470_v47  ;;  %v17481_v47 = vld [vmem:[#allocation82_spill] sm:$0xff] }
 0xe06   :  { %10708 = vmatpush1.bf16.msra.mxu0 %v17471_v28  ;;  %v17482_v28 = vld [vmem:[#allocation84_spill] sm:$0xff] }
 0xe07   :  { %10774 = vmatprep.subr.bf16.mxu0 %v17472_v7  ;;  %v17483_v7 = vld [vmem:[#allocation86_spill] sm:$0xff] }
 0xe08   :  { %10744 = vmatpush1.bf16.msra.mxu1 %v17473_v0  ;;  %v17484_v0 = vld [vmem:[#allocation88_spill] sm:$0xff] }
 0xe09   :  { %10746 = vmatprep.subr.bf16.mxu1 %v17474_v23  ;;  %v17485_v23 = vld [vmem:[#allocation90_spill] sm:$0xff] }
 0xe0c   :  { %10748 = vmatpush1.bf16.msra.mxu1 %v17475_v62  ;;  %v17486_v62 = vld [vmem:[#allocation92_spill] sm:$0xff] }
 0xe0d   :  { %10750 = vmatprep.subr.bf16.mxu1 %v17476_v45  ;;  %v17487_v45 = vld [vmem:[#allocation94_spill] sm:$0xff] }
 0xe10   :  { %10752 = vmatpush1.bf16.msra.mxu1 %v17477_v59  ;;  %v17488_v59 = vld [vmem:[#allocation113_spill] sm:$0xff] }
 0xe11   :  { %10754 = vmatprep.subr.bf16.mxu1 %v17478_v25 }
 0xe14   :  { %10756 = vmatpush1.bf16.msra.mxu1 %v17479_v43 }
 0xe15   :  { %10758 = vmatprep.subr.bf16.mxu1 %v17480_v41 }
 0xe18   :  { %10760 = vmatpush1.bf16.msra.mxu1 %v17481_v47 }
 0xe19   :  { %10762 = vmatprep.subr.bf16.mxu1 %v17482_v28 }
 0xe1c   :  { %10764 = vmatpush1.bf16.msra.mxu1 %v17483_v7  ;;  %v17490_v7 = vld [vmem:[#allocation147_spill] sm:$0xff] }
 0xe1d   :  { %10766 = vmatprep.subr.bf16.mxu1 %v17484_v0 }
 0xe20   :  { %10768 = vmatpush1.bf16.msra.mxu1 %v17485_v23 }
 0xe21   :  { %10770 = vmatprep.subr.bf16.mxu1 %v17486_v62 }
 0xe24   :  { %10772 = vmatpush1.bf16.msra.mxu1 %v17487_v45 }
 0xe25   :  { %10838 = vmatprep.subr.bf16.mxu1 %v17488_v59 }
 0xe7a   :  { %v3747_v25 = vpop.f32.mrb[30].mxu0  ;;  %v7805_v43 = vpop.f32.mrb[44].mxu1 }
 0xe7b   :  { %v3748_v41 = vadd.f32 %v3747_v25, %v17489_v15  ;;  %v3749_v52 = vpop.f32.mrb[31].mxu0  ;;  %v7806_v47 = vpop.f32.mrb[45].mxu1 }
 0xe7c   :  { %v7807_v1 = vadd.f32 %v7806_v47, %v7805_v43  ;;  %v3750_v44 = vadd.f32 %v3749_v52, %v17490_v7 }
 0xe7d   :  { %v7362_v28 = vmul.f32 -1.442695, %v3748_v41 }
 0xe7e   :  { %v7363_v0 = vmul.f32 -1.442695, %v3750_v44  ;;  %v3819_v43 = vadd.f32 %v7807_v1, %v17123_v24 }
 0xe7f   :  { %12548 = vpow2.f32 %v7362_v28 }
 0xe80   :  { %12550 = vpow2.f32 %v7363_v0 }
 0xe89   :  { %v12549_v49 = vpop.eup %12548 }
 0xe8a   :  { %v3895_v23 = vadd.f32 1.0, %v12549_v49  ;;  %v12551_v62 = vpop.eup %12550 }
 0xe8b   :  { %v3901_v45 = vadd.f32 1.0, %v12551_v62 }
 0xe8c   :  { %12552 = vrcp.f32 %v3895_v23 }
 0xe8d   :  { %12554 = vrcp.f32 %v3901_v45 }
 0xe96   :  { %v12553_v15 = vpop.eup %12552 }
 0xe97   :  { %v12555_v44 = vpop.eup %12554 }
 0xe98   :  { %v3907_v52 = vsub.f32 1.0, %v12555_v44  ;;  %v3909_v62 = vmul.f32 %v12555_v44, %v14930_v39 }
 0xe9a   :  { %v3888_v57 = vpop.f32.mrb[46].mxu1  ;;  %v3979_v59 = vpop.f32.mrb[32].mxu0 }
 0xe9b   :  { %v3889_v48 = vadd.f32 %v17491_v60, %v3888_v57  ;;  %v8537_v5 = vpop.f32.mrb[47].mxu1  ;;  %v3981_v25 = vpop.f32.mrb[33].mxu0 }
 0xe9c   :  { %v4059_v33 = vcombine.low %v3979_v59, %v3981_v25 }
 0xe9d   :  { %v3904_v41 = vmul.f32 %v12553_v15, %v3889_v48  ;;  %v7364_v48 = vld [vmem:[%s16258_s0 + $0x20] sm:$0xff] }
 0xe9e   :  { %v4067_v57 = vrot.slane %v4059_v33, %v17124_v42 }
 0xe9f   :  { %v3905_v47 = vadd.f32 %v3904_v41, %v3819_v43 }
 0xea1   :  { %12556 = vtanh.f32 %v3905_v47 }
 0xeab   :  { %v12557_v49 = vpop.eup %12556 }
 0xeac   :  { %v3908_v23 = vmul.f32 %v12557_v49, %v3907_v52 }
 0xeae   :  { %v15211_v28 = vadd.f32 %v3909_v62, %v3908_v23 }
 0xeba   :  { %v4050_v0 = vpop.f32.mrb[48].mxu1 }
 0xebb   :  { %v4052_v60 = vpop.f32.mrb[49].mxu1 }
 0xebc   :  { %v4060_v5 = vcombine.low %v4050_v0, %v4052_v60 }
 0xebe   :  { %v4074_v45 = vrot.slane %v4060_v5, %v17124_v42 }
 0xec0   :  { %v4075_v1 = vcombine.low %v4067_v57, %v4074_v45 }
 0xec2   :  { %v4077_v59 = vadd.f32 %v7364_v48, %v4075_v1 }
 0xec4   :  { %v7365_v15 = vmul.f32 -1.442695, %v4077_v59  ;;  %v4085_v25 = vrot.slane %v4077_v59, 2  ;;  %v4096_v39 = vrot.slane %v4077_v59, 6  ;;  %v4093_v44 = vrot.slane %v4077_v59, 4 }
 0xec6   :  { %12558 = vpow2.f32 %v7365_v15  ;;  %v7366_v43 = vmul.f32 -1.442695, %v4085_v25  ;;  %v7367_v41 = vmul.f32 -1.442695, %v4096_v39  ;;  %v17493_v25 = vld [vmem:[#allocation99_spill] sm:$0xff]  ;;  %v17495_v39 = vld [vmem:[#allocation100_spill] sm:$0xff] }
 0xec8   :  { %12560 = vpow2.f32 %v7366_v43  ;;  %v17494_v43 = vld [vmem:[#allocation117_spill] sm:$0xff] }
 0xec9   :  { %12562 = vpow2.f32 %v7367_v41  ;;  %v17496_v41 = vld [vmem:[#allocation119_spill] sm:$0xff] }
 0xed0   :  { %v12559_v47 = vpop.eup %12558 }
 0xed1   :  { %v4081_v52 = vadd.f32 1.0, %v12559_v47  ;;  %v17497_v47 = vld [vmem:[#allocation101_spill] sm:$0xff] }
 0xed2   :  { %v12561_v49 = vpop.eup %12560 }
 0xed3   :  { %12564 = vrcp.f32 %v4081_v52  ;;  %v4090_v33 = vadd.f32 1.0, %v12561_v49  ;;  %v12563_v23 = vpop.eup %12562  ;;  %v17499_v52 = vld [vmem:[#allocation102_spill] sm:$0xff]  ;;  %v17500_v49 = vld [vmem:[#allocation123_spill] sm:$0xff] }
 0xed4   :  { %12566 = vtanh.f32 %v4093_v44  ;;  %v4101_v5 = vadd.f32 1.0, %v12563_v23  ;;  %v17498_v44 = vld [vmem:[#allocation121_spill] sm:$0xff] }
 0xed5   :  { %12568 = vrcp.f32 %v4090_v33  ;;  %v17501_v33 = vld [vmem:[#allocation103_spill] sm:$0xff]  ;;  %v17502_v23 = vld [vmem:[#allocation125_spill] sm:$0xff] }
 0xed6   :  { %12570 = vrcp.f32 %v4101_v5  ;;  %v17506_v5 = vld [vmem:[#allocation129_spill] sm:$0xff] }
 0xedd   :  { %v12565_v62 = vpop.eup %12564 }
 0xede   :  { %v12567_v0 = vpop.eup %12566 }
 0xedf   :  { %v12569_v60 = vpop.eup %12568  ;;  %v4105_v45 = vmul.f32 %v12567_v0, %v12565_v62  ;;  %v17503_v62 = vld [vmem:[#allocation104_spill] sm:$0xff]  ;;  %v17504_v0 = vld [vmem:[#allocation127_spill] sm:$0xff] }
 0xee0   :  { %v4104_v57 = vmul.f32 %v12569_v60, %v14938_v32  ;;  %v12571_v1 = vpop.eup %12570  ;;  %v17492_v32 = vld [vmem:[#allocation115_spill] sm:$0xff]  ;;  %v17505_v60 = vld [vmem:[#allocation105_spill] sm:$0xff] }
 0xee2   :  { %v15219_v48 = vadd.f32 %v4105_v45, %v4104_v57  ;;  %v17507_v57 = vld [vmem:[#allocation106_spill] sm:$0xff]  ;;  %v17508_v45 = vld [vmem:[#allocation131_spill] sm:$0xff] }
 0xee4   :  { %12572 = vtanh.f32 %v15219_v48 }
 0xeee   :  { %v12573_v59 = vpop.eup %12572 }
 0xeef   :  { %v15222_v15 = vmul.f32 %v12573_v59, %v12571_v1  ;;  %v17509_v1 = vld [vmem:[#allocation107_spill] sm:$0xff]  ;;  %v17510_v59 = vld [vmem:[#allocation133_spill] sm:$0xff] }
 0xef1   :  { %4174 = vmatmul.mubr.f32.vlgmr.msra.gmra.mrb[34].mxu0 %v15222_v15  ;;  %4245 = vmatmul.mubr.f32.vlgmr.msra.gmra.mrb[50].mxu1 %v15222_v15 }
 0xef2   :  { %4339 = vmatprep.mubr.f32.mxu0 %v15081_v56  ;;  %4410 = vmatprep.mubr.f32.mxu1 %v15081_v56 }
 0xef3   :  { %10776 = vmatpush1.bf16.msra.mxu0 %v17309_v38  ;;  %10840 = vmatpush3.bf16.msra.mxu1 %v17492_v32 }
 0xef4   :  { %10778 = vmatprep.subr.bf16.mxu0 %v17493_v25  ;;  %10842 = vmatprep.subr.bf16.mxu1 %v17494_v43 }
 0xef7   :  { %10780 = vmatpush1.bf16.msra.mxu0 %v17495_v39  ;;  %10844 = vmatpush3.bf16.msra.mxu1 %v17496_v41 }
 0xef8   :  { %10782 = vmatprep.subr.bf16.mxu0 %v17497_v47  ;;  %10846 = vmatprep.subr.bf16.mxu1 %v17498_v44 }
 0xefb   :  { %10784 = vmatpush1.bf16.msra.mxu0 %v17499_v52  ;;  %10848 = vmatpush3.bf16.msra.mxu1 %v17500_v49  ;;  %v17511_v49 = vld [vmem:[#allocation108_spill] sm:$0xff] }
 0xefc   :  { %10786 = vmatprep.subr.bf16.mxu0 %v17501_v33  ;;  %10850 = vmatprep.subr.bf16.mxu1 %v17502_v23  ;;  %v17512_v33 = vld [vmem:[#allocation135_spill] sm:$0xff]  ;;  %v17513_v23 = vld [vmem:[#allocation109_spill] sm:$0xff]  ;;  %v17538_v52 = vld [vmem:[#allocation148_spill] sm:$0xff] }
 0xeff   :  { %10788 = vmatpush1.bf16.msra.mxu0 %v17503_v62  ;;  %10852 = vmatpush3.bf16.msra.mxu1 %v17504_v0  ;;  %v17514_v62 = vld [vmem:[#allocation137_spill] sm:$0xff]  ;;  %v17515_v0 = vld [vmem:[#allocation110_spill] sm:$0xff] }
 0xf00   :  { %10790 = vmatprep.subr.bf16.mxu0 %v17505_v60  ;;  %10854 = vmatprep.subr.bf16.mxu1 %v17506_v5  ;;  %v17516_v60 = vld [vmem:[#allocation139_spill] sm:$0xff] }
 0xf01   :  { %v17517_v5 = vld [vmem:[#allocation111_spill] sm:$0xff] }
 0xf03   :  { %10792 = vmatpush1.bf16.msra.mxu0 %v17507_v57  ;;  %10856 = vmatpush3.bf16.msra.mxu1 %v17508_v45  ;;  %v17518_v57 = vld [vmem:[#allocation141_spill] sm:$0xff]  ;;  %v17519_v45 = vld [vmem:[#allocation112_spill] sm:$0xff] }
 0xf04   :  { %10794 = vmatprep.subr.bf16.mxu0 %v17509_v1  ;;  %10858 = vmatprep.subr.bf16.mxu1 %v17510_v59  ;;  %v17520_v1 = vld [vmem:[#allocation143_spill] sm:$0xff]  ;;  %v17521_v59 = vld [vmem:[#allocation114_spill] sm:$0xff] }
 0xf07   :  { %10796 = vmatpush1.bf16.msra.mxu0 %v17511_v49  ;;  %10860 = vmatpush3.bf16.msra.mxu1 %v17512_v33  ;;  %v17522_v33 = vld [vmem:[#allocation116_spill] sm:$0xff] }
 0xf08   :  { %10798 = vmatprep.subr.bf16.mxu0 %v17513_v23  ;;  %10862 = vmatprep.subr.bf16.mxu1 %v17514_v62  ;;  %v17523_v23 = vld [vmem:[#allocation118_spill] sm:$0xff]  ;;  %v17524_v62 = vld [vmem:[#allocation120_spill] sm:$0xff] }
 0xf09   :  { %v17532_v49 = vld [vmem:[#allocation136_spill] sm:$0xff] }
 0xf0b   :  { %10800 = vmatpush1.bf16.msra.mxu0 %v17515_v0  ;;  %10864 = vmatpush3.bf16.msra.mxu1 %v17516_v60  ;;  %v17525_v0 = vld [vmem:[#allocation122_spill] sm:$0xff]  ;;  %v17526_v60 = vld [vmem:[#allocation124_spill] sm:$0xff] }
 0xf0c   :  { %10802 = vmatprep.subr.bf16.mxu0 %v17517_v5  ;;  %10866 = vmatprep.subr.bf16.mxu1 %v17518_v57  ;;  %v17527_v5 = vld [vmem:[#allocation126_spill] sm:$0xff]  ;;  %v17528_v57 = vld [vmem:[#allocation128_spill] sm:$0xff] }
 0xf0f   :  { %10804 = vmatpush1.bf16.msra.mxu0 %v17519_v45  ;;  %10868 = vmatpush3.bf16.msra.mxu1 %v17520_v1  ;;  %v17529_v45 = vld [vmem:[#allocation130_spill] sm:$0xff]  ;;  %v17530_v1 = vld [vmem:[#allocation132_spill] sm:$0xff] }
 0xf10   :  { %10806 = vmatprep.subr.bf16.mxu0 %v17521_v59  ;;  %10869 = vmatprep.subr.bf16.mxu1 %v16820_v21  ;;  %v17531_v59 = vld [vmem:[#allocation134_spill] sm:$0xff] }
 0xf13   :  { %10808 = vmatpush1.bf16.msra.mxu0 %v17522_v33  ;;  %v17533_v33 = vld [vmem:[#allocation138_spill] sm:$0xff] }
 0xf14   :  { %10810 = vmatprep.subr.bf16.mxu0 %v17523_v23  ;;  %v17534_v23 = vld [vmem:[#allocation140_spill] sm:$0xff] }
 0xf17   :  { %10812 = vmatpush1.bf16.msra.mxu0 %v17524_v62  ;;  %v17535_v62 = vld [vmem:[#allocation142_spill] sm:$0xff] }
 0xf18   :  { %10814 = vmatprep.subr.bf16.mxu0 %v17525_v0  ;;  %v17536_v0 = vld [vmem:[#allocation144_spill] sm:$0xff] }
 0xf1b   :  { %10816 = vmatpush1.bf16.msra.mxu0 %v17526_v60  ;;  %v17537_v60 = vld [vmem:[#allocation145_spill] sm:$0xff] }
 0xf1c   :  { %10818 = vmatprep.subr.bf16.mxu0 %v17527_v5 }
 0xf1f   :  { %10820 = vmatpush1.bf16.msra.mxu0 %v17528_v57 }
 0xf20   :  { %10822 = vmatprep.subr.bf16.mxu0 %v17529_v45 }
 0xf23   :  { %10824 = vmatpush1.bf16.msra.mxu0 %v17530_v1 }
 0xf24   :  { %10826 = vmatprep.subr.bf16.mxu0 %v17531_v59 }
 0xf27   :  { %10828 = vmatpush1.bf16.msra.mxu0 %v17532_v49 }
 0xf28   :  { %10830 = vmatprep.subr.bf16.mxu0 %v17533_v33  ;;  %v17539_v33 = vld [vmem:[#allocation150_spill] sm:$0xff] }
 0xf2b   :  { %10832 = vmatpush1.bf16.msra.mxu0 %v17534_v23 }
 0xf2c   :  { %10834 = vmatprep.subr.bf16.mxu0 %v17535_v62  ;;  %v17540_v62 = vld [vmem:[#allocation152_spill] sm:$0xff] }
 0xf2f   :  { %10836 = vmatpush1.bf16.msra.mxu0 %v17536_v0 }
 0xf30   :  { %10894 = vmatprep.subr.bf16.mxu0 %v17537_v60 }
 0xfc4   :  { %v4175_v5 = vpop.f32.mrb[34].mxu0  ;;  %v4246_v57 = vpop.f32.mrb[50].mxu1 }
 0xfc5   :  { %v4176_v45 = vadd.f32 %v4175_v5, %v17538_v52  ;;  %v4177_v44 = vpop.f32.mrb[35].mxu0  ;;  %v4248_v1 = vpop.f32.mrb[51].mxu1  ;;  %v4247_v39 = vadd.f32 %v4246_v57, %v17540_v62  ;;  %v17548_v57 = vld [vmem:[#allocation160_spill] sm:$0xff] }
 0xfc6   :  { %v4178_v59 = vadd.f32 %v4177_v44, %v17357_v29  ;;  %v4249_v23 = vadd.f32 %v4248_v1, %v17539_v33 }
 0xfc7   :  { %v7368_v47 = vmul.f32 -1.442695, %v4176_v45 }
 0xfc8   :  { %v7369_v49 = vmul.f32 -1.442695, %v4178_v59  ;;  %v7370_v41 = vmul.f32 -1.442695, %v4249_v23 }
 0xfc9   :  { %12574 = vpow2.f32 %v7368_v47 }
 0xfca   :  { %12576 = vpow2.f32 %v7369_v49  ;;  %v17541_v49 = vld [vmem:[#allocation151_spill] sm:$0xff] }
 0xfcb   :  { %12578 = vpow2.f32 %v7370_v41 }
 0xfcc   :  { %12580 = vtanh.f32 %v4247_v39  ;;  %v17545_v39 = vld [vmem:[#allocation157_spill] sm:$0xff] }
 0xfd3   :  { %v12575_v0 = vpop.eup %12574 }
 0xfd4   :  { %v12577_v43 = vpop.eup %12576  ;;  %v4254_v60 = vadd.f32 1.0, %v12575_v0 }
 0xfd5   :  { %v4260_v25 = vadd.f32 1.0, %v12577_v43  ;;  %v12579_v5 = vpop.eup %12578  ;;  %v17544_v43 = vld [vmem:[#allocation156_spill] sm:$0xff] }
 0xfd6   :  { %12582 = vrcp.f32 %v4254_v60  ;;  %v12581_v52 = vpop.eup %12580  ;;  %v4267_v47 = vadd.f32 1.0, %v12579_v5  ;;  %v17547_v60 = vld [vmem:[#allocation159_spill] sm:$0xff]  ;;  %v17549_v5 = vld [vmem:[#allocation161_spill] sm:$0xff] }
 0xfd7   :  { %12584 = vrcp.f32 %v4260_v25  ;;  %v17542_v25 = vld [vmem:[#allocation154_spill] sm:$0xff] }
 0xfd8   :  { %12586 = vrcp.f32 %v4267_v47  ;;  %v17553_v47 = vld [vmem:[#allocation169_spill] sm:$0xff] }
 0xfe0   :  { %v12583_v44 = vpop.eup %12582 }
 0xfe1   :  { %v12585_v45 = vpop.eup %12584  ;;  %v4271_v59 = vmul.f32 %v12583_v44, %v12581_v52  ;;  %v17546_v52 = vld [vmem:[#allocation158_spill] sm:$0xff]  ;;  %v17550_v44 = vld [vmem:[#allocation167_spill] sm:$0xff] }
 0xfe2   :  { %v4270_v29 = vmul.f32 %v12585_v45, %v17541_v49  ;;  %v12587_v23 = vpop.eup %12586  ;;  %v17551_v45 = vld [vmem:[#allocation162_spill] sm:$0xff]  ;;  %v17554_v49 = vld [vmem:[#allocation163_spill] sm:$0xff] }
 0xfe4   :  { %v15281_v1 = vadd.f32 %v4271_v59, %v4270_v29  ;;  %v17543_v29 = vld [vmem:[#allocation155_spill] sm:$0xff]  ;;  %v17552_v59 = vld [vmem:[#allocation168_spill] sm:$0xff] }
 0xfe6   :  { %12588 = vtanh.f32 %v15281_v1 }
 0xff0   :  { %v12589_v0 = vpop.eup %12588 }
 0xff1   :  { %v15284_v41 = vmul.f32 %v12589_v0, %v12587_v23  ;;  %v17555_v23 = vld [vmem:[#allocation170_spill] sm:$0xff]  ;;  %v17556_v0 = vld [vmem:[#allocation171_spill] sm:$0xff] }
 0xff3   :  { %4340 = vmatmul.mubr.f32.vlgmr.msra.gmra.mrb[36].mxu0 %v15284_v41  ;;  %4411 = vmatmul.mubr.f32.vlgmr.msra.gmra.mrb[52].mxu1 %v15284_v41 }
 0xff4   :  { %10871 = vmatpush3.bf16.msra.mxu1 %v17542_v25  ;;  %4569 = vmatprep.mubr.f32.mxu0 %v15211_v28 }
 0xff5   :  { %10872 = vmatprep.subr.bf16.mxu1 %v16820_v21  ;;  %8570 = vmatprep.mubr.msk.f32.mxu1 %vm12951_vm0, %v16762_v61 }
 0xff6   :  { %10896 = vmatpush1.bf16.msra.mxu0 %v17543_v29 }
 0xff7   :  { %10898 = vmatprep.subr.bf16.mxu0 %v17544_v43 }
 0xff8   :  { %10874 = vmatpush3.bf16.msra.mxu1 %v17545_v39 }
 0xff9   :  { %10875 = vmatprep.subr.bf16.mxu1 %v16820_v21 }
 0xffa   :  { %10900 = vmatpush1.bf16.msra.mxu0 %v17546_v52  ;;  %v17577_v52 = vld [vmem:[#allocation187_spill] sm:$0xff] }
 0xffb   :  { %10902 = vmatprep.subr.bf16.mxu0 %v17547_v60  ;;  %v17575_v60 = vld [vmem:[#allocation188_spill] sm:$0xff] }
 0xffc   :  { %10877 = vmatpush3.bf16.msra.mxu1 %v17548_v57  ;;  %v17557_v57 = vld [vmem:[#allocation164_spill] sm:$0xff] }
 0xffd   :  { %10878 = vmatprep.subr.bf16.mxu1 %v16820_v21 }
 0xffe   :  { %10904 = vmatpush1.bf16.msra.mxu0 %v17549_v5  ;;  %v17560_v5 = vld [vmem:[#allocation165_spill] sm:$0xff] }
 0xfff   :  { %10906 = vmatprep.subr.bf16.mxu0 %v17550_v44  ;;  %v17558_v44 = vld [vmem:[#allocation172_spill] sm:$0xff] }
0x1000   :  { %10880 = vmatpush3.bf16.msra.mxu1 %v17551_v45  ;;  %v17559_v45 = vld [vmem:[#allocation173_spill] sm:$0xff] }
0x1001   :  { %10881 = vmatprep.subr.bf16.mxu1 %v16820_v21 }
0x1002   :  { %10908 = vmatpush1.bf16.msra.mxu0 %v17552_v59  ;;  %v17563_v59 = vld [vmem:[#allocation166_spill] sm:$0xff] }
0x1003   :  { %10910 = vmatprep.subr.bf16.mxu0 %v17553_v47  ;;  %v17561_v47 = vld [vmem:[#allocation174_spill] sm:$0xff] }
0x1004   :  { %10883 = vmatpush3.bf16.msra.mxu1 %v17554_v49  ;;  %v17562_v49 = vld [vmem:[#allocation175_spill] sm:$0xff] }
0x1005   :  { %10884 = vmatprep.subr.bf16.mxu1 %v16820_v21 }
0x1006   :  { %10912 = vmatpush1.bf16.msra.mxu0 %v17555_v23  ;;  %v17564_v23 = vld [vmem:[#allocation178_spill] sm:$0xff] }
0x1007   :  { %10914 = vmatprep.subr.bf16.mxu0 %v17556_v0  ;;  %v17565_v0 = vld [vmem:[#allocation176_spill] sm:$0xff] }
0x1008   :  { %10886 = vmatpush3.bf16.msra.mxu1 %v17557_v57  ;;  %v17566_v57 = vld [vmem:[#allocation177_spill] sm:$0xff] }
0x1009   :  { %10887 = vmatprep.subr.bf16.mxu1 %v16820_v21 }
0x100a   :  { %10916 = vmatpush1.bf16.msra.mxu0 %v17558_v44  ;;  %v17569_v44 = vld [vmem:[#allocation179_spill] sm:$0xff] }
0x100b   :  { %10918 = vmatprep.subr.bf16.mxu0 %v17559_v45  ;;  %v17567_v45 = vld [vmem:[#allocation180_spill] sm:$0xff] }
0x100c   :  { %10889 = vmatpush3.bf16.msra.mxu1 %v17560_v5  ;;  %v17568_v5 = vld [vmem:[#allocation182_spill] sm:$0xff] }
0x100d   :  { %10890 = vmatprep.subr.bf16.mxu1 %v16820_v21 }
0x100e   :  { %10920 = vmatpush1.bf16.msra.mxu0 %v17561_v47  ;;  %v17570_v47 = vld [vmem:[#allocation181_spill] sm:$0xff] }
0x100f   :  { %10922 = vmatprep.subr.bf16.mxu0 %v17562_v49  ;;  %v17571_v49 = vld [vmem:[#allocation184_spill] sm:$0xff] }
0x1010   :  { %10892 = vmatpush3.bf16.msra.mxu1 %v17563_v59  ;;  %v17572_v59 = vld [vmem:[#allocation186_spill] sm:$0xff] }
0x1011   :  { %10958 = vmatprep.subr.bf16.mxu1 %v17564_v23  ;;  %v17573_v23 = vld [vmem:[#allocation183_spill] sm:$0xff] }
0x1012   :  { %10924 = vmatpush1.bf16.msra.mxu0 %v17565_v0  ;;  %v17574_v0 = vld [vmem:[#allocation185_spill] sm:$0xff] }
0x1013   :  { %8571 = vmatmul.mubr.f32.vlgmr.msra.gmra.mrb[54].mxu1 %v15081_v56  ;;  %10926 = vmatprep.subr.bf16.mxu0 %v17566_v57  ;;  %v17576_v57 = vld [vmem:[#allocation190_spill] sm:$0xff] }
0x1014   :  { %4640 = vmatprep.mubr.f32.mxu1 %v15211_v28  ;;  %10960 = vmatpush3.bf16.msra.mxu1 %v17567_v45  ;;  %v17578_v45 = vld [vmem:[#allocation189_spill] sm:$0xff] }
0x1015   :  { %10962 = vmatprep.subr.bf16.mxu1 %v17568_v5  ;;  %v17579_v5 = vld [vmem:[#allocation192_spill] sm:$0xff] }
0x1016   :  { %10928 = vmatpush1.bf16.msra.mxu0 %v17569_v44  ;;  %v17580_v44 = vld [vmem:[#allocation194_spill] sm:$0xff] }
0x1017   :  { %10930 = vmatprep.subr.bf16.mxu0 %v17570_v47  ;;  %v17581_v47 = vld [vmem:[#allocation191_spill] sm:$0xff] }
0x1018   :  { %10964 = vmatpush3.bf16.msra.mxu1 %v17571_v49  ;;  %v17582_v49 = vld [vmem:[#allocation193_spill] sm:$0xff] }
0x1019   :  { %10966 = vmatprep.subr.bf16.mxu1 %v17572_v59  ;;  %v17583_v59 = vld [vmem:[#allocation196_spill] sm:$0xff] }
0x101a   :  { %10932 = vmatpush1.bf16.msra.mxu0 %v17573_v23  ;;  %v17584_v23 = vld [vmem:[#allocation198_spill] sm:$0xff] }
0x101b   :  { %10934 = vmatprep.subr.bf16.mxu0 %v17574_v0  ;;  %v17585_v0 = vld [vmem:[#allocation195_spill] sm:$0xff] }
0x101c   :  { %10968 = vmatpush3.bf16.msra.mxu1 %v17575_v60  ;;  %v17586_v60 = vld [vmem:[#allocation197_spill] sm:$0xff] }
0x101d   :  { %10970 = vmatprep.subr.bf16.mxu1 %v17576_v57  ;;  %v17587_v57 = vld [vmem:[#allocation200_spill] sm:$0xff] }
0x101e   :  { %10936 = vmatpush1.bf16.msra.mxu0 %v17577_v52  ;;  %v17588_v52 = vld [vmem:[#allocation202_spill] sm:$0xff] }
0x101f   :  { %10938 = vmatprep.subr.bf16.mxu0 %v17578_v45  ;;  %v17589_v45 = vld [vmem:[#allocation199_spill] sm:$0xff] }
0x1020   :  { %10972 = vmatpush3.bf16.msra.mxu1 %v17579_v5  ;;  %v17590_v5 = vld [vmem:[#allocation201_spill] sm:$0xff] }
0x1021   :  { %10974 = vmatprep.subr.bf16.mxu1 %v17580_v44  ;;  %v17591_v44 = vld [vmem:[#allocation204_spill] sm:$0xff] }
0x1022   :  { %10940 = vmatpush1.bf16.msra.mxu0 %v17581_v47  ;;  %v17592_v47 = vld [vmem:[#allocation206_spill] sm:$0xff] }
0x1023   :  { %10942 = vmatprep.subr.bf16.mxu0 %v17582_v49  ;;  %v17593_v49 = vld [vmem:[#allocation203_spill] sm:$0xff] }
0x1024   :  { %10976 = vmatpush3.bf16.msra.mxu1 %v17583_v59  ;;  %v17594_v59 = vld [vmem:[#allocation205_spill] sm:$0xff] }
0x1025   :  { %10978 = vmatprep.subr.bf16.mxu1 %v17584_v23  ;;  %v17595_v23 = vld [vmem:[#allocation208_spill] sm:$0xff] }
0x1026   :  { %10944 = vmatpush1.bf16.msra.mxu0 %v17585_v0 }
0x1027   :  { %10946 = vmatprep.subr.bf16.mxu0 %v17586_v60  ;;  %v17596_v60 = vld [vmem:[#allocation207_spill] sm:$0xff] }
0x1028   :  { %10980 = vmatpush3.bf16.msra.mxu1 %v17587_v57  ;;  %v17597_v57 = vld [vmem:[#allocation19_spill] sm:$0xff] }
0x1029   :  { %10982 = vmatprep.subr.bf16.mxu1 %v17588_v52 }
0x102a   :  { %10948 = vmatpush1.bf16.msra.mxu0 %v17589_v45 }
0x102b   :  { %10950 = vmatprep.subr.bf16.mxu0 %v17590_v5 }
0x102c   :  { %10984 = vmatpush3.bf16.msra.mxu1 %v17591_v44 }
0x102d   :  { %10986 = vmatprep.subr.bf16.mxu1 %v17592_v47 }
0x102e   :  { %10952 = vmatpush1.bf16.msra.mxu0 %v17593_v49 }
0x102f   :  { %10954 = vmatprep.subr.bf16.mxu0 %v17594_v59 }
0x1030   :  { %10988 = vmatpush3.bf16.msra.mxu1 %v17595_v23 }
0x1031   :  { %10989 = vmatprep.subr.bf16.mxu1 %v16820_v21 }
0x1032   :  { %10956 = vmatpush1.bf16.msra.mxu0 %v17596_v60 }
0x1033   :  { %11014 = vmatprep.subr.bf16.mxu0 %v17597_v57  ;;  %v15362_v57 = vld [vmem:[%s16265_s7] ss:$0 sm:$0xff] }
0x10c6   :  { %v4341_v52 = vpop.f32.mrb[36].mxu0  ;;  %v7857_v45 = vpop.f32.mrb[52].mxu1 }
0x10c7   :  { %v4342_v5 = vadd.f32 %v4341_v52, %v17050_v19  ;;  %v4343_v0 = vpop.f32.mrb[37].mxu0  ;;  %v7858_v44 = vpop.f32.mrb[53].mxu1 }
0x10c8   :  { %v7859_v39 = vadd.f32 %v7858_v44, %v7857_v45  ;;  %v4344_v49 = vadd.f32 %v4343_v0, %v17415_v58 }
0x10c9   :  { %v7371_v47 = vmul.f32 -1.442695, %v4342_v5 }
0x10ca   :  { %v7372_v59 = vmul.f32 -1.442695, %v4344_v49  ;;  %v4413_v45 = vadd.f32 %v7859_v39, %v14192_v3  ;;  %v17600_v39 = vld [vmem:[#allocation22_spill] sm:$0xff] }
0x10cb   :  { %12590 = vpow2.f32 %v7371_v47 }
0x10cc   :  { %12592 = vpow2.f32 %v7372_v59 }
0x10d5   :  { %v12591_v43 = vpop.eup %12590 }
0x10d6   :  { %v4489_v23 = vadd.f32 1.0, %v12591_v43  ;;  %v12593_v29 = vpop.eup %12592 }
0x10d7   :  { %v4495_v60 = vadd.f32 1.0, %v12593_v29 }
0x10d8   :  { %12594 = vrcp.f32 %v4489_v23 }
0x10d9   :  { %12596 = vrcp.f32 %v4495_v60  ;;  %v17601_v60 = vld [vmem:[#allocation23_spill] sm:$0xff] }
0x10e2   :  { %v12595_v5 = vpop.eup %12594 }
0x10e3   :  { %v12597_v43 = vpop.eup %12596 }
0x10e4   :  { %v4501_v59 = vsub.f32 1.0, %v12597_v43  ;;  %v4503_v29 = vmul.f32 %v12597_v43, %v15081_v56  ;;  %v17598_v56 = vld [vmem:[#allocation37_spill] sm:$0xff]  ;;  %v17608_v43 = vld [vmem:[#allocation26_spill] sm:$0xff] }
0x10e6   :  { %v4482_v25 = vpop.f32.mrb[54].mxu1 }
0x10e7   :  { %v4483_v52 = vadd.f32 %v15362_v57, %v4482_v25  ;;  %v8572_v44 = vpop.f32.mrb[55].mxu1  ;;  %v17599_v25 = vld [vmem:[#allocation39_spill] sm:$0xff] }
0x10e8   :  { %v17603_v44 = vld [vmem:[#allocation43_spill] sm:$0xff] }
0x10e9   :  { %v4498_v47 = vmul.f32 %v12595_v5, %v4483_v52  ;;  %v17602_v52 = vld [vmem:[#allocation41_spill] sm:$0xff]  ;;  %v17604_v5 = vld [vmem:[#allocation24_spill] sm:$0xff] }
0x10eb   :  { %v4499_v49 = vadd.f32 %v4498_v47, %v4413_v45  ;;  %v17605_v45 = vld [vmem:[#allocation25_spill] sm:$0xff] }
0x10ec   :  { %v17606_v47 = vld [vmem:[#allocation45_spill] sm:$0xff] }
0x10ed   :  { %12598 = vtanh.f32 %v4499_v49  ;;  %v17607_v49 = vld [vmem:[#allocation47_spill] sm:$0xff] }
0x10f7   :  { %v12599_v23 = vpop.eup %12598 }
0x10f8   :  { %v4502_v0 = vmul.f32 %v12599_v23, %v4501_v59  ;;  %v17609_v59 = vld [vmem:[#allocation27_spill] sm:$0xff]  ;;  %v17610_v23 = vld [vmem:[#allocation49_spill] sm:$0xff] }
0x10fa   :  { %v15367_v58 = vadd.f32 %v4503_v29, %v4502_v0  ;;  %v17611_v29 = vld [vmem:[#allocation51_spill] sm:$0xff]  ;;  %v17612_v0 = vld [vmem:[#allocation28_spill] sm:$0xff] }
0x10fc   :  { %4570 = vmatmul.mubr.f32.vlgmr.msra.gmra.mrb[38].mxu0 %v15367_v58  ;;  %4641 = vmatmul.mubr.f32.vlgmr.msra.gmra.mrb[56].mxu1 %v15367_v58 }
0x10fd   :  { %10991 = vmatpush3.bf16.msra.mxu1 %v14196_v36  ;;  %11016 = vmatpush1.bf16.msra.mxu0 %v13122_v9 }
0x10fe   :  { %10992 = vmatprep.subr.bf16.mxu1 %v16820_v21  ;;  %11018 = vmatprep.subr.bf16.mxu0 %v13129_v17 }
0x10ff   :  { %8605 = vmatprep.mubr.msk.f32.mxu1 %vm12951_vm0, %v16762_v61  ;;  %4801 = vmatprep.mubr.f32.mxu0 %v16762_v61 }
0x1101   :  { %10994 = vmatpush3.bf16.msra.mxu1 %v14204_v46  ;;  %11020 = vmatpush1.bf16.msra.mxu0 %v13134_v22 }
0x1102   :  { %10995 = vmatprep.subr.bf16.mxu1 %v16820_v21  ;;  %11022 = vmatprep.subr.bf16.mxu0 %v13140_v27 }
0x1105   :  { %10997 = vmatpush3.bf16.msra.mxu1 %v14213_v6  ;;  %11024 = vmatpush1.bf16.msra.mxu0 %v13145_v35 }
0x1106   :  { %10998 = vmatprep.subr.bf16.mxu1 %v16820_v21  ;;  %11026 = vmatprep.subr.bf16.mxu0 %v13151_v40 }
0x1109   :  { %11000 = vmatpush3.bf16.msra.mxu1 %v14219_v30  ;;  %11028 = vmatpush1.bf16.msra.mxu0 %v13157_v51 }
0x110a   :  { %11001 = vmatprep.subr.bf16.mxu1 %v16820_v21  ;;  %11030 = vmatprep.subr.bf16.mxu0 %v13163_v53 }
0x110d   :  { %11003 = vmatpush3.bf16.msra.mxu1 %v14225_v4  ;;  %11032 = vmatpush1.bf16.msra.mxu0 %v13169_v63 }
0x110e   :  { %11004 = vmatprep.subr.bf16.mxu1 %v16820_v21  ;;  %11034 = vmatprep.subr.bf16.mxu0 %v13175_v2 }
0x1111   :  { %11006 = vmatpush3.bf16.msra.mxu1 %v14231_v14  ;;  %11036 = vmatpush1.bf16.msra.mxu0 %v13181_v16 }
0x1112   :  { %11007 = vmatprep.subr.bf16.mxu1 %v16820_v21  ;;  %11038 = vmatprep.subr.bf16.mxu0 %v13187_v20 }
0x1115   :  { %11009 = vmatpush3.bf16.msra.mxu1 %v14237_v11  ;;  %11040 = vmatpush1.bf16.msra.mxu0 %v13193_v34 }
0x1116   :  { %11010 = vmatprep.subr.bf16.mxu1 %v16820_v21  ;;  %11042 = vmatprep.subr.bf16.mxu0 %v13199_v37 }
0x1119   :  { %11012 = vmatpush3.bf16.msra.mxu1 %v14243_v54  ;;  %11044 = vmatpush1.bf16.msra.mxu0 %v13217_v50 }
0x111a   :  { %11046 = vmatprep.subr.bf16.mxu1 %v13120_v8  ;;  %11078 = vmatprep.subr.bf16.mxu0 %v13223_v55 }
0x111c   :  { %8606 = vmatmul.mubr.f32.vlgmr.msra.gmra.mrb[58].mxu1 %v15211_v28  ;;  %4802 = vmatmul.mubr.f32.vlgmr.msra.gmra.mrb[40].mxu0 %v15222_v15 }
0x111d   :  { %11048 = vmatpush1.bf16.msra.mxu1 %v13125_v13  ;;  %4997 = vmatprep.mubr.f32.mxu0 %v15284_v41 }
0x111e   :  { %11050 = vmatprep.subr.bf16.mxu1 %v13131_v18  ;;  %4872 = vmatprep.mubr.f32.mxu1 %v16762_v61 }
0x111f   :  { %11080 = vmatpush1.bf16.msra.mxu0 %v13253_v10 }
0x1120   :  { %11082 = vmatprep.subr.bf16.mxu0 %v13259_v12 }
0x1121   :  { %11052 = vmatpush1.bf16.msra.mxu1 %v13138_v26 }
0x1122   :  { %11054 = vmatprep.subr.bf16.mxu1 %v13142_v31 }
0x1123   :  { %11084 = vmatpush1.bf16.msra.mxu0 %v17598_v56 }
0x1124   :  { %11086 = vmatprep.subr.bf16.mxu0 %v17599_v25 }
0x1125   :  { %11056 = vmatpush1.bf16.msra.mxu1 %v17600_v39 }
0x1126   :  { %11058 = vmatprep.subr.bf16.mxu1 %v17601_v60 }
0x1127   :  { %11088 = vmatpush1.bf16.msra.mxu0 %v17602_v52  ;;  %v17613_v52 = vld [vmem:[#allocation29_spill] sm:$0xff] }
0x1128   :  { %11090 = vmatprep.subr.bf16.mxu0 %v17603_v44  ;;  %v17614_v44 = vld [vmem:[#allocation53_spill] sm:$0xff] }
0x1129   :  { %11060 = vmatpush1.bf16.msra.mxu1 %v17604_v5  ;;  %v17615_v5 = vld [vmem:[#allocation55_spill] sm:$0xff] }
0x112a   :  { %11062 = vmatprep.subr.bf16.mxu1 %v17605_v45  ;;  %v17616_v45 = vld [vmem:[#allocation30_spill] sm:$0xff] }
0x112b   :  { %11092 = vmatpush1.bf16.msra.mxu0 %v17606_v47  ;;  %v17617_v47 = vld [vmem:[#allocation31_spill] sm:$0xff] }
0x112c   :  { %11094 = vmatprep.subr.bf16.mxu0 %v17607_v49  ;;  %v17618_v49 = vld [vmem:[#allocation57_spill] sm:$0xff] }
0x112d   :  { %11064 = vmatpush1.bf16.msra.mxu1 %v17608_v43  ;;  %v17619_v43 = vld [vmem:[#allocation59_spill] sm:$0xff] }
0x112e   :  { %11066 = vmatprep.subr.bf16.mxu1 %v17609_v59  ;;  %v17620_v59 = vld [vmem:[#allocation32_spill] sm:$0xff] }
0x112f   :  { %11096 = vmatpush1.bf16.msra.mxu0 %v17610_v23  ;;  %v17621_v23 = vld [vmem:[#allocation33_spill] sm:$0xff] }
0x1130   :  { %11098 = vmatprep.subr.bf16.mxu0 %v17611_v29  ;;  %v17622_v29 = vld [vmem:[#allocation61_spill] sm:$0xff] }
0x1131   :  { %11068 = vmatpush1.bf16.msra.mxu1 %v17612_v0 }
0x1132   :  { %11070 = vmatprep.subr.bf16.mxu1 %v17613_v52  ;;  %v17623_v52 = vld [vmem:[#allocation63_spill] sm:$0xff] }
0x1133   :  { %11100 = vmatpush1.bf16.msra.mxu0 %v17614_v44  ;;  %v17672_v44 = vld [vmem:[#allocation146_spill] sm:$0xff] }
0x1134   :  { %11102 = vmatprep.subr.bf16.mxu0 %v17615_v5  ;;  %v17624_v5 = vld [vmem:[#allocation34_spill] sm:$0xff] }
0x1135   :  { %11072 = vmatpush1.bf16.msra.mxu1 %v17616_v45  ;;  %v17625_v45 = vld [vmem:[#allocation36_spill] sm:$0xff] }
0x1136   :  { %11074 = vmatprep.subr.bf16.mxu1 %v17617_v47  ;;  %v17626_v47 = vld [vmem:[#allocation65_spill] sm:$0xff] }
0x1137   :  { %11104 = vmatpush1.bf16.msra.mxu0 %v17618_v49  ;;  %v17627_v49 = vld [vmem:[#allocation67_spill] sm:$0xff] }
0x1138   :  { %11106 = vmatprep.subr.bf16.mxu0 %v17619_v43  ;;  %v17628_v43 = vld [vmem:[#allocation38_spill] sm:$0xff] }
0x1139   :  { %11076 = vmatpush1.bf16.msra.mxu1 %v17620_v59  ;;  %v17629_v59 = vld [vmem:[#allocation40_spill] sm:$0xff] }
0x113a   :  { %11142 = vmatprep.subr.bf16.mxu1 %v17621_v23  ;;  %v17630_v23 = vld [vmem:[#allocation69_spill] sm:$0xff] }
0x113b   :  { %11108 = vmatpush1.bf16.msra.mxu0 %v17622_v29  ;;  %v17631_v29 = vld [vmem:[#allocation71_spill] sm:$0xff] }
0x113c   :  { %4873 = vmatmul.mubr.f32.vlgmr.msra.gmra.mrb[60].mxu1 %v15222_v15  ;;  %11110 = vmatprep.subr.bf16.mxu0 %v17623_v52  ;;  %v17632_v15 = vld [vmem:[#allocation42_spill] sm:$0xff]  ;;  %v17633_v52 = vld [vmem:[#allocation44_spill] sm:$0xff] }
0x113d   :  { %5068 = vmatprep.mubr.f32.mxu1 %v15284_v41  ;;  %11144 = vmatpush1.bf16.msra.mxu1 %v17624_v5  ;;  %v17634_v41 = vld [vmem:[#allocation73_spill] sm:$0xff]  ;;  %v17635_v5 = vld [vmem:[#allocation75_spill] sm:$0xff] }
0x113e   :  { %11146 = vmatprep.subr.bf16.mxu1 %v17625_v45  ;;  %v17636_v45 = vld [vmem:[#allocation46_spill] sm:$0xff] }
0x113f   :  { %11112 = vmatpush1.bf16.msra.mxu0 %v17626_v47  ;;  %v17637_v47 = vld [vmem:[#allocation48_spill] sm:$0xff] }
0x1140   :  { %11114 = vmatprep.subr.bf16.mxu0 %v17627_v49  ;;  %v17638_v49 = vld [vmem:[#allocation77_spill] sm:$0xff] }
0x1141   :  { %11148 = vmatpush1.bf16.msra.mxu1 %v17628_v43  ;;  %v17639_v43 = vld [vmem:[#allocation79_spill] sm:$0xff] }
0x1142   :  { %11150 = vmatprep.subr.bf16.mxu1 %v17629_v59  ;;  %v17640_v59 = vld [vmem:[#allocation50_spill] sm:$0xff] }
0x1143   :  { %11116 = vmatpush1.bf16.msra.mxu0 %v17630_v23  ;;  %v17641_v23 = vld [vmem:[#allocation52_spill] sm:$0xff] }
0x1144   :  { %11118 = vmatprep.subr.bf16.mxu0 %v17631_v29  ;;  %v17642_v29 = vld [vmem:[#allocation81_spill] sm:$0xff] }
0x1145   :  { %11152 = vmatpush1.bf16.msra.mxu1 %v17632_v15  ;;  %v17643_v15 = vld [vmem:[#allocation83_spill] sm:$0xff] }
0x1146   :  { %11154 = vmatprep.subr.bf16.mxu1 %v17633_v52  ;;  %v17644_v52 = vld [vmem:[#allocation54_spill] sm:$0xff] }
0x1147   :  { %11120 = vmatpush1.bf16.msra.mxu0 %v17634_v41  ;;  %v17645_v41 = vld [vmem:[#allocation56_spill] sm:$0xff] }
0x1148   :  { %11122 = vmatprep.subr.bf16.mxu0 %v17635_v5  ;;  %v17646_v5 = vld [vmem:[#allocation85_spill] sm:$0xff] }
0x1149   :  { %11156 = vmatpush1.bf16.msra.mxu1 %v17636_v45  ;;  %v17647_v45 = vld [vmem:[#allocation87_spill] sm:$0xff] }
0x114a   :  { %11158 = vmatprep.subr.bf16.mxu1 %v17637_v47  ;;  %v17648_v47 = vld [vmem:[#allocation58_spill] sm:$0xff] }
0x114b   :  { %11124 = vmatpush1.bf16.msra.mxu0 %v17638_v49  ;;  %v17649_v49 = vld [vmem:[#allocation60_spill] sm:$0xff] }
0x114c   :  { %11126 = vmatprep.subr.bf16.mxu0 %v17639_v43  ;;  %v17650_v43 = vld [vmem:[#allocation89_spill] sm:$0xff] }
0x114d   :  { %11160 = vmatpush1.bf16.msra.mxu1 %v17640_v59  ;;  %v17651_v59 = vld [vmem:[#allocation91_spill] sm:$0xff] }
0x114e   :  { %11162 = vmatprep.subr.bf16.mxu1 %v17641_v23  ;;  %v17652_v23 = vld [vmem:[#allocation62_spill] sm:$0xff] }
0x114f   :  { %11128 = vmatpush1.bf16.msra.mxu0 %v17642_v29  ;;  %v17653_v29 = vld [vmem:[#allocation64_spill] sm:$0xff] }
0x1150   :  { %11130 = vmatprep.subr.bf16.mxu0 %v17643_v15  ;;  %v17654_v15 = vld [vmem:[#allocation93_spill] sm:$0xff] }
0x1151   :  { %11164 = vmatpush1.bf16.msra.mxu1 %v17644_v52  ;;  %v17655_v52 = vld [vmem:[#allocation95_spill] sm:$0xff] }
0x1152   :  { %11166 = vmatprep.subr.bf16.mxu1 %v17645_v41  ;;  %v17656_v41 = vld [vmem:[#allocation66_spill] sm:$0xff] }
0x1153   :  { %11132 = vmatpush1.bf16.msra.mxu0 %v17646_v5  ;;  %v17657_v5 = vld [vmem:[#allocation68_spill] sm:$0xff] }
0x1154   :  { %11134 = vmatprep.subr.bf16.mxu0 %v17647_v45  ;;  %v17658_v45 = vld [vmem:[#allocation70_spill] sm:$0xff] }
0x1155   :  { %11168 = vmatpush1.bf16.msra.mxu1 %v17648_v47  ;;  %v17659_v47 = vld [vmem:[#allocation72_spill] sm:$0xff] }
0x1156   :  { %11170 = vmatprep.subr.bf16.mxu1 %v17649_v49  ;;  %v17660_v49 = vld [vmem:[#allocation74_spill] sm:$0xff] }
0x1157   :  { %11136 = vmatpush1.bf16.msra.mxu0 %v17650_v43  ;;  %v17661_v43 = vld [vmem:[#allocation76_spill] sm:$0xff] }
0x1158   :  { %11138 = vmatprep.subr.bf16.mxu0 %v17651_v59  ;;  %v17662_v59 = vld [vmem:[#allocation78_spill] sm:$0xff] }
0x1159   :  { %11172 = vmatpush1.bf16.msra.mxu1 %v17652_v23  ;;  %v17663_v23 = vld [vmem:[#allocation80_spill] sm:$0xff] }
0x115a   :  { %11174 = vmatprep.subr.bf16.mxu1 %v17653_v29  ;;  %v17664_v29 = vld [vmem:[#allocation82_spill] sm:$0xff] }
0x115b   :  { %11140 = vmatpush1.bf16.msra.mxu0 %v17654_v15  ;;  %v17665_v15 = vld [vmem:[#allocation84_spill] sm:$0xff] }
0x115c   :  { %11206 = vmatprep.subr.bf16.mxu0 %v17655_v52  ;;  %v17666_v52 = vld [vmem:[#allocation86_spill] sm:$0xff] }
0x115d   :  { %11176 = vmatpush1.bf16.msra.mxu1 %v17656_v41  ;;  %v17667_v41 = vld [vmem:[#allocation88_spill] sm:$0xff] }
0x115e   :  { %11178 = vmatprep.subr.bf16.mxu1 %v17657_v5  ;;  %v17668_v5 = vld [vmem:[#allocation90_spill] sm:$0xff] }
0x1161   :  { %11180 = vmatpush1.bf16.msra.mxu1 %v17658_v45  ;;  %v17669_v45 = vld [vmem:[#allocation92_spill] sm:$0xff] }
0x1162   :  { %11182 = vmatprep.subr.bf16.mxu1 %v17659_v47  ;;  %v17670_v47 = vld [vmem:[#allocation94_spill] sm:$0xff] }
0x1165   :  { %11184 = vmatpush1.bf16.msra.mxu1 %v17660_v49  ;;  %v17671_v49 = vld [vmem:[#allocation113_spill] sm:$0xff] }
0x1166   :  { %11186 = vmatprep.subr.bf16.mxu1 %v17661_v43 }
0x1169   :  { %11188 = vmatpush1.bf16.msra.mxu1 %v17662_v59 }
0x116a   :  { %11190 = vmatprep.subr.bf16.mxu1 %v17663_v23 }
0x116d   :  { %11192 = vmatpush1.bf16.msra.mxu1 %v17664_v29 }
0x116e   :  { %11194 = vmatprep.subr.bf16.mxu1 %v17665_v15 }
0x1171   :  { %11196 = vmatpush1.bf16.msra.mxu1 %v17666_v52 }
0x1172   :  { %11198 = vmatprep.subr.bf16.mxu1 %v17667_v41 }
0x1175   :  { %11200 = vmatpush1.bf16.msra.mxu1 %v17668_v5 }
0x1176   :  { %11202 = vmatprep.subr.bf16.mxu1 %v17669_v45 }
0x1179   :  { %11204 = vmatpush1.bf16.msra.mxu1 %v17670_v47 }
0x117a   :  { %11270 = vmatprep.subr.bf16.mxu1 %v17671_v49 }
0x11cf   :  { %v4571_v43 = vpop.f32.mrb[38].mxu0  ;;  %v7909_v59 = vpop.f32.mrb[56].mxu1 }
0x11d0   :  { %v4572_v23 = vadd.f32 %v4571_v43, %v17672_v44  ;;  %v4573_v0 = vpop.f32.mrb[39].mxu0  ;;  %v7910_v29 = vpop.f32.mrb[57].mxu1  ;;  %v15497_v43 = vld [vmem:[%s16269_s11] ss:$0 sm:$0xff] }
0x11d1   :  { %v7911_v60 = vadd.f32 %v7910_v29, %v7909_v59  ;;  %v4574_v52 = vadd.f32 %v4573_v0, %v17490_v7  ;;  %17673 = vst [vmem:[#allocation96_spill] sm:$0xff] %v15497_v43 }
0x11d2   :  { %v7373_v15 = vmul.f32 -1.442695, %v4572_v23 }
0x11d3   :  { %v7374_v41 = vmul.f32 -1.442695, %v4574_v52  ;;  %v4643_v52 = vadd.f32 %v7911_v60, %v17123_v24  ;;  %v7375_v60 = vld [vmem:[%s16258_s0 + $0x28] sm:$0xff] }
0x11d4   :  { %12600 = vpow2.f32 %v7373_v15 }
0x11d5   :  { %12602 = vpow2.f32 %v7374_v41 }
0x11de   :  { %v12601_v39 = vpop.eup %12600 }
0x11df   :  { %v4719_v5 = vadd.f32 1.0, %v12601_v39  ;;  %v12603_v45 = vpop.eup %12602 }
0x11e0   :  { %v4725_v47 = vadd.f32 1.0, %v12603_v45 }
0x11e1   :  { %12604 = vrcp.f32 %v4719_v5 }
0x11e2   :  { %12606 = vrcp.f32 %v4725_v47 }
0x11eb   :  { %v12605_v15 = vpop.eup %12604 }
0x11ec   :  { %v12607_v45 = vpop.eup %12606 }
0x11ed   :  { %v4731_v41 = vsub.f32 1.0, %v12607_v45  ;;  %v4733_v56 = vmul.f32 %v12607_v45, %v15211_v28 }
0x11ef   :  { %v4712_v25 = vpop.f32.mrb[58].mxu1  ;;  %v4803_v49 = vpop.f32.mrb[40].mxu0 }
0x11f0   :  { %v4713_v59 = vadd.f32 %v15497_v43, %v4712_v25  ;;  %v8607_v23 = vpop.f32.mrb[59].mxu1  ;;  %v4805_v29 = vpop.f32.mrb[41].mxu0 }
0x11f1   :  { %v4883_v0 = vcombine.low %v4803_v49, %v4805_v29 }
0x11f2   :  { %v4728_v39 = vmul.f32 %v12605_v15, %v4713_v59 }
0x11f3   :  { %v4891_v43 = vrot.slane %v4883_v0, %v17124_v42 }
0x11f4   :  { %v4729_v5 = vadd.f32 %v4728_v39, %v4643_v52 }
0x11f6   :  { %12608 = vtanh.f32 %v4729_v5 }
0x1200   :  { %v12609_v7 = vpop.eup %12608 }
0x1201   :  { %v4732_v44 = vmul.f32 %v12609_v7, %v4731_v41 }
0x1203   :  { %v15502_v31 = vadd.f32 %v4733_v56, %v4732_v44 }
0x120f   :  { %v4874_v26 = vpop.f32.mrb[60].mxu1 }
0x1210   :  { %v4876_v25 = vpop.f32.mrb[61].mxu1 }
0x1211   :  { %v4884_v23 = vcombine.low %v4874_v26, %v4876_v25 }
0x1213   :  { %v4898_v47 = vrot.slane %v4884_v23, %v17124_v42 }
0x1215   :  { %v4899_v49 = vcombine.low %v4891_v43, %v4898_v47 }
0x1217   :  { %v4901_v59 = vadd.f32 %v7375_v60, %v4899_v49 }
0x1219   :  { %v7376_v29 = vmul.f32 -1.442695, %v4901_v59  ;;  %v4909_v15 = vrot.slane %v4901_v59, 2  ;;  %v4920_v28 = vrot.slane %v4901_v59, 6  ;;  %v4917_v52 = vrot.slane %v4901_v59, 4 }
0x121b   :  { %12610 = vpow2.f32 %v7376_v29  ;;  %v7377_v7 = vmul.f32 -1.442695, %v4909_v15  ;;  %v7378_v56 = vmul.f32 -1.442695, %v4920_v28  ;;  %v17675_v15 = vld [vmem:[#allocation117_spill] sm:$0xff]  ;;  %v17677_v28 = vld [vmem:[#allocation119_spill] sm:$0xff] }
0x121d   :  { %12612 = vpow2.f32 %v7377_v7  ;;  %v17676_v7 = vld [vmem:[#allocation100_spill] sm:$0xff] }
0x121e   :  { %12614 = vpow2.f32 %v7378_v56  ;;  %v17678_v56 = vld [vmem:[#allocation101_spill] sm:$0xff] }
0x1225   :  { %v12611_v44 = vpop.eup %12610 }
0x1226   :  { %v4905_v26 = vadd.f32 1.0, %v12611_v44  ;;  %v17679_v44 = vld [vmem:[#allocation121_spill] sm:$0xff] }
0x1227   :  { %v12613_v39 = vpop.eup %12612 }
0x1228   :  { %12616 = vrcp.f32 %v4905_v26  ;;  %v4914_v0 = vadd.f32 1.0, %v12613_v39  ;;  %v12615_v5 = vpop.eup %12614  ;;  %v17681_v26 = vld [vmem:[#allocation123_spill] sm:$0xff] }
0x1229   :  { %12618 = vtanh.f32 %v4917_v52  ;;  %v4925_v25 = vadd.f32 1.0, %v12615_v5  ;;  %v17680_v52 = vld [vmem:[#allocation102_spill] sm:$0xff]  ;;  %v17682_v39 = vld [vmem:[#allocation103_spill] sm:$0xff]  ;;  %v17684_v5 = vld [vmem:[#allocation104_spill] sm:$0xff] }
0x122a   :  { %12620 = vrcp.f32 %v4914_v0  ;;  %v17683_v0 = vld [vmem:[#allocation125_spill] sm:$0xff] }
0x122b   :  { %12622 = vrcp.f32 %v4925_v25  ;;  %v17688_v25 = vld [vmem:[#allocation106_spill] sm:$0xff] }
0x1232   :  { %v12617_v45 = vpop.eup %12616 }
0x1233   :  { %v12619_v43 = vpop.eup %12618 }
0x1234   :  { %v12621_v41 = vpop.eup %12620  ;;  %v4929_v47 = vmul.f32 %v12619_v43, %v12617_v45  ;;  %v17685_v45 = vld [vmem:[#allocation127_spill] sm:$0xff]  ;;  %v17686_v43 = vld [vmem:[#allocation105_spill] sm:$0xff] }
0x1235   :  { %v4928_v23 = vmul.f32 %v12621_v41, %v15219_v48  ;;  %v12623_v49 = vpop.eup %12622  ;;  %v17674_v48 = vld [vmem:[#allocation99_spill] sm:$0xff]  ;;  %v17687_v41 = vld [vmem:[#allocation129_spill] sm:$0xff] }
0x1237   :  { %v15510_v60 = vadd.f32 %v4929_v47, %v4928_v23  ;;  %v17689_v23 = vld [vmem:[#allocation131_spill] sm:$0xff] }
0x1238   :  { %v17690_v47 = vld [vmem:[#allocation107_spill] sm:$0xff] }
0x1239   :  { %12624 = vtanh.f32 %v15510_v60 }
0x1243   :  { %v12625_v59 = vpop.eup %12624 }
0x1244   :  { %v15513_v29 = vmul.f32 %v12625_v59, %v12623_v49  ;;  %v17691_v49 = vld [vmem:[#allocation133_spill] sm:$0xff]  ;;  %v17692_v59 = vld [vmem:[#allocation108_spill] sm:$0xff] }
0x1246   :  { %4998 = vmatmul.mubr.f32.vlgmr.msra.gmra.mrb[42].mxu0 %v15513_v29  ;;  %5069 = vmatmul.mubr.f32.vlgmr.msra.gmra.mrb[62].mxu1 %v15513_v29 }
0x1247   :  { %5163 = vmatprep.mubr.f32.mxu0 %v15367_v58  ;;  %5234 = vmatprep.mubr.f32.mxu1 %v15367_v58 }
0x1248   :  { %11208 = vmatpush1.bf16.msra.mxu0 %v17309_v38  ;;  %11272 = vmatpush3.bf16.msra.mxu1 %v17492_v32 }
0x1249   :  { %11210 = vmatprep.subr.bf16.mxu0 %v17674_v48  ;;  %11274 = vmatprep.subr.bf16.mxu1 %v17675_v15 }
0x124c   :  { %11212 = vmatpush1.bf16.msra.mxu0 %v17676_v7  ;;  %11276 = vmatpush3.bf16.msra.mxu1 %v17677_v28 }
0x124d   :  { %11214 = vmatprep.subr.bf16.mxu0 %v17678_v56  ;;  %11278 = vmatprep.subr.bf16.mxu1 %v17679_v44  ;;  %v17720_v44 = vld [vmem:[#allocation149_spill] sm:$0xff] }
0x1250   :  { %11216 = vmatpush1.bf16.msra.mxu0 %v17680_v52  ;;  %11280 = vmatpush3.bf16.msra.mxu1 %v17681_v26  ;;  %v17719_v26 = vld [vmem:[#allocation148_spill] sm:$0xff] }
0x1251   :  { %11218 = vmatprep.subr.bf16.mxu0 %v17682_v39  ;;  %11282 = vmatprep.subr.bf16.mxu1 %v17683_v0  ;;  %v17693_v39 = vld [vmem:[#allocation135_spill] sm:$0xff]  ;;  %v17694_v0 = vld [vmem:[#allocation109_spill] sm:$0xff] }
0x1254   :  { %11220 = vmatpush1.bf16.msra.mxu0 %v17684_v5  ;;  %11284 = vmatpush3.bf16.msra.mxu1 %v17685_v45  ;;  %v17695_v5 = vld [vmem:[#allocation137_spill] sm:$0xff]  ;;  %v17696_v45 = vld [vmem:[#allocation110_spill] sm:$0xff] }
0x1255   :  { %11222 = vmatprep.subr.bf16.mxu0 %v17686_v43  ;;  %11286 = vmatprep.subr.bf16.mxu1 %v17687_v41  ;;  %v17697_v43 = vld [vmem:[#allocation139_spill] sm:$0xff] }
0x1256   :  { %v17698_v41 = vld [vmem:[#allocation111_spill] sm:$0xff] }
0x1258   :  { %11224 = vmatpush1.bf16.msra.mxu0 %v17688_v25  ;;  %11288 = vmatpush3.bf16.msra.mxu1 %v17689_v23  ;;  %v17699_v25 = vld [vmem:[#allocation141_spill] sm:$0xff]  ;;  %v17700_v23 = vld [vmem:[#allocation112_spill] sm:$0xff] }
0x1259   :  { %11226 = vmatprep.subr.bf16.mxu0 %v17690_v47  ;;  %11290 = vmatprep.subr.bf16.mxu1 %v17691_v49  ;;  %v17701_v47 = vld [vmem:[#allocation143_spill] sm:$0xff]  ;;  %v17702_v49 = vld [vmem:[#allocation114_spill] sm:$0xff] }
0x125c   :  { %11228 = vmatpush1.bf16.msra.mxu0 %v17692_v59  ;;  %11292 = vmatpush3.bf16.msra.mxu1 %v17693_v39  ;;  %v17703_v39 = vld [vmem:[#allocation116_spill] sm:$0xff] }
0x125d   :  { %11230 = vmatprep.subr.bf16.mxu0 %v17694_v0  ;;  %11294 = vmatprep.subr.bf16.mxu1 %v17695_v5  ;;  %v17704_v0 = vld [vmem:[#allocation118_spill] sm:$0xff]  ;;  %v17705_v5 = vld [vmem:[#allocation120_spill] sm:$0xff] }
0x125e   :  { %v17713_v59 = vld [vmem:[#allocation136_spill] sm:$0xff] }
0x1260   :  { %11232 = vmatpush1.bf16.msra.mxu0 %v17696_v45  ;;  %11296 = vmatpush3.bf16.msra.mxu1 %v17697_v43  ;;  %v17706_v45 = vld [vmem:[#allocation122_spill] sm:$0xff]  ;;  %v17707_v43 = vld [vmem:[#allocation124_spill] sm:$0xff] }
0x1261   :  { %11234 = vmatprep.subr.bf16.mxu0 %v17698_v41  ;;  %11298 = vmatprep.subr.bf16.mxu1 %v17699_v25  ;;  %v17708_v41 = vld [vmem:[#allocation126_spill] sm:$0xff]  ;;  %v17709_v25 = vld [vmem:[#allocation128_spill] sm:$0xff] }
0x1264   :  { %11236 = vmatpush1.bf16.msra.mxu0 %v17700_v23  ;;  %11300 = vmatpush3.bf16.msra.mxu1 %v17701_v47  ;;  %v17710_v23 = vld [vmem:[#allocation130_spill] sm:$0xff]  ;;  %v17711_v47 = vld [vmem:[#allocation132_spill] sm:$0xff] }
0x1265   :  { %11238 = vmatprep.subr.bf16.mxu0 %v17702_v49  ;;  %11301 = vmatprep.subr.bf16.mxu1 %v16820_v21  ;;  %v17712_v49 = vld [vmem:[#allocation134_spill] sm:$0xff] }
0x1268   :  { %11240 = vmatpush1.bf16.msra.mxu0 %v17703_v39  ;;  %v17714_v39 = vld [vmem:[#allocation138_spill] sm:$0xff] }
0x1269   :  { %11242 = vmatprep.subr.bf16.mxu0 %v17704_v0  ;;  %v17715_v0 = vld [vmem:[#allocation140_spill] sm:$0xff] }
0x126c   :  { %11244 = vmatpush1.bf16.msra.mxu0 %v17705_v5  ;;  %v17716_v5 = vld [vmem:[#allocation142_spill] sm:$0xff] }
0x126d   :  { %11246 = vmatprep.subr.bf16.mxu0 %v17706_v45  ;;  %v17717_v45 = vld [vmem:[#allocation144_spill] sm:$0xff] }
0x1270   :  { %11248 = vmatpush1.bf16.msra.mxu0 %v17707_v43  ;;  %v17718_v43 = vld [vmem:[#allocation145_spill] sm:$0xff] }
0x1271   :  { %11250 = vmatprep.subr.bf16.mxu0 %v17708_v41 }
0x1274   :  { %11252 = vmatpush1.bf16.msra.mxu0 %v17709_v25 }
0x1275   :  { %11254 = vmatprep.subr.bf16.mxu0 %v17710_v23 }
0x1278   :  { %11256 = vmatpush1.bf16.msra.mxu0 %v17711_v47 }
0x1279   :  { %11258 = vmatprep.subr.bf16.mxu0 %v17712_v49 }
0x127c   :  { %11260 = vmatpush1.bf16.msra.mxu0 %v17713_v59 }
0x127d   :  { %11262 = vmatprep.subr.bf16.mxu0 %v17714_v39 }
0x1280   :  { %11264 = vmatpush1.bf16.msra.mxu0 %v17715_v0 }
0x1281   :  { %11266 = vmatprep.subr.bf16.mxu0 %v17716_v5 }
0x1284   :  { %11268 = vmatpush1.bf16.msra.mxu0 %v17717_v45 }
0x1285   :  { %11326 = vmatprep.subr.bf16.mxu0 %v17718_v43 }
0x1319   :  { %v4999_v41 = vpop.f32.mrb[42].mxu0  ;;  %v5070_v25 = vpop.f32.mrb[62].mxu1 }
0x131a   :  { %v5000_v23 = vadd.f32 %v4999_v41, %v17719_v26  ;;  %v5001_v52 = vpop.f32.mrb[43].mxu0  ;;  %v5072_v47 = vpop.f32.mrb[63].mxu1  ;;  %v5071_v5 = vadd.f32 %v5070_v25, %v17540_v62  ;;  %v17728_v25 = vld [vmem:[#allocation160_spill] sm:$0xff] }
0x131b   :  { %v5002_v49 = vadd.f32 %v5001_v52, %v17720_v44  ;;  %v5073_v0 = vadd.f32 %v5072_v47, %v17539_v33 }
0x131c   :  { %v7379_v56 = vmul.f32 -1.442695, %v5000_v23 }
0x131d   :  { %v7380_v59 = vmul.f32 -1.442695, %v5002_v49  ;;  %v7381_v39 = vmul.f32 -1.442695, %v5073_v0 }
0x131e   :  { %12626 = vpow2.f32 %v7379_v56 }
0x131f   :  { %12628 = vpow2.f32 %v7380_v59 }
0x1320   :  { %12630 = vpow2.f32 %v7381_v39 }
0x1321   :  { %12632 = vtanh.f32 %v5071_v5  ;;  %v17726_v5 = vld [vmem:[#allocation158_spill] sm:$0xff] }
0x1328   :  { %v12627_v45 = vpop.eup %12626 }
0x1329   :  { %v12629_v28 = vpop.eup %12628  ;;  %v5078_v43 = vadd.f32 1.0, %v12627_v45 }
0x132a   :  { %v5084_v7 = vadd.f32 1.0, %v12629_v28  ;;  %v12631_v41 = vpop.eup %12630  ;;  %v17724_v28 = vld [vmem:[#allocation156_spill] sm:$0xff] }
0x132b   :  { %12634 = vrcp.f32 %v5078_v43  ;;  %v12633_v26 = vpop.eup %12632  ;;  %v5091_v56 = vadd.f32 1.0, %v12631_v41  ;;  %v17727_v43 = vld [vmem:[#allocation159_spill] sm:$0xff]  ;;  %v17729_v41 = vld [vmem:[#allocation161_spill] sm:$0xff] }
0x132c   :  { %12636 = vrcp.f32 %v5084_v7  ;;  %v17722_v7 = vld [vmem:[#allocation154_spill] sm:$0xff] }
0x132d   :  { %12638 = vrcp.f32 %v5091_v56  ;;  %v17733_v56 = vld [vmem:[#allocation169_spill] sm:$0xff] }
0x1335   :  { %v12635_v52 = vpop.eup %12634 }
0x1336   :  { %v12637_v23 = vpop.eup %12636  ;;  %v5095_v49 = vmul.f32 %v12635_v52, %v12633_v26  ;;  %v17725_v26 = vld [vmem:[#allocation157_spill] sm:$0xff]  ;;  %v17730_v52 = vld [vmem:[#allocation167_spill] sm:$0xff] }
0x1337   :  { %v5094_v59 = vmul.f32 %v12637_v23, %v15281_v1  ;;  %v12639_v0 = vpop.eup %12638  ;;  %v17723_v1 = vld [vmem:[#allocation155_spill] sm:$0xff]  ;;  %v17731_v23 = vld [vmem:[#allocation162_spill] sm:$0xff] }
0x1339   :  { %v15572_v47 = vadd.f32 %v5095_v49, %v5094_v59  ;;  %v17732_v49 = vld [vmem:[#allocation168_spill] sm:$0xff]  ;;  %v17734_v59 = vld [vmem:[#allocation163_spill] sm:$0xff] }
0x133b   :  { %17721 = vst [vmem:[#allocation97_spill] sm:$0xff] %v15572_v47  ;;  %12640 = vtanh.f32 %v15572_v47 }
0x1345   :  { %v12641_v45 = vpop.eup %12640 }
0x1346   :  { %v15575_v39 = vmul.f32 %v12641_v45, %v12639_v0  ;;  %v17735_v0 = vld [vmem:[#allocation170_spill] sm:$0xff]  ;;  %v17736_v45 = vld [vmem:[#allocation171_spill] sm:$0xff] }
0x1348   :  { %5164 = vmatmul.mubr.f32.vlgmr.msra.gmra.mrb[44].mxu0 %v15575_v39  ;;  %5235 = vmatmul.mubr.f32.vlgmr.msra.gmra.mrb[64].mxu1 %v15575_v39 }
0x1349   :  { %11303 = vmatpush3.bf16.msra.mxu1 %v17722_v7  ;;  %5393 = vmatprep.mubr.f32.mxu0 %v15502_v31 }
0x134a   :  { %11304 = vmatprep.subr.bf16.mxu1 %v16820_v21  ;;  %8640 = vmatprep.mubr.msk.f32.mxu1 %vm12951_vm0, %v16762_v61 }
0x134b   :  { %11328 = vmatpush1.bf16.msra.mxu0 %v17723_v1 }
0x134c   :  { %11330 = vmatprep.subr.bf16.mxu0 %v17724_v28 }
0x134d   :  { %11306 = vmatpush3.bf16.msra.mxu1 %v17725_v26 }
0x134e   :  { %11307 = vmatprep.subr.bf16.mxu1 %v16820_v21 }
0x134f   :  { %11332 = vmatpush1.bf16.msra.mxu0 %v17726_v5  ;;  %v17757_v5 = vld [vmem:[#allocation187_spill] sm:$0xff] }
0x1350   :  { %11334 = vmatprep.subr.bf16.mxu0 %v17727_v43  ;;  %v17755_v43 = vld [vmem:[#allocation188_spill] sm:$0xff] }
0x1351   :  { %11309 = vmatpush3.bf16.msra.mxu1 %v17728_v25  ;;  %v17737_v25 = vld [vmem:[#allocation164_spill] sm:$0xff] }
0x1352   :  { %11310 = vmatprep.subr.bf16.mxu1 %v16820_v21 }
0x1353   :  { %11336 = vmatpush1.bf16.msra.mxu0 %v17729_v41  ;;  %v17740_v41 = vld [vmem:[#allocation165_spill] sm:$0xff] }
0x1354   :  { %11338 = vmatprep.subr.bf16.mxu0 %v17730_v52  ;;  %v17738_v52 = vld [vmem:[#allocation172_spill] sm:$0xff] }
0x1355   :  { %11312 = vmatpush3.bf16.msra.mxu1 %v17731_v23  ;;  %v17739_v23 = vld [vmem:[#allocation173_spill] sm:$0xff] }
0x1356   :  { %11313 = vmatprep.subr.bf16.mxu1 %v16820_v21 }
0x1357   :  { %11340 = vmatpush1.bf16.msra.mxu0 %v17732_v49  ;;  %v17743_v49 = vld [vmem:[#allocation166_spill] sm:$0xff] }
0x1358   :  { %11342 = vmatprep.subr.bf16.mxu0 %v17733_v56  ;;  %v17741_v56 = vld [vmem:[#allocation174_spill] sm:$0xff] }
0x1359   :  { %11315 = vmatpush3.bf16.msra.mxu1 %v17734_v59  ;;  %v17742_v59 = vld [vmem:[#allocation175_spill] sm:$0xff] }
0x135a   :  { %11316 = vmatprep.subr.bf16.mxu1 %v16820_v21 }
0x135b   :  { %11344 = vmatpush1.bf16.msra.mxu0 %v17735_v0  ;;  %v17744_v0 = vld [vmem:[#allocation178_spill] sm:$0xff] }
0x135c   :  { %11346 = vmatprep.subr.bf16.mxu0 %v17736_v45  ;;  %v17745_v45 = vld [vmem:[#allocation176_spill] sm:$0xff] }
0x135d   :  { %11318 = vmatpush3.bf16.msra.mxu1 %v17737_v25  ;;  %v17746_v25 = vld [vmem:[#allocation177_spill] sm:$0xff] }
0x135e   :  { %11319 = vmatprep.subr.bf16.mxu1 %v16820_v21 }
0x135f   :  { %11348 = vmatpush1.bf16.msra.mxu0 %v17738_v52  ;;  %v17749_v52 = vld [vmem:[#allocation179_spill] sm:$0xff] }
0x1360   :  { %11350 = vmatprep.subr.bf16.mxu0 %v17739_v23  ;;  %v17747_v23 = vld [vmem:[#allocation180_spill] sm:$0xff] }
0x1361   :  { %11321 = vmatpush3.bf16.msra.mxu1 %v17740_v41  ;;  %v17748_v41 = vld [vmem:[#allocation182_spill] sm:$0xff] }
0x1362   :  { %11322 = vmatprep.subr.bf16.mxu1 %v16820_v21 }
0x1363   :  { %11352 = vmatpush1.bf16.msra.mxu0 %v17741_v56  ;;  %v17750_v56 = vld [vmem:[#allocation181_spill] sm:$0xff] }
0x1364   :  { %11354 = vmatprep.subr.bf16.mxu0 %v17742_v59  ;;  %v17751_v59 = vld [vmem:[#allocation184_spill] sm:$0xff] }
0x1365   :  { %11324 = vmatpush3.bf16.msra.mxu1 %v17743_v49  ;;  %v17752_v49 = vld [vmem:[#allocation186_spill] sm:$0xff] }
0x1366   :  { %11390 = vmatprep.subr.bf16.mxu1 %v17744_v0  ;;  %v17753_v0 = vld [vmem:[#allocation183_spill] sm:$0xff] }
0x1367   :  { %11356 = vmatpush1.bf16.msra.mxu0 %v17745_v45  ;;  %v17754_v45 = vld [vmem:[#allocation185_spill] sm:$0xff] }
0x1368   :  { %8641 = vmatmul.mubr.f32.vlgmr.msra.gmra.mrb[66].mxu1 %v15367_v58  ;;  %11358 = vmatprep.subr.bf16.mxu0 %v17746_v25  ;;  %v17756_v25 = vld [vmem:[#allocation190_spill] sm:$0xff] }
0x1369   :  { %5464 = vmatprep.mubr.f32.mxu1 %v15502_v31  ;;  %11392 = vmatpush3.bf16.msra.mxu1 %v17747_v23  ;;  %v17758_v23 = vld [vmem:[#allocation189_spill] sm:$0xff] }
0x136a   :  { %11394 = vmatprep.subr.bf16.mxu1 %v17748_v41  ;;  %v17759_v41 = vld [vmem:[#allocation192_spill] sm:$0xff] }
0x136b   :  { %11360 = vmatpush1.bf16.msra.mxu0 %v17749_v52  ;;  %v17760_v52 = vld [vmem:[#allocation194_spill] sm:$0xff] }
0x136c   :  { %11362 = vmatprep.subr.bf16.mxu0 %v17750_v56  ;;  %v17761_v56 = vld [vmem:[#allocation191_spill] sm:$0xff] }
0x136d   :  { %11396 = vmatpush3.bf16.msra.mxu1 %v17751_v59  ;;  %v17762_v59 = vld [vmem:[#allocation193_spill] sm:$0xff] }
0x136e   :  { %11398 = vmatprep.subr.bf16.mxu1 %v17752_v49  ;;  %v17763_v49 = vld [vmem:[#allocation196_spill] sm:$0xff] }
0x136f   :  { %11364 = vmatpush1.bf16.msra.mxu0 %v17753_v0  ;;  %v17764_v0 = vld [vmem:[#allocation198_spill] sm:$0xff] }
0x1370   :  { %11366 = vmatprep.subr.bf16.mxu0 %v17754_v45  ;;  %v17765_v45 = vld [vmem:[#allocation195_spill] sm:$0xff] }
0x1371   :  { %11400 = vmatpush3.bf16.msra.mxu1 %v17755_v43  ;;  %v17766_v43 = vld [vmem:[#allocation197_spill] sm:$0xff] }
0x1372   :  { %11402 = vmatprep.subr.bf16.mxu1 %v17756_v25  ;;  %v17767_v25 = vld [vmem:[#allocation200_spill] sm:$0xff] }
0x1373   :  { %11368 = vmatpush1.bf16.msra.mxu0 %v17757_v5  ;;  %v17768_v5 = vld [vmem:[#allocation202_spill] sm:$0xff] }
0x1374   :  { %11370 = vmatprep.subr.bf16.mxu0 %v17758_v23  ;;  %v17769_v23 = vld [vmem:[#allocation199_spill] sm:$0xff] }
0x1375   :  { %11404 = vmatpush3.bf16.msra.mxu1 %v17759_v41  ;;  %v17770_v41 = vld [vmem:[#allocation201_spill] sm:$0xff] }
0x1376   :  { %11406 = vmatprep.subr.bf16.mxu1 %v17760_v52  ;;  %v17771_v52 = vld [vmem:[#allocation204_spill] sm:$0xff] }
0x1377   :  { %11372 = vmatpush1.bf16.msra.mxu0 %v17761_v56  ;;  %v17772_v56 = vld [vmem:[#allocation206_spill] sm:$0xff] }
0x1378   :  { %11374 = vmatprep.subr.bf16.mxu0 %v17762_v59  ;;  %v17773_v59 = vld [vmem:[#allocation203_spill] sm:$0xff] }
0x1379   :  { %11408 = vmatpush3.bf16.msra.mxu1 %v17763_v49  ;;  %v17774_v49 = vld [vmem:[#allocation205_spill] sm:$0xff] }
0x137a   :  { %11410 = vmatprep.subr.bf16.mxu1 %v17764_v0  ;;  %v17775_v0 = vld [vmem:[#allocation208_spill] sm:$0xff] }
0x137b   :  { %11376 = vmatpush1.bf16.msra.mxu0 %v17765_v45 }
0x137c   :  { %11378 = vmatprep.subr.bf16.mxu0 %v17766_v43  ;;  %v17776_v43 = vld [vmem:[#allocation207_spill] sm:$0xff] }
0x137d   :  { %11412 = vmatpush3.bf16.msra.mxu1 %v17767_v25  ;;  %v17777_v25 = vld [vmem:[#allocation19_spill] sm:$0xff] }
0x137e   :  { %11414 = vmatprep.subr.bf16.mxu1 %v17768_v5 }
0x137f   :  { %11380 = vmatpush1.bf16.msra.mxu0 %v17769_v23 }
0x1380   :  { %11382 = vmatprep.subr.bf16.mxu0 %v17770_v41 }
0x1381   :  { %11416 = vmatpush3.bf16.msra.mxu1 %v17771_v52 }
0x1382   :  { %11418 = vmatprep.subr.bf16.mxu1 %v17772_v56 }
0x1383   :  { %11384 = vmatpush1.bf16.msra.mxu0 %v17773_v59  ;;  %v17778_v59 = vld [vmem:[#allocation210_spill] sm:$0xff] }
0x1384   :  { %11386 = vmatprep.subr.bf16.mxu0 %v17774_v49 }
0x1385   :  { %11420 = vmatpush3.bf16.msra.mxu1 %v17775_v0 }
0x1386   :  { %11421 = vmatprep.subr.bf16.mxu1 %v16820_v21 }
0x1387   :  { %11388 = vmatpush1.bf16.msra.mxu0 %v17776_v43 }
0x1388   :  { %11446 = vmatprep.subr.bf16.mxu0 %v17777_v25 }
0x141b   :  { %v5165_v5 = vpop.f32.mrb[44].mxu0  ;;  %v7961_v23 = vpop.f32.mrb[64].mxu1 }
0x141c   :  { %v5166_v41 = vadd.f32 %v5165_v5, %v17050_v19  ;;  %v5167_v45 = vpop.f32.mrb[45].mxu0  ;;  %v7962_v52 = vpop.f32.mrb[65].mxu1 }
0x141d   :  { %v7963_v26 = vadd.f32 %v7962_v52, %v7961_v23  ;;  %v5168_v28 = vadd.f32 %v5167_v45, %v17778_v59  ;;  %v17788_v45 = vld [vmem:[#allocation25_spill] sm:$0xff] }
0x141e   :  { %v7382_v56 = vmul.f32 -1.442695, %v5166_v41 }
0x141f   :  { %v7383_v49 = vmul.f32 -1.442695, %v5168_v28  ;;  %v5237_v5 = vadd.f32 %v7963_v26, %v14192_v3  ;;  %v17785_v26 = vld [vmem:[#allocation41_spill] sm:$0xff] }
0x1420   :  { %12642 = vpow2.f32 %v7382_v56 }
0x1421   :  { %12644 = vpow2.f32 %v7383_v49 }
0x142a   :  { %v12643_v1 = vpop.eup %12642 }
0x142b   :  { %v5313_v0 = vadd.f32 1.0, %v12643_v1  ;;  %v12645_v7 = vpop.eup %12644 }
0x142c   :  { %v5319_v43 = vadd.f32 1.0, %v12645_v7  ;;  %v17784_v7 = vld [vmem:[#allocation23_spill] sm:$0xff] }
0x142d   :  { %12646 = vrcp.f32 %v5313_v0 }
0x142e   :  { %12648 = vrcp.f32 %v5319_v43  ;;  %v17786_v43 = vld [vmem:[#allocation43_spill] sm:$0xff] }
0x1437   :  { %v12647_v33 = vpop.eup %12646 }
0x1438   :  { %v12649_v23 = vpop.eup %12648 }
0x1439   :  { %v5325_v56 = vsub.f32 1.0, %v12649_v23  ;;  %v5327_v49 = vmul.f32 %v12649_v23, %v15367_v58  ;;  %v17779_v58 = vld [vmem:[#allocation20_spill] sm:$0xff]  ;;  %v17792_v23 = vld [vmem:[#allocation27_spill] sm:$0xff] }
0x143b   :  { %v5306_v47 = vpop.f32.mrb[66].mxu1 }
0x143c   :  { %v5307_v25 = vadd.f32 %v15362_v57, %v5306_v47  ;;  %v8642_v62 = vpop.f32.mrb[67].mxu1  ;;  %v17782_v57 = vld [vmem:[#allocation39_spill] sm:$0xff]  ;;  %v17783_v47 = vld [vmem:[#allocation22_spill] sm:$0xff] }
0x143d   :  { %v17781_v62 = vld [vmem:[#allocation37_spill] sm:$0xff] }
0x143e   :  { %v5322_v52 = vmul.f32 %v12647_v33, %v5307_v25  ;;  %v17780_v33 = vld [vmem:[#allocation21_spill] sm:$0xff]  ;;  %v17787_v25 = vld [vmem:[#allocation24_spill] sm:$0xff] }
0x1440   :  { %v5323_v41 = vadd.f32 %v5322_v52, %v5237_v5  ;;  %v17789_v5 = vld [vmem:[#allocation45_spill] sm:$0xff]  ;;  %v17790_v52 = vld [vmem:[#allocation47_spill] sm:$0xff] }
0x1442   :  { %12650 = vtanh.f32 %v5323_v41  ;;  %v17791_v41 = vld [vmem:[#allocation26_spill] sm:$0xff] }
0x144c   :  { %v12651_v28 = vpop.eup %12650 }
0x144d   :  { %v5326_v1 = vmul.f32 %v12651_v28, %v5325_v56  ;;  %v17793_v56 = vld [vmem:[#allocation49_spill] sm:$0xff]  ;;  %v17794_v28 = vld [vmem:[#allocation51_spill] sm:$0xff] }
0x144f   :  { %v15653_v0 = vadd.f32 %v5327_v49, %v5326_v1  ;;  %v17795_v49 = vld [vmem:[#allocation28_spill] sm:$0xff]  ;;  %v17796_v1 = vld [vmem:[#allocation29_spill] sm:$0xff] }
0x1451   :  { %5394 = vmatmul.mubr.f32.vlgmr.msra.gmra.mrb[46].mxu0 %v15653_v0  ;;  %5465 = vmatmul.mubr.f32.vlgmr.msra.gmra.mrb[68].mxu1 %v15653_v0 }
0x1452   :  { %11423 = vmatpush3.bf16.msra.mxu1 %v14196_v36  ;;  %11448 = vmatpush1.bf16.msra.mxu0 %v13122_v9 }
0x1453   :  { %11424 = vmatprep.subr.bf16.mxu1 %v16820_v21  ;;  %11450 = vmatprep.subr.bf16.mxu0 %v13129_v17 }
0x1454   :  { %8675 = vmatprep.mubr.msk.f32.mxu1 %vm12951_vm0, %v16762_v61  ;;  %5625 = vmatprep.mubr.f32.mxu0 %v16762_v61 }
0x1456   :  { %11426 = vmatpush3.bf16.msra.mxu1 %v14204_v46  ;;  %11452 = vmatpush1.bf16.msra.mxu0 %v13134_v22 }
0x1457   :  { %11427 = vmatprep.subr.bf16.mxu1 %v16820_v21  ;;  %11454 = vmatprep.subr.bf16.mxu0 %v13140_v27 }
0x145a   :  { %11429 = vmatpush3.bf16.msra.mxu1 %v14213_v6  ;;  %11456 = vmatpush1.bf16.msra.mxu0 %v13145_v35 }
0x145b   :  { %11430 = vmatprep.subr.bf16.mxu1 %v16820_v21  ;;  %11458 = vmatprep.subr.bf16.mxu0 %v13151_v40 }
0x145e   :  { %11432 = vmatpush3.bf16.msra.mxu1 %v14219_v30  ;;  %11460 = vmatpush1.bf16.msra.mxu0 %v13157_v51 }
0x145f   :  { %11433 = vmatprep.subr.bf16.mxu1 %v16820_v21  ;;  %11462 = vmatprep.subr.bf16.mxu0 %v13163_v53 }
0x1462   :  { %11435 = vmatpush3.bf16.msra.mxu1 %v14225_v4  ;;  %11464 = vmatpush1.bf16.msra.mxu0 %v13169_v63 }
0x1463   :  { %11436 = vmatprep.subr.bf16.mxu1 %v16820_v21  ;;  %11466 = vmatprep.subr.bf16.mxu0 %v13175_v2 }
0x1466   :  { %11438 = vmatpush3.bf16.msra.mxu1 %v14231_v14  ;;  %11468 = vmatpush1.bf16.msra.mxu0 %v13181_v16 }
0x1467   :  { %11439 = vmatprep.subr.bf16.mxu1 %v16820_v21  ;;  %11470 = vmatprep.subr.bf16.mxu0 %v13187_v20 }
0x146a   :  { %11441 = vmatpush3.bf16.msra.mxu1 %v14237_v11  ;;  %11472 = vmatpush1.bf16.msra.mxu0 %v13193_v34 }
0x146b   :  { %11442 = vmatprep.subr.bf16.mxu1 %v16820_v21  ;;  %11474 = vmatprep.subr.bf16.mxu0 %v13199_v37 }
0x146e   :  { %11444 = vmatpush3.bf16.msra.mxu1 %v14243_v54  ;;  %11476 = vmatpush1.bf16.msra.mxu0 %v13217_v50 }
0x146f   :  { %11478 = vmatprep.subr.bf16.mxu1 %v13120_v8  ;;  %11510 = vmatprep.subr.bf16.mxu0 %v13223_v55 }
0x1471   :  { %8676 = vmatmul.mubr.f32.vlgmr.msra.gmra.mrb[70].mxu1 %v15502_v31  ;;  %5626 = vmatmul.mubr.f32.vlgmr.msra.gmra.mrb[48].mxu0 %v15513_v29 }
0x1472   :  { %11480 = vmatpush1.bf16.msra.mxu1 %v13125_v13  ;;  %5821 = vmatprep.mubr.f32.mxu0 %v15575_v39 }
0x1473   :  { %11482 = vmatprep.subr.bf16.mxu1 %v13131_v18  ;;  %5696 = vmatprep.mubr.f32.mxu1 %v16762_v61 }
0x1474   :  { %11512 = vmatpush1.bf16.msra.mxu0 %v13253_v10 }
0x1475   :  { %11514 = vmatprep.subr.bf16.mxu0 %v13259_v12 }
0x1476   :  { %11484 = vmatpush1.bf16.msra.mxu1 %v17779_v58 }
0x1477   :  { %11486 = vmatprep.subr.bf16.mxu1 %v17780_v33 }
0x1478   :  { %11516 = vmatpush1.bf16.msra.mxu0 %v17781_v62  ;;  %v17857_v62 = vld [vmem:[#allocation96_spill] sm:$0xff] }
0x1479   :  { %11518 = vmatprep.subr.bf16.mxu0 %v17782_v57 }
0x147a   :  { %11488 = vmatpush1.bf16.msra.mxu1 %v17783_v47 }
0x147b   :  { %11490 = vmatprep.subr.bf16.mxu1 %v17784_v7 }
0x147c   :  { %11520 = vmatpush1.bf16.msra.mxu0 %v17785_v26 }
0x147d   :  { %11522 = vmatprep.subr.bf16.mxu0 %v17786_v43  ;;  %v17797_v43 = vld [vmem:[#allocation53_spill] sm:$0xff] }
0x147e   :  { %11492 = vmatpush1.bf16.msra.mxu1 %v17787_v25  ;;  %v17798_v25 = vld [vmem:[#allocation55_spill] sm:$0xff] }
0x147f   :  { %11494 = vmatprep.subr.bf16.mxu1 %v17788_v45  ;;  %v17799_v45 = vld [vmem:[#allocation30_spill] sm:$0xff] }
0x1480   :  { %11524 = vmatpush1.bf16.msra.mxu0 %v17789_v5  ;;  %v17800_v5 = vld [vmem:[#allocation31_spill] sm:$0xff] }
0x1481   :  { %11526 = vmatprep.subr.bf16.mxu0 %v17790_v52  ;;  %v17801_v52 = vld [vmem:[#allocation57_spill] sm:$0xff] }
0x1482   :  { %11496 = vmatpush1.bf16.msra.mxu1 %v17791_v41  ;;  %v17802_v41 = vld [vmem:[#allocation59_spill] sm:$0xff] }
0x1483   :  { %11498 = vmatprep.subr.bf16.mxu1 %v17792_v23  ;;  %v17803_v23 = vld [vmem:[#allocation32_spill] sm:$0xff] }
0x1484   :  { %11528 = vmatpush1.bf16.msra.mxu0 %v17793_v56  ;;  %v17804_v56 = vld [vmem:[#allocation33_spill] sm:$0xff] }
0x1485   :  { %11530 = vmatprep.subr.bf16.mxu0 %v17794_v28  ;;  %v17805_v28 = vld [vmem:[#allocation61_spill] sm:$0xff] }
0x1486   :  { %11500 = vmatpush1.bf16.msra.mxu1 %v17795_v49 }
0x1487   :  { %11502 = vmatprep.subr.bf16.mxu1 %v17796_v1  ;;  %v17806_v1 = vld [vmem:[#allocation63_spill] sm:$0xff] }
0x1488   :  { %11532 = vmatpush1.bf16.msra.mxu0 %v17797_v43  ;;  %v17855_v43 = vld [vmem:[#allocation146_spill] sm:$0xff] }
0x1489   :  { %11534 = vmatprep.subr.bf16.mxu0 %v17798_v25  ;;  %v17807_v25 = vld [vmem:[#allocation34_spill] sm:$0xff] }
0x148a   :  { %11504 = vmatpush1.bf16.msra.mxu1 %v17799_v45  ;;  %v17808_v45 = vld [vmem:[#allocation36_spill] sm:$0xff] }
0x148b   :  { %11506 = vmatprep.subr.bf16.mxu1 %v17800_v5  ;;  %v17809_v5 = vld [vmem:[#allocation65_spill] sm:$0xff] }
0x148c   :  { %11536 = vmatpush1.bf16.msra.mxu0 %v17801_v52  ;;  %v17810_v52 = vld [vmem:[#allocation67_spill] sm:$0xff] }
0x148d   :  { %11538 = vmatprep.subr.bf16.mxu0 %v17802_v41  ;;  %v17811_v41 = vld [vmem:[#allocation38_spill] sm:$0xff] }
0x148e   :  { %11508 = vmatpush1.bf16.msra.mxu1 %v17803_v23  ;;  %v17812_v23 = vld [vmem:[#allocation40_spill] sm:$0xff] }
0x148f   :  { %11574 = vmatprep.subr.bf16.mxu1 %v17804_v56  ;;  %v17813_v56 = vld [vmem:[#allocation69_spill] sm:$0xff] }
0x1490   :  { %11540 = vmatpush1.bf16.msra.mxu0 %v17805_v28  ;;  %v17814_v28 = vld [vmem:[#allocation71_spill] sm:$0xff] }
0x1491   :  { %5697 = vmatmul.mubr.f32.vlgmr.msra.gmra.mrb[72].mxu1 %v15513_v29  ;;  %11542 = vmatprep.subr.bf16.mxu0 %v17806_v1  ;;  %v17815_v29 = vld [vmem:[#allocation42_spill] sm:$0xff]  ;;  %v17816_v1 = vld [vmem:[#allocation44_spill] sm:$0xff] }
0x1492   :  { %5892 = vmatprep.mubr.f32.mxu1 %v15575_v39  ;;  %11576 = vmatpush1.bf16.msra.mxu1 %v17807_v25  ;;  %v17817_v39 = vld [vmem:[#allocation73_spill] sm:$0xff]  ;;  %v17818_v25 = vld [vmem:[#allocation75_spill] sm:$0xff] }
0x1493   :  { %11578 = vmatprep.subr.bf16.mxu1 %v17808_v45  ;;  %v17819_v45 = vld [vmem:[#allocation46_spill] sm:$0xff] }
0x1494   :  { %11544 = vmatpush1.bf16.msra.mxu0 %v17809_v5  ;;  %v17820_v5 = vld [vmem:[#allocation48_spill] sm:$0xff] }
0x1495   :  { %11546 = vmatprep.subr.bf16.mxu0 %v17810_v52  ;;  %v17821_v52 = vld [vmem:[#allocation77_spill] sm:$0xff] }
0x1496   :  { %11580 = vmatpush1.bf16.msra.mxu1 %v17811_v41  ;;  %v17822_v41 = vld [vmem:[#allocation79_spill] sm:$0xff] }
0x1497   :  { %11582 = vmatprep.subr.bf16.mxu1 %v17812_v23  ;;  %v17823_v23 = vld [vmem:[#allocation50_spill] sm:$0xff] }
0x1498   :  { %11548 = vmatpush1.bf16.msra.mxu0 %v17813_v56  ;;  %v17824_v56 = vld [vmem:[#allocation52_spill] sm:$0xff] }
0x1499   :  { %11550 = vmatprep.subr.bf16.mxu0 %v17814_v28  ;;  %v17825_v28 = vld [vmem:[#allocation81_spill] sm:$0xff] }
0x149a   :  { %11584 = vmatpush1.bf16.msra.mxu1 %v17815_v29  ;;  %v17826_v29 = vld [vmem:[#allocation83_spill] sm:$0xff] }
0x149b   :  { %11586 = vmatprep.subr.bf16.mxu1 %v17816_v1  ;;  %v17827_v1 = vld [vmem:[#allocation54_spill] sm:$0xff] }
0x149c   :  { %11552 = vmatpush1.bf16.msra.mxu0 %v17817_v39  ;;  %v17828_v39 = vld [vmem:[#allocation56_spill] sm:$0xff] }
0x149d   :  { %11554 = vmatprep.subr.bf16.mxu0 %v17818_v25  ;;  %v17829_v25 = vld [vmem:[#allocation85_spill] sm:$0xff] }
0x149e   :  { %11588 = vmatpush1.bf16.msra.mxu1 %v17819_v45  ;;  %v17830_v45 = vld [vmem:[#allocation87_spill] sm:$0xff] }
0x149f   :  { %11590 = vmatprep.subr.bf16.mxu1 %v17820_v5  ;;  %v17831_v5 = vld [vmem:[#allocation58_spill] sm:$0xff] }
0x14a0   :  { %11556 = vmatpush1.bf16.msra.mxu0 %v17821_v52  ;;  %v17832_v52 = vld [vmem:[#allocation60_spill] sm:$0xff] }
0x14a1   :  { %11558 = vmatprep.subr.bf16.mxu0 %v17822_v41  ;;  %v17833_v41 = vld [vmem:[#allocation89_spill] sm:$0xff] }
0x14a2   :  { %11592 = vmatpush1.bf16.msra.mxu1 %v17823_v23  ;;  %v17834_v23 = vld [vmem:[#allocation91_spill] sm:$0xff] }
0x14a3   :  { %11594 = vmatprep.subr.bf16.mxu1 %v17824_v56  ;;  %v17835_v56 = vld [vmem:[#allocation62_spill] sm:$0xff] }
0x14a4   :  { %11560 = vmatpush1.bf16.msra.mxu0 %v17825_v28  ;;  %v17836_v28 = vld [vmem:[#allocation64_spill] sm:$0xff] }
0x14a5   :  { %11562 = vmatprep.subr.bf16.mxu0 %v17826_v29  ;;  %v17837_v29 = vld [vmem:[#allocation93_spill] sm:$0xff] }
0x14a6   :  { %11596 = vmatpush1.bf16.msra.mxu1 %v17827_v1  ;;  %v17838_v1 = vld [vmem:[#allocation95_spill] sm:$0xff] }
0x14a7   :  { %11598 = vmatprep.subr.bf16.mxu1 %v17828_v39  ;;  %v17839_v39 = vld [vmem:[#allocation66_spill] sm:$0xff] }
0x14a8   :  { %11564 = vmatpush1.bf16.msra.mxu0 %v17829_v25  ;;  %v17840_v25 = vld [vmem:[#allocation68_spill] sm:$0xff] }
0x14a9   :  { %11566 = vmatprep.subr.bf16.mxu0 %v17830_v45  ;;  %v17841_v45 = vld [vmem:[#allocation70_spill] sm:$0xff] }
0x14aa   :  { %11600 = vmatpush1.bf16.msra.mxu1 %v17831_v5  ;;  %v17842_v5 = vld [vmem:[#allocation72_spill] sm:$0xff] }
0x14ab   :  { %11602 = vmatprep.subr.bf16.mxu1 %v17832_v52  ;;  %v17843_v52 = vld [vmem:[#allocation74_spill] sm:$0xff] }
0x14ac   :  { %11568 = vmatpush1.bf16.msra.mxu0 %v17833_v41  ;;  %v17844_v41 = vld [vmem:[#allocation76_spill] sm:$0xff] }
0x14ad   :  { %11570 = vmatprep.subr.bf16.mxu0 %v17834_v23  ;;  %v17845_v23 = vld [vmem:[#allocation78_spill] sm:$0xff] }
0x14ae   :  { %11604 = vmatpush1.bf16.msra.mxu1 %v17835_v56  ;;  %v17846_v56 = vld [vmem:[#allocation80_spill] sm:$0xff] }
0x14af   :  { %11606 = vmatprep.subr.bf16.mxu1 %v17836_v28  ;;  %v17847_v28 = vld [vmem:[#allocation82_spill] sm:$0xff] }
0x14b0   :  { %11572 = vmatpush1.bf16.msra.mxu0 %v17837_v29  ;;  %v17848_v29 = vld [vmem:[#allocation84_spill] sm:$0xff] }
0x14b1   :  { %11638 = vmatprep.subr.bf16.mxu0 %v17838_v1  ;;  %v17849_v1 = vld [vmem:[#allocation86_spill] sm:$0xff] }
0x14b2   :  { %11608 = vmatpush1.bf16.msra.mxu1 %v17839_v39  ;;  %v17850_v39 = vld [vmem:[#allocation88_spill] sm:$0xff] }
0x14b3   :  { %11610 = vmatprep.subr.bf16.mxu1 %v17840_v25  ;;  %v17851_v25 = vld [vmem:[#allocation90_spill] sm:$0xff] }
0x14b6   :  { %11612 = vmatpush1.bf16.msra.mxu1 %v17841_v45  ;;  %v17852_v45 = vld [vmem:[#allocation92_spill] sm:$0xff] }
0x14b7   :  { %11614 = vmatprep.subr.bf16.mxu1 %v17842_v5  ;;  %v17853_v5 = vld [vmem:[#allocation94_spill] sm:$0xff] }
0x14ba   :  { %11616 = vmatpush1.bf16.msra.mxu1 %v17843_v52  ;;  %v17854_v52 = vld [vmem:[#allocation113_spill] sm:$0xff] }
0x14bb   :  { %11618 = vmatprep.subr.bf16.mxu1 %v17844_v41 }
0x14be   :  { %11620 = vmatpush1.bf16.msra.mxu1 %v17845_v23 }
0x14bf   :  { %11622 = vmatprep.subr.bf16.mxu1 %v17846_v56 }
0x14c2   :  { %11624 = vmatpush1.bf16.msra.mxu1 %v17847_v28 }
0x14c3   :  { %11626 = vmatprep.subr.bf16.mxu1 %v17848_v29 }
0x14c6   :  { %11628 = vmatpush1.bf16.msra.mxu1 %v17849_v1  ;;  %v17856_v1 = vld [vmem:[#allocation147_spill] sm:$0xff] }
0x14c7   :  { %11630 = vmatprep.subr.bf16.mxu1 %v17850_v39 }
0x14ca   :  { %11632 = vmatpush1.bf16.msra.mxu1 %v17851_v25 }
0x14cb   :  { %11634 = vmatprep.subr.bf16.mxu1 %v17852_v45 }
0x14ce   :  { %11636 = vmatpush1.bf16.msra.mxu1 %v17853_v5 }
0x14cf   :  { %11702 = vmatprep.subr.bf16.mxu1 %v17854_v52 }
0x1524   :  { %v5395_v41 = vpop.f32.mrb[46].mxu0  ;;  %v8013_v23 = vpop.f32.mrb[68].mxu1 }
0x1525   :  { %v5396_v56 = vadd.f32 %v5395_v41, %v17855_v43  ;;  %v5397_v49 = vpop.f32.mrb[47].mxu0  ;;  %v8014_v28 = vpop.f32.mrb[69].mxu1 }
0x1526   :  { %v8015_v26 = vadd.f32 %v8014_v28, %v8013_v23  ;;  %v5398_v7 = vadd.f32 %v5397_v49, %v17856_v1 }
0x1527   :  { %v7384_v29 = vmul.f32 -1.442695, %v5396_v56 }
0x1528   :  { %v7385_v39 = vmul.f32 -1.442695, %v5398_v7  ;;  %v5467_v23 = vadd.f32 %v8015_v26, %v17123_v24 }
0x1529   :  { %12652 = vpow2.f32 %v7384_v29 }
0x152a   :  { %12654 = vpow2.f32 %v7385_v39 }
0x1533   :  { %v12653_v47 = vpop.eup %12652 }
0x1534   :  { %v5543_v25 = vadd.f32 1.0, %v12653_v47  ;;  %v12655_v45 = vpop.eup %12654 }
0x1535   :  { %v5549_v5 = vadd.f32 1.0, %v12655_v45 }
0x1536   :  { %12656 = vrcp.f32 %v5543_v25 }
0x1537   :  { %12658 = vrcp.f32 %v5549_v5 }
0x1540   :  { %v12657_v43 = vpop.eup %12656 }
0x1541   :  { %v12659_v7 = vpop.eup %12658 }
0x1542   :  { %v5555_v49 = vsub.f32 1.0, %v12659_v7  ;;  %v5557_v45 = vmul.f32 %v12659_v7, %v15502_v31 }
0x1544   :  { %v5536_v57 = vpop.f32.mrb[70].mxu1  ;;  %v5627_v52 = vpop.f32.mrb[48].mxu0 }
0x1545   :  { %v5537_v33 = vadd.f32 %v17857_v62, %v5536_v57  ;;  %v8677_v58 = vpop.f32.mrb[71].mxu1  ;;  %v5629_v41 = vpop.f32.mrb[49].mxu0 }
0x1546   :  { %v5707_v12 = vcombine.low %v5627_v52, %v5629_v41 }
0x1547   :  { %v5552_v56 = vmul.f32 %v12657_v43, %v5537_v33  ;;  %v7386_v33 = vld [vmem:[%s16258_s0 + $0x30] sm:$0xff] }
0x1548   :  { %v5715_v57 = vrot.slane %v5707_v12, %v17124_v42 }
0x1549   :  { %v5553_v28 = vadd.f32 %v5552_v56, %v5467_v23 }
0x154b   :  { %12660 = vtanh.f32 %v5553_v28 }
0x1555   :  { %v12661_v47 = vpop.eup %12660 }
0x1556   :  { %v5556_v25 = vmul.f32 %v12661_v47, %v5555_v49 }
0x1558   :  { %v15783_v29 = vadd.f32 %v5557_v45, %v5556_v25 }
0x1564   :  { %v5698_v39 = vpop.f32.mrb[72].mxu1 }
0x1565   :  { %v5700_v62 = vpop.f32.mrb[73].mxu1 }
0x1566   :  { %v5708_v58 = vcombine.low %v5698_v39, %v5700_v62 }
0x1568   :  { %v5722_v5 = vrot.slane %v5708_v58, %v17124_v42 }
0x156a   :  { %v5723_v26 = vcombine.low %v5715_v57, %v5722_v5 }
0x156c   :  { %v5725_v43 = vadd.f32 %v7386_v33, %v5723_v26 }
0x156e   :  { %v7387_v52 = vmul.f32 -1.442695, %v5725_v43  ;;  %v5733_v41 = vrot.slane %v5725_v43, 2  ;;  %v5744_v31 = vrot.slane %v5725_v43, 6  ;;  %v5741_v7 = vrot.slane %v5725_v43, 4 }
0x1570   :  { %12662 = vpow2.f32 %v7387_v52  ;;  %v7388_v23 = vmul.f32 -1.442695, %v5733_v41  ;;  %v7389_v56 = vmul.f32 -1.442695, %v5744_v31  ;;  %v17859_v41 = vld [vmem:[#allocation119_spill] sm:$0xff]  ;;  %v17861_v31 = vld [vmem:[#allocation121_spill] sm:$0xff] }
0x1572   :  { %12664 = vpow2.f32 %v7388_v23  ;;  %v17860_v23 = vld [vmem:[#allocation101_spill] sm:$0xff] }
0x1573   :  { %12666 = vpow2.f32 %v7389_v56  ;;  %v17862_v56 = vld [vmem:[#allocation102_spill] sm:$0xff] }
0x157a   :  { %v12663_v28 = vpop.eup %12662 }
0x157b   :  { %v5729_v49 = vadd.f32 1.0, %v12663_v28  ;;  %v17863_v28 = vld [vmem:[#allocation123_spill] sm:$0xff] }
0x157c   :  { %v12665_v47 = vpop.eup %12664 }
0x157d   :  { %12668 = vrcp.f32 %v5729_v49  ;;  %v5738_v12 = vadd.f32 1.0, %v12665_v47  ;;  %v12667_v25 = vpop.eup %12666  ;;  %v17865_v49 = vld [vmem:[#allocation125_spill] sm:$0xff]  ;;  %v17866_v47 = vld [vmem:[#allocation104_spill] sm:$0xff] }
0x157e   :  { %12670 = vtanh.f32 %v5741_v7  ;;  %v5749_v58 = vadd.f32 1.0, %v12667_v25  ;;  %v17864_v7 = vld [vmem:[#allocation103_spill] sm:$0xff]  ;;  %v17868_v25 = vld [vmem:[#allocation105_spill] sm:$0xff] }
0x157f   :  { %12672 = vrcp.f32 %v5738_v12  ;;  %v17867_v12 = vld [vmem:[#allocation127_spill] sm:$0xff] }
0x1580   :  { %12674 = vrcp.f32 %v5749_v58  ;;  %v17872_v58 = vld [vmem:[#allocation107_spill] sm:$0xff] }
0x1587   :  { %v12669_v45 = vpop.eup %12668 }
0x1588   :  { %v12671_v39 = vpop.eup %12670 }
0x1589   :  { %v12673_v62 = vpop.eup %12672  ;;  %v5753_v5 = vmul.f32 %v12671_v39, %v12669_v45  ;;  %v17869_v45 = vld [vmem:[#allocation129_spill] sm:$0xff]  ;;  %v17870_v39 = vld [vmem:[#allocation106_spill] sm:$0xff] }
0x158a   :  { %v5752_v57 = vmul.f32 %v12673_v62, %v15510_v60  ;;  %v12675_v26 = vpop.eup %12674  ;;  %v17858_v60 = vld [vmem:[#allocation100_spill] sm:$0xff]  ;;  %v17871_v62 = vld [vmem:[#allocation131_spill] sm:$0xff] }
0x158c   :  { %v15791_v33 = vadd.f32 %v5753_v5, %v5752_v57  ;;  %v17873_v57 = vld [vmem:[#allocation133_spill] sm:$0xff]  ;;  %v17874_v5 = vld [vmem:[#allocation108_spill] sm:$0xff] }
0x158e   :  { %12676 = vtanh.f32 %v15791_v33 }
0x1598   :  { %v12677_v43 = vpop.eup %12676 }
0x1599   :  { %v15794_v52 = vmul.f32 %v12677_v43, %v12675_v26  ;;  %v17875_v26 = vld [vmem:[#allocation135_spill] sm:$0xff]  ;;  %v17876_v43 = vld [vmem:[#allocation109_spill] sm:$0xff] }
0x159b   :  { %5822 = vmatmul.mubr.f32.vlgmr.msra.gmra.mrb[50].mxu0 %v15794_v52  ;;  %5893 = vmatmul.mubr.f32.vlgmr.msra.gmra.mrb[74].mxu1 %v15794_v52 }
0x159c   :  { %5987 = vmatprep.mubr.f32.mxu0 %v15653_v0  ;;  %6058 = vmatprep.mubr.f32.mxu1 %v15653_v0 }
0x159d   :  { %11640 = vmatpush1.bf16.msra.mxu0 %v17309_v38  ;;  %11704 = vmatpush3.bf16.msra.mxu1 %v17492_v32 }
0x159e   :  { %11642 = vmatprep.subr.bf16.mxu0 %v17674_v48  ;;  %11706 = vmatprep.subr.bf16.mxu1 %v17675_v15 }
0x15a1   :  { %11644 = vmatpush1.bf16.msra.mxu0 %v17858_v60  ;;  %11708 = vmatpush3.bf16.msra.mxu1 %v17859_v41 }
0x15a2   :  { %11646 = vmatprep.subr.bf16.mxu0 %v17860_v23  ;;  %11710 = vmatprep.subr.bf16.mxu1 %v17861_v31 }
0x15a5   :  { %11648 = vmatpush1.bf16.msra.mxu0 %v17862_v56  ;;  %11712 = vmatpush3.bf16.msra.mxu1 %v17863_v28 }
0x15a6   :  { %11650 = vmatprep.subr.bf16.mxu0 %v17864_v7  ;;  %11714 = vmatprep.subr.bf16.mxu1 %v17865_v49  ;;  %v17901_v49 = vld [vmem:[#allocation148_spill] sm:$0xff] }
0x15a9   :  { %11652 = vmatpush1.bf16.msra.mxu0 %v17866_v47  ;;  %11716 = vmatpush3.bf16.msra.mxu1 %v17867_v12  ;;  %v17877_v47 = vld [vmem:[#allocation137_spill] sm:$0xff]  ;;  %v17878_v12 = vld [vmem:[#allocation110_spill] sm:$0xff] }
0x15aa   :  { %11654 = vmatprep.subr.bf16.mxu0 %v17868_v25  ;;  %11718 = vmatprep.subr.bf16.mxu1 %v17869_v45  ;;  %v17879_v25 = vld [vmem:[#allocation139_spill] sm:$0xff] }
0x15ab   :  { %v17880_v45 = vld [vmem:[#allocation111_spill] sm:$0xff] }
0x15ad   :  { %11656 = vmatpush1.bf16.msra.mxu0 %v17870_v39  ;;  %11720 = vmatpush3.bf16.msra.mxu1 %v17871_v62  ;;  %v17881_v39 = vld [vmem:[#allocation141_spill] sm:$0xff]  ;;  %v17882_v62 = vld [vmem:[#allocation112_spill] sm:$0xff] }
0x15ae   :  { %11658 = vmatprep.subr.bf16.mxu0 %v17872_v58  ;;  %11722 = vmatprep.subr.bf16.mxu1 %v17873_v57  ;;  %v17883_v58 = vld [vmem:[#allocation143_spill] sm:$0xff]  ;;  %v17884_v57 = vld [vmem:[#allocation114_spill] sm:$0xff] }
0x15b1   :  { %11660 = vmatpush1.bf16.msra.mxu0 %v17874_v5  ;;  %11724 = vmatpush3.bf16.msra.mxu1 %v17875_v26  ;;  %v17885_v26 = vld [vmem:[#allocation116_spill] sm:$0xff] }
0x15b2   :  { %11662 = vmatprep.subr.bf16.mxu0 %v17876_v43  ;;  %11726 = vmatprep.subr.bf16.mxu1 %v17877_v47  ;;  %v17886_v43 = vld [vmem:[#allocation118_spill] sm:$0xff]  ;;  %v17887_v47 = vld [vmem:[#allocation120_spill] sm:$0xff] }
0x15b3   :  { %v17895_v5 = vld [vmem:[#allocation136_spill] sm:$0xff] }
0x15b5   :  { %11664 = vmatpush1.bf16.msra.mxu0 %v17878_v12  ;;  %11728 = vmatpush3.bf16.msra.mxu1 %v17879_v25  ;;  %v17888_v12 = vld [vmem:[#allocation122_spill] sm:$0xff]  ;;  %v17889_v25 = vld [vmem:[#allocation124_spill] sm:$0xff] }
0x15b6   :  { %11666 = vmatprep.subr.bf16.mxu0 %v17880_v45  ;;  %11730 = vmatprep.subr.bf16.mxu1 %v17881_v39  ;;  %v17890_v45 = vld [vmem:[#allocation126_spill] sm:$0xff]  ;;  %v17891_v39 = vld [vmem:[#allocation128_spill] sm:$0xff] }
0x15b9   :  { %11668 = vmatpush1.bf16.msra.mxu0 %v17882_v62  ;;  %11732 = vmatpush3.bf16.msra.mxu1 %v17883_v58  ;;  %v17892_v62 = vld [vmem:[#allocation130_spill] sm:$0xff]  ;;  %v17893_v58 = vld [vmem:[#allocation132_spill] sm:$0xff] }
0x15ba   :  { %11670 = vmatprep.subr.bf16.mxu0 %v17884_v57  ;;  %11733 = vmatprep.subr.bf16.mxu1 %v16820_v21  ;;  %v17894_v57 = vld [vmem:[#allocation134_spill] sm:$0xff] }
0x15bd   :  { %11672 = vmatpush1.bf16.msra.mxu0 %v17885_v26  ;;  %v17896_v26 = vld [vmem:[#allocation138_spill] sm:$0xff] }
0x15be   :  { %11674 = vmatprep.subr.bf16.mxu0 %v17886_v43  ;;  %v17897_v43 = vld [vmem:[#allocation140_spill] sm:$0xff] }
0x15c1   :  { %11676 = vmatpush1.bf16.msra.mxu0 %v17887_v47  ;;  %v17898_v47 = vld [vmem:[#allocation142_spill] sm:$0xff] }
0x15c2   :  { %11678 = vmatprep.subr.bf16.mxu0 %v17888_v12  ;;  %v17899_v12 = vld [vmem:[#allocation144_spill] sm:$0xff] }
0x15c5   :  { %11680 = vmatpush1.bf16.msra.mxu0 %v17889_v25  ;;  %v17900_v25 = vld [vmem:[#allocation145_spill] sm:$0xff] }
0x15c6   :  { %11682 = vmatprep.subr.bf16.mxu0 %v17890_v45 }
0x15c9   :  { %11684 = vmatpush1.bf16.msra.mxu0 %v17891_v39 }
0x15ca   :  { %11686 = vmatprep.subr.bf16.mxu0 %v17892_v62 }
0x15cd   :  { %11688 = vmatpush1.bf16.msra.mxu0 %v17893_v58 }
0x15ce   :  { %11690 = vmatprep.subr.bf16.mxu0 %v17894_v57 }
0x15d1   :  { %11692 = vmatpush1.bf16.msra.mxu0 %v17895_v5 }
0x15d2   :  { %11694 = vmatprep.subr.bf16.mxu0 %v17896_v26  ;;  %v17902_v26 = vld [vmem:[#allocation150_spill] sm:$0xff] }
0x15d5   :  { %11696 = vmatpush1.bf16.msra.mxu0 %v17897_v43 }
0x15d6   :  { %11698 = vmatprep.subr.bf16.mxu0 %v17898_v47  ;;  %v17903_v47 = vld [vmem:[#allocation152_spill] sm:$0xff] }
0x15d9   :  { %11700 = vmatpush1.bf16.msra.mxu0 %v17899_v12 }
0x15da   :  { %11758 = vmatprep.subr.bf16.mxu0 %v17900_v25 }
0x166e   :  { %v5823_v45 = vpop.f32.mrb[50].mxu0  ;;  %v5894_v39 = vpop.f32.mrb[74].mxu1 }
0x166f   :  { %v5824_v62 = vadd.f32 %v5823_v45, %v17901_v49  ;;  %v5825_v7 = vpop.f32.mrb[51].mxu0  ;;  %v5896_v58 = vpop.f32.mrb[75].mxu1  ;;  %v5895_v31 = vadd.f32 %v5894_v39, %v17903_v47 }
0x1670   :  { %v5826_v57 = vadd.f32 %v5825_v7, %v17720_v44  ;;  %v5897_v43 = vadd.f32 %v5896_v58, %v17902_v26 }
0x1671   :  { %v7390_v28 = vmul.f32 -1.442695, %v5824_v62 }
0x1672   :  { %v7391_v5 = vmul.f32 -1.442695, %v5826_v57  ;;  %v7392_v56 = vmul.f32 -1.442695, %v5897_v43  ;;  %v17911_v43 = vld [vmem:[#allocation160_spill] sm:$0xff] }
0x1673   :  { %12678 = vpow2.f32 %v7390_v28 }
0x1674   :  { %12680 = vpow2.f32 %v7391_v5  ;;  %v17904_v5 = vld [vmem:[#allocation97_spill] sm:$0xff] }
0x1675   :  { %12682 = vpow2.f32 %v7392_v56 }
0x1676   :  { %12684 = vtanh.f32 %v5895_v31  ;;  %v17908_v31 = vld [vmem:[#allocation157_spill] sm:$0xff] }
0x167d   :  { %v12679_v12 = vpop.eup %12678 }
0x167e   :  { %v12681_v23 = vpop.eup %12680  ;;  %v5902_v25 = vadd.f32 1.0, %v12679_v12 }
0x167f   :  { %v5908_v41 = vadd.f32 1.0, %v12681_v23  ;;  %v12683_v45 = vpop.eup %12682  ;;  %v17907_v23 = vld [vmem:[#allocation156_spill] sm:$0xff] }
0x1680   :  { %12686 = vrcp.f32 %v5902_v25  ;;  %v12685_v49 = vpop.eup %12684  ;;  %v5915_v28 = vadd.f32 1.0, %v12683_v45  ;;  %v17910_v25 = vld [vmem:[#allocation159_spill] sm:$0xff]  ;;  %v17912_v45 = vld [vmem:[#allocation161_spill] sm:$0xff] }
0x1681   :  { %12688 = vrcp.f32 %v5908_v41  ;;  %v17905_v41 = vld [vmem:[#allocation154_spill] sm:$0xff] }
0x1682   :  { %12690 = vrcp.f32 %v5915_v28  ;;  %v17916_v28 = vld [vmem:[#allocation169_spill] sm:$0xff] }
0x168a   :  { %v12687_v7 = vpop.eup %12686 }
0x168b   :  { %v12689_v62 = vpop.eup %12688  ;;  %v5919_v57 = vmul.f32 %v12687_v7, %v12685_v49  ;;  %v17909_v49 = vld [vmem:[#allocation158_spill] sm:$0xff]  ;;  %v17913_v7 = vld [vmem:[#allocation167_spill] sm:$0xff] }
0x168c   :  { %v5918_v44 = vmul.f32 %v12689_v62, %v17904_v5  ;;  %v12691_v39 = vpop.eup %12690  ;;  %v17914_v62 = vld [vmem:[#allocation162_spill] sm:$0xff]  ;;  %v17917_v5 = vld [vmem:[#allocation163_spill] sm:$0xff] }
0x168e   :  { %v15853_v58 = vadd.f32 %v5919_v57, %v5918_v44  ;;  %v17906_v44 = vld [vmem:[#allocation155_spill] sm:$0xff]  ;;  %v17915_v57 = vld [vmem:[#allocation168_spill] sm:$0xff] }
0x1690   :  { %12692 = vtanh.f32 %v15853_v58 }
0x169a   :  { %v12693_v12 = vpop.eup %12692 }
0x169b   :  { %v15856_v56 = vmul.f32 %v12693_v12, %v12691_v39  ;;  %v17918_v39 = vld [vmem:[#allocation170_spill] sm:$0xff]  ;;  %v17919_v12 = vld [vmem:[#allocation171_spill] sm:$0xff] }
0x169d   :  { %5988 = vmatmul.mubr.f32.vlgmr.msra.gmra.mrb[52].mxu0 %v15856_v56  ;;  %6059 = vmatmul.mubr.f32.vlgmr.msra.gmra.mrb[76].mxu1 %v15856_v56 }
0x169e   :  { %11735 = vmatpush3.bf16.msra.mxu1 %v17905_v41  ;;  %6217 = vmatprep.mubr.f32.mxu0 %v15783_v29 }
0x169f   :  { %11736 = vmatprep.subr.bf16.mxu1 %v16820_v21  ;;  %8710 = vmatprep.mubr.msk.f32.mxu1 %vm12951_vm0, %v16762_v61 }
0x16a0   :  { %11760 = vmatpush1.bf16.msra.mxu0 %v17906_v44 }
0x16a1   :  { %11762 = vmatprep.subr.bf16.mxu0 %v17907_v23 }
0x16a2   :  { %11738 = vmatpush3.bf16.msra.mxu1 %v17908_v31 }
0x16a3   :  { %11739 = vmatprep.subr.bf16.mxu1 %v16820_v21 }
0x16a4   :  { %11764 = vmatpush1.bf16.msra.mxu0 %v17909_v49  ;;  %v17940_v49 = vld [vmem:[#allocation187_spill] sm:$0xff] }
0x16a5   :  { %11766 = vmatprep.subr.bf16.mxu0 %v17910_v25  ;;  %v17938_v25 = vld [vmem:[#allocation188_spill] sm:$0xff] }
0x16a6   :  { %11741 = vmatpush3.bf16.msra.mxu1 %v17911_v43  ;;  %v17920_v43 = vld [vmem:[#allocation164_spill] sm:$0xff] }
0x16a7   :  { %11742 = vmatprep.subr.bf16.mxu1 %v16820_v21 }
0x16a8   :  { %11768 = vmatpush1.bf16.msra.mxu0 %v17912_v45  ;;  %v17923_v45 = vld [vmem:[#allocation165_spill] sm:$0xff] }
0x16a9   :  { %11770 = vmatprep.subr.bf16.mxu0 %v17913_v7  ;;  %v17921_v7 = vld [vmem:[#allocation172_spill] sm:$0xff] }
0x16aa   :  { %11744 = vmatpush3.bf16.msra.mxu1 %v17914_v62  ;;  %v17922_v62 = vld [vmem:[#allocation173_spill] sm:$0xff] }
0x16ab   :  { %11745 = vmatprep.subr.bf16.mxu1 %v16820_v21 }
0x16ac   :  { %11772 = vmatpush1.bf16.msra.mxu0 %v17915_v57  ;;  %v17926_v57 = vld [vmem:[#allocation166_spill] sm:$0xff] }
0x16ad   :  { %11774 = vmatprep.subr.bf16.mxu0 %v17916_v28  ;;  %v17924_v28 = vld [vmem:[#allocation174_spill] sm:$0xff] }
0x16ae   :  { %11747 = vmatpush3.bf16.msra.mxu1 %v17917_v5  ;;  %v17925_v5 = vld [vmem:[#allocation175_spill] sm:$0xff] }
0x16af   :  { %11748 = vmatprep.subr.bf16.mxu1 %v16820_v21 }
0x16b0   :  { %11776 = vmatpush1.bf16.msra.mxu0 %v17918_v39  ;;  %v17927_v39 = vld [vmem:[#allocation178_spill] sm:$0xff] }
0x16b1   :  { %11778 = vmatprep.subr.bf16.mxu0 %v17919_v12  ;;  %v17928_v12 = vld [vmem:[#allocation176_spill] sm:$0xff] }
0x16b2   :  { %11750 = vmatpush3.bf16.msra.mxu1 %v17920_v43  ;;  %v17929_v43 = vld [vmem:[#allocation177_spill] sm:$0xff] }
0x16b3   :  { %11751 = vmatprep.subr.bf16.mxu1 %v16820_v21 }
0x16b4   :  { %11780 = vmatpush1.bf16.msra.mxu0 %v17921_v7  ;;  %v17932_v7 = vld [vmem:[#allocation179_spill] sm:$0xff] }
0x16b5   :  { %11782 = vmatprep.subr.bf16.mxu0 %v17922_v62  ;;  %v17930_v62 = vld [vmem:[#allocation180_spill] sm:$0xff] }
0x16b6   :  { %11753 = vmatpush3.bf16.msra.mxu1 %v17923_v45  ;;  %v17931_v45 = vld [vmem:[#allocation182_spill] sm:$0xff] }
0x16b7   :  { %11754 = vmatprep.subr.bf16.mxu1 %v16820_v21 }
0x16b8   :  { %11784 = vmatpush1.bf16.msra.mxu0 %v17924_v28  ;;  %v17933_v28 = vld [vmem:[#allocation181_spill] sm:$0xff] }
0x16b9   :  { %11786 = vmatprep.subr.bf16.mxu0 %v17925_v5  ;;  %v17934_v5 = vld [vmem:[#allocation184_spill] sm:$0xff] }
0x16ba   :  { %11756 = vmatpush3.bf16.msra.mxu1 %v17926_v57  ;;  %v17935_v57 = vld [vmem:[#allocation186_spill] sm:$0xff] }
0x16bb   :  { %11822 = vmatprep.subr.bf16.mxu1 %v17927_v39  ;;  %v17936_v39 = vld [vmem:[#allocation183_spill] sm:$0xff] }
0x16bc   :  { %11788 = vmatpush1.bf16.msra.mxu0 %v17928_v12  ;;  %v17937_v12 = vld [vmem:[#allocation185_spill] sm:$0xff] }
0x16bd   :  { %8711 = vmatmul.mubr.f32.vlgmr.msra.gmra.mrb[78].mxu1 %v15653_v0  ;;  %11790 = vmatprep.subr.bf16.mxu0 %v17929_v43  ;;  %v17939_v43 = vld [vmem:[#allocation190_spill] sm:$0xff] }
0x16be   :  { %6288 = vmatprep.mubr.f32.mxu1 %v15783_v29  ;;  %11824 = vmatpush3.bf16.msra.mxu1 %v17930_v62  ;;  %v17941_v62 = vld [vmem:[#allocation189_spill] sm:$0xff] }
0x16bf   :  { %11826 = vmatprep.subr.bf16.mxu1 %v17931_v45  ;;  %v17942_v45 = vld [vmem:[#allocation192_spill] sm:$0xff] }
0x16c0   :  { %11792 = vmatpush1.bf16.msra.mxu0 %v17932_v7  ;;  %v17943_v7 = vld [vmem:[#allocation194_spill] sm:$0xff] }
0x16c1   :  { %11794 = vmatprep.subr.bf16.mxu0 %v17933_v28  ;;  %v17944_v28 = vld [vmem:[#allocation191_spill] sm:$0xff] }
0x16c2   :  { %11828 = vmatpush3.bf16.msra.mxu1 %v17934_v5  ;;  %v17945_v5 = vld [vmem:[#allocation193_spill] sm:$0xff] }
0x16c3   :  { %11830 = vmatprep.subr.bf16.mxu1 %v17935_v57  ;;  %v17946_v57 = vld [vmem:[#allocation196_spill] sm:$0xff] }
0x16c4   :  { %11796 = vmatpush1.bf16.msra.mxu0 %v17936_v39  ;;  %v17947_v39 = vld [vmem:[#allocation198_spill] sm:$0xff] }
0x16c5   :  { %11798 = vmatprep.subr.bf16.mxu0 %v17937_v12  ;;  %v17948_v12 = vld [vmem:[#allocation195_spill] sm:$0xff] }
0x16c6   :  { %11832 = vmatpush3.bf16.msra.mxu1 %v17938_v25  ;;  %v17949_v25 = vld [vmem:[#allocation197_spill] sm:$0xff] }
0x16c7   :  { %11834 = vmatprep.subr.bf16.mxu1 %v17939_v43  ;;  %v17950_v43 = vld [vmem:[#allocation200_spill] sm:$0xff] }
0x16c8   :  { %11800 = vmatpush1.bf16.msra.mxu0 %v17940_v49  ;;  %v17951_v49 = vld [vmem:[#allocation202_spill] sm:$0xff] }
0x16c9   :  { %11802 = vmatprep.subr.bf16.mxu0 %v17941_v62  ;;  %v17952_v62 = vld [vmem:[#allocation199_spill] sm:$0xff] }
0x16ca   :  { %11836 = vmatpush3.bf16.msra.mxu1 %v17942_v45  ;;  %v17953_v45 = vld [vmem:[#allocation201_spill] sm:$0xff] }
0x16cb   :  { %11838 = vmatprep.subr.bf16.mxu1 %v17943_v7  ;;  %v17954_v7 = vld [vmem:[#allocation204_spill] sm:$0xff] }
0x16cc   :  { %11804 = vmatpush1.bf16.msra.mxu0 %v17944_v28  ;;  %v17955_v28 = vld [vmem:[#allocation206_spill] sm:$0xff] }
0x16cd   :  { %11806 = vmatprep.subr.bf16.mxu0 %v17945_v5  ;;  %v17956_v5 = vld [vmem:[#allocation203_spill] sm:$0xff] }
0x16ce   :  { %11840 = vmatpush3.bf16.msra.mxu1 %v17946_v57  ;;  %v17957_v57 = vld [vmem:[#allocation205_spill] sm:$0xff] }
0x16cf   :  { %11842 = vmatprep.subr.bf16.mxu1 %v17947_v39  ;;  %v17958_v39 = vld [vmem:[#allocation208_spill] sm:$0xff] }
0x16d0   :  { %11808 = vmatpush1.bf16.msra.mxu0 %v17948_v12 }
0x16d1   :  { %11810 = vmatprep.subr.bf16.mxu0 %v17949_v25  ;;  %v17959_v25 = vld [vmem:[#allocation207_spill] sm:$0xff] }
0x16d2   :  { %11844 = vmatpush3.bf16.msra.mxu1 %v17950_v43  ;;  %v17960_v43 = vld [vmem:[#allocation19_spill] sm:$0xff] }
0x16d3   :  { %11846 = vmatprep.subr.bf16.mxu1 %v17951_v49 }
0x16d4   :  { %11812 = vmatpush1.bf16.msra.mxu0 %v17952_v62 }
0x16d5   :  { %11814 = vmatprep.subr.bf16.mxu0 %v17953_v45 }
0x16d6   :  { %11848 = vmatpush3.bf16.msra.mxu1 %v17954_v7 }
0x16d7   :  { %11850 = vmatprep.subr.bf16.mxu1 %v17955_v28 }
0x16d8   :  { %11816 = vmatpush1.bf16.msra.mxu0 %v17956_v5 }
0x16d9   :  { %11818 = vmatprep.subr.bf16.mxu0 %v17957_v57 }
0x16da   :  { %11852 = vmatpush3.bf16.msra.mxu1 %v17958_v39 }
0x16db   :  { %11853 = vmatprep.subr.bf16.mxu1 %v16820_v21 }
0x16dc   :  { %11820 = vmatpush1.bf16.msra.mxu0 %v17959_v25 }
0x16dd   :  { %11878 = vmatprep.subr.bf16.mxu0 %v17960_v43  ;;  %v15934_v43 = vld [vmem:[%s16265_s7] ss:$0 sm:$0xff] }
0x1770   :  { %v5989_v49 = vpop.f32.mrb[52].mxu0  ;;  %v8065_v62 = vpop.f32.mrb[76].mxu1 }
0x1771   :  { %v5990_v45 = vadd.f32 %v5989_v49, %v17050_v19  ;;  %v5991_v12 = vpop.f32.mrb[53].mxu0  ;;  %v8066_v7 = vpop.f32.mrb[77].mxu1 }
0x1772   :  { %v8067_v31 = vadd.f32 %v8066_v7, %v8065_v62  ;;  %v5992_v5 = vadd.f32 %v5991_v12, %v17778_v59 }
0x1773   :  { %v7393_v28 = vmul.f32 -1.442695, %v5990_v45 }
0x1774   :  { %v7394_v57 = vmul.f32 -1.442695, %v5992_v5  ;;  %v6061_v62 = vadd.f32 %v8067_v31, %v14192_v3  ;;  %v17983_v31 = vld [vmem:[#allocation31_spill] sm:$0xff] }
0x1775   :  { %12694 = vpow2.f32 %v7393_v28 }
0x1776   :  { %12696 = vpow2.f32 %v7394_v57 }
0x177f   :  { %v12695_v23 = vpop.eup %12694 }
0x1780   :  { %v6137_v39 = vadd.f32 1.0, %v12695_v23  ;;  %v12697_v44 = vpop.eup %12696 }
0x1781   :  { %v6143_v25 = vadd.f32 1.0, %v12697_v44 }
0x1782   :  { %12698 = vrcp.f32 %v6137_v39 }
0x1783   :  { %12700 = vrcp.f32 %v6143_v25  ;;  %v17984_v25 = vld [vmem:[#allocation57_spill] sm:$0xff] }
0x178c   :  { %v12699_v45 = vpop.eup %12698 }
0x178d   :  { %v12701_v23 = vpop.eup %12700 }
0x178e   :  { %v6149_v57 = vsub.f32 1.0, %v12701_v23  ;;  %v6151_v44 = vmul.f32 %v12701_v23, %v15653_v0  ;;  %v17981_v0 = vld [vmem:[#allocation55_spill] sm:$0xff]  ;;  %v17991_v23 = vld [vmem:[#allocation36_spill] sm:$0xff] }
0x1790   :  { %v6130_v41 = vpop.f32.mrb[78].mxu1 }
0x1791   :  { %v6131_v49 = vadd.f32 %v15934_v43, %v6130_v41  ;;  %v8712_v7 = vpop.f32.mrb[79].mxu1  ;;  %v17982_v41 = vld [vmem:[#allocation30_spill] sm:$0xff] }
0x1792   :  { %v17986_v7 = vld [vmem:[#allocation32_spill] sm:$0xff] }
0x1793   :  { %v6146_v28 = vmul.f32 %v12699_v45, %v6131_v49  ;;  %v17985_v49 = vld [vmem:[#allocation59_spill] sm:$0xff]  ;;  %v17987_v45 = vld [vmem:[#allocation33_spill] sm:$0xff] }
0x1795   :  { %v6147_v5 = vadd.f32 %v6146_v28, %v6061_v62  ;;  %v17988_v62 = vld [vmem:[#allocation61_spill] sm:$0xff]  ;;  %v17989_v28 = vld [vmem:[#allocation63_spill] sm:$0xff] }
0x1797   :  { %12702 = vtanh.f32 %v6147_v5  ;;  %v17990_v5 = vld [vmem:[#allocation34_spill] sm:$0xff] }
0x17a1   :  { %v12703_v39 = vpop.eup %12702 }
0x17a2   :  { %v6150_v12 = vmul.f32 %v12703_v39, %v6149_v57  ;;  %v17992_v57 = vld [vmem:[#allocation65_spill] sm:$0xff]  ;;  %v17993_v39 = vld [vmem:[#allocation67_spill] sm:$0xff] }
0x17a4   :  { %v15939_v59 = vadd.f32 %v6151_v44, %v6150_v12  ;;  %v17994_v44 = vld [vmem:[#allocation38_spill] sm:$0xff]  ;;  %v17995_v12 = vld [vmem:[#allocation40_spill] sm:$0xff] }
0x17a6   :  { %6218 = vmatmul.mubr.f32.vlgmr.msra.gmra.mrb[54].mxu0 %v15939_v59  ;;  %6289 = vmatmul.mubr.f32.vlgmr.msra.gmra.mrb[80].mxu1 %v15939_v59 }
0x17a7   :  { %11855 = vmatpush3.bf16.msra.mxu1 %v14196_v36  ;;  %11880 = vmatpush1.bf16.msra.mxu0 %v13122_v9  ;;  %v17961_v9 = vld [vmem:[#allocation35_spill] sm:$0xff] }
0x17a8   :  { %11856 = vmatprep.subr.bf16.mxu1 %v16820_v21  ;;  %11882 = vmatprep.subr.bf16.mxu0 %v13129_v17  ;;  %v17962_v17 = vld [vmem:[#allocation20_spill] sm:$0xff] }
0x17a9   :  { %8745 = vmatprep.mubr.msk.f32.mxu1 %vm12951_vm0, %v16762_v61  ;;  %6449 = vmatprep.mubr.f32.mxu0 %v16762_v61 }
0x17ab   :  { %11858 = vmatpush3.bf16.msra.mxu1 %v14204_v46  ;;  %11884 = vmatpush1.bf16.msra.mxu0 %v13134_v22  ;;  %v17964_v22 = vld [vmem:[#allocation37_spill] sm:$0xff] }
0x17ac   :  { %11859 = vmatprep.subr.bf16.mxu1 %v16820_v21  ;;  %11886 = vmatprep.subr.bf16.mxu0 %v13140_v27  ;;  %v17965_v27 = vld [vmem:[#allocation39_spill] sm:$0xff] }
0x17af   :  { %11861 = vmatpush3.bf16.msra.mxu1 %v14213_v6  ;;  %11888 = vmatpush1.bf16.msra.mxu0 %v13145_v35  ;;  %v17966_v35 = vld [vmem:[#allocation22_spill] sm:$0xff] }
0x17b0   :  { %11862 = vmatprep.subr.bf16.mxu1 %v16820_v21  ;;  %11890 = vmatprep.subr.bf16.mxu0 %v13151_v40  ;;  %v17968_v40 = vld [vmem:[#allocation41_spill] sm:$0xff] }
0x17b3   :  { %11864 = vmatpush3.bf16.msra.mxu1 %v14219_v30  ;;  %11892 = vmatpush1.bf16.msra.mxu0 %v13157_v51  ;;  %v17970_v51 = vld [vmem:[#allocation24_spill] sm:$0xff] }
0x17b4   :  { %11865 = vmatprep.subr.bf16.mxu1 %v16820_v21  ;;  %11894 = vmatprep.subr.bf16.mxu0 %v13163_v53  ;;  %v17971_v53 = vld [vmem:[#allocation25_spill] sm:$0xff] }
0x17b7   :  { %11867 = vmatpush3.bf16.msra.mxu1 %v14225_v4  ;;  %11896 = vmatpush1.bf16.msra.mxu0 %v13169_v63  ;;  %v17972_v63 = vld [vmem:[#allocation45_spill] sm:$0xff] }
0x17b8   :  { %11868 = vmatprep.subr.bf16.mxu1 %v16820_v21  ;;  %11898 = vmatprep.subr.bf16.mxu0 %v13175_v2  ;;  %v17973_v2 = vld [vmem:[#allocation47_spill] sm:$0xff] }
0x17bb   :  { %11870 = vmatpush3.bf16.msra.mxu1 %v14231_v14  ;;  %11900 = vmatpush1.bf16.msra.mxu0 %v13181_v16  ;;  %v17974_v16 = vld [vmem:[#allocation26_spill] sm:$0xff] }
0x17bc   :  { %11871 = vmatprep.subr.bf16.mxu1 %v16820_v21  ;;  %11902 = vmatprep.subr.bf16.mxu0 %v13187_v20  ;;  %v17975_v20 = vld [vmem:[#allocation27_spill] sm:$0xff] }
0x17bf   :  { %11873 = vmatpush3.bf16.msra.mxu1 %v14237_v11  ;;  %11904 = vmatpush1.bf16.msra.mxu0 %v13193_v34  ;;  %v17976_v34 = vld [vmem:[#allocation49_spill] sm:$0xff] }
0x17c0   :  { %11874 = vmatprep.subr.bf16.mxu1 %v16820_v21  ;;  %11906 = vmatprep.subr.bf16.mxu0 %v13199_v37  ;;  %v17977_v37 = vld [vmem:[#allocation51_spill] sm:$0xff] }
0x17c3   :  { %11876 = vmatpush3.bf16.msra.mxu1 %v14243_v54  ;;  %11908 = vmatpush1.bf16.msra.mxu0 %v13217_v50  ;;  %v17978_v50 = vld [vmem:[#allocation28_spill] sm:$0xff] }
0x17c4   :  { %11910 = vmatprep.subr.bf16.mxu1 %v13120_v8  ;;  %11942 = vmatprep.subr.bf16.mxu0 %v13223_v55  ;;  %v17963_v8 = vld [vmem:[#allocation21_spill] sm:$0xff] }
0x17c5   :  { %v17979_v55 = vld [vmem:[#allocation29_spill] sm:$0xff] }
0x17c6   :  { %8746 = vmatmul.mubr.f32.vlgmr.msra.gmra.mrb[82].mxu1 %v15783_v29  ;;  %6450 = vmatmul.mubr.f32.vlgmr.msra.gmra.mrb[56].mxu0 %v15794_v52 }
0x17c7   :  { %11912 = vmatpush1.bf16.msra.mxu1 %v13125_v13  ;;  %6645 = vmatprep.mubr.f32.mxu0 %v15856_v56  ;;  %v17967_v13 = vld [vmem:[#allocation23_spill] sm:$0xff] }
0x17c8   :  { %11914 = vmatprep.subr.bf16.mxu1 %v13131_v18  ;;  %6520 = vmatprep.mubr.f32.mxu1 %v16762_v61  ;;  %v17969_v18 = vld [vmem:[#allocation43_spill] sm:$0xff] }
0x17c9   :  { %11944 = vmatpush1.bf16.msra.mxu0 %v13253_v10  ;;  %v17980_v10 = vld [vmem:[#allocation53_spill] sm:$0xff] }
0x17ca   :  { %11946 = vmatprep.subr.bf16.mxu0 %v17961_v9  ;;  %v17996_v9 = vld [vmem:[#allocation69_spill] sm:$0xff] }
0x17cb   :  { %11916 = vmatpush1.bf16.msra.mxu1 %v17962_v17  ;;  %v17997_v17 = vld [vmem:[#allocation71_spill] sm:$0xff] }
0x17cc   :  { %11918 = vmatprep.subr.bf16.mxu1 %v17963_v8  ;;  %v17999_v8 = vld [vmem:[#allocation44_spill] sm:$0xff] }
0x17cd   :  { %11948 = vmatpush1.bf16.msra.mxu0 %v17964_v22  ;;  %v18001_v22 = vld [vmem:[#allocation75_spill] sm:$0xff] }
0x17ce   :  { %11950 = vmatprep.subr.bf16.mxu0 %v17965_v27  ;;  %v18002_v27 = vld [vmem:[#allocation46_spill] sm:$0xff] }
0x17cf   :  { %11920 = vmatpush1.bf16.msra.mxu1 %v17966_v35  ;;  %v18003_v35 = vld [vmem:[#allocation48_spill] sm:$0xff] }
0x17d0   :  { %11922 = vmatprep.subr.bf16.mxu1 %v17967_v13  ;;  %v18004_v13 = vld [vmem:[#allocation77_spill] sm:$0xff] }
0x17d1   :  { %11952 = vmatpush1.bf16.msra.mxu0 %v17968_v40  ;;  %v18005_v40 = vld [vmem:[#allocation79_spill] sm:$0xff] }
0x17d2   :  { %11954 = vmatprep.subr.bf16.mxu0 %v17969_v18  ;;  %v18006_v18 = vld [vmem:[#allocation50_spill] sm:$0xff] }
0x17d3   :  { %11924 = vmatpush1.bf16.msra.mxu1 %v17970_v51  ;;  %v18007_v51 = vld [vmem:[#allocation52_spill] sm:$0xff] }
0x17d4   :  { %11926 = vmatprep.subr.bf16.mxu1 %v17971_v53  ;;  %v18008_v53 = vld [vmem:[#allocation81_spill] sm:$0xff] }
0x17d5   :  { %11956 = vmatpush1.bf16.msra.mxu0 %v17972_v63  ;;  %v18009_v63 = vld [vmem:[#allocation83_spill] sm:$0xff] }
0x17d6   :  { %11958 = vmatprep.subr.bf16.mxu0 %v17973_v2  ;;  %v18010_v2 = vld [vmem:[#allocation54_spill] sm:$0xff] }
0x17d7   :  { %11928 = vmatpush1.bf16.msra.mxu1 %v17974_v16  ;;  %v18011_v16 = vld [vmem:[#allocation56_spill] sm:$0xff] }
0x17d8   :  { %11930 = vmatprep.subr.bf16.mxu1 %v17975_v20  ;;  %v18012_v20 = vld [vmem:[#allocation85_spill] sm:$0xff] }
0x17d9   :  { %11960 = vmatpush1.bf16.msra.mxu0 %v17976_v34  ;;  %v18013_v34 = vld [vmem:[#allocation87_spill] sm:$0xff] }
0x17da   :  { %11962 = vmatprep.subr.bf16.mxu0 %v17977_v37  ;;  %v18014_v37 = vld [vmem:[#allocation58_spill] sm:$0xff] }
0x17db   :  { %11932 = vmatpush1.bf16.msra.mxu1 %v17978_v50  ;;  %v18015_v50 = vld [vmem:[#allocation60_spill] sm:$0xff] }
0x17dc   :  { %11934 = vmatprep.subr.bf16.mxu1 %v17979_v55  ;;  %v18016_v55 = vld [vmem:[#allocation89_spill] sm:$0xff] }
0x17dd   :  { %11964 = vmatpush1.bf16.msra.mxu0 %v17980_v10  ;;  %v18017_v10 = vld [vmem:[#allocation91_spill] sm:$0xff] }
0x17de   :  { %11966 = vmatprep.subr.bf16.mxu0 %v17981_v0  ;;  %v18018_v0 = vld [vmem:[#allocation62_spill] sm:$0xff] }
0x17df   :  { %11936 = vmatpush1.bf16.msra.mxu1 %v17982_v41  ;;  %v18019_v41 = vld [vmem:[#allocation64_spill] sm:$0xff] }
0x17e0   :  { %11938 = vmatprep.subr.bf16.mxu1 %v17983_v31  ;;  %v18020_v31 = vld [vmem:[#allocation93_spill] sm:$0xff] }
0x17e1   :  { %11968 = vmatpush1.bf16.msra.mxu0 %v17984_v25  ;;  %v18021_v25 = vld [vmem:[#allocation95_spill] sm:$0xff] }
0x17e2   :  { %11970 = vmatprep.subr.bf16.mxu0 %v17985_v49  ;;  %v18022_v49 = vld [vmem:[#allocation66_spill] sm:$0xff] }
0x17e3   :  { %11940 = vmatpush1.bf16.msra.mxu1 %v17986_v7  ;;  %v18023_v7 = vld [vmem:[#allocation68_spill] sm:$0xff] }
0x17e4   :  { %12006 = vmatprep.subr.bf16.mxu1 %v17987_v45  ;;  %v18024_v45 = vld [vmem:[#allocation70_spill] sm:$0xff] }
0x17e5   :  { %11972 = vmatpush1.bf16.msra.mxu0 %v17988_v62  ;;  %v18025_v62 = vld [vmem:[#allocation72_spill] sm:$0xff] }
0x17e6   :  { %6521 = vmatmul.mubr.f32.vlgmr.msra.gmra.mrb[84].mxu1 %v15794_v52  ;;  %11974 = vmatprep.subr.bf16.mxu0 %v17989_v28  ;;  %v17998_v52 = vld [vmem:[#allocation42_spill] sm:$0xff] }
0x17e7   :  { %6716 = vmatprep.mubr.f32.mxu1 %v15856_v56  ;;  %12008 = vmatpush1.bf16.msra.mxu1 %v17990_v5  ;;  %v18000_v56 = vld [vmem:[#allocation73_spill] sm:$0xff]  ;;  %v18026_v28 = vld [vmem:[#allocation74_spill] sm:$0xff]  ;;  %v18027_v5 = vld [vmem:[#allocation76_spill] sm:$0xff] }
0x17e8   :  { %12010 = vmatprep.subr.bf16.mxu1 %v17991_v23  ;;  %v18028_v23 = vld [vmem:[#allocation78_spill] sm:$0xff] }
0x17e9   :  { %11976 = vmatpush1.bf16.msra.mxu0 %v17992_v57  ;;  %v18029_v57 = vld [vmem:[#allocation80_spill] sm:$0xff] }
0x17ea   :  { %11978 = vmatprep.subr.bf16.mxu0 %v17993_v39  ;;  %v18030_v39 = vld [vmem:[#allocation82_spill] sm:$0xff] }
0x17eb   :  { %12012 = vmatpush1.bf16.msra.mxu1 %v17994_v44  ;;  %v18031_v44 = vld [vmem:[#allocation84_spill] sm:$0xff] }
0x17ec   :  { %12014 = vmatprep.subr.bf16.mxu1 %v17995_v12  ;;  %v18032_v12 = vld [vmem:[#allocation86_spill] sm:$0xff] }
0x17ed   :  { %11980 = vmatpush1.bf16.msra.mxu0 %v17996_v9  ;;  %v18033_v9 = vld [vmem:[#allocation88_spill] sm:$0xff] }
0x17ee   :  { %11982 = vmatprep.subr.bf16.mxu0 %v17997_v17  ;;  %v18034_v17 = vld [vmem:[#allocation90_spill] sm:$0xff] }
0x17ef   :  { %12016 = vmatpush1.bf16.msra.mxu1 %v17998_v52  ;;  %v18035_v52 = vld [vmem:[#allocation92_spill] sm:$0xff] }
0x17f0   :  { %12018 = vmatprep.subr.bf16.mxu1 %v17999_v8  ;;  %v18036_v8 = vld [vmem:[#allocation94_spill] sm:$0xff] }
0x17f1   :  { %11984 = vmatpush1.bf16.msra.mxu0 %v18000_v56  ;;  %v18037_v56 = vld [vmem:[#allocation113_spill] sm:$0xff] }
0x17f2   :  { %11986 = vmatprep.subr.bf16.mxu0 %v18001_v22 }
0x17f3   :  { %12020 = vmatpush1.bf16.msra.mxu1 %v18002_v27 }
0x17f4   :  { %12022 = vmatprep.subr.bf16.mxu1 %v18003_v35  ;;  %v18038_v35 = vld [vmem:[#allocation146_spill] sm:$0xff] }
0x17f5   :  { %11988 = vmatpush1.bf16.msra.mxu0 %v18004_v13 }
0x17f6   :  { %11990 = vmatprep.subr.bf16.mxu0 %v18005_v40 }
0x17f7   :  { %12024 = vmatpush1.bf16.msra.mxu1 %v18006_v18 }
0x17f8   :  { %12026 = vmatprep.subr.bf16.mxu1 %v18007_v51 }
0x17f9   :  { %11992 = vmatpush1.bf16.msra.mxu0 %v18008_v53 }
0x17fa   :  { %11994 = vmatprep.subr.bf16.mxu0 %v18009_v63 }
0x17fb   :  { %12028 = vmatpush1.bf16.msra.mxu1 %v18010_v2 }
0x17fc   :  { %12030 = vmatprep.subr.bf16.mxu1 %v18011_v16 }
0x17fd   :  { %11996 = vmatpush1.bf16.msra.mxu0 %v18012_v20 }
0x17fe   :  { %11998 = vmatprep.subr.bf16.mxu0 %v18013_v34 }
0x17ff   :  { %12032 = vmatpush1.bf16.msra.mxu1 %v18014_v37 }
0x1800   :  { %12034 = vmatprep.subr.bf16.mxu1 %v18015_v50 }
0x1801   :  { %12000 = vmatpush1.bf16.msra.mxu0 %v18016_v55 }
0x1802   :  { %12002 = vmatprep.subr.bf16.mxu0 %v18017_v10  ;;  %v16069_v10 = vld [vmem:[%s16269_s11] ss:$0 sm:$0xff] }
0x1803   :  { %12036 = vmatpush1.bf16.msra.mxu1 %v18018_v0 }
0x1804   :  { %12038 = vmatprep.subr.bf16.mxu1 %v18019_v41 }
0x1805   :  { %12004 = vmatpush1.bf16.msra.mxu0 %v18020_v31 }
0x1806   :  { %12070 = vmatprep.subr.bf16.mxu0 %v18021_v25 }
0x1807   :  { %12040 = vmatpush1.bf16.msra.mxu1 %v18022_v49 }
0x1808   :  { %12042 = vmatprep.subr.bf16.mxu1 %v18023_v7 }
0x180b   :  { %12044 = vmatpush1.bf16.msra.mxu1 %v18024_v45 }
0x180c   :  { %12046 = vmatprep.subr.bf16.mxu1 %v18025_v62 }
0x180f   :  { %12048 = vmatpush1.bf16.msra.mxu1 %v18026_v28 }
0x1810   :  { %12050 = vmatprep.subr.bf16.mxu1 %v18027_v5 }
0x1813   :  { %12052 = vmatpush1.bf16.msra.mxu1 %v18028_v23 }
0x1814   :  { %12054 = vmatprep.subr.bf16.mxu1 %v18029_v57 }
0x1817   :  { %12056 = vmatpush1.bf16.msra.mxu1 %v18030_v39 }
0x1818   :  { %12058 = vmatprep.subr.bf16.mxu1 %v18031_v44 }
0x181b   :  { %12060 = vmatpush1.bf16.msra.mxu1 %v18032_v12 }
0x181c   :  { %12062 = vmatprep.subr.bf16.mxu1 %v18033_v9 }
0x181f   :  { %12064 = vmatpush1.bf16.msra.mxu1 %v18034_v17 }
0x1820   :  { %12066 = vmatprep.subr.bf16.mxu1 %v18035_v52 }
0x1823   :  { %12068 = vmatpush1.bf16.msra.mxu1 %v18036_v8 }
0x1824   :  { %12134 = vmatprep.subr.bf16.mxu1 %v18037_v56  ;;  %v7397_v56 = vld [vmem:[%s16258_s0 + $0x38] sm:$0xff] }
0x1879   :  { %v6219_v22 = vpop.f32.mrb[54].mxu0  ;;  %v8117_v27 = vpop.f32.mrb[80].mxu1 }
0x187a   :  { %v6220_v13 = vadd.f32 %v6219_v22, %v18038_v35  ;;  %v6221_v40 = vpop.f32.mrb[55].mxu0  ;;  %v8118_v18 = vpop.f32.mrb[81].mxu1 }
0x187b   :  { %v8119_v51 = vadd.f32 %v8118_v18, %v8117_v27  ;;  %v6222_v63 = vadd.f32 %v6221_v40, %v17856_v1 }
0x187c   :  { %v7395_v53 = vmul.f32 -1.442695, %v6220_v13 }
0x187d   :  { %v7396_v2 = vmul.f32 -1.442695, %v6222_v63  ;;  %v6291_v7 = vadd.f32 %v8119_v51, %v17123_v24 }
0x187e   :  { %12704 = vpow2.f32 %v7395_v53 }
0x187f   :  { %12706 = vpow2.f32 %v7396_v2 }
0x1888   :  { %v12705_v16 = vpop.eup %12704 }
0x1889   :  { %v6367_v20 = vadd.f32 1.0, %v12705_v16  ;;  %v12707_v34 = vpop.eup %12706 }
0x188a   :  { %v6373_v37 = vadd.f32 1.0, %v12707_v34 }
0x188b   :  { %12708 = vrcp.f32 %v6367_v20 }
0x188c   :  { %12710 = vrcp.f32 %v6373_v37 }
0x1895   :  { %v12709_v25 = vpop.eup %12708 }
0x1896   :  { %v12711_v28 = vpop.eup %12710 }
0x1897   :  { %v6379_v5 = vsub.f32 1.0, %v12711_v28  ;;  %v6381_v39 = vmul.f32 %v12711_v28, %v15783_v29  ;;  %v18042_v28 = vld [vmem:[#allocation102_spill] sm:$0xff] }
0x1899   :  { %v6360_v50 = vpop.f32.mrb[82].mxu1  ;;  %v6451_v55 = vpop.f32.mrb[56].mxu0 }
0x189a   :  { %v6361_v0 = vadd.f32 %v16069_v10, %v6360_v50  ;;  %v8747_v41 = vpop.f32.mrb[83].mxu1  ;;  %v6453_v31 = vpop.f32.mrb[57].mxu0 }
0x189b   :  { %v6531_v49 = vcombine.low %v6451_v55, %v6453_v31 }
0x189c   :  { %v6376_v45 = vmul.f32 %v12709_v25, %v6361_v0 }
0x189d   :  { %v6539_v52 = vrot.slane %v6531_v49, %v17124_v42 }
0x189e   :  { %v6377_v62 = vadd.f32 %v6376_v45, %v6291_v7  ;;  %v18040_v45 = vld [vmem:[#allocation101_spill] sm:$0xff] }
0x18a0   :  { %12712 = vtanh.f32 %v6377_v62  ;;  %v18041_v62 = vld [vmem:[#allocation121_spill] sm:$0xff] }
0x18aa   :  { %v12713_v23 = vpop.eup %12712 }
0x18ab   :  { %v6380_v57 = vmul.f32 %v12713_v23, %v6379_v5  ;;  %v18043_v5 = vld [vmem:[#allocation123_spill] sm:$0xff] }
0x18ac   :  { %v18044_v23 = vld [vmem:[#allocation103_spill] sm:$0xff] }
0x18ad   :  { %v16074_v44 = vadd.f32 %v6381_v39, %v6380_v57  ;;  %v18050_v57 = vld [vmem:[#allocation106_spill] sm:$0xff]  ;;  %v18051_v39 = vld [vmem:[#allocation131_spill] sm:$0xff] }
0x18b9   :  { %v6522_v12 = vpop.f32.mrb[84].mxu1 }
0x18ba   :  { %v6524_v9 = vpop.f32.mrb[85].mxu1 }
0x18bb   :  { %v6532_v17 = vcombine.low %v6522_v12, %v6524_v9  ;;  %v18052_v12 = vld [vmem:[#allocation107_spill] sm:$0xff]  ;;  %v18053_v9 = vld [vmem:[#allocation133_spill] sm:$0xff] }
0x18bd   :  { %v6546_v8 = vrot.slane %v6532_v17, %v17124_v42  ;;  %v18054_v17 = vld [vmem:[#allocation108_spill] sm:$0xff] }
0x18bf   :  { %v6547_v22 = vcombine.low %v6539_v52, %v6546_v8  ;;  %v18055_v52 = vld [vmem:[#allocation135_spill] sm:$0xff]  ;;  %v18056_v8 = vld [vmem:[#allocation109_spill] sm:$0xff] }
0x18c1   :  { %v6549_v27 = vadd.f32 %v7397_v56, %v6547_v22  ;;  %v18057_v56 = vld [vmem:[#allocation137_spill] sm:$0xff]  ;;  %v18058_v22 = vld [vmem:[#allocation110_spill] sm:$0xff] }
0x18c3   :  { %v7398_v13 = vmul.f32 -1.442695, %v6549_v27  ;;  %v6557_v40 = vrot.slane %v6549_v27, 2  ;;  %v6568_v29 = vrot.slane %v6549_v27, 6  ;;  %v6565_v63 = vrot.slane %v6549_v27, 4  ;;  %v18059_v27 = vld [vmem:[#allocation139_spill] sm:$0xff] }
0x18c5   :  { %12714 = vpow2.f32 %v7398_v13  ;;  %v7399_v18 = vmul.f32 -1.442695, %v6557_v40  ;;  %v7400_v51 = vmul.f32 -1.442695, %v6568_v29  ;;  %v18060_v13 = vld [vmem:[#allocation111_spill] sm:$0xff]  ;;  %v18061_v40 = vld [vmem:[#allocation141_spill] sm:$0xff] }
0x18c6   :  { %v18063_v29 = vld [vmem:[#allocation143_spill] sm:$0xff] }
0x18c7   :  { %12716 = vpow2.f32 %v7399_v18  ;;  %v18062_v18 = vld [vmem:[#allocation112_spill] sm:$0xff] }
0x18c8   :  { %12718 = vpow2.f32 %v7400_v51  ;;  %v18064_v51 = vld [vmem:[#allocation114_spill] sm:$0xff] }
0x18cf   :  { %v12715_v53 = vpop.eup %12714 }
0x18d0   :  { %v6553_v2 = vadd.f32 1.0, %v12715_v53  ;;  %v18065_v53 = vld [vmem:[#allocation116_spill] sm:$0xff] }
0x18d1   :  { %v12717_v16 = vpop.eup %12716 }
0x18d2   :  { %12720 = vrcp.f32 %v6553_v2  ;;  %v6562_v42 = vadd.f32 1.0, %v12717_v16  ;;  %v12719_v20 = vpop.eup %12718  ;;  %v18067_v2 = vld [vmem:[#allocation120_spill] sm:$0xff]  ;;  %v18068_v16 = vld [vmem:[#allocation122_spill] sm:$0xff] }
0x18d3   :  { %12722 = vtanh.f32 %v6565_v63  ;;  %v6573_v55 = vadd.f32 1.0, %v12719_v20  ;;  %v18066_v63 = vld [vmem:[#allocation118_spill] sm:$0xff] }
0x18d4   :  { %12724 = vrcp.f32 %v6562_v42  ;;  %v18069_v42 = vld [vmem:[#allocation124_spill] sm:$0xff]  ;;  %v18070_v20 = vld [vmem:[#allocation126_spill] sm:$0xff] }
0x18d5   :  { %12726 = vrcp.f32 %v6573_v55  ;;  %v18074_v55 = vld [vmem:[#allocation134_spill] sm:$0xff] }
0x18dc   :  { %v12721_v34 = vpop.eup %12720 }
0x18dd   :  { %v12723_v37 = vpop.eup %12722 }
0x18de   :  { %v12725_v50 = vpop.eup %12724  ;;  %v6577_v41 = vmul.f32 %v12723_v37, %v12721_v34  ;;  %v18071_v34 = vld [vmem:[#allocation128_spill] sm:$0xff]  ;;  %v18072_v37 = vld [vmem:[#allocation130_spill] sm:$0xff] }
0x18df   :  { %v6576_v0 = vmul.f32 %v12725_v50, %v15791_v33  ;;  %v12727_v25 = vpop.eup %12726  ;;  %v18039_v33 = vld [vmem:[#allocation119_spill] sm:$0xff]  ;;  %v18073_v50 = vld [vmem:[#allocation132_spill] sm:$0xff] }
0x18e1   :  { %v6578_v31 = vadd.f32 %v6577_v41, %v6576_v0  ;;  %v18075_v0 = vld [vmem:[#allocation136_spill] sm:$0xff]  ;;  %v18076_v41 = vld [vmem:[#allocation138_spill] sm:$0xff] }
0x18e3   :  { %12728 = vtanh.f32 %v6578_v31  ;;  %v18077_v31 = vld [vmem:[#allocation140_spill] sm:$0xff] }
0x18ed   :  { %v12729_v49 = vpop.eup %12728 }
0x18ee   :  { %v6580_v7 = vmul.f32 %v12729_v49, %v12727_v25  ;;  %v18078_v25 = vld [vmem:[#allocation142_spill] sm:$0xff]  ;;  %v18079_v49 = vld [vmem:[#allocation144_spill] sm:$0xff] }
0x18f0   :  { %6646 = vmatmul.mubr.f32.vlgmr.msra.gmra.mrb[58].mxu0 %v6580_v7  ;;  %6717 = vmatmul.mubr.f32.vlgmr.msra.gmra.mrb[86].mxu1 %v6580_v7  ;;  %v18080_v7 = vld [vmem:[#allocation145_spill] sm:$0xff] }
0x18f1   :  { %6811 = vmatprep.mubr.f32.mxu0 %v15939_v59  ;;  %6882 = vmatprep.mubr.f32.mxu1 %v15939_v59 }
0x18f2   :  { %12072 = vmatpush1.bf16.msra.mxu0 %v17309_v38  ;;  %12136 = vmatpush3.bf16.msra.mxu1 %v17492_v32  ;;  %v18045_v38 = vld [vmem:[#allocation125_spill] sm:$0xff]  ;;  %v18046_v32 = vld [vmem:[#allocation104_spill] sm:$0xff] }
0x18f3   :  { %12074 = vmatprep.subr.bf16.mxu0 %v17674_v48  ;;  %12138 = vmatprep.subr.bf16.mxu1 %v17675_v15  ;;  %v18047_v48 = vld [vmem:[#allocation127_spill] sm:$0xff]  ;;  %v18048_v15 = vld [vmem:[#allocation105_spill] sm:$0xff] }
0x18f6   :  { %12076 = vmatpush1.bf16.msra.mxu0 %v17858_v60  ;;  %12140 = vmatpush3.bf16.msra.mxu1 %v18039_v33  ;;  %v18049_v60 = vld [vmem:[#allocation129_spill] sm:$0xff] }
0x18f7   :  { %12078 = vmatprep.subr.bf16.mxu0 %v18040_v45  ;;  %12142 = vmatprep.subr.bf16.mxu1 %v18041_v62  ;;  %v18081_v62 = vld [vmem:[#allocation148_spill] sm:$0xff] }
0x18fa   :  { %12080 = vmatpush1.bf16.msra.mxu0 %v18042_v28  ;;  %12144 = vmatpush3.bf16.msra.mxu1 %v18043_v5 }
0x18fb   :  { %12082 = vmatprep.subr.bf16.mxu0 %v18044_v23  ;;  %12146 = vmatprep.subr.bf16.mxu1 %v18045_v38  ;;  %v18082_v38 = vld [vmem:[#allocation149_spill] sm:$0xff] }
0x18fe   :  { %12084 = vmatpush1.bf16.msra.mxu0 %v18046_v32  ;;  %12148 = vmatpush3.bf16.msra.mxu1 %v18047_v48 }
0x18ff   :  { %12086 = vmatprep.subr.bf16.mxu0 %v18048_v15  ;;  %12150 = vmatprep.subr.bf16.mxu1 %v18049_v60 }
0x1902   :  { %12088 = vmatpush1.bf16.msra.mxu0 %v18050_v57  ;;  %12152 = vmatpush3.bf16.msra.mxu1 %v18051_v39 }
0x1903   :  { %12090 = vmatprep.subr.bf16.mxu0 %v18052_v12  ;;  %12154 = vmatprep.subr.bf16.mxu1 %v18053_v9 }
0x1906   :  { %12092 = vmatpush1.bf16.msra.mxu0 %v18054_v17  ;;  %12156 = vmatpush3.bf16.msra.mxu1 %v18055_v52 }
0x1907   :  { %12094 = vmatprep.subr.bf16.mxu0 %v18056_v8  ;;  %12158 = vmatprep.subr.bf16.mxu1 %v18057_v56 }
0x190a   :  { %12096 = vmatpush1.bf16.msra.mxu0 %v18058_v22  ;;  %12160 = vmatpush3.bf16.msra.mxu1 %v18059_v27 }
0x190b   :  { %12098 = vmatprep.subr.bf16.mxu0 %v18060_v13  ;;  %12162 = vmatprep.subr.bf16.mxu1 %v18061_v40 }
0x190e   :  { %12100 = vmatpush1.bf16.msra.mxu0 %v18062_v18  ;;  %12164 = vmatpush3.bf16.msra.mxu1 %v18063_v29 }
0x190f   :  { %12102 = vmatprep.subr.bf16.mxu0 %v18064_v51  ;;  %12165 = vmatprep.subr.bf16.mxu1 %v16820_v21 }
0x1912   :  { %12104 = vmatpush1.bf16.msra.mxu0 %v18065_v53  ;;  %v18083_v53 = vld [vmem:[#allocation154_spill] sm:$0xff] }
0x1913   :  { %12106 = vmatprep.subr.bf16.mxu0 %v18066_v63  ;;  %v18084_v63 = vld [vmem:[#allocation155_spill] sm:$0xff] }
0x1916   :  { %12108 = vmatpush1.bf16.msra.mxu0 %v18067_v2  ;;  %v18086_v2 = vld [vmem:[#allocation157_spill] sm:$0xff] }
0x1917   :  { %12110 = vmatprep.subr.bf16.mxu0 %v18068_v16  ;;  %v18087_v16 = vld [vmem:[#allocation158_spill] sm:$0xff] }
0x191a   :  { %12112 = vmatpush1.bf16.msra.mxu0 %v18069_v42  ;;  %v18088_v42 = vld [vmem:[#allocation159_spill] sm:$0xff] }
0x191b   :  { %12114 = vmatprep.subr.bf16.mxu0 %v18070_v20  ;;  %v18089_v20 = vld [vmem:[#allocation160_spill] sm:$0xff] }
0x191e   :  { %12116 = vmatpush1.bf16.msra.mxu0 %v18071_v34  ;;  %v18090_v34 = vld [vmem:[#allocation161_spill] sm:$0xff] }
0x191f   :  { %12118 = vmatprep.subr.bf16.mxu0 %v18072_v37  ;;  %v18091_v37 = vld [vmem:[#allocation167_spill] sm:$0xff] }
0x1922   :  { %12120 = vmatpush1.bf16.msra.mxu0 %v18073_v50  ;;  %v18092_v50 = vld [vmem:[#allocation162_spill] sm:$0xff] }
0x1923   :  { %12122 = vmatprep.subr.bf16.mxu0 %v18074_v55  ;;  %v18093_v55 = vld [vmem:[#allocation168_spill] sm:$0xff] }
0x1926   :  { %12124 = vmatpush1.bf16.msra.mxu0 %v18075_v0  ;;  %v18094_v0 = vld [vmem:[#allocation169_spill] sm:$0xff] }
0x1927   :  { %12126 = vmatprep.subr.bf16.mxu0 %v18076_v41  ;;  %v18095_v41 = vld [vmem:[#allocation163_spill] sm:$0xff] }
0x192a   :  { %12128 = vmatpush1.bf16.msra.mxu0 %v18077_v31  ;;  %v18096_v31 = vld [vmem:[#allocation170_spill] sm:$0xff] }
0x192b   :  { %12130 = vmatprep.subr.bf16.mxu0 %v18078_v25  ;;  %v18097_v25 = vld [vmem:[#allocation171_spill] sm:$0xff] }
0x192e   :  { %12132 = vmatpush1.bf16.msra.mxu0 %v18079_v49  ;;  %v18098_v49 = vld [vmem:[#allocation164_spill] sm:$0xff] }
0x192f   :  { %12190 = vmatprep.subr.bf16.mxu0 %v18080_v7  ;;  %v18099_v7 = vld [vmem:[#allocation172_spill] sm:$0xff] }
0x19c3   :  { %v6647_v33 = vpop.f32.mrb[58].mxu0  ;;  %v6718_v45 = vpop.f32.mrb[86].mxu1 }
0x19c4   :  { %v6648_v28 = vadd.f32 %v6647_v33, %v18081_v62  ;;  %v6649_v5 = vpop.f32.mrb[59].mxu0  ;;  %v6720_v23 = vpop.f32.mrb[87].mxu1  ;;  %v6719_v39 = vadd.f32 %v6718_v45, %v17903_v47  ;;  %v18100_v33 = vld [vmem:[#allocation173_spill] sm:$0xff]  ;;  %v18102_v62 = vld [vmem:[#allocation174_spill] sm:$0xff] }
0x19c5   :  { %v6650_v32 = vadd.f32 %v6649_v5, %v18082_v38  ;;  %v6721_v60 = vadd.f32 %v6720_v23, %v17902_v26  ;;  %v18101_v45 = vld [vmem:[#allocation165_spill] sm:$0xff]  ;;  %v18104_v5 = vld [vmem:[#allocation166_spill] sm:$0xff]  ;;  %v18106_v38 = vld [vmem:[#allocation176_spill] sm:$0xff] }
0x19c6   :  { %v7401_v48 = vmul.f32 -1.442695, %v6648_v28  ;;  %v18103_v28 = vld [vmem:[#allocation175_spill] sm:$0xff]  ;;  %v18105_v23 = vld [vmem:[#allocation178_spill] sm:$0xff] }
0x19c7   :  { %v7402_v15 = vmul.f32 -1.442695, %v6650_v32  ;;  %v7403_v57 = vmul.f32 -1.442695, %v6721_v60  ;;  %v18107_v32 = vld [vmem:[#allocation177_spill] sm:$0xff]  ;;  %v18110_v60 = vld [vmem:[#allocation179_spill] sm:$0xff] }
0x19c8   :  { %12730 = vpow2.f32 %v7401_v48  ;;  %v18108_v48 = vld [vmem:[#allocation180_spill] sm:$0xff] }
0x19c9   :  { %12732 = vpow2.f32 %v7402_v15  ;;  %v18109_v15 = vld [vmem:[#allocation182_spill] sm:$0xff] }
0x19ca   :  { %12734 = vpow2.f32 %v7403_v57  ;;  %v18111_v57 = vld [vmem:[#allocation181_spill] sm:$0xff] }
0x19cb   :  { %12736 = vtanh.f32 %v6719_v39  ;;  %v18112_v39 = vld [vmem:[#allocation184_spill] sm:$0xff] }
0x19d2   :  { %v12731_v12 = vpop.eup %12730 }
0x19d3   :  { %v12733_v9 = vpop.eup %12732  ;;  %v6726_v17 = vadd.f32 1.0, %v12731_v12  ;;  %v18113_v12 = vld [vmem:[#allocation186_spill] sm:$0xff] }
0x19d4   :  { %v6732_v52 = vadd.f32 1.0, %v12733_v9  ;;  %v12735_v8 = vpop.eup %12734  ;;  %v18114_v9 = vld [vmem:[#allocation183_spill] sm:$0xff] }
0x19d5   :  { %12738 = vrcp.f32 %v6726_v17  ;;  %v12737_v56 = vpop.eup %12736  ;;  %v6739_v40 = vadd.f32 1.0, %v12735_v8  ;;  %v18115_v17 = vld [vmem:[#allocation185_spill] sm:$0xff]  ;;  %v18117_v8 = vld [vmem:[#allocation190_spill] sm:$0xff] }
0x19d6   :  { %12740 = vrcp.f32 %v6732_v52  ;;  %v18116_v52 = vld [vmem:[#allocation188_spill] sm:$0xff] }
0x19d7   :  { %12742 = vrcp.f32 %v6739_v40  ;;  %v18122_v40 = vld [vmem:[#allocation191_spill] sm:$0xff] }
0x19df   :  { %v12739_v22 = vpop.eup %12738 }
0x19e0   :  { %v12741_v27 = vpop.eup %12740  ;;  %v6743_v13 = vmul.f32 %v12739_v22, %v12737_v56  ;;  %v18118_v56 = vld [vmem:[#allocation187_spill] sm:$0xff]  ;;  %v18119_v22 = vld [vmem:[#allocation189_spill] sm:$0xff] }
0x19e1   :  { %v6742_v18 = vmul.f32 %v12741_v27, %v15853_v58  ;;  %v12743_v47 = vpop.eup %12742  ;;  %v18085_v58 = vld [vmem:[#allocation156_spill] sm:$0xff] }
0x19e2   :  { %v18120_v27 = vld [vmem:[#allocation192_spill] sm:$0xff] }
0x19e3   :  { %v6744_v26 = vadd.f32 %v6743_v13, %v6742_v18  ;;  %v18121_v13 = vld [vmem:[#allocation194_spill] sm:$0xff]  ;;  %v18123_v18 = vld [vmem:[#allocation193_spill] sm:$0xff] }
0x19e5   :  { %12744 = vtanh.f32 %v6744_v26  ;;  %v18124_v26 = vld [vmem:[#allocation196_spill] sm:$0xff] }
0x19ef   :  { %v12745_v29 = vpop.eup %12744 }
0x19f0   :  { %v6746_v51 = vmul.f32 %v12745_v29, %v12743_v47  ;;  %v18125_v47 = vld [vmem:[#allocation198_spill] sm:$0xff]  ;;  %v18126_v29 = vld [vmem:[#allocation195_spill] sm:$0xff] }
0x19f2   :  { %6812 = vmatmul.mubr.f32.vlgmr.msra.gmra.mrb[60].mxu0 %v6746_v51  ;;  %6883 = vmatmul.mubr.f32.vlgmr.msra.gmra.mrb[88].mxu1 %v6746_v51  ;;  %v18127_v51 = vld [vmem:[#allocation197_spill] sm:$0xff] }
0x19f3   :  { %12167 = vmatpush3.bf16.msra.mxu1 %v18083_v53  ;;  %7041 = vmatprep.mubr.f32.mxu0 %v16074_v44  ;;  %v18128_v53 = vld [vmem:[#allocation200_spill] sm:$0xff] }
0x19f4   :  { %12168 = vmatprep.subr.bf16.mxu1 %v16820_v21  ;;  %8780 = vmatprep.mubr.msk.f32.mxu1 %vm12951_vm0, %v16762_v61 }
0x19f5   :  { %12192 = vmatpush1.bf16.msra.mxu0 %v18084_v63  ;;  %v18129_v63 = vld [vmem:[#allocation202_spill] sm:$0xff] }
0x19f6   :  { %12194 = vmatprep.subr.bf16.mxu0 %v18085_v58  ;;  %v18130_v58 = vld [vmem:[#allocation199_spill] sm:$0xff] }
0x19f7   :  { %12170 = vmatpush3.bf16.msra.mxu1 %v18086_v2  ;;  %v18131_v2 = vld [vmem:[#allocation201_spill] sm:$0xff] }
0x19f8   :  { %12171 = vmatprep.subr.bf16.mxu1 %v16820_v21 }
0x19f9   :  { %12196 = vmatpush1.bf16.msra.mxu0 %v18087_v16  ;;  %v18132_v16 = vld [vmem:[#allocation204_spill] sm:$0xff] }
0x19fa   :  { %12198 = vmatprep.subr.bf16.mxu0 %v18088_v42  ;;  %v18133_v42 = vld [vmem:[#allocation206_spill] sm:$0xff] }
0x19fb   :  { %12173 = vmatpush3.bf16.msra.mxu1 %v18089_v20  ;;  %v18134_v20 = vld [vmem:[#allocation203_spill] sm:$0xff] }
0x19fc   :  { %12174 = vmatprep.subr.bf16.mxu1 %v16820_v21 }
0x19fd   :  { %12200 = vmatpush1.bf16.msra.mxu0 %v18090_v34  ;;  %v18135_v34 = vld [vmem:[#allocation205_spill] sm:$0xff] }
0x19fe   :  { %12202 = vmatprep.subr.bf16.mxu0 %v18091_v37  ;;  %v18136_v37 = vld [vmem:[#allocation208_spill] sm:$0xff] }
0x19ff   :  { %12176 = vmatpush3.bf16.msra.mxu1 %v18092_v50  ;;  %v18137_v50 = vld [vmem:[#allocation207_spill] sm:$0xff] }
0x1a00   :  { %12177 = vmatprep.subr.bf16.mxu1 %v16820_v21 }
0x1a01   :  { %12204 = vmatpush1.bf16.msra.mxu0 %v18093_v55 }
0x1a02   :  { %12206 = vmatprep.subr.bf16.mxu0 %v18094_v0 }
0x1a03   :  { %12179 = vmatpush3.bf16.msra.mxu1 %v18095_v41 }
0x1a04   :  { %12180 = vmatprep.subr.bf16.mxu1 %v16820_v21 }
0x1a05   :  { %12208 = vmatpush1.bf16.msra.mxu0 %v18096_v31 }
0x1a06   :  { %12210 = vmatprep.subr.bf16.mxu0 %v18097_v25 }
0x1a07   :  { %12182 = vmatpush3.bf16.msra.mxu1 %v18098_v49 }
0x1a08   :  { %12183 = vmatprep.subr.bf16.mxu1 %v16820_v21 }
0x1a09   :  { %12212 = vmatpush1.bf16.msra.mxu0 %v18099_v7 }
0x1a0a   :  { %12214 = vmatprep.subr.bf16.mxu0 %v18100_v33  ;;  %v18138_v33 = vld [vmem:[#allocation210_spill] sm:$0xff] }
0x1a0b   :  { %12185 = vmatpush3.bf16.msra.mxu1 %v18101_v45 }
0x1a0c   :  { %12186 = vmatprep.subr.bf16.mxu1 %v16820_v21 }
0x1a0d   :  { %12216 = vmatpush1.bf16.msra.mxu0 %v18102_v62 }
0x1a0e   :  { %12218 = vmatprep.subr.bf16.mxu0 %v18103_v28 }
0x1a0f   :  { %12188 = vmatpush3.bf16.msra.mxu1 %v18104_v5 }
0x1a10   :  { %12254 = vmatprep.subr.bf16.mxu1 %v18105_v23 }
0x1a11   :  { %12220 = vmatpush1.bf16.msra.mxu0 %v18106_v38 }
0x1a12   :  { %8781 = vmatmul.mubr.f32.vlgmr.msra.gmra.mrb[90].mxu1 %v15939_v59  ;;  %12222 = vmatprep.subr.bf16.mxu0 %v18107_v32 }
0x1a13   :  { %7112 = vmatprep.mubr.f32.mxu1 %v16074_v44  ;;  %12256 = vmatpush3.bf16.msra.mxu1 %v18108_v48 }
0x1a14   :  { %12258 = vmatprep.subr.bf16.mxu1 %v18109_v15 }
0x1a15   :  { %12224 = vmatpush1.bf16.msra.mxu0 %v18110_v60 }
0x1a16   :  { %12226 = vmatprep.subr.bf16.mxu0 %v18111_v57 }
0x1a17   :  { %12260 = vmatpush3.bf16.msra.mxu1 %v18112_v39 }
0x1a18   :  { %12262 = vmatprep.subr.bf16.mxu1 %v18113_v12 }
0x1a19   :  { %12228 = vmatpush1.bf16.msra.mxu0 %v18114_v9 }
0x1a1a   :  { %12230 = vmatprep.subr.bf16.mxu0 %v18115_v17 }
0x1a1b   :  { %12264 = vmatpush3.bf16.msra.mxu1 %v18116_v52 }
0x1a1c   :  { %12266 = vmatprep.subr.bf16.mxu1 %v18117_v8 }
0x1a1d   :  { %12232 = vmatpush1.bf16.msra.mxu0 %v18118_v56 }
0x1a1e   :  { %12234 = vmatprep.subr.bf16.mxu0 %v18119_v22  ;;  %v7215_v22 = vld [vmem:[#allocation11 + $0x40] sm:$0xff] }
0x1a1f   :  { %12268 = vmatpush3.bf16.msra.mxu1 %v18120_v27  ;;  %v7216_v27 = vld [vmem:[#allocation11 + $0x48] sm:$0xff] }
0x1a20   :  { %12270 = vmatprep.subr.bf16.mxu1 %v18121_v13  ;;  %v12322_v13 = vpack.c.bf16 %v7216_v27, %v7215_v22 }
0x1a21   :  { %12236 = vmatpush1.bf16.msra.mxu0 %v18122_v40  ;;  %v7217_v40 = vld [vmem:[#allocation11 + $0x50] sm:$0xff] }
0x1a22   :  { %12238 = vmatprep.subr.bf16.mxu0 %v18123_v18  ;;  %v7218_v18 = vld [vmem:[#allocation11 + $0x58] sm:$0xff] }
0x1a23   :  { %12272 = vmatpush3.bf16.msra.mxu1 %v18124_v26  ;;  %v12325_v26 = vpack.c.bf16 %v7218_v18, %v7217_v40 }
0x1a24   :  { %12274 = vmatprep.subr.bf16.mxu1 %v18125_v47  ;;  %v7219_v47 = vld [vmem:[#allocation11 + $0x60] sm:$0xff] }
0x1a25   :  { %12240 = vmatpush1.bf16.msra.mxu0 %v18126_v29  ;;  %v7220_v29 = vld [vmem:[#allocation11 + $0x68] sm:$0xff] }
0x1a26   :  { %12242 = vmatprep.subr.bf16.mxu0 %v18127_v51  ;;  %v12328_v51 = vpack.c.bf16 %v7220_v29, %v7219_v47 }
0x1a27   :  { %12276 = vmatpush3.bf16.msra.mxu1 %v18128_v53  ;;  %v7221_v53 = vld [vmem:[#allocation11 + $0x70] sm:$0xff] }
0x1a28   :  { %12278 = vmatprep.subr.bf16.mxu1 %v18129_v63  ;;  %v7222_v63 = vld [vmem:[#allocation11 + $0x78] sm:$0xff] }
0x1a29   :  { %12244 = vmatpush1.bf16.msra.mxu0 %v18130_v58  ;;  %v12331_v58 = vpack.c.bf16 %v7222_v63, %v7221_v53 }
0x1a2a   :  { %12246 = vmatprep.subr.bf16.mxu0 %v18131_v2 }
0x1a2b   :  { %12280 = vmatpush3.bf16.msra.mxu1 %v18132_v16 }
0x1a2c   :  { %12282 = vmatprep.subr.bf16.mxu1 %v18133_v42 }
0x1a2d   :  { %12248 = vmatpush1.bf16.msra.mxu0 %v18134_v20 }
0x1a2e   :  { %12250 = vmatprep.subr.bf16.mxu0 %v18135_v34 }
0x1a2f   :  { %12284 = vmatpush3.bf16.msra.mxu1 %v18136_v37 }
0x1a30   :  { %12285 = vmatprep.subr.bf16.mxu1 %v16820_v21 }
0x1a31   :  { %12252 = vmatpush1.bf16.msra.mxu0 %v18137_v50 }
0x1a32   :  { %12309 = vmatprep.subr.bf16.mxu0 %v16820_v21 }
0x1ac5   :  { %v6813_v55 = vpop.f32.mrb[60].mxu0  ;;  %v8169_v0 = vpop.f32.mrb[88].mxu1 }
0x1ac6   :  { %v6814_v41 = vadd.f32 %v6813_v55, %v17050_v19  ;;  %v6815_v31 = vpop.f32.mrb[61].mxu0  ;;  %v8170_v25 = vpop.f32.mrb[89].mxu1 }
0x1ac7   :  { %v8171_v49 = vadd.f32 %v8170_v25, %v8169_v0  ;;  %v6816_v45 = vadd.f32 %v6815_v31, %v18138_v33 }
0x1ac8   :  { %v7404_v7 = vmul.f32 -1.442695, %v6814_v41 }
0x1ac9   :  { %v7405_v62 = vmul.f32 -1.442695, %v6816_v45  ;;  %v6885_v19 = vadd.f32 %v8171_v49, %v14192_v3  ;;  %v7208_v3 = vld [vmem:[#allocation11 + $0x8] sm:$0xff] }
0x1aca   :  { %12746 = vpow2.f32 %v7404_v7 }
0x1acb   :  { %12748 = vpow2.f32 %v7405_v62 }
0x1ad4   :  { %v12747_v28 = vpop.eup %12746 }
0x1ad5   :  { %v6961_v5 = vadd.f32 1.0, %v12747_v28  ;;  %v12749_v23 = vpop.eup %12748 }
0x1ad6   :  { %v6967_v38 = vadd.f32 1.0, %v12749_v23 }
0x1ad7   :  { %12750 = vrcp.f32 %v6961_v5 }
0x1ad8   :  { %12752 = vrcp.f32 %v6967_v38 }
0x1ae1   :  { %v12751_v60 = vpop.eup %12750 }
0x1ae2   :  { %v12753_v12 = vpop.eup %12752 }
0x1ae3   :  { %v6973_v9 = vsub.f32 1.0, %v12753_v12  ;;  %v6975_v8 = vmul.f32 %v12753_v12, %v15939_v59 }
0x1ae5   :  { %v6954_v32 = vpop.f32.mrb[90].mxu1 }
0x1ae6   :  { %v6955_v48 = vadd.f32 %v15934_v43, %v6954_v32  ;;  %v8782_v15 = vpop.f32.mrb[91].mxu1 }
0x1ae8   :  { %v6970_v57 = vmul.f32 %v12751_v60, %v6955_v48 }
0x1aea   :  { %v6971_v39 = vadd.f32 %v6970_v57, %v6885_v19 }
0x1aec   :  { %12754 = vtanh.f32 %v6971_v39 }
0x1af6   :  { %v12755_v17 = vpop.eup %12754 }
0x1af7   :  { %v6974_v52 = vmul.f32 %v12755_v17, %v6973_v9 }
0x1af9   :  { %v6976_v56 = vadd.f32 %v6975_v8, %v6974_v52 }
0x1afb   :  { %7042 = vmatmul.mubr.f32.vlgmr.msra.gmra.mrb[62].mxu0 %v6976_v56  ;;  %7113 = vmatmul.mubr.f32.vlgmr.msra.gmra.mrb[92].mxu1 %v6976_v56 }
0x1afc   :  { %12287 = vmatpush3.bf16.msra.mxu1 %v14196_v36  ;;  %8815 = vmatprep.mubr.msk.f32.mxu1 %vm12951_vm0, %v16762_v61  ;;  %v7209_v36 = vld [vmem:[#allocation11 + $0x10] sm:$0xff] }
0x1afd   :  { %12288 = vmatprep.subr.bf16.mxu1 %v16820_v21  ;;  %8850 = vmatprep.mubr.msk.f32.mxu0 %vm12951_vm0, %v16762_v61  ;;  %v7207_v61 = vld [vmem:[#allocation11] sm:$0xff] }
0x1b00   :  { %12290 = vmatpush3.bf16.msra.mxu1 %v14204_v46  ;;  %v12310_v46 = vpack.c.bf16 %v7208_v3, %v7207_v61 }
0x1b01   :  { %12291 = vmatprep.subr.bf16.mxu1 %v16820_v21 }
0x1b02   :  { %12311 = vmatpush3.bf16.msra.mxu0 %v12310_v46 }
0x1b03   :  { %12312 = vmatprep.subr.bf16.mxu0 %v16820_v21 }
0x1b04   :  { %12293 = vmatpush3.bf16.msra.mxu1 %v14213_v6  ;;  %v7210_v6 = vld [vmem:[#allocation11 + $0x18] sm:$0xff] }
0x1b05   :  { %12294 = vmatprep.subr.bf16.mxu1 %v16820_v21 }
0x1b08   :  { %12296 = vmatpush3.bf16.msra.mxu1 %v14219_v30  ;;  %v12313_v30 = vpack.c.bf16 %v7210_v6, %v7209_v36 }
0x1b09   :  { %12297 = vmatprep.subr.bf16.mxu1 %v16820_v21 }
0x1b0a   :  { %12314 = vmatpush3.bf16.msra.mxu0 %v12313_v30 }
0x1b0b   :  { %12315 = vmatprep.subr.bf16.mxu0 %v16820_v21 }
0x1b0c   :  { %12299 = vmatpush3.bf16.msra.mxu1 %v14225_v4  ;;  %v7211_v4 = vld [vmem:[#allocation11 + $0x20] sm:$0xff] }
0x1b0d   :  { %12300 = vmatprep.subr.bf16.mxu1 %v16820_v21 }
0x1b10   :  { %12302 = vmatpush3.bf16.msra.mxu1 %v14231_v14  ;;  %v7212_v14 = vld [vmem:[#allocation11 + $0x28] sm:$0xff] }
0x1b11   :  { %12303 = vmatprep.subr.bf16.mxu1 %v16820_v21  ;;  %v12316_v59 = vpack.c.bf16 %v7212_v14, %v7211_v4 }
0x1b13   :  { %12317 = vmatpush3.bf16.msra.mxu0 %v12316_v59 }
0x1b14   :  { %12305 = vmatpush3.bf16.msra.mxu1 %v14237_v11  ;;  %12318 = vmatprep.subr.bf16.mxu0 %v16820_v21  ;;  %v7213_v11 = vld [vmem:[#allocation11 + $0x30] sm:$0xff] }
0x1b15   :  { %12306 = vmatprep.subr.bf16.mxu1 %v16820_v21 }
0x1b18   :  { %12308 = vmatpush3.bf16.msra.mxu1 %v14243_v54  ;;  %v7214_v54 = vld [vmem:[#allocation11 + $0x38] sm:$0xff] }
0x1b19   :  { %v12319_v43 = vpack.c.bf16 %v7214_v54, %v7213_v11 }
0x1b1b   :  { %8816 = vmatmul.mubr.f32.vlgmr.msra.gmra.mrb[94].mxu1 %v16074_v44  ;;  %12320 = vmatpush3.bf16.msra.mxu0 %v12319_v43 }
0x1b1c   :  { %12321 = vmatprep.subr.bf16.mxu0 %v16820_v21 }
0x1b1f   :  { %12323 = vmatpush3.bf16.msra.mxu0 %v12322_v13 }
0x1b20   :  { %12324 = vmatprep.subr.bf16.mxu0 %v16820_v21 }
0x1b23   :  { %12326 = vmatpush3.bf16.msra.mxu0 %v12325_v26 }
0x1b24   :  { %12327 = vmatprep.subr.bf16.mxu0 %v16820_v21 }
0x1b27   :  { %12329 = vmatpush3.bf16.msra.mxu0 %v12328_v51 }
0x1b28   :  { %12330 = vmatprep.subr.bf16.mxu0 %v16820_v21 }
0x1b2b   :  { %12332 = vmatpush3.bf16.msra.mxu0 %v12331_v58 }
0x1bce   :  { %v7043_v2 = vpop.f32.mrb[62].mxu0  ;;  %v8221_v16 = vpop.f32.mrb[92].mxu1 }
0x1bcf   :  { %v7044_v42 = vadd.f32 %v7043_v2, %v18038_v35  ;;  %v7045_v20 = vpop.f32.mrb[63].mxu0  ;;  %v8222_v34 = vpop.f32.mrb[93].mxu1 }
0x1bd0   :  { %v8223_v37 = vadd.f32 %v8222_v34, %v8221_v16  ;;  %v7046_v55 = vadd.f32 %v7045_v20, %v17856_v1 }
0x1bd1   :  { %v7406_v50 = vmul.f32 -1.442695, %v7044_v42 }
0x1bd2   :  { %v7407_v0 = vmul.f32 -1.442695, %v7046_v55  ;;  %v7115_v35 = vadd.f32 %v8223_v37, %v17123_v24 }
0x1bd3   :  { %12756 = vpow2.f32 %v7406_v50 }
0x1bd4   :  { %12758 = vpow2.f32 %v7407_v0 }
0x1bdd   :  { %v12757_v41 = vpop.eup %12756 }
0x1bde   :  { %v7191_v31 = vadd.f32 1.0, %v12757_v41  ;;  %v12759_v25 = vpop.eup %12758 }
0x1bdf   :  { %v7197_v49 = vadd.f32 1.0, %v12759_v25 }
0x1be0   :  { %12760 = vrcp.f32 %v7191_v31 }
0x1be1   :  { %12762 = vrcp.f32 %v7197_v49 }
0x1bea   :  { %v12761_v45 = vpop.eup %12760 }
0x1beb   :  { %v12763_v5 = vpop.eup %12762 }
0x1bec   :  { %v7203_v1 = vsub.f32 1.0, %v12763_v5  ;;  %v7205_v32 = vmul.f32 %v12763_v5, %v16074_v44 }
0x1bee   :  { %v7184_v21 = vpop.f32.mrb[94].mxu1 }
0x1bef   :  { %v7185_v7 = vadd.f32 %v16069_v10, %v7184_v21  ;;  %v8817_v33 = vpop.f32.mrb[95].mxu1  ;;  %v7408_v10 = vld [vmem:[%s16271_s13] ss:$0 sm:$0xff] }
0x1bf1   :  { %v7200_v62 = vmul.f32 %v12761_v45, %v7185_v7 }
0x1bf3   :  { %v7201_v28 = vadd.f32 %v7200_v62, %v7115_v35 }
0x1bf5   :  { %12764 = vtanh.f32 %v7201_v28 }
0x1bff   :  { %v12765_v23 = vpop.eup %12764 }
0x1c00   :  { %v7204_v38 = vmul.f32 %v12765_v23, %v7203_v1 }
0x1c02   :  { %v7206_v48 = vadd.f32 %v7205_v32, %v7204_v38 }
0x1c04   :  { %8851 = vmatmul.mubr.f32.vlgmr.msra.gmra.mrb[64].mxu0 %v7206_v48 }
0x1cd7   :  { %v7296_v15 = vpop.f32.mrb[64].mxu0 }
0x1cd8   :  { %v7297_v60 = vadd.f32 %v7408_v10, %v7296_v15  ;;  %v8852_v24 = vpop.f32.mrb[65].mxu0 }
0x1cda   :  { %7300 = vst [vmem:[#allocation13] sm:$0x3] %v7297_v60 }
0x1cdb   :  { %12915 = shalt.err (!%p12912_p10)
}
0x1cdc   :  { %s12916_s4 = scalar_lea.hbm %s16272_s14, 32 }
0x1cdd   :  { %p12917_p11 = scmp.ne.s32.totalorder %s16272_s14, %s12916_s4  ;;  %p12920_p12 = scmp.lt.u32.totalorder %s12916_s4, %s16272_s14 }
0x1cdf   :  { %p12922_p13 = pnand %p12920_p12, %p12917_p11 }
0x1ce1   :  { %12925 = shalt.err (!%p12922_p13)
}
0x1ce2   :  { %7310 = dma.vmem_to_hbm [thread:$0]  %s7308_s12, 32, %s16272_s14, [#allocation4]  }
0x1ce3   :  { %12934 = dma.done.wait [#allocation4], 32  }
0x1ce4   :  { %12935 = vsyncadd [#allocation4], 4294967264 }
0x1ce5   :  { %7314 = vsyncpa [#allocation3], 1 }
0x1ce6   :  { %7315 = vsyncpa [#allocation6], 1 }
0x1ce7   :  { %7316 = vsyncpa [#allocation9], 1 }
0x1ce8   :  { %7317 = vsyncpa [#allocation12], 1 }
0x1ce9   :  { %7318 = vsyncpa [#allocation4], 1 }

</bundles_post_ra>
